<compile_context>
chip_gen: v5e
topology: v5e:2x2
jax: 0.10.0
libtpu: 0.0.40
codegen_flags: <defaults>
</compile_context>

<pallas_src>
import functools

import numpy as np
import jax
import jax.numpy as jnp
from jax.experimental import pallas as pl
from jax.experimental.pallas import tpu as pltpu

BN_EPS = 1e-5
VMEM_LIMIT = 32 * 1024 * 1024


# ----------------------------- Pallas kernels -------------------------------

def _apply_act(acc, act, slope):
    if act == "relu":
        return jnp.maximum(acc, 0.0)
    if act == "leaky":
        return jnp.where(acc > 0.0, acc, slope * acc)
    return acc


def _conv_gemm_kernel(w_ref, p_ref, b_ref, o_ref, *, act, slope):
    acc = jnp.dot(w_ref[...], p_ref[...], preferred_element_type=jnp.float32)
    acc = acc + b_ref[...]
    o_ref[...] = _apply_act(acc, act, slope).astype(o_ref.dtype)


def _conv_gemm_res_kernel(w_ref, p_ref, b_ref, r_ref, o_ref, *, act, slope):
    acc = jnp.dot(w_ref[...], p_ref[...], preferred_element_type=jnp.float32)
    acc = acc + b_ref[...]
    o_ref[...] = (_apply_act(acc, act, slope) + r_ref[...]).astype(o_ref.dtype)


def conv_gemm(wm, bias2, patches, residual=None, act="none", slope=0.2,
              out_dtype=jnp.float32):
    """out(Cout, M) = wm(Cout, Kp) @ patches(Kp, M) with fused bias/act/residual.

    Lane-dense orientation: spatial M on lanes, Cout on sublanes.
    bf16 MXU operands, f32 accumulation and epilogue.
    Grid only splits over M (no Cout split — marginal on multi-core, pure
    overhead on single-core chips).
    """
    Cout, Kp = wm.shape
    M = patches.shape[1]
    TM = 256 if M % 256 == 0 else M        # lane tile; full-dim tail otherwise
    gm = M // TM

    args = [wm, patches, bias2]
    in_specs = [
        pl.BlockSpec((Cout, Kp), lambda m: (0, 0)),
        pl.BlockSpec((Kp, TM), lambda m: (0, m)),
        pl.BlockSpec((Cout, 1), lambda m: (0, 0)),
    ]
    if residual is not None:
        args.append(residual)
        in_specs.append(pl.BlockSpec((Cout, TM), lambda m: (0, m)))
        kern = functools.partial(_conv_gemm_res_kernel, act=act, slope=slope)
    else:
        kern = functools.partial(_conv_gemm_kernel, act=act, slope=slope)

    return pl.pallas_call(
        kern,
        out_shape=jax.ShapeDtypeStruct((Cout, M), out_dtype),
        grid=(gm,),
        in_specs=in_specs,
        out_specs=pl.BlockSpec((Cout, TM), lambda m: (0, m)),
        compiler_params=pltpu.CompilerParams(
            dimension_semantics=("parallel",),
            vmem_limit_bytes=VMEM_LIMIT),
    )(*args)


def _res_chain_kernel(x0_ref, w1_ref, b1_ref, w2_ref, b2_ref, g_ref,
                      o_ref, act_ref):
    """One fused ResNet chain: grid axis = block index, activation resident in
    VMEM scratch.  The reflect-pad 3x3 conv is computed as 9 per-tap matmuls
    against precomputed 0/1 permutation matrices G_t (exact for bf16)."""
    @pl.when(pl.program_id(0) == 0)
    def _():
        act_ref[...] = x0_ref[...].astype(jnp.float32)

    dim, m = o_ref.shape
    g = g_ref[...]                                   # (9, M, M) bf16

    def conv3x3(xb, w_ref_, b_ref_):
        acc = jnp.zeros((dim, m), jnp.float32)
        for t in range(9):                           # unrolled at trace time
            xt = jnp.dot(xb, g[t],
                         preferred_element_type=jnp.float32).astype(jnp.bfloat16)
            acc = acc + jnp.dot(w_ref_[t], xt,
                                preferred_element_type=jnp.float32)
        return acc + b_ref_[...]

    x = act_ref[...]
    h = jnp.maximum(conv3x3(x.astype(jnp.bfloat16), w1_ref, b1_ref), 0.0)
    y = conv3x3(h.astype(jnp.bfloat16), w2_ref, b2_ref) + x   # fused skip add
    act_ref[...] = y
    o_ref[...] = y.astype(o_ref.dtype)


def res_chain(x0, blocks, g):
    """Run all ResNet blocks of one generator in a single pallas_call."""
    w1s, b1s, w2s, b2s = blocks
    nb, _, dim, _ = w1s.shape
    M = x0.shape[1]
    return pl.pallas_call(
        _res_chain_kernel,
        out_shape=jax.ShapeDtypeStruct((dim, M), jnp.bfloat16),
        grid=(nb,),
        in_specs=[
            pl.BlockSpec((dim, M), lambda i: (0, 0)),
            pl.BlockSpec((None, 9, dim, dim), lambda i: (i, 0, 0, 0)),
            pl.BlockSpec((None, dim, 1), lambda i: (i, 0, 0)),
            pl.BlockSpec((None, 9, dim, dim), lambda i: (i, 0, 0, 0)),
            pl.BlockSpec((None, dim, 1), lambda i: (i, 0, 0)),
            pl.BlockSpec((9, M, M), lambda i: (0, 0, 0)),
        ],
        out_specs=pl.BlockSpec((dim, M), lambda i: (0, 0)),
        scratch_shapes=[pltpu.VMEM((dim, M), jnp.float32)],
        compiler_params=pltpu.CompilerParams(
            dimension_semantics=("arbitrary",),
            vmem_limit_bytes=VMEM_LIMIT),
    )(x0, w1s, b1s, w2s, b2s, g)


# ------------------------------ conv plumbing -------------------------------

def to_cf(x):        # NCHW -> CBHW
    return jnp.transpose(x, (1, 0, 2, 3))


def from_cf(x):      # CBHW -> NCHW
    return jnp.transpose(x, (1, 0, 2, 3))


def conv2d_cf(x_cf, layer, stride=(1, 1), padding=0, pad_mode="zero",
              act="none", slope=0.2, residual_cf=None, residual_tile=1,
              out_dtype=jnp.float32):
    """Conv2d on CBHW activations via transposed im2col + lane-dense GEMM.

    Used for the non-ResNet convs (7x7 stems/outputs, stride-2 down, up).
    # TODO(synk): the 7x7 stem/output im2col is still built XLA-side (49 tap
    # slices); an in-kernel slab version would save the patch materialization.
    """
    wm, bias2, (Cout, Cin, KH, KW) = layer
    _, B, H, W = x_cf.shape
    sh, sw = stride
    if padding > 0:
        mode = "reflect" if pad_mode == "reflect" else "constant"
        x_cf = jnp.pad(
            x_cf, ((0, 0), (0, 0), (padding, padding), (padding, padding)),
            mode=mode)
    x_cf = x_cf.astype(jnp.bfloat16)       # cast before tap stacking (halves bytes)
    Hp, Wp = x_cf.shape[2], x_cf.shape[3]
    OH = (Hp - KH) // sh + 1
    OW = (Wp - KW) // sw + 1
    M = B * OH * OW
    taps = []
    for kh in range(KH):
        for kw in range(KW):
            taps.append(x_cf[:, :, kh:kh + sh * OH:sh, kw:kw + sw * OW:sw])
    p = jnp.stack(taps, axis=1).reshape(Cin * KH * KW, M)
    K = Cin * KH * KW
    Kp = wm.shape[1]
    if Kp > K:                             # pad contraction dim to mult of 16 only
        p = jnp.pad(p, ((0, Kp - K), (0, 0)))
    res = None
    if residual_cf is not None:
        res = residual_cf.reshape(residual_cf.shape[0], -1).astype(jnp.float32)
        if residual_tile > 1:
            res = jnp.concatenate([res] * residual_tile, axis=0)
    out = conv_gemm(wm, bias2, p, residual=res, act=act, slope=slope,
                    out_dtype=out_dtype)
    return out.reshape(Cout, B, OH, OW)


def upsample_cf(x, f):
    C, B, H, W = x.shape
    x = jnp.broadcast_to(x[:, :, :, None, :, None], (C, B, H, f, W, f))
    return x.reshape(C, B, H * f, W * f)


def upsample_nchw(x, f):
    B, C, H, W = x.shape
    x = jnp.broadcast_to(x[:, :, :, None, :, None], (B, C, H, f, W, f))
    return x.reshape(B, C, H * f, W * f)


# ---------------------------- parameter helpers ------------------------------

def conv_raw_init(key, cout, cin, kh, kw, scale=0.05):
    kw_key, kb_key = jax.random.split(key)
    w = jax.random.normal(kw_key, (cout, cin, kh, kw), jnp.float32) * scale
    b = jax.random.normal(kb_key, (cout,), jnp.float32) * scale
    return w, b


def prep_conv(w, b, bn=False):
    """Fold eval-mode BN (default stats) and pack the weight as a bf16 GEMM
    matrix; contraction dim is only padded to a multiple of 16 (bf16 pack)."""
    if bn:
        s = 1.0 / float(np.sqrt(1.0 + BN_EPS))
        w = w * s
        b = b * s
    Cout, Cin, KH, KW = w.shape
    K = Cin * KH * KW
    Kp = ((K + 15) // 16) * 16
    wm = jnp.pad(w.reshape(Cout, K), ((0, 0), (0, Kp - K))).astype(jnp.bfloat16)
    return wm, b.astype(jnp.float32).reshape(Cout, 1), (Cout, Cin, KH, KW)


def init_block_stack(key, dim, n_blocks, scale=0.05):
    """Stacked, BN-folded, tap-major weights for one fused ResNet chain."""
    ks = jax.random.split(key, 2 * n_blocks)
    s = 1.0 / float(np.sqrt(1.0 + BN_EPS))
    w1s, b1s, w2s, b2s = [], [], [], []
    for i in range(n_blocks):
        w1, b1 = conv_raw_init(ks[2 * i], dim, dim, 3, 3, scale)
        w2, b2 = conv_raw_init(ks[2 * i + 1], dim, dim, 3, 3, scale)
        w1s.append(jnp.transpose(w1 * s, (2, 3, 0, 1)).reshape(9, dim, dim))
        b1s.append((b1 * s).reshape(dim, 1))
        w2s.append(jnp.transpose(w2 * s, (2, 3, 0, 1)).reshape(9, dim, dim))
        b2s.append((b2 * s).reshape(dim, 1))
    return (jnp.stack(w1s).astype(jnp.bfloat16),
            jnp.stack(b1s).astype(jnp.float32),
            jnp.stack(w2s).astype(jnp.bfloat16),
            jnp.stack(b2s).astype(jnp.float32))


def build_reflect_g(B, H, W):
    """(9, M, M) 0/1 tap-permutation matrices implementing reflect-pad(1) +
    3x3 im2col on a (C, B*H*W) activation; built at trace time (constant)."""
    M = B * H * W

    def refl(p, n):
        if p < 0:
            return -p
        if p >= n:
            return 2 * n - 2 - p
        return p

    g = np.zeros((9, M, M), np.float32)
    t = 0
    for dh in (-1, 0, 1):
        for dw in (-1, 0, 1):
            for b in range(B):
                for i in range(H):
                    for j in range(W):
                        dst = (b * H + i) * W + j
                        src = (b * H + refl(i + dh, H)) * W + refl(j + dw, W)
                        g[t, src, dst] = 1.0
            t += 1
    return jnp.asarray(g, dtype=jnp.bfloat16)


# ------------------------------ LowGenerator --------------------------------

def init_low_generator(key, in_nc, out_nc, ngf=16, n_blocks=6):
    ks = jax.random.split(key, 8)
    P = {}
    P["c_in"] = prep_conv(*conv_raw_init(ks[0], ngf, in_nc, 7, 7), bn=True)
    P["down"] = []
    for i in range(2):
        m = 2 ** i
        P["down"].append(
            prep_conv(*conv_raw_init(ks[1 + i], ngf * m * 2, ngf * m, 3, 3),
                      bn=True))
    dim = ngf * 4
    P["blocks"] = init_block_stack(ks[3], dim, n_blocks)
    P["up"] = []
    for i in range(2):
        m = 2 ** (2 - i)
        P["up"].append(
            prep_conv(*conv_raw_init(ks[4 + i], ngf * m // 2, ngf * m, 3, 3),
                      bn=True))
    P["c_out"] = prep_conv(*conv_raw_init(ks[6], out_nc, ngf, 7, 7))
    return P


def low_generator_fwd(P, x_nchw):
    y = to_cf(x_nchw)
    y = conv2d_cf(y, P["c_in"], padding=3, pad_mode="reflect", act="relu",
                  out_dtype=jnp.bfloat16)
    for layer in P["down"]:
        y = conv2d_cf(y, layer, stride=(2, 2), padding=1, act="relu",
                      out_dtype=jnp.bfloat16)
    C, B, H, W = y.shape
    g = build_reflect_g(B, H, W)
    y = res_chain(y.reshape(C, B * H * W), P["blocks"], g).reshape(C, B, H, W)
    for layer in P["up"]:
        y = upsample_cf(y, 2)
        y = conv2d_cf(y, layer, padding=1, act="relu", out_dtype=jnp.bfloat16)
    y = conv2d_cf(y, P["c_out"], padding=3, pad_mode="reflect", act="none",
                  out_dtype=jnp.float32)
    return from_cf(y)


# ------------------------------ HighGenerator -------------------------------

def init_high_generator(key, in_nc, out_nc, ngf=16, n_blocks=6):
    ks = jax.random.split(key, 6)
    P = {"in_nc": in_nc, "out_nc": out_nc}
    P["ref_feature"] = prep_conv(*conv_raw_init(ks[0], ngf >> 1, 9, 7, 7))
    P["to_feature"] = prep_conv(*conv_raw_init(ks[1], ngf >> 1, in_nc, 7, 7))
    P["c_in"] = prep_conv(*conv_raw_init(ks[2], ngf, ngf, 7, 7), bn=True)
    P["blocks"] = init_block_stack(ks[3], ngf, n_blocks)
    P["c_out"] = prep_conv(*conv_raw_init(ks[4], out_nc, ngf, 7, 7))
    return P


def high_generator_fwd(P, inputs, reference, stride):
    sub_bands = len(inputs)
    inp = jnp.concatenate(inputs, axis=1)            # NCHW
    in_out_ratio = P["out_nc"] // P["in_nc"]
    C = in_out_ratio * inp.shape[1] // sub_bands
    ref = jnp.concatenate(reference, axis=1)
    inp_cf = to_cf(inp)
    ref_cf = to_cf(ref)
    ref_f = conv2d_cf(ref_cf, P["ref_feature"], stride=stride, padding=3,
                      act="none", out_dtype=jnp.bfloat16)
    xf = conv2d_cf(inp_cf, P["to_feature"], padding=3, act="none",
                   out_dtype=jnp.bfloat16)
    x = jnp.concatenate([xf, ref_f], axis=0)         # channel axis = 0 in CBHW
    x = conv2d_cf(x, P["c_in"], padding=3, pad_mode="reflect",
                  act="leaky", slope=0.3, out_dtype=jnp.bfloat16)
    Cc, B, H, W = x.shape
    g = build_reflect_g(B, H, W)
    x = res_chain(x.reshape(Cc, B * H * W), P["blocks"], g).reshape(Cc, B, H, W)
    rep = P["out_nc"] // inp.shape[1]
    # Final conv; the `x + cat([input]*rep)` skip is fused into the epilogue.
    x = conv2d_cf(x, P["c_out"], padding=3, pad_mode="reflect", act="none",
                  residual_cf=inp_cf, residual_tile=rep, out_dtype=jnp.float32)
    x = from_cf(x)
    return [x[:, ix * C:(ix + 1) * C] for ix in range(sub_bands)]


# ----------------------- contourlet decomposition/rec ------------------------
# TODO(synk): ContourDec / dfbrec_layer / ContourRec source was not provided;
# these are shape-faithful stand-ins (avg-pool Laplacian pyramid + critically
# sampled polyphase band split) instead of the 9-7 pyramid + directional
# filter bank of the original implementation.

def contour_dec(x, nlev=4):
    B, C, H, W = x.shape
    xlo = x.reshape(B, C, H // 2, 2, W // 2, 2).mean(axis=(3, 5))
    xhi = x - upsample_nchw(xlo, 2)                  # plain jnp; XLA fuses it
    half = 2 ** (nlev - 1)                           # 8 bands per orientation
    xr = xhi.reshape(B, C, H // 2, 2, W)
    even = xr[:, :, :, 0, :]                         # (B, C, H/2, W)
    odd = xr[:, :, :, 1, :]
    e = even.reshape(B, C, H // 8, 4, W // 2, 2)
    bands = []
    for k in range(half):                            # bands 0..7: (B,C,H/8,W/2)
        r, cp = k % 4, k // 4
        bands.append(e[:, :, :, r, :, cp])
    o = odd.reshape(B, C, H // 2, W // 8, 8)
    for k in range(half):                            # bands 8..15: (B,C,H/2,W/8)
        bands.append(o[:, :, :, :, k])
    return xlo, bands


def dfb_rec(bands):
    # Inverse of the polyphase split above, via reshape/transpose interleave.
    half = len(bands) // 2
    B, C, H8, W2 = bands[0].shape
    H2, W = H8 * 4, W2 * 2
    ev = jnp.stack(bands[:half], axis=0).reshape(2, 4, B, C, H8, W2)
    even = ev.transpose(2, 3, 4, 1, 5, 0).reshape(B, C, H2, W)
    od = jnp.stack(bands[half:], axis=0)             # (8, B, C, H2, W/8)
    odd = od.transpose(1, 2, 3, 4, 0).reshape(B, C, H2, W)
    return jnp.stack([even, odd], axis=3).reshape(B, C, 2 * H2, W)


def contour_rec(xlo, bands):
    xhi = dfb_rec(bands)
    return upsample_nchw(xlo, 2) + xhi               # plain jnp add


# ---------------------------- ContourGenerator -------------------------------

def contour_generator_fwd(params, x, nlev=4):
    xlo, xhi = contour_dec(x, nlev)
    refined_low = low_generator_fwd(params["refineL"], xlo)

    combine = len(xhi) >> 2
    tmp1 = jnp.concatenate(xhi[:combine], axis=1)
    tmp2 = jnp.concatenate(xhi[combine:2 * combine], axis=1)
    tmp3 = jnp.concatenate(xhi[2 * combine:3 * combine], axis=1)
    tmp4 = jnp.concatenate(xhi[3 * combine:], axis=1)

    reference = [refined_low, xlo]
    stride_h = (2 ** (nlev - 2), 1)
    stride_w = (1, 2 ** (nlev - 2))
    tmp1, tmp2 = high_generator_fwd(params["refineH0"], [tmp1, tmp2],
                                    reference, stride_h)
    tmp3, tmp4 = high_generator_fwd(params["refineH1"], [tmp3, tmp4],
                                    reference, stride_w)

    new_bands = []
    for tmp in (tmp1, tmp2, tmp3, tmp4):
        Cc = tmp.shape[1] // combine
        new_bands += [tmp[:, N * Cc:(N + 1) * Cc] for N in range(combine)]

    bands_copy = [[band[:, :3] for band in new_bands]]
    xhi_img = dfb_rec(new_bands)
    lap_copy = [[refined_low[:, :3], xhi_img[:, :3]]]
    rec_img = contour_rec(refined_low, new_bands)
    # refine=False -> no Enhancer path.
    # TODO(synk): Enhancer(6,3) branch (refine=True) not exercised here.
    # TODO(synk): pix_shuffle=True (DepthToSpace/SpaceToDepth) path not exercised.
    return rec_img, bands_copy, lap_copy


# ----------------------------------- main ------------------------------------

if __name__ == "__main__":
    key = jax.random.PRNGKey(0)
    k_in, k_low, k_h0, k_h1 = jax.random.split(key, 4)

    input_nc, output_nc, nlev, ngf, n_blocks = 3, 6, 4, 16, 6
    B, H, W = 2, 32, 32
    x = jax.random.normal(k_in, (B, input_nc, H, W), jnp.float32)

    params = {
        "refineL": init_low_generator(k_low, input_nc, output_nc,
                                      ngf=ngf, n_blocks=n_blocks),
        "refineH0": init_high_generator(k_h0, input_nc << (nlev - 1),
                                        output_nc << (nlev - 1),
                                        ngf=ngf, n_blocks=n_blocks),
        "refineH1": init_high_generator(k_h1, input_nc << (nlev - 1),
                                        output_nc << (nlev - 1),
                                        ngf=ngf, n_blocks=n_blocks),
    }

    # Close over params so layer shape metadata stays static; jit lets XLA
    # fuse the small im2col / reshuffle glue between Pallas kernels.
    fwd = jax.jit(lambda inp: contour_generator_fwd(params, inp, nlev))

    rec_img, bands_copy, lap_copy = fwd(x)
    jax.block_until_ready(rec_img)
    jax.block_until_ready(jax.tree_util.tree_leaves((bands_copy, lap_copy)))
    assert rec_img.shape == (B, output_nc, H, W)
    assert len(bands_copy[0]) == 2 ** nlev
    print("KERNEL_OK")
</pallas_src>

<mosaic_0001>
module attributes {stable_mosaic.version = 11 : i64} {
  func.func @_conv_gemm_kernel(%arg0: i32, %arg1: memref<16x160xbf16, #tpu.memory_space<vmem>>, %arg2: memref<160x256xbf16, #tpu.memory_space<vmem>>, %arg3: memref<16x1xf32, #tpu.memory_space<vmem>>, %arg4: memref<16x256xbf16, #tpu.memory_space<vmem>>) attributes {dimension_semantics = [#tpu.dimension_semantics<parallel>], iteration_bounds = array<i64: 2>, scalar_prefetch = 0 : i64, scratch_operands = 0 : i64, tpu.core_type = #tpu.core_type<tc>, window_params = [{pipeline_mode = #tpu.pipeline_mode<synchronous>, transform_indices = @transform_0, window_bounds = array<i64: 16, 160>}, {transform_indices = @transform_1, window_bounds = array<i64: 160, 256>}, {pipeline_mode = #tpu.pipeline_mode<synchronous>, transform_indices = @transform_2, window_bounds = array<i64: 16, 1>}, {transform_indices = @transform_3, window_bounds = array<i64: 16, 256>}]} {
    %c0 = arith.constant 0 : index
    %c0_0 = arith.constant 0 : index
    %0 = vector.load %arg1[%c0, %c0_0] : memref<16x160xbf16, #tpu.memory_space<vmem>>, vector<16x160xbf16>
    %c0_1 = arith.constant 0 : index
    %c0_2 = arith.constant 0 : index
    %1 = vector.load %arg2[%c0_1, %c0_2] : memref<160x256xbf16, #tpu.memory_space<vmem>>, vector<160x256xbf16>
    %cst = arith.constant dense<0.000000e+00> : vector<16x256xf32>
    %2 = tpu.matmul %0, %1, %cst {dimension_numbers = #tpu.dot_dimension_numbers<[1], [0], [0], [1], [0, 0, 1, 1], [], []>} : vector<16x160xbf16>, vector<160x256xbf16>, vector<16x256xf32> -> vector<16x256xf32>
    %c0_3 = arith.constant 0 : index
    %c0_4 = arith.constant 0 : index
    %3 = vector.load %arg3[%c0_3, %c0_4] : memref<16x1xf32, #tpu.memory_space<vmem>>, vector<16x1xf32>
    %4 = vector.broadcast %3 : vector<16x1xf32> to vector<16x256xf32>
    %5 = arith.addf %2, %4 : vector<16x256xf32>
    %cst_5 = arith.constant 0.000000e+00 : f32
    %6 = vector.broadcast %cst_5 : f32 to vector<16x256xf32>
    %7 = arith.maximumf %5, %6 : vector<16x256xf32>
    %8 = arith.truncf %7 : vector<16x256xf32> to vector<16x256xbf16>
    %c0_6 = arith.constant 0 : index
    %c0_7 = arith.constant 0 : index
    %9 = vector.load %arg4[%c0_6, %c0_7] : memref<16x256xbf16, #tpu.memory_space<vmem>>, vector<16x256xbf16>
    tpu.vector_store %arg4[%c0_6, %c0_7], %8 {strides = array<i32>} : memref<16x256xbf16, #tpu.memory_space<vmem>>, vector<16x256xbf16>,
    return
  }
  func.func @transform_0(%arg0: i32) -> (i32, i32) {
    %c0_i32 = arith.constant 0 : i32
    %c0_i32_0 = arith.constant 0 : i32
    %c0_i32_1 = arith.constant 0 : i32
    return %c0_i32, %c0_i32_0 : i32, i32
  }
  func.func @transform_1(%arg0: i32) -> (i32, i32) {
    %c0_i32 = arith.constant 0 : i32
    %c0_i32_0 = arith.constant 0 : i32
    return %c0_i32, %arg0 : i32, i32
  }
  func.func @transform_2(%arg0: i32) -> (i32, i32) {
    %c0_i32 = arith.constant 0 : i32
    %c0_i32_0 = arith.constant 0 : i32
    %c0_i32_1 = arith.constant 0 : i32
    return %c0_i32, %c0_i32_0 : i32, i32
  }
  func.func @transform_3(%arg0: i32) -> (i32, i32) {
    %c0_i32 = arith.constant 0 : i32
    %c0_i32_0 = arith.constant 0 : i32
    return %c0_i32, %arg0 : i32, i32
  }
}

module attributes {stable_mosaic.version = 11 : i64} {
  func.func @_conv_gemm_kernel(%arg0: i32, %arg1: memref<32x144xbf16, #tpu.memory_space<vmem>>, %arg2: memref<144x128xbf16, #tpu.memory_space<vmem>>, %arg3: memref<32x1xf32, #tpu.memory_space<vmem>>, %arg4: memref<32x128xbf16, #tpu.memory_space<vmem>>) attributes {dimension_semantics = [#tpu.dimension_semantics<parallel>], iteration_bounds = array<i64: 1>, scalar_prefetch = 0 : i64, scratch_operands = 0 : i64, tpu.core_type = #tpu.core_type<tc>, window_params = [{pipeline_mode = #tpu.pipeline_mode<synchronous>, transform_indices = @transform_0, window_bounds = array<i64: 32, 144>}, {transform_indices = @transform_1, window_bounds = array<i64: 144, 128>}, {pipeline_mode = #tpu.pipeline_mode<synchronous>, transform_indices = @transform_2, window_bounds = array<i64: 32, 1>}, {transform_indices = @transform_3, window_bounds = array<i64: 32, 128>}]} {
    %c0 = arith.constant 0 : index
    %c0_0 = arith.constant 0 : index
    %0 = vector.load %arg1[%c0, %c0_0] : memref<32x144xbf16, #tpu.memory_space<vmem>>, vector<32x144xbf16>
    %c0_1 = arith.constant 0 : index
    %c0_2 = arith.constant 0 : index
    %1 = vector.load %arg2[%c0_1, %c0_2] : memref<144x128xbf16, #tpu.memory_space<vmem>>, vector<144x128xbf16>
    %cst = arith.constant dense<0.000000e+00> : vector<32x128xf32>
    %2 = tpu.matmul %0, %1, %cst {dimension_numbers = #tpu.dot_dimension_numbers<[1], [0], [0], [1], [0, 0, 1, 1], [], []>} : vector<32x144xbf16>, vector<144x128xbf16>, vector<32x128xf32> -> vector<32x128xf32>
    %c0_3 = arith.constant 0 : index
    %c0_4 = arith.constant 0 : index
    %3 = vector.load %arg3[%c0_3, %c0_4] : memref<32x1xf32, #tpu.memory_space<vmem>>, vector<32x1xf32>
    %4 = vector.broadcast %3 : vector<32x1xf32> to vector<32x128xf32>
    %5 = arith.addf %2, %4 : vector<32x128xf32>
    %cst_5 = arith.constant 0.000000e+00 : f32
    %6 = vector.broadcast %cst_5 : f32 to vector<32x128xf32>
    %7 = arith.maximumf %5, %6 : vector<32x128xf32>
    %8 = arith.truncf %7 : vector<32x128xf32> to vector<32x128xbf16>
    %c0_6 = arith.constant 0 : index
    %c0_7 = arith.constant 0 : index
    %9 = vector.load %arg4[%c0_6, %c0_7] : memref<32x128xbf16, #tpu.memory_space<vmem>>, vector<32x128xbf16>
    tpu.vector_store %arg4[%c0_6, %c0_7], %8 {strides = array<i32>} : memref<32x128xbf16, #tpu.memory_space<vmem>>, vector<32x128xbf16>,
    return
  }
  func.func @transform_0(%arg0: i32) -> (i32, i32) {
    %c0_i32 = arith.constant 0 : i32
    %c0_i32_0 = arith.constant 0 : i32
    %c0_i32_1 = arith.constant 0 : i32
    return %c0_i32, %c0_i32_0 : i32, i32
  }
  func.func @transform_1(%arg0: i32) -> (i32, i32) {
    %c0_i32 = arith.constant 0 : i32
    %c0_i32_0 = arith.constant 0 : i32
    return %c0_i32, %arg0 : i32, i32
  }
  func.func @transform_2(%arg0: i32) -> (i32, i32) {
    %c0_i32 = arith.constant 0 : i32
    %c0_i32_0 = arith.constant 0 : i32
    %c0_i32_1 = arith.constant 0 : i32
    return %c0_i32, %c0_i32_0 : i32, i32
  }
  func.func @transform_3(%arg0: i32) -> (i32, i32) {
    %c0_i32 = arith.constant 0 : i32
    %c0_i32_0 = arith.constant 0 : i32
    return %c0_i32, %arg0 : i32, i32
  }
}

module attributes {stable_mosaic.version = 11 : i64} {
  func.func @_conv_gemm_kernel(%arg0: i32, %arg1: memref<64x288xbf16, #tpu.memory_space<vmem>>, %arg2: memref<288x32xbf16, #tpu.memory_space<vmem>>, %arg3: memref<64x1xf32, #tpu.memory_space<vmem>>, %arg4: memref<64x32xbf16, #tpu.memory_space<vmem>>) attributes {dimension_semantics = [#tpu.dimension_semantics<parallel>], iteration_bounds = array<i64: 1>, scalar_prefetch = 0 : i64, scratch_operands = 0 : i64, tpu.core_type = #tpu.core_type<tc>, window_params = [{pipeline_mode = #tpu.pipeline_mode<synchronous>, transform_indices = @transform_0, window_bounds = array<i64: 64, 288>}, {transform_indices = @transform_1, window_bounds = array<i64: 288, 32>}, {pipeline_mode = #tpu.pipeline_mode<synchronous>, transform_indices = @transform_2, window_bounds = array<i64: 64, 1>}, {transform_indices = @transform_3, window_bounds = array<i64: 64, 32>}]} {
    %c0 = arith.constant 0 : index
    %c0_0 = arith.constant 0 : index
    %0 = vector.load %arg1[%c0, %c0_0] : memref<64x288xbf16, #tpu.memory_space<vmem>>, vector<64x288xbf16>
    %c0_1 = arith.constant 0 : index
    %c0_2 = arith.constant 0 : index
    %1 = vector.load %arg2[%c0_1, %c0_2] : memref<288x32xbf16, #tpu.memory_space<vmem>>, vector<288x32xbf16>
    %cst = arith.constant dense<0.000000e+00> : vector<64x32xf32>
    %2 = tpu.matmul %0, %1, %cst {dimension_numbers = #tpu.dot_dimension_numbers<[1], [0], [0], [1], [0, 0, 1, 1], [], []>} : vector<64x288xbf16>, vector<288x32xbf16>, vector<64x32xf32> -> vector<64x32xf32>
    %c0_3 = arith.constant 0 : index
    %c0_4 = arith.constant 0 : index
    %3 = vector.load %arg3[%c0_3, %c0_4] : memref<64x1xf32, #tpu.memory_space<vmem>>, vector<64x1xf32>
    %4 = vector.broadcast %3 : vector<64x1xf32> to vector<64x32xf32>
    %5 = arith.addf %2, %4 : vector<64x32xf32>
    %cst_5 = arith.constant 0.000000e+00 : f32
    %6 = vector.broadcast %cst_5 : f32 to vector<64x32xf32>
    %7 = arith.maximumf %5, %6 : vector<64x32xf32>
    %8 = arith.truncf %7 : vector<64x32xf32> to vector<64x32xbf16>
    %c0_6 = arith.constant 0 : index
    %c0_7 = arith.constant 0 : index
    %9 = vector.load %arg4[%c0_6, %c0_7] : memref<64x32xbf16, #tpu.memory_space<vmem>>, vector<64x32xbf16>
    tpu.vector_store %arg4[%c0_6, %c0_7], %8 {strides = array<i32>} : memref<64x32xbf16, #tpu.memory_space<vmem>>, vector<64x32xbf16>,
    return
  }
  func.func @transform_0(%arg0: i32) -> (i32, i32) {
    %c0_i32 = arith.constant 0 : i32
    %c0_i32_0 = arith.constant 0 : i32
    %c0_i32_1 = arith.constant 0 : i32
    return %c0_i32, %c0_i32_0 : i32, i32
  }
  func.func @transform_1(%arg0: i32) -> (i32, i32) {
    %c0_i32 = arith.constant 0 : i32
    %c0_i32_0 = arith.constant 0 : i32
    return %c0_i32, %arg0 : i32, i32
  }
  func.func @transform_2(%arg0: i32) -> (i32, i32) {
    %c0_i32 = arith.constant 0 : i32
    %c0_i32_0 = arith.constant 0 : i32
    %c0_i32_1 = arith.constant 0 : i32
    return %c0_i32, %c0_i32_0 : i32, i32
  }
  func.func @transform_3(%arg0: i32) -> (i32, i32) {
    %c0_i32 = arith.constant 0 : i32
    %c0_i32_0 = arith.constant 0 : i32
    return %c0_i32, %arg0 : i32, i32
  }
}

module attributes {stable_mosaic.version = 11 : i64} {
  func.func @_res_chain_kernel(%arg0: i32, %arg1: memref<64x32xbf16, #tpu.memory_space<vmem>>, %arg2: memref<1x9x64x64xbf16, #tpu.memory_space<vmem>>, %arg3: memref<1x64x1xf32, #tpu.memory_space<vmem>>, %arg4: memref<1x9x64x64xbf16, #tpu.memory_space<vmem>>, %arg5: memref<1x64x1xf32, #tpu.memory_space<vmem>>, %arg6: memref<9x32x32xbf16, #tpu.memory_space<vmem>>, %arg7: memref<64x32xbf16, #tpu.memory_space<vmem>>, %arg8: memref<64x32xf32, #tpu.memory_space<vmem>>) attributes {dimension_semantics = [#tpu.dimension_semantics<arbitrary>], iteration_bounds = array<i64: 6>, scalar_prefetch = 0 : i64, scratch_operands = 1 : i64, tpu.core_type = #tpu.core_type<tc>, window_params = [{pipeline_mode = #tpu.pipeline_mode<synchronous>, transform_indices = @transform_0, window_bounds = array<i64: 64, 32>}, {transform_indices = @transform_1, window_bounds = array<i64: 1, 9, 64, 64>}, {transform_indices = @transform_2, window_bounds = array<i64: 1, 64, 1>}, {transform_indices = @transform_3, window_bounds = array<i64: 1, 9, 64, 64>}, {transform_indices = @transform_4, window_bounds = array<i64: 1, 64, 1>}, {pipeline_mode = #tpu.pipeline_mode<synchronous>, transform_indices = @transform_5, window_bounds = array<i64: 9, 32, 32>}, {pipeline_mode = #tpu.pipeline_mode<synchronous>, transform_indices = @transform_6, window_bounds = array<i64: 64, 32>}]} {
    %c0_i32 = arith.constant 0 : i32
    %0 = arith.cmpi eq, %arg0, %c0_i32 : i32
    %1 = arith.extui %0 : i1 to i32
    %c0_i32_0 = arith.constant 0 : i32
    %2 = arith.cmpi ne, %1, %c0_i32_0 : i32
    scf.if %2 {
      %c0_117 = arith.constant 0 : index
      %c0_118 = arith.constant 0 : index
      %167 = vector.load %arg1[%c0_117, %c0_118] : memref<64x32xbf16, #tpu.memory_space<vmem>>, vector<64x32xbf16>
      %168 = arith.extf %167 : vector<64x32xbf16> to vector<64x32xf32>
      %c0_119 = arith.constant 0 : index
      %c0_120 = arith.constant 0 : index
      %169 = vector.load %arg8[%c0_119, %c0_120] : memref<64x32xf32, #tpu.memory_space<vmem>>, vector<64x32xf32>
      tpu.vector_store %arg8[%c0_119, %c0_120], %168 {strides = array<i32>} : memref<64x32xf32, #tpu.memory_space<vmem>>, vector<64x32xf32>,
    } else {
    }
    %c0 = arith.constant 0 : index
    %c0_1 = arith.constant 0 : index
    %c0_2 = arith.constant 0 : index
    %3 = vector.load %arg6[%c0, %c0_1, %c0_2] : memref<9x32x32xbf16, #tpu.memory_space<vmem>>, vector<9x32x32xbf16>
    %c0_3 = arith.constant 0 : index
    %c0_4 = arith.constant 0 : index
    %4 = vector.load %arg8[%c0_3, %c0_4] : memref<64x32xf32, #tpu.memory_space<vmem>>, vector<64x32xf32>
    %5 = arith.truncf %4 : vector<64x32xf32> to vector<64x32xbf16>
    %cst = arith.constant 0.000000e+00 : f32
    %6 = vector.broadcast %cst : f32 to vector<64x32xf32>
    %7 = vector.extract_strided_slice %3 {offsets = [0, 0, 0], sizes = [1, 32, 32], strides = [1, 1, 1]} : vector<9x32x32xbf16> to vector<1x32x32xbf16>
    %8 = vector.shape_cast %7 : vector<1x32x32xbf16> to vector<32x32xbf16>
    %cst_5 = arith.constant dense<0.000000e+00> : vector<64x32xf32>
    %9 = tpu.matmul %5, %8, %cst_5 {dimension_numbers = #tpu.dot_dimension_numbers<[1], [0], [0], [1], [0, 0, 1, 1], [], []>} : vector<64x32xbf16>, vector<32x32xbf16>, vector<64x32xf32> -> vector<64x32xf32>
    %10 = arith.truncf %9 : vector<64x32xf32> to vector<64x32xbf16>
    %c0_6 = arith.constant 0 : index
    %c0_7 = arith.constant 0 : index
    %c0_8 = arith.constant 0 : index
    %c0_9 = arith.constant 0 : index
    %11 = vector.load %arg2[%c0_6, %c0_7, %c0_8, %c0_9] : memref<1x9x64x64xbf16, #tpu.memory_space<vmem>>, vector<1x1x64x64xbf16>
    %12 = vector.shape_cast %11 : vector<1x1x64x64xbf16> to vector<64x64xbf16>
    %cst_10 = arith.constant dense<0.000000e+00> : vector<64x32xf32>
    %13 = tpu.matmul %12, %10, %cst_10 {dimension_numbers = #tpu.dot_dimension_numbers<[1], [0], [0], [1], [0, 0, 1, 1], [], []>} : vector<64x64xbf16>, vector<64x32xbf16>, vector<64x32xf32> -> vector<64x32xf32>
    %14 = arith.addf %6, %13 : vector<64x32xf32>
    %15 = vector.extract_strided_slice %3 {offsets = [1, 0, 0], sizes = [1, 32, 32], strides = [1, 1, 1]} : vector<9x32x32xbf16> to vector<1x32x32xbf16>
    %16 = vector.shape_cast %15 : vector<1x32x32xbf16> to vector<32x32xbf16>
    %cst_11 = arith.constant dense<0.000000e+00> : vector<64x32xf32>
    %17 = tpu.matmul %5, %16, %cst_11 {dimension_numbers = #tpu.dot_dimension_numbers<[1], [0], [0], [1], [0, 0, 1, 1], [], []>} : vector<64x32xbf16>, vector<32x32xbf16>, vector<64x32xf32> -> vector<64x32xf32>
    %18 = arith.truncf %17 : vector<64x32xf32> to vector<64x32xbf16>
    %c0_12 = arith.constant 0 : index
    %c1 = arith.constant 1 : index
    %c0_13 = arith.constant 0 : index
    %c0_14 = arith.constant 0 : index
    %19 = vector.load %arg2[%c0_12, %c1, %c0_13, %c0_14] : memref<1x9x64x64xbf16, #tpu.memory_space<vmem>>, vector<1x1x64x64xbf16>
    %20 = vector.shape_cast %19 : vector<1x1x64x64xbf16> to vector<64x64xbf16>
    %cst_15 = arith.constant dense<0.000000e+00> : vector<64x32xf32>
    %21 = tpu.matmul %20, %18, %cst_15 {dimension_numbers = #tpu.dot_dimension_numbers<[1], [0], [0], [1], [0, 0, 1, 1], [], []>} : vector<64x64xbf16>, vector<64x32xbf16>, vector<64x32xf32> -> vector<64x32xf32>
    %22 = arith.addf %14, %21 : vector<64x32xf32>
    %23 = vector.extract_strided_slice %3 {offsets = [2, 0, 0], sizes = [1, 32, 32], strides = [1, 1, 1]} : vector<9x32x32xbf16> to vector<1x32x32xbf16>
    %24 = vector.shape_cast %23 : vector<1x32x32xbf16> to vector<32x32xbf16>
    %cst_16 = arith.constant dense<0.000000e+00> : vector<64x32xf32>
    %25 = tpu.matmul %5, %24, %cst_16 {dimension_numbers = #tpu.dot_dimension_numbers<[1], [0], [0], [1], [0, 0, 1, 1], [], []>} : vector<64x32xbf16>, vector<32x32xbf16>, vector<64x32xf32> -> vector<64x32xf32>
    %26 = arith.truncf %25 : vector<64x32xf32> to vector<64x32xbf16>
    %c0_17 = arith.constant 0 : index
    %c2 = arith.constant 2 : index
    %c0_18 = arith.constant 0 : index
    %c0_19 = arith.constant 0 : index
    %27 = vector.load %arg2[%c0_17, %c2, %c0_18, %c0_19] : memref<1x9x64x64xbf16, #tpu.memory_space<vmem>>, vector<1x1x64x64xbf16>
    %28 = vector.shape_cast %27 : vector<1x1x64x64xbf16> to vector<64x64xbf16>
    %cst_20 = arith.constant dense<0.000000e+00> : vector<64x32xf32>
    %29 = tpu.matmul %28, %26, %cst_20 {dimension_numbers = #tpu.dot_dimension_numbers<[1], [0], [0], [1], [0, 0, 1, 1], [], []>} : vector<64x64xbf16>, vector<64x32xbf16>, vector<64x32xf32> -> vector<64x32xf32>
    %30 = arith.addf %22, %29 : vector<64x32xf32>
    %31 = vector.extract_strided_slice %3 {offsets = [3, 0, 0], sizes = [1, 32, 32], strides = [1, 1, 1]} : vector<9x32x32xbf16> to vector<1x32x32xbf16>
    %32 = vector.shape_cast %31 : vector<1x32x32xbf16> to vector<32x32xbf16>
    %cst_21 = arith.constant dense<0.000000e+00> : vector<64x32xf32>
    %33 = tpu.matmul %5, %32, %cst_21 {dimension_numbers = #tpu.dot_dimension_numbers<[1], [0], [0], [1], [0, 0, 1, 1], [], []>} : vector<64x32xbf16>, vector<32x32xbf16>, vector<64x32xf32> -> vector<64x32xf32>
    %34 = arith.truncf %33 : vector<64x32xf32> to vector<64x32xbf16>
    %c0_22 = arith.constant 0 : index
    %c3 = arith.constant 3 : index
    %c0_23 = arith.constant 0 : index
    %c0_24 = arith.constant 0 : index
    %35 = vector.load %arg2[%c0_22, %c3, %c0_23, %c0_24] : memref<1x9x64x64xbf16, #tpu.memory_space<vmem>>, vector<1x1x64x64xbf16>
    %36 = vector.shape_cast %35 : vector<1x1x64x64xbf16> to vector<64x64xbf16>
    %cst_25 = arith.constant dense<0.000000e+00> : vector<64x32xf32>
    %37 = tpu.matmul %36, %34, %cst_25 {dimension_numbers = #tpu.dot_dimension_numbers<[1], [0], [0], [1], [0, 0, 1, 1], [], []>} : vector<64x64xbf16>, vector<64x32xbf16>, vector<64x32xf32> -> vector<64x32xf32>
    %38 = arith.addf %30, %37 : vector<64x32xf32>
    %39 = vector.extract_strided_slice %3 {offsets = [4, 0, 0], sizes = [1, 32, 32], strides = [1, 1, 1]} : vector<9x32x32xbf16> to vector<1x32x32xbf16>
    %40 = vector.shape_cast %39 : vector<1x32x32xbf16> to vector<32x32xbf16>
    %cst_26 = arith.constant dense<0.000000e+00> : vector<64x32xf32>
    %41 = tpu.matmul %5, %40, %cst_26 {dimension_numbers = #tpu.dot_dimension_numbers<[1], [0], [0], [1], [0, 0, 1, 1], [], []>} : vector<64x32xbf16>, vector<32x32xbf16>, vector<64x32xf32> -> vector<64x32xf32>
    %42 = arith.truncf %41 : vector<64x32xf32> to vector<64x32xbf16>
    %c0_27 = arith.constant 0 : index
    %c4 = arith.constant 4 : index
    %c0_28 = arith.constant 0 : index
    %c0_29 = arith.constant 0 : index
    %43 = vector.load %arg2[%c0_27, %c4, %c0_28, %c0_29] : memref<1x9x64x64xbf16, #tpu.memory_space<vmem>>, vector<1x1x64x64xbf16>
    %44 = vector.shape_cast %43 : vector<1x1x64x64xbf16> to vector<64x64xbf16>
    %cst_30 = arith.constant dense<0.000000e+00> : vector<64x32xf32>
    %45 = tpu.matmul %44, %42, %cst_30 {dimension_numbers = #tpu.dot_dimension_numbers<[1], [0], [0], [1], [0, 0, 1, 1], [], []>} : vector<64x64xbf16>, vector<64x32xbf16>, vector<64x32xf32> -> vector<64x32xf32>
    %46 = arith.addf %38, %45 : vector<64x32xf32>
    %47 = vector.extract_strided_slice %3 {offsets = [5, 0, 0], sizes = [1, 32, 32], strides = [1, 1, 1]} : vector<9x32x32xbf16> to vector<1x32x32xbf16>
    %48 = vector.shape_cast %47 : vector<1x32x32xbf16> to vector<32x32xbf16>
    %cst_31 = arith.constant dense<0.000000e+00> : vector<64x32xf32>
    %49 = tpu.matmul %5, %48, %cst_31 {dimension_numbers = #tpu.dot_dimension_numbers<[1], [0], [0], [1], [0, 0, 1, 1], [], []>} : vector<64x32xbf16>, vector<32x32xbf16>, vector<64x32xf32> -> vector<64x32xf32>
    %50 = arith.truncf %49 : vector<64x32xf32> to vector<64x32xbf16>
    %c0_32 = arith.constant 0 : index
    %c5 = arith.constant 5 : index
    %c0_33 = arith.constant 0 : index
    %c0_34 = arith.constant 0 : index
    %51 = vector.load %arg2[%c0_32, %c5, %c0_33, %c0_34] : memref<1x9x64x64xbf16, #tpu.memory_space<vmem>>, vector<1x1x64x64xbf16>
    %52 = vector.shape_cast %51 : vector<1x1x64x64xbf16> to vector<64x64xbf16>
    %cst_35 = arith.constant dense<0.000000e+00> : vector<64x32xf32>
    %53 = tpu.matmul %52, %50, %cst_35 {dimension_numbers = #tpu.dot_dimension_numbers<[1], [0], [0], [1], [0, 0, 1, 1], [], []>} : vector<64x64xbf16>, vector<64x32xbf16>, vector<64x32xf32> -> vector<64x32xf32>
    %54 = arith.addf %46, %53 : vector<64x32xf32>
    %55 = vector.extract_strided_slice %3 {offsets = [6, 0, 0], sizes = [1, 32, 32], strides = [1, 1, 1]} : vector<9x32x32xbf16> to vector<1x32x32xbf16>
    %56 = vector.shape_cast %55 : vector<1x32x32xbf16> to vector<32x32xbf16>
    %cst_36 = arith.constant dense<0.000000e+00> : vector<64x32xf32>
    %57 = tpu.matmul %5, %56, %cst_36 {dimension_numbers = #tpu.dot_dimension_numbers<[1], [0], [0], [1], [0, 0, 1, 1], [], []>} : vector<64x32xbf16>, vector<32x32xbf16>, vector<64x32xf32> -> vector<64x32xf32>
    %58 = arith.truncf %57 : vector<64x32xf32> to vector<64x32xbf16>
    %c0_37 = arith.constant 0 : index
    %c6 = arith.constant 6 : index
    %c0_38 = arith.constant 0 : index
    %c0_39 = arith.constant 0 : index
    %59 = vector.load %arg2[%c0_37, %c6, %c0_38, %c0_39] : memref<1x9x64x64xbf16, #tpu.memory_space<vmem>>, vector<1x1x64x64xbf16>
    %60 = vector.shape_cast %59 : vector<1x1x64x64xbf16> to vector<64x64xbf16>
    %cst_40 = arith.constant dense<0.000000e+00> : vector<64x32xf32>
    %61 = tpu.matmul %60, %58, %cst_40 {dimension_numbers = #tpu.dot_dimension_numbers<[1], [0], [0], [1], [0, 0, 1, 1], [], []>} : vector<64x64xbf16>, vector<64x32xbf16>, vector<64x32xf32> -> vector<64x32xf32>
    %62 = arith.addf %54, %61 : vector<64x32xf32>
    %63 = vector.extract_strided_slice %3 {offsets = [7, 0, 0], sizes = [1, 32, 32], strides = [1, 1, 1]} : vector<9x32x32xbf16> to vector<1x32x32xbf16>
    %64 = vector.shape_cast %63 : vector<1x32x32xbf16> to vector<32x32xbf16>
    %cst_41 = arith.constant dense<0.000000e+00> : vector<64x32xf32>
    %65 = tpu.matmul %5, %64, %cst_41 {dimension_numbers = #tpu.dot_dimension_numbers<[1], [0], [0], [1], [0, 0, 1, 1], [], []>} : vector<64x32xbf16>, vector<32x32xbf16>, vector<64x32xf32> -> vector<64x32xf32>
    %66 = arith.truncf %65 : vector<64x32xf32> to vector<64x32xbf16>
    %c0_42 = arith.constant 0 : index
    %c7 = arith.constant 7 : index
    %c0_43 = arith.constant 0 : index
    %c0_44 = arith.constant 0 : index
    %67 = vector.load %arg2[%c0_42, %c7, %c0_43, %c0_44] : memref<1x9x64x64xbf16, #tpu.memory_space<vmem>>, vector<1x1x64x64xbf16>
    %68 = vector.shape_cast %67 : vector<1x1x64x64xbf16> to vector<64x64xbf16>
    %cst_45 = arith.constant dense<0.000000e+00> : vector<64x32xf32>
    %69 = tpu.matmul %68, %66, %cst_45 {dimension_numbers = #tpu.dot_dimension_numbers<[1], [0], [0], [1], [0, 0, 1, 1], [], []>} : vector<64x64xbf16>, vector<64x32xbf16>, vector<64x32xf32> -> vector<64x32xf32>
    %70 = arith.addf %62, %69 : vector<64x32xf32>
    %71 = vector.extract_strided_slice %3 {offsets = [8, 0, 0], sizes = [1, 32, 32], strides = [1, 1, 1]} : vector<9x32x32xbf16> to vector<1x32x32xbf16>
    %72 = vector.shape_cast %71 : vector<1x32x32xbf16> to vector<32x32xbf16>
    %cst_46 = arith.constant dense<0.000000e+00> : vector<64x32xf32>
    %73 = tpu.matmul %5, %72, %cst_46 {dimension_numbers = #tpu.dot_dimension_numbers<[1], [0], [0], [1], [0, 0, 1, 1], [], []>} : vector<64x32xbf16>, vector<32x32xbf16>, vector<64x32xf32> -> vector<64x32xf32>
    %74 = arith.truncf %73 : vector<64x32xf32> to vector<64x32xbf16>
    %c0_47 = arith.constant 0 : index
    %c8 = arith.constant 8 : index
    %c0_48 = arith.constant 0 : index
    %c0_49 = arith.constant 0 : index
    %75 = vector.load %arg2[%c0_47, %c8, %c0_48, %c0_49] : memref<1x9x64x64xbf16, #tpu.memory_space<vmem>>, vector<1x1x64x64xbf16>
    %76 = vector.shape_cast %75 : vector<1x1x64x64xbf16> to vector<64x64xbf16>
    %cst_50 = arith.constant dense<0.000000e+00> : vector<64x32xf32>
    %77 = tpu.matmul %76, %74, %cst_50 {dimension_numbers = #tpu.dot_dimension_numbers<[1], [0], [0], [1], [0, 0, 1, 1], [], []>} : vector<64x64xbf16>, vector<64x32xbf16>, vector<64x32xf32> -> vector<64x32xf32>
    %78 = arith.addf %70, %77 : vector<64x32xf32>
    %c0_51 = arith.constant 0 : index
    %c0_52 = arith.constant 0 : index
    %c0_53 = arith.constant 0 : index
    %79 = vector.load %arg3[%c0_51, %c0_52, %c0_53] : memref<1x64x1xf32, #tpu.memory_space<vmem>>, vector<1x64x1xf32>
    %80 = vector.shape_cast %79 : vector<1x64x1xf32> to vector<64x1xf32>
    %81 = vector.broadcast %80 : vector<64x1xf32> to vector<64x32xf32>
    %82 = arith.addf %78, %81 : vector<64x32xf32>
    %cst_54 = arith.constant 0.000000e+00 : f32
    %83 = vector.broadcast %cst_54 : f32 to vector<64x32xf32>
    %84 = arith.maximumf %82, %83 : vector<64x32xf32>
    %85 = arith.truncf %84 : vector<64x32xf32> to vector<64x32xbf16>
    %cst_55 = arith.constant 0.000000e+00 : f32
    %86 = vector.broadcast %cst_55 : f32 to vector<64x32xf32>
    %87 = vector.extract_strided_slice %3 {offsets = [0, 0, 0], sizes = [1, 32, 32], strides = [1, 1, 1]} : vector<9x32x32xbf16> to vector<1x32x32xbf16>
    %88 = vector.shape_cast %87 : vector<1x32x32xbf16> to vector<32x32xbf16>
    %cst_56 = arith.constant dense<0.000000e+00> : vector<64x32xf32>
    %89 = tpu.matmul %85, %88, %cst_56 {dimension_numbers = #tpu.dot_dimension_numbers<[1], [0], [0], [1], [0, 0, 1, 1], [], []>} : vector<64x32xbf16>, vector<32x32xbf16>, vector<64x32xf32> -> vector<64x32xf32>
    %90 = arith.truncf %89 : vector<64x32xf32> to vector<64x32xbf16>
    %c0_57 = arith.constant 0 : index
    %c0_58 = arith.constant 0 : index
    %c0_59 = arith.constant 0 : index
    %c0_60 = arith.constant 0 : index
    %91 = vector.load %arg4[%c0_57, %c0_58, %c0_59, %c0_60] : memref<1x9x64x64xbf16, #tpu.memory_space<vmem>>, vector<1x1x64x64xbf16>
    %92 = vector.shape_cast %91 : vector<1x1x64x64xbf16> to vector<64x64xbf16>
    %cst_61 = arith.constant dense<0.000000e+00> : vector<64x32xf32>
    %93 = tpu.matmul %92, %90, %cst_61 {dimension_numbers = #tpu.dot_dimension_numbers<[1], [0], [0], [1], [0, 0, 1, 1], [], []>} : vector<64x64xbf16>, vector<64x32xbf16>, vector<64x32xf32> -> vector<64x32xf32>
    %94 = arith.addf %86, %93 : vector<64x32xf32>
    %95 = vector.extract_strided_slice %3 {offsets = [1, 0, 0], sizes = [1, 32, 32], strides = [1, 1, 1]} : vector<9x32x32xbf16> to vector<1x32x32xbf16>
    %96 = vector.shape_cast %95 : vector<1x32x32xbf16> to vector<32x32xbf16>
    %cst_62 = arith.constant dense<0.000000e+00> : vector<64x32xf32>
    %97 = tpu.matmul %85, %96, %cst_62 {dimension_numbers = #tpu.dot_dimension_numbers<[1], [0], [0], [1], [0, 0, 1, 1], [], []>} : vector<64x32xbf16>, vector<32x32xbf16>, vector<64x32xf32> -> vector<64x32xf32>
    %98 = arith.truncf %97 : vector<64x32xf32> to vector<64x32xbf16>
    %c0_63 = arith.constant 0 : index
    %c1_64 = arith.constant 1 : index
    %c0_65 = arith.constant 0 : index
    %c0_66 = arith.constant 0 : index
    %99 = vector.load %arg4[%c0_63, %c1_64, %c0_65, %c0_66] : memref<1x9x64x64xbf16, #tpu.memory_space<vmem>>, vector<1x1x64x64xbf16>
    %100 = vector.shape_cast %99 : vector<1x1x64x64xbf16> to vector<64x64xbf16>
    %cst_67 = arith.constant dense<0.000000e+00> : vector<64x32xf32>
    %101 = tpu.matmul %100, %98, %cst_67 {dimension_numbers = #tpu.dot_dimension_numbers<[1], [0], [0], [1], [0, 0, 1, 1], [], []>} : vector<64x64xbf16>, vector<64x32xbf16>, vector<64x32xf32> -> vector<64x32xf32>
    %102 = arith.addf %94, %101 : vector<64x32xf32>
    %103 = vector.extract_strided_slice %3 {offsets = [2, 0, 0], sizes = [1, 32, 32], strides = [1, 1, 1]} : vector<9x32x32xbf16> to vector<1x32x32xbf16>
    %104 = vector.shape_cast %103 : vector<1x32x32xbf16> to vector<32x32xbf16>
    %cst_68 = arith.constant dense<0.000000e+00> : vector<64x32xf32>
    %105 = tpu.matmul %85, %104, %cst_68 {dimension_numbers = #tpu.dot_dimension_numbers<[1], [0], [0], [1], [0, 0, 1, 1], [], []>} : vector<64x32xbf16>, vector<32x32xbf16>, vector<64x32xf32> -> vector<64x32xf32>
    %106 = arith.truncf %105 : vector<64x32xf32> to vector<64x32xbf16>
    %c0_69 = arith.constant 0 : index
    %c2_70 = arith.constant 2 : index
    %c0_71 = arith.constant 0 : index
    %c0_72 = arith.constant 0 : index
    %107 = vector.load %arg4[%c0_69, %c2_70, %c0_71, %c0_72] : memref<1x9x64x64xbf16, #tpu.memory_space<vmem>>, vector<1x1x64x64xbf16>
    %108 = vector.shape_cast %107 : vector<1x1x64x64xbf16> to vector<64x64xbf16>
    %cst_73 = arith.constant dense<0.000000e+00> : vector<64x32xf32>
    %109 = tpu.matmul %108, %106, %cst_73 {dimension_numbers = #tpu.dot_dimension_numbers<[1], [0], [0], [1], [0, 0, 1, 1], [], []>} : vector<64x64xbf16>, vector<64x32xbf16>, vector<64x32xf32> -> vector<64x32xf32>
    %110 = arith.addf %102, %109 : vector<64x32xf32>
    %111 = vector.extract_strided_slice %3 {offsets = [3, 0, 0], sizes = [1, 32, 32], strides = [1, 1, 1]} : vector<9x32x32xbf16> to vector<1x32x32xbf16>
    %112 = vector.shape_cast %111 : vector<1x32x32xbf16> to vector<32x32xbf16>
    %cst_74 = arith.constant dense<0.000000e+00> : vector<64x32xf32>
    %113 = tpu.matmul %85, %112, %cst_74 {dimension_numbers = #tpu.dot_dimension_numbers<[1], [0], [0], [1], [0, 0, 1, 1], [], []>} : vector<64x32xbf16>, vector<32x32xbf16>, vector<64x32xf32> -> vector<64x32xf32>
    %114 = arith.truncf %113 : vector<64x32xf32> to vector<64x32xbf16>
    %c0_75 = arith.constant 0 : index
    %c3_76 = arith.constant 3 : index
    %c0_77 = arith.constant 0 : index
    %c0_78 = arith.constant 0 : index
    %115 = vector.load %arg4[%c0_75, %c3_76, %c0_77, %c0_78] : memref<1x9x64x64xbf16, #tpu.memory_space<vmem>>, vector<1x1x64x64xbf16>
    %116 = vector.shape_cast %115 : vector<1x1x64x64xbf16> to vector<64x64xbf16>
    %cst_79 = arith.constant dense<0.000000e+00> : vector<64x32xf32>
    %117 = tpu.matmul %116, %114, %cst_79 {dimension_numbers = #tpu.dot_dimension_numbers<[1], [0], [0], [1], [0, 0, 1, 1], [], []>} : vector<64x64xbf16>, vector<64x32xbf16>, vector<64x32xf32> -> vector<64x32xf32>
    %118 = arith.addf %110, %117 : vector<64x32xf32>
    %119 = vector.extract_strided_slice %3 {offsets = [4, 0, 0], sizes = [1, 32, 32], strides = [1, 1, 1]} : vector<9x32x32xbf16> to vector<1x32x32xbf16>
    %120 = vector.shape_cast %119 : vector<1x32x32xbf16> to vector<32x32xbf16>
    %cst_80 = arith.constant dense<0.000000e+00> : vector<64x32xf32>
    %121 = tpu.matmul %85, %120, %cst_80 {dimension_numbers = #tpu.dot_dimension_numbers<[1], [0], [0], [1], [0, 0, 1, 1], [], []>} : vector<64x32xbf16>, vector<32x32xbf16>, vector<64x32xf32> -> vector<64x32xf32>
    %122 = arith.truncf %121 : vector<64x32xf32> to vector<64x32xbf16>
    %c0_81 = arith.constant 0 : index
    %c4_82 = arith.constant 4 : index
    %c0_83 = arith.constant 0 : index
    %c0_84 = arith.constant 0 : index
    %123 = vector.load %arg4[%c0_81, %c4_82, %c0_83, %c0_84] : memref<1x9x64x64xbf16, #tpu.memory_space<vmem>>, vector<1x1x64x64xbf16>
    %124 = vector.shape_cast %123 : vector<1x1x64x64xbf16> to vector<64x64xbf16>
    %cst_85 = arith.constant dense<0.000000e+00> : vector<64x32xf32>
    %125 = tpu.matmul %124, %122, %cst_85 {dimension_numbers = #tpu.dot_dimension_numbers<[1], [0], [0], [1], [0, 0, 1, 1], [], []>} : vector<64x64xbf16>, vector<64x32xbf16>, vector<64x32xf32> -> vector<64x32xf32>
    %126 = arith.addf %118, %125 : vector<64x32xf32>
    %127 = vector.extract_strided_slice %3 {offsets = [5, 0, 0], sizes = [1, 32, 32], strides = [1, 1, 1]} : vector<9x32x32xbf16> to vector<1x32x32xbf16>
    %128 = vector.shape_cast %127 : vector<1x32x32xbf16> to vector<32x32xbf16>
    %cst_86 = arith.constant dense<0.000000e+00> : vector<64x32xf32>
    %129 = tpu.matmul %85, %128, %cst_86 {dimension_numbers = #tpu.dot_dimension_numbers<[1], [0], [0], [1], [0, 0, 1, 1], [], []>} : vector<64x32xbf16>, vector<32x32xbf16>, vector<64x32xf32> -> vector<64x32xf32>
    %130 = arith.truncf %129 : vector<64x32xf32> to vector<64x32xbf16>
    %c0_87 = arith.constant 0 : index
    %c5_88 = arith.constant 5 : index
    %c0_89 = arith.constant 0 : index
    %c0_90 = arith.constant 0 : index
    %131 = vector.load %arg4[%c0_87, %c5_88, %c0_89, %c0_90] : memref<1x9x64x64xbf16, #tpu.memory_space<vmem>>, vector<1x1x64x64xbf16>
    %132 = vector.shape_cast %131 : vector<1x1x64x64xbf16> to vector<64x64xbf16>
    %cst_91 = arith.constant dense<0.000000e+00> : vector<64x32xf32>
    %133 = tpu.matmul %132, %130, %cst_91 {dimension_numbers = #tpu.dot_dimension_numbers<[1], [0], [0], [1], [0, 0, 1, 1], [], []>} : vector<64x64xbf16>, vector<64x32xbf16>, vector<64x32xf32> -> vector<64x32xf32>
    %134 = arith.addf %126, %133 : vector<64x32xf32>
    %135 = vector.extract_strided_slice %3 {offsets = [6, 0, 0], sizes = [1, 32, 32], strides = [1, 1, 1]} : vector<9x32x32xbf16> to vector<1x32x32xbf16>
    %136 = vector.shape_cast %135 : vector<1x32x32xbf16> to vector<32x32xbf16>
    %cst_92 = arith.constant dense<0.000000e+00> : vector<64x32xf32>
    %137 = tpu.matmul %85, %136, %cst_92 {dimension_numbers = #tpu.dot_dimension_numbers<[1], [0], [0], [1], [0, 0, 1, 1], [], []>} : vector<64x32xbf16>, vector<32x32xbf16>, vector<64x32xf32> -> vector<64x32xf32>
    %138 = arith.truncf %137 : vector<64x32xf32> to vector<64x32xbf16>
    %c0_93 = arith.constant 0 : index
    %c6_94 = arith.constant 6 : index
    %c0_95 = arith.constant 0 : index
    %c0_96 = arith.constant 0 : index
    %139 = vector.load %arg4[%c0_93, %c6_94, %c0_95, %c0_96] : memref<1x9x64x64xbf16, #tpu.memory_space<vmem>>, vector<1x1x64x64xbf16>
    %140 = vector.shape_cast %139 : vector<1x1x64x64xbf16> to vector<64x64xbf16>
    %cst_97 = arith.constant dense<0.000000e+00> : vector<64x32xf32>
    %141 = tpu.matmul %140, %138, %cst_97 {dimension_numbers = #tpu.dot_dimension_numbers<[1], [0], [0], [1], [0, 0, 1, 1], [], []>} : vector<64x64xbf16>, vector<64x32xbf16>, vector<64x32xf32> -> vector<64x32xf32>
    %142 = arith.addf %134, %141 : vector<64x32xf32>
    %143 = vector.extract_strided_slice %3 {offsets = [7, 0, 0], sizes = [1, 32, 32], strides = [1, 1, 1]} : vector<9x32x32xbf16> to vector<1x32x32xbf16>
    %144 = vector.shape_cast %143 : vector<1x32x32xbf16> to vector<32x32xbf16>
    %cst_98 = arith.constant dense<0.000000e+00> : vector<64x32xf32>
    %145 = tpu.matmul %85, %144, %cst_98 {dimension_numbers = #tpu.dot_dimension_numbers<[1], [0], [0], [1], [0, 0, 1, 1], [], []>} : vector<64x32xbf16>, vector<32x32xbf16>, vector<64x32xf32> -> vector<64x32xf32>
    %146 = arith.truncf %145 : vector<64x32xf32> to vector<64x32xbf16>
    %c0_99 = arith.constant 0 : index
    %c7_100 = arith.constant 7 : index
    %c0_101 = arith.constant 0 : index
    %c0_102 = arith.constant 0 : index
    %147 = vector.load %arg4[%c0_99, %c7_100, %c0_101, %c0_102] : memref<1x9x64x64xbf16, #tpu.memory_space<vmem>>, vector<1x1x64x64xbf16>
    %148 = vector.shape_cast %147 : vector<1x1x64x64xbf16> to vector<64x64xbf16>
    %cst_103 = arith.constant dense<0.000000e+00> : vector<64x32xf32>
    %149 = tpu.matmul %148, %146, %cst_103 {dimension_numbers = #tpu.dot_dimension_numbers<[1], [0], [0], [1], [0, 0, 1, 1], [], []>} : vector<64x64xbf16>, vector<64x32xbf16>, vector<64x32xf32> -> vector<64x32xf32>
    %150 = arith.addf %142, %149 : vector<64x32xf32>
    %151 = vector.extract_strided_slice %3 {offsets = [8, 0, 0], sizes = [1, 32, 32], strides = [1, 1, 1]} : vector<9x32x32xbf16> to vector<1x32x32xbf16>
    %152 = vector.shape_cast %151 : vector<1x32x32xbf16> to vector<32x32xbf16>
    %cst_104 = arith.constant dense<0.000000e+00> : vector<64x32xf32>
    %153 = tpu.matmul %85, %152, %cst_104 {dimension_numbers = #tpu.dot_dimension_numbers<[1], [0], [0], [1], [0, 0, 1, 1], [], []>} : vector<64x32xbf16>, vector<32x32xbf16>, vector<64x32xf32> -> vector<64x32xf32>
    %154 = arith.truncf %153 : vector<64x32xf32> to vector<64x32xbf16>
    %c0_105 = arith.constant 0 : index
    %c8_106 = arith.constant 8 : index
    %c0_107 = arith.constant 0 : index
    %c0_108 = arith.constant 0 : index
    %155 = vector.load %arg4[%c0_105, %c8_106, %c0_107, %c0_108] : memref<1x9x64x64xbf16, #tpu.memory_space<vmem>>, vector<1x1x64x64xbf16>
    %156 = vector.shape_cast %155 : vector<1x1x64x64xbf16> to vector<64x64xbf16>
    %cst_109 = arith.constant dense<0.000000e+00> : vector<64x32xf32>
    %157 = tpu.matmul %156, %154, %cst_109 {dimension_numbers = #tpu.dot_dimension_numbers<[1], [0], [0], [1], [0, 0, 1, 1], [], []>} : vector<64x64xbf16>, vector<64x32xbf16>, vector<64x32xf32> -> vector<64x32xf32>
    %158 = arith.addf %150, %157 : vector<64x32xf32>
    %c0_110 = arith.constant 0 : index
    %c0_111 = arith.constant 0 : index
    %c0_112 = arith.constant 0 : index
    %159 = vector.load %arg5[%c0_110, %c0_111, %c0_112] : memref<1x64x1xf32, #tpu.memory_space<vmem>>, vector<1x64x1xf32>
    %160 = vector.shape_cast %159 : vector<1x64x1xf32> to vector<64x1xf32>
    %161 = vector.broadcast %160 : vector<64x1xf32> to vector<64x32xf32>
    %162 = arith.addf %158, %161 : vector<64x32xf32>
    %163 = arith.addf %162, %4 : vector<64x32xf32>
    %c0_113 = arith.constant 0 : index
    %c0_114 = arith.constant 0 : index
    %164 = vector.load %arg8[%c0_113, %c0_114] : memref<64x32xf32, #tpu.memory_space<vmem>>, vector<64x32xf32>
    tpu.vector_store %arg8[%c0_113, %c0_114], %163 {strides = array<i32>} : memref<64x32xf32, #tpu.memory_space<vmem>>, vector<64x32xf32>,
    %165 = arith.truncf %163 : vector<64x32xf32> to vector<64x32xbf16>
    %c0_115 = arith.constant 0 : index
    %c0_116 = arith.constant 0 : index
    %166 = vector.load %arg7[%c0_115, %c0_116] : memref<64x32xbf16, #tpu.memory_space<vmem>>, vector<64x32xbf16>
    tpu.vector_store %arg7[%c0_115, %c0_116], %165 {strides = array<i32>} : memref<64x32xbf16, #tpu.memory_space<vmem>>, vector<64x32xbf16>,
    return
  }
  func.func @transform_0(%arg0: i32) -> (i32, i32) {
    %c0_i32 = arith.constant 0 : i32
    %c0_i32_0 = arith.constant 0 : i32
    %c0_i32_1 = arith.constant 0 : i32
    return %c0_i32, %c0_i32_0 : i32, i32
  }
  func.func @transform_1(%arg0: i32) -> (i32, i32, i32, i32) {
    %c0_i32 = arith.constant 0 : i32
    %c0_i32_0 = arith.constant 0 : i32
    %c0_i32_1 = arith.constant 0 : i32
    %c0_i32_2 = arith.constant 0 : i32
    return %arg0, %c0_i32, %c0_i32_0, %c0_i32_1 : i32, i32, i32, i32
  }
  func.func @transform_2(%arg0: i32) -> (i32, i32, i32) {
    %c0_i32 = arith.constant 0 : i32
    %c0_i32_0 = arith.constant 0 : i32
    %c0_i32_1 = arith.constant 0 : i32
    return %arg0, %c0_i32, %c0_i32_0 : i32, i32, i32
  }
  func.func @transform_3(%arg0: i32) -> (i32, i32, i32, i32) {
    %c0_i32 = arith.constant 0 : i32
    %c0_i32_0 = arith.constant 0 : i32
    %c0_i32_1 = arith.constant 0 : i32
    %c0_i32_2 = arith.constant 0 : i32
    return %arg0, %c0_i32, %c0_i32_0, %c0_i32_1 : i32, i32, i32, i32
  }
  func.func @transform_4(%arg0: i32) -> (i32, i32, i32) {
    %c0_i32 = arith.constant 0 : i32
    %c0_i32_0 = arith.constant 0 : i32
    %c0_i32_1 = arith.constant 0 : i32
    return %arg0, %c0_i32, %c0_i32_0 : i32, i32, i32
  }
  func.func @transform_5(%arg0: i32) -> (i32, i32, i32) {
    %c0_i32 = arith.constant 0 : i32
    %c0_i32_0 = arith.constant 0 : i32
    %c0_i32_1 = arith.constant 0 : i32
    %c0_i32_2 = arith.constant 0 : i32
    return %c0_i32, %c0_i32_0, %c0_i32_1 : i32, i32, i32
  }
  func.func @transform_6(%arg0: i32) -> (i32, i32) {
    %c0_i32 = arith.constant 0 : i32
    %c0_i32_0 = arith.constant 0 : i32
    %c0_i32_1 = arith.constant 0 : i32
    return %c0_i32, %c0_i32_0 : i32, i32
  }
}

module attributes {stable_mosaic.version = 11 : i64} {
  func.func @_conv_gemm_kernel(%arg0: i32, %arg1: memref<32x576xbf16, #tpu.memory_space<vmem>>, %arg2: memref<576x128xbf16, #tpu.memory_space<vmem>>, %arg3: memref<32x1xf32, #tpu.memory_space<vmem>>, %arg4: memref<32x128xbf16, #tpu.memory_space<vmem>>) attributes {dimension_semantics = [#tpu.dimension_semantics<parallel>], iteration_bounds = array<i64: 1>, scalar_prefetch = 0 : i64, scratch_operands = 0 : i64, tpu.core_type = #tpu.core_type<tc>, window_params = [{pipeline_mode = #tpu.pipeline_mode<synchronous>, transform_indices = @transform_0, window_bounds = array<i64: 32, 576>}, {transform_indices = @transform_1, window_bounds = array<i64: 576, 128>}, {pipeline_mode = #tpu.pipeline_mode<synchronous>, transform_indices = @transform_2, window_bounds = array<i64: 32, 1>}, {transform_indices = @transform_3, window_bounds = array<i64: 32, 128>}]} {
    %c0 = arith.constant 0 : index
    %c0_0 = arith.constant 0 : index
    %0 = vector.load %arg1[%c0, %c0_0] : memref<32x576xbf16, #tpu.memory_space<vmem>>, vector<32x576xbf16>
    %c0_1 = arith.constant 0 : index
    %c0_2 = arith.constant 0 : index
    %1 = vector.load %arg2[%c0_1, %c0_2] : memref<576x128xbf16, #tpu.memory_space<vmem>>, vector<576x128xbf16>
    %cst = arith.constant dense<0.000000e+00> : vector<32x128xf32>
    %2 = tpu.matmul %0, %1, %cst {dimension_numbers = #tpu.dot_dimension_numbers<[1], [0], [0], [1], [0, 0, 1, 1], [], []>} : vector<32x576xbf16>, vector<576x128xbf16>, vector<32x128xf32> -> vector<32x128xf32>
    %c0_3 = arith.constant 0 : index
    %c0_4 = arith.constant 0 : index
    %3 = vector.load %arg3[%c0_3, %c0_4] : memref<32x1xf32, #tpu.memory_space<vmem>>, vector<32x1xf32>
    %4 = vector.broadcast %3 : vector<32x1xf32> to vector<32x128xf32>
    %5 = arith.addf %2, %4 : vector<32x128xf32>
    %cst_5 = arith.constant 0.000000e+00 : f32
    %6 = vector.broadcast %cst_5 : f32 to vector<32x128xf32>
    %7 = arith.maximumf %5, %6 : vector<32x128xf32>
    %8 = arith.truncf %7 : vector<32x128xf32> to vector<32x128xbf16>
    %c0_6 = arith.constant 0 : index
    %c0_7 = arith.constant 0 : index
    %9 = vector.load %arg4[%c0_6, %c0_7] : memref<32x128xbf16, #tpu.memory_space<vmem>>, vector<32x128xbf16>
    tpu.vector_store %arg4[%c0_6, %c0_7], %8 {strides = array<i32>} : memref<32x128xbf16, #tpu.memory_space<vmem>>, vector<32x128xbf16>,
    return
  }
  func.func @transform_0(%arg0: i32) -> (i32, i32) {
    %c0_i32 = arith.constant 0 : i32
    %c0_i32_0 = arith.constant 0 : i32
    %c0_i32_1 = arith.constant 0 : i32
    return %c0_i32, %c0_i32_0 : i32, i32
  }
  func.func @transform_1(%arg0: i32) -> (i32, i32) {
    %c0_i32 = arith.constant 0 : i32
    %c0_i32_0 = arith.constant 0 : i32
    return %c0_i32, %arg0 : i32, i32
  }
  func.func @transform_2(%arg0: i32) -> (i32, i32) {
    %c0_i32 = arith.constant 0 : i32
    %c0_i32_0 = arith.constant 0 : i32
    %c0_i32_1 = arith.constant 0 : i32
    return %c0_i32, %c0_i32_0 : i32, i32
  }
  func.func @transform_3(%arg0: i32) -> (i32, i32) {
    %c0_i32 = arith.constant 0 : i32
    %c0_i32_0 = arith.constant 0 : i32
    return %c0_i32, %arg0 : i32, i32
  }
}

module attributes {stable_mosaic.version = 11 : i64} {
  func.func @_conv_gemm_kernel(%arg0: i32, %arg1: memref<16x288xbf16, #tpu.memory_space<vmem>>, %arg2: memref<288x256xbf16, #tpu.memory_space<vmem>>, %arg3: memref<16x1xf32, #tpu.memory_space<vmem>>, %arg4: memref<16x256xbf16, #tpu.memory_space<vmem>>) attributes {dimension_semantics = [#tpu.dimension_semantics<parallel>], iteration_bounds = array<i64: 2>, scalar_prefetch = 0 : i64, scratch_operands = 0 : i64, tpu.core_type = #tpu.core_type<tc>, window_params = [{pipeline_mode = #tpu.pipeline_mode<synchronous>, transform_indices = @transform_0, window_bounds = array<i64: 16, 288>}, {transform_indices = @transform_1, window_bounds = array<i64: 288, 256>}, {pipeline_mode = #tpu.pipeline_mode<synchronous>, transform_indices = @transform_2, window_bounds = array<i64: 16, 1>}, {transform_indices = @transform_3, window_bounds = array<i64: 16, 256>}]} {
    %c0 = arith.constant 0 : index
    %c0_0 = arith.constant 0 : index
    %0 = vector.load %arg1[%c0, %c0_0] : memref<16x288xbf16, #tpu.memory_space<vmem>>, vector<16x288xbf16>
    %c0_1 = arith.constant 0 : index
    %c0_2 = arith.constant 0 : index
    %1 = vector.load %arg2[%c0_1, %c0_2] : memref<288x256xbf16, #tpu.memory_space<vmem>>, vector<288x256xbf16>
    %cst = arith.constant dense<0.000000e+00> : vector<16x256xf32>
    %2 = tpu.matmul %0, %1, %cst {dimension_numbers = #tpu.dot_dimension_numbers<[1], [0], [0], [1], [0, 0, 1, 1], [], []>} : vector<16x288xbf16>, vector<288x256xbf16>, vector<16x256xf32> -> vector<16x256xf32>
    %c0_3 = arith.constant 0 : index
    %c0_4 = arith.constant 0 : index
    %3 = vector.load %arg3[%c0_3, %c0_4] : memref<16x1xf32, #tpu.memory_space<vmem>>, vector<16x1xf32>
    %4 = vector.broadcast %3 : vector<16x1xf32> to vector<16x256xf32>
    %5 = arith.addf %2, %4 : vector<16x256xf32>
    %cst_5 = arith.constant 0.000000e+00 : f32
    %6 = vector.broadcast %cst_5 : f32 to vector<16x256xf32>
    %7 = arith.maximumf %5, %6 : vector<16x256xf32>
    %8 = arith.truncf %7 : vector<16x256xf32> to vector<16x256xbf16>
    %c0_6 = arith.constant 0 : index
    %c0_7 = arith.constant 0 : index
    %9 = vector.load %arg4[%c0_6, %c0_7] : memref<16x256xbf16, #tpu.memory_space<vmem>>, vector<16x256xbf16>
    tpu.vector_store %arg4[%c0_6, %c0_7], %8 {strides = array<i32>} : memref<16x256xbf16, #tpu.memory_space<vmem>>, vector<16x256xbf16>,
    return
  }
  func.func @transform_0(%arg0: i32) -> (i32, i32) {
    %c0_i32 = arith.constant 0 : i32
    %c0_i32_0 = arith.constant 0 : i32
    %c0_i32_1 = arith.constant 0 : i32
    return %c0_i32, %c0_i32_0 : i32, i32
  }
  func.func @transform_1(%arg0: i32) -> (i32, i32) {
    %c0_i32 = arith.constant 0 : i32
    %c0_i32_0 = arith.constant 0 : i32
    return %c0_i32, %arg0 : i32, i32
  }
  func.func @transform_2(%arg0: i32) -> (i32, i32) {
    %c0_i32 = arith.constant 0 : i32
    %c0_i32_0 = arith.constant 0 : i32
    %c0_i32_1 = arith.constant 0 : i32
    return %c0_i32, %c0_i32_0 : i32, i32
  }
  func.func @transform_3(%arg0: i32) -> (i32, i32) {
    %c0_i32 = arith.constant 0 : i32
    %c0_i32_0 = arith.constant 0 : i32
    return %c0_i32, %arg0 : i32, i32
  }
}

module attributes {stable_mosaic.version = 11 : i64} {
  func.func @_conv_gemm_kernel(%arg0: i32, %arg1: memref<6x784xbf16, #tpu.memory_space<vmem>>, %arg2: memref<784x256xbf16, #tpu.memory_space<vmem>>, %arg3: memref<6x1xf32, #tpu.memory_space<vmem>>, %arg4: memref<6x256xf32, #tpu.memory_space<vmem>>) attributes {dimension_semantics = [#tpu.dimension_semantics<parallel>], iteration_bounds = array<i64: 2>, scalar_prefetch = 0 : i64, scratch_operands = 0 : i64, tpu.core_type = #tpu.core_type<tc>, window_params = [{pipeline_mode = #tpu.pipeline_mode<synchronous>, transform_indices = @transform_0, window_bounds = array<i64: 6, 784>}, {transform_indices = @transform_1, window_bounds = array<i64: 784, 256>}, {pipeline_mode = #tpu.pipeline_mode<synchronous>, transform_indices = @transform_2, window_bounds = array<i64: 6, 1>}, {transform_indices = @transform_3, window_bounds = array<i64: 6, 256>}]} {
    %c0 = arith.constant 0 : index
    %c0_0 = arith.constant 0 : index
    %0 = vector.load %arg1[%c0, %c0_0] : memref<6x784xbf16, #tpu.memory_space<vmem>>, vector<6x784xbf16>
    %c0_1 = arith.constant 0 : index
    %c0_2 = arith.constant 0 : index
    %1 = vector.load %arg2[%c0_1, %c0_2] : memref<784x256xbf16, #tpu.memory_space<vmem>>, vector<784x256xbf16>
    %cst = arith.constant dense<0.000000e+00> : vector<6x256xf32>
    %2 = tpu.matmul %0, %1, %cst {dimension_numbers = #tpu.dot_dimension_numbers<[1], [0], [0], [1], [0, 0, 1, 1], [], []>} : vector<6x784xbf16>, vector<784x256xbf16>, vector<6x256xf32> -> vector<6x256xf32>
    %c0_3 = arith.constant 0 : index
    %c0_4 = arith.constant 0 : index
    %3 = vector.load %arg3[%c0_3, %c0_4] : memref<6x1xf32, #tpu.memory_space<vmem>>, vector<6x1xf32>
    %4 = vector.broadcast %3 : vector<6x1xf32> to vector<6x256xf32>
    %5 = arith.addf %2, %4 : vector<6x256xf32>
    %c0_5 = arith.constant 0 : index
    %c0_6 = arith.constant 0 : index
    %6 = vector.load %arg4[%c0_5, %c0_6] : memref<6x256xf32, #tpu.memory_space<vmem>>, vector<6x256xf32>
    tpu.vector_store %arg4[%c0_5, %c0_6], %5 {strides = array<i32>} : memref<6x256xf32, #tpu.memory_space<vmem>>, vector<6x256xf32>,
    return
  }
  func.func @transform_0(%arg0: i32) -> (i32, i32) {
    %c0_i32 = arith.constant 0 : i32
    %c0_i32_0 = arith.constant 0 : i32
    %c0_i32_1 = arith.constant 0 : i32
    return %c0_i32, %c0_i32_0 : i32, i32
  }
  func.func @transform_1(%arg0: i32) -> (i32, i32) {
    %c0_i32 = arith.constant 0 : i32
    %c0_i32_0 = arith.constant 0 : i32
    return %c0_i32, %arg0 : i32, i32
  }
  func.func @transform_2(%arg0: i32) -> (i32, i32) {
    %c0_i32 = arith.constant 0 : i32
    %c0_i32_0 = arith.constant 0 : i32
    %c0_i32_1 = arith.constant 0 : i32
    return %c0_i32, %c0_i32_0 : i32, i32
  }
  func.func @transform_3(%arg0: i32) -> (i32, i32) {
    %c0_i32 = arith.constant 0 : i32
    %c0_i32_0 = arith.constant 0 : i32
    return %c0_i32, %arg0 : i32, i32
  }
}

module attributes {stable_mosaic.version = 11 : i64} {
  func.func @_conv_gemm_kernel(%arg0: i32, %arg1: memref<8x448xbf16, #tpu.memory_space<vmem>>, %arg2: memref<448x128xbf16, #tpu.memory_space<vmem>>, %arg3: memref<8x1xf32, #tpu.memory_space<vmem>>, %arg4: memref<8x128xbf16, #tpu.memory_space<vmem>>) attributes {dimension_semantics = [#tpu.dimension_semantics<parallel>], iteration_bounds = array<i64: 1>, scalar_prefetch = 0 : i64, scratch_operands = 0 : i64, tpu.core_type = #tpu.core_type<tc>, window_params = [{pipeline_mode = #tpu.pipeline_mode<synchronous>, transform_indices = @transform_0, window_bounds = array<i64: 8, 448>}, {transform_indices = @transform_1, window_bounds = array<i64: 448, 128>}, {pipeline_mode = #tpu.pipeline_mode<synchronous>, transform_indices = @transform_2, window_bounds = array<i64: 8, 1>}, {transform_indices = @transform_3, window_bounds = array<i64: 8, 128>}]} {
    %c0 = arith.constant 0 : index
    %c0_0 = arith.constant 0 : index
    %0 = vector.load %arg1[%c0, %c0_0] : memref<8x448xbf16, #tpu.memory_space<vmem>>, vector<8x448xbf16>
    %c0_1 = arith.constant 0 : index
    %c0_2 = arith.constant 0 : index
    %1 = vector.load %arg2[%c0_1, %c0_2] : memref<448x128xbf16, #tpu.memory_space<vmem>>, vector<448x128xbf16>
    %cst = arith.constant dense<0.000000e+00> : vector<8x128xf32>
    %2 = tpu.matmul %0, %1, %cst {dimension_numbers = #tpu.dot_dimension_numbers<[1], [0], [0], [1], [0, 0, 1, 1], [], []>} : vector<8x448xbf16>, vector<448x128xbf16>, vector<8x128xf32> -> vector<8x128xf32>
    %c0_3 = arith.constant 0 : index
    %c0_4 = arith.constant 0 : index
    %3 = vector.load %arg3[%c0_3, %c0_4] : memref<8x1xf32, #tpu.memory_space<vmem>>, vector<8x1xf32>
    %4 = vector.broadcast %3 : vector<8x1xf32> to vector<8x128xf32>
    %5 = arith.addf %2, %4 : vector<8x128xf32>
    %6 = arith.truncf %5 : vector<8x128xf32> to vector<8x128xbf16>
    %c0_5 = arith.constant 0 : index
    %c0_6 = arith.constant 0 : index
    %7 = vector.load %arg4[%c0_5, %c0_6] : memref<8x128xbf16, #tpu.memory_space<vmem>>, vector<8x128xbf16>
    tpu.vector_store %arg4[%c0_5, %c0_6], %6 {strides = array<i32>} : memref<8x128xbf16, #tpu.memory_space<vmem>>, vector<8x128xbf16>,
    return
  }
  func.func @transform_0(%arg0: i32) -> (i32, i32) {
    %c0_i32 = arith.constant 0 : i32
    %c0_i32_0 = arith.constant 0 : i32
    %c0_i32_1 = arith.constant 0 : i32
    return %c0_i32, %c0_i32_0 : i32, i32
  }
  func.func @transform_1(%arg0: i32) -> (i32, i32) {
    %c0_i32 = arith.constant 0 : i32
    %c0_i32_0 = arith.constant 0 : i32
    return %c0_i32, %arg0 : i32, i32
  }
  func.func @transform_2(%arg0: i32) -> (i32, i32) {
    %c0_i32 = arith.constant 0 : i32
    %c0_i32_0 = arith.constant 0 : i32
    %c0_i32_1 = arith.constant 0 : i32
    return %c0_i32, %c0_i32_0 : i32, i32
  }
  func.func @transform_3(%arg0: i32) -> (i32, i32) {
    %c0_i32 = arith.constant 0 : i32
    %c0_i32_0 = arith.constant 0 : i32
    return %c0_i32, %arg0 : i32, i32
  }
}

module attributes {stable_mosaic.version = 11 : i64} {
  func.func @_conv_gemm_kernel(%arg0: i32, %arg1: memref<8x1184xbf16, #tpu.memory_space<vmem>>, %arg2: memref<1184x128xbf16, #tpu.memory_space<vmem>>, %arg3: memref<8x1xf32, #tpu.memory_space<vmem>>, %arg4: memref<8x128xbf16, #tpu.memory_space<vmem>>) attributes {dimension_semantics = [#tpu.dimension_semantics<parallel>], iteration_bounds = array<i64: 1>, scalar_prefetch = 0 : i64, scratch_operands = 0 : i64, tpu.core_type = #tpu.core_type<tc>, window_params = [{pipeline_mode = #tpu.pipeline_mode<synchronous>, transform_indices = @transform_0, window_bounds = array<i64: 8, 1184>}, {transform_indices = @transform_1, window_bounds = array<i64: 1184, 128>}, {pipeline_mode = #tpu.pipeline_mode<synchronous>, transform_indices = @transform_2, window_bounds = array<i64: 8, 1>}, {transform_indices = @transform_3, window_bounds = array<i64: 8, 128>}]} {
    %c0 = arith.constant 0 : index
    %c0_0 = arith.constant 0 : index
    %0 = vector.load %arg1[%c0, %c0_0] : memref<8x1184xbf16, #tpu.memory_space<vmem>>, vector<8x1184xbf16>
    %c0_1 = arith.constant 0 : index
    %c0_2 = arith.constant 0 : index
    %1 = vector.load %arg2[%c0_1, %c0_2] : memref<1184x128xbf16, #tpu.memory_space<vmem>>, vector<1184x128xbf16>
    %cst = arith.constant dense<0.000000e+00> : vector<8x128xf32>
    %2 = tpu.matmul %0, %1, %cst {dimension_numbers = #tpu.dot_dimension_numbers<[1], [0], [0], [1], [0, 0, 1, 1], [], []>} : vector<8x1184xbf16>, vector<1184x128xbf16>, vector<8x128xf32> -> vector<8x128xf32>
    %c0_3 = arith.constant 0 : index
    %c0_4 = arith.constant 0 : index
    %3 = vector.load %arg3[%c0_3, %c0_4] : memref<8x1xf32, #tpu.memory_space<vmem>>, vector<8x1xf32>
    %4 = vector.broadcast %3 : vector<8x1xf32> to vector<8x128xf32>
    %5 = arith.addf %2, %4 : vector<8x128xf32>
    %6 = arith.truncf %5 : vector<8x128xf32> to vector<8x128xbf16>
    %c0_5 = arith.constant 0 : index
    %c0_6 = arith.constant 0 : index
    %7 = vector.load %arg4[%c0_5, %c0_6] : memref<8x128xbf16, #tpu.memory_space<vmem>>, vector<8x128xbf16>
    tpu.vector_store %arg4[%c0_5, %c0_6], %6 {strides = array<i32>} : memref<8x128xbf16, #tpu.memory_space<vmem>>, vector<8x128xbf16>,
    return
  }
  func.func @transform_0(%arg0: i32) -> (i32, i32) {
    %c0_i32 = arith.constant 0 : i32
    %c0_i32_0 = arith.constant 0 : i32
    %c0_i32_1 = arith.constant 0 : i32
    return %c0_i32, %c0_i32_0 : i32, i32
  }
  func.func @transform_1(%arg0: i32) -> (i32, i32) {
    %c0_i32 = arith.constant 0 : i32
    %c0_i32_0 = arith.constant 0 : i32
    return %c0_i32, %arg0 : i32, i32
  }
  func.func @transform_2(%arg0: i32) -> (i32, i32) {
    %c0_i32 = arith.constant 0 : i32
    %c0_i32_0 = arith.constant 0 : i32
    %c0_i32_1 = arith.constant 0 : i32
    return %c0_i32, %c0_i32_0 : i32, i32
  }
  func.func @transform_3(%arg0: i32) -> (i32, i32) {
    %c0_i32 = arith.constant 0 : i32
    %c0_i32_0 = arith.constant 0 : i32
    return %c0_i32, %arg0 : i32, i32
  }
}

module attributes {stable_mosaic.version = 11 : i64} {
  func.func @_conv_gemm_kernel(%arg0: i32, %arg1: memref<16x784xbf16, #tpu.memory_space<vmem>>, %arg2: memref<784x128xbf16, #tpu.memory_space<vmem>>, %arg3: memref<16x1xf32, #tpu.memory_space<vmem>>, %arg4: memref<16x128xbf16, #tpu.memory_space<vmem>>) attributes {dimension_semantics = [#tpu.dimension_semantics<parallel>], iteration_bounds = array<i64: 1>, scalar_prefetch = 0 : i64, scratch_operands = 0 : i64, tpu.core_type = #tpu.core_type<tc>, window_params = [{pipeline_mode = #tpu.pipeline_mode<synchronous>, transform_indices = @transform_0, window_bounds = array<i64: 16, 784>}, {transform_indices = @transform_1, window_bounds = array<i64: 784, 128>}, {pipeline_mode = #tpu.pipeline_mode<synchronous>, transform_indices = @transform_2, window_bounds = array<i64: 16, 1>}, {transform_indices = @transform_3, window_bounds = array<i64: 16, 128>}]} {
    %c0 = arith.constant 0 : index
    %c0_0 = arith.constant 0 : index
    %0 = vector.load %arg1[%c0, %c0_0] : memref<16x784xbf16, #tpu.memory_space<vmem>>, vector<16x784xbf16>
    %c0_1 = arith.constant 0 : index
    %c0_2 = arith.constant 0 : index
    %1 = vector.load %arg2[%c0_1, %c0_2] : memref<784x128xbf16, #tpu.memory_space<vmem>>, vector<784x128xbf16>
    %cst = arith.constant dense<0.000000e+00> : vector<16x128xf32>
    %2 = tpu.matmul %0, %1, %cst {dimension_numbers = #tpu.dot_dimension_numbers<[1], [0], [0], [1], [0, 0, 1, 1], [], []>} : vector<16x784xbf16>, vector<784x128xbf16>, vector<16x128xf32> -> vector<16x128xf32>
    %c0_3 = arith.constant 0 : index
    %c0_4 = arith.constant 0 : index
    %3 = vector.load %arg3[%c0_3, %c0_4] : memref<16x1xf32, #tpu.memory_space<vmem>>, vector<16x1xf32>
    %4 = vector.broadcast %3 : vector<16x1xf32> to vector<16x128xf32>
    %5 = arith.addf %2, %4 : vector<16x128xf32>
    %cst_5 = arith.constant 0.000000e+00 : f32
    %6 = vector.broadcast %cst_5 : f32 to vector<16x128xf32>
    %7 = arith.cmpf ogt, %5, %6 : vector<16x128xf32>
    %cst_6 = arith.constant 3.000000e-01 : f32
    %8 = vector.broadcast %cst_6 : f32 to vector<16x128xf32>
    %9 = arith.mulf %8, %5 : vector<16x128xf32>
    %10 = arith.select %7, %5, %9 : vector<16x128xi1>, vector<16x128xf32>
    %11 = arith.truncf %10 : vector<16x128xf32> to vector<16x128xbf16>
    %c0_7 = arith.constant 0 : index
    %c0_8 = arith.constant 0 : index
    %12 = vector.load %arg4[%c0_7, %c0_8] : memref<16x128xbf16, #tpu.memory_space<vmem>>, vector<16x128xbf16>
    tpu.vector_store %arg4[%c0_7, %c0_8], %11 {strides = array<i32>} : memref<16x128xbf16, #tpu.memory_space<vmem>>, vector<16x128xbf16>,
    return
  }
  func.func @transform_0(%arg0: i32) -> (i32, i32) {
    %c0_i32 = arith.constant 0 : i32
    %c0_i32_0 = arith.constant 0 : i32
    %c0_i32_1 = arith.constant 0 : i32
    return %c0_i32, %c0_i32_0 : i32, i32
  }
  func.func @transform_1(%arg0: i32) -> (i32, i32) {
    %c0_i32 = arith.constant 0 : i32
    %c0_i32_0 = arith.constant 0 : i32
    return %c0_i32, %arg0 : i32, i32
  }
  func.func @transform_2(%arg0: i32) -> (i32, i32) {
    %c0_i32 = arith.constant 0 : i32
    %c0_i32_0 = arith.constant 0 : i32
    %c0_i32_1 = arith.constant 0 : i32
    return %c0_i32, %c0_i32_0 : i32, i32
  }
  func.func @transform_3(%arg0: i32) -> (i32, i32) {
    %c0_i32 = arith.constant 0 : i32
    %c0_i32_0 = arith.constant 0 : i32
    return %c0_i32, %arg0 : i32, i32
  }
}

module attributes {stable_mosaic.version = 11 : i64} {
  func.func @_res_chain_kernel(%arg0: i32, %arg1: memref<16x128xbf16, #tpu.memory_space<vmem>>, %arg2: memref<1x9x16x16xbf16, #tpu.memory_space<vmem>>, %arg3: memref<1x16x1xf32, #tpu.memory_space<vmem>>, %arg4: memref<1x9x16x16xbf16, #tpu.memory_space<vmem>>, %arg5: memref<1x16x1xf32, #tpu.memory_space<vmem>>, %arg6: memref<9x128x128xbf16, #tpu.memory_space<vmem>>, %arg7: memref<16x128xbf16, #tpu.memory_space<vmem>>, %arg8: memref<16x128xf32, #tpu.memory_space<vmem>>) attributes {dimension_semantics = [#tpu.dimension_semantics<arbitrary>], iteration_bounds = array<i64: 6>, scalar_prefetch = 0 : i64, scratch_operands = 1 : i64, tpu.core_type = #tpu.core_type<tc>, window_params = [{pipeline_mode = #tpu.pipeline_mode<synchronous>, transform_indices = @transform_0, window_bounds = array<i64: 16, 128>}, {transform_indices = @transform_1, window_bounds = array<i64: 1, 9, 16, 16>}, {transform_indices = @transform_2, window_bounds = array<i64: 1, 16, 1>}, {transform_indices = @transform_3, window_bounds = array<i64: 1, 9, 16, 16>}, {transform_indices = @transform_4, window_bounds = array<i64: 1, 16, 1>}, {pipeline_mode = #tpu.pipeline_mode<synchronous>, transform_indices = @transform_5, window_bounds = array<i64: 9, 128, 128>}, {pipeline_mode = #tpu.pipeline_mode<synchronous>, transform_indices = @transform_6, window_bounds = array<i64: 16, 128>}]} {
    %c0_i32 = arith.constant 0 : i32
    %0 = arith.cmpi eq, %arg0, %c0_i32 : i32
    %1 = arith.extui %0 : i1 to i32
    %c0_i32_0 = arith.constant 0 : i32
    %2 = arith.cmpi ne, %1, %c0_i32_0 : i32
    scf.if %2 {
      %c0_117 = arith.constant 0 : index
      %c0_118 = arith.constant 0 : index
      %167 = vector.load %arg1[%c0_117, %c0_118] : memref<16x128xbf16, #tpu.memory_space<vmem>>, vector<16x128xbf16>
      %168 = arith.extf %167 : vector<16x128xbf16> to vector<16x128xf32>
      %c0_119 = arith.constant 0 : index
      %c0_120 = arith.constant 0 : index
      %169 = vector.load %arg8[%c0_119, %c0_120] : memref<16x128xf32, #tpu.memory_space<vmem>>, vector<16x128xf32>
      tpu.vector_store %arg8[%c0_119, %c0_120], %168 {strides = array<i32>} : memref<16x128xf32, #tpu.memory_space<vmem>>, vector<16x128xf32>,
    } else {
    }
    %c0 = arith.constant 0 : index
    %c0_1 = arith.constant 0 : index
    %c0_2 = arith.constant 0 : index
    %3 = vector.load %arg6[%c0, %c0_1, %c0_2] : memref<9x128x128xbf16, #tpu.memory_space<vmem>>, vector<9x128x128xbf16>
    %c0_3 = arith.constant 0 : index
    %c0_4 = arith.constant 0 : index
    %4 = vector.load %arg8[%c0_3, %c0_4] : memref<16x128xf32, #tpu.memory_space<vmem>>, vector<16x128xf32>
    %5 = arith.truncf %4 : vector<16x128xf32> to vector<16x128xbf16>
    %cst = arith.constant 0.000000e+00 : f32
    %6 = vector.broadcast %cst : f32 to vector<16x128xf32>
    %7 = vector.extract_strided_slice %3 {offsets = [0, 0, 0], sizes = [1, 128, 128], strides = [1, 1, 1]} : vector<9x128x128xbf16> to vector<1x128x128xbf16>
    %8 = vector.shape_cast %7 : vector<1x128x128xbf16> to vector<128x128xbf16>
    %cst_5 = arith.constant dense<0.000000e+00> : vector<16x128xf32>
    %9 = tpu.matmul %5, %8, %cst_5 {dimension_numbers = #tpu.dot_dimension_numbers<[1], [0], [0], [1], [0, 0, 1, 1], [], []>} : vector<16x128xbf16>, vector<128x128xbf16>, vector<16x128xf32> -> vector<16x128xf32>
    %10 = arith.truncf %9 : vector<16x128xf32> to vector<16x128xbf16>
    %c0_6 = arith.constant 0 : index
    %c0_7 = arith.constant 0 : index
    %c0_8 = arith.constant 0 : index
    %c0_9 = arith.constant 0 : index
    %11 = vector.load %arg2[%c0_6, %c0_7, %c0_8, %c0_9] : memref<1x9x16x16xbf16, #tpu.memory_space<vmem>>, vector<1x1x16x16xbf16>
    %12 = vector.shape_cast %11 : vector<1x1x16x16xbf16> to vector<16x16xbf16>
    %cst_10 = arith.constant dense<0.000000e+00> : vector<16x128xf32>
    %13 = tpu.matmul %12, %10, %cst_10 {dimension_numbers = #tpu.dot_dimension_numbers<[1], [0], [0], [1], [0, 0, 1, 1], [], []>} : vector<16x16xbf16>, vector<16x128xbf16>, vector<16x128xf32> -> vector<16x128xf32>
    %14 = arith.addf %6, %13 : vector<16x128xf32>
    %15 = vector.extract_strided_slice %3 {offsets = [1, 0, 0], sizes = [1, 128, 128], strides = [1, 1, 1]} : vector<9x128x128xbf16> to vector<1x128x128xbf16>
    %16 = vector.shape_cast %15 : vector<1x128x128xbf16> to vector<128x128xbf16>
    %cst_11 = arith.constant dense<0.000000e+00> : vector<16x128xf32>
    %17 = tpu.matmul %5, %16, %cst_11 {dimension_numbers = #tpu.dot_dimension_numbers<[1], [0], [0], [1], [0, 0, 1, 1], [], []>} : vector<16x128xbf16>, vector<128x128xbf16>, vector<16x128xf32> -> vector<16x128xf32>
    %18 = arith.truncf %17 : vector<16x128xf32> to vector<16x128xbf16>
    %c0_12 = arith.constant 0 : index
    %c1 = arith.constant 1 : index
    %c0_13 = arith.constant 0 : index
    %c0_14 = arith.constant 0 : index
    %19 = vector.load %arg2[%c0_12, %c1, %c0_13, %c0_14] : memref<1x9x16x16xbf16, #tpu.memory_space<vmem>>, vector<1x1x16x16xbf16>
    %20 = vector.shape_cast %19 : vector<1x1x16x16xbf16> to vector<16x16xbf16>
    %cst_15 = arith.constant dense<0.000000e+00> : vector<16x128xf32>
    %21 = tpu.matmul %20, %18, %cst_15 {dimension_numbers = #tpu.dot_dimension_numbers<[1], [0], [0], [1], [0, 0, 1, 1], [], []>} : vector<16x16xbf16>, vector<16x128xbf16>, vector<16x128xf32> -> vector<16x128xf32>
    %22 = arith.addf %14, %21 : vector<16x128xf32>
    %23 = vector.extract_strided_slice %3 {offsets = [2, 0, 0], sizes = [1, 128, 128], strides = [1, 1, 1]} : vector<9x128x128xbf16> to vector<1x128x128xbf16>
    %24 = vector.shape_cast %23 : vector<1x128x128xbf16> to vector<128x128xbf16>
    %cst_16 = arith.constant dense<0.000000e+00> : vector<16x128xf32>
    %25 = tpu.matmul %5, %24, %cst_16 {dimension_numbers = #tpu.dot_dimension_numbers<[1], [0], [0], [1], [0, 0, 1, 1], [], []>} : vector<16x128xbf16>, vector<128x128xbf16>, vector<16x128xf32> -> vector<16x128xf32>
    %26 = arith.truncf %25 : vector<16x128xf32> to vector<16x128xbf16>
    %c0_17 = arith.constant 0 : index
    %c2 = arith.constant 2 : index
    %c0_18 = arith.constant 0 : index
    %c0_19 = arith.constant 0 : index
    %27 = vector.load %arg2[%c0_17, %c2, %c0_18, %c0_19] : memref<1x9x16x16xbf16, #tpu.memory_space<vmem>>, vector<1x1x16x16xbf16>
    %28 = vector.shape_cast %27 : vector<1x1x16x16xbf16> to vector<16x16xbf16>
    %cst_20 = arith.constant dense<0.000000e+00> : vector<16x128xf32>
    %29 = tpu.matmul %28, %26, %cst_20 {dimension_numbers = #tpu.dot_dimension_numbers<[1], [0], [0], [1], [0, 0, 1, 1], [], []>} : vector<16x16xbf16>, vector<16x128xbf16>, vector<16x128xf32> -> vector<16x128xf32>
    %30 = arith.addf %22, %29 : vector<16x128xf32>
    %31 = vector.extract_strided_slice %3 {offsets = [3, 0, 0], sizes = [1, 128, 128], strides = [1, 1, 1]} : vector<9x128x128xbf16> to vector<1x128x128xbf16>
    %32 = vector.shape_cast %31 : vector<1x128x128xbf16> to vector<128x128xbf16>
    %cst_21 = arith.constant dense<0.000000e+00> : vector<16x128xf32>
    %33 = tpu.matmul %5, %32, %cst_21 {dimension_numbers = #tpu.dot_dimension_numbers<[1], [0], [0], [1], [0, 0, 1, 1], [], []>} : vector<16x128xbf16>, vector<128x128xbf16>, vector<16x128xf32> -> vector<16x128xf32>
    %34 = arith.truncf %33 : vector<16x128xf32> to vector<16x128xbf16>
    %c0_22 = arith.constant 0 : index
    %c3 = arith.constant 3 : index
    %c0_23 = arith.constant 0 : index
    %c0_24 = arith.constant 0 : index
    %35 = vector.load %arg2[%c0_22, %c3, %c0_23, %c0_24] : memref<1x9x16x16xbf16, #tpu.memory_space<vmem>>, vector<1x1x16x16xbf16>
    %36 = vector.shape_cast %35 : vector<1x1x16x16xbf16> to vector<16x16xbf16>
    %cst_25 = arith.constant dense<0.000000e+00> : vector<16x128xf32>
    %37 = tpu.matmul %36, %34, %cst_25 {dimension_numbers = #tpu.dot_dimension_numbers<[1], [0], [0], [1], [0, 0, 1, 1], [], []>} : vector<16x16xbf16>, vector<16x128xbf16>, vector<16x128xf32> -> vector<16x128xf32>
    %38 = arith.addf %30, %37 : vector<16x128xf32>
    %39 = vector.extract_strided_slice %3 {offsets = [4, 0, 0], sizes = [1, 128, 128], strides = [1, 1, 1]} : vector<9x128x128xbf16> to vector<1x128x128xbf16>
    %40 = vector.shape_cast %39 : vector<1x128x128xbf16> to vector<128x128xbf16>
    %cst_26 = arith.constant dense<0.000000e+00> : vector<16x128xf32>
    %41 = tpu.matmul %5, %40, %cst_26 {dimension_numbers = #tpu.dot_dimension_numbers<[1], [0], [0], [1], [0, 0, 1, 1], [], []>} : vector<16x128xbf16>, vector<128x128xbf16>, vector<16x128xf32> -> vector<16x128xf32>
    %42 = arith.truncf %41 : vector<16x128xf32> to vector<16x128xbf16>
    %c0_27 = arith.constant 0 : index
    %c4 = arith.constant 4 : index
    %c0_28 = arith.constant 0 : index
    %c0_29 = arith.constant 0 : index
    %43 = vector.load %arg2[%c0_27, %c4, %c0_28, %c0_29] : memref<1x9x16x16xbf16, #tpu.memory_space<vmem>>, vector<1x1x16x16xbf16>
    %44 = vector.shape_cast %43 : vector<1x1x16x16xbf16> to vector<16x16xbf16>
    %cst_30 = arith.constant dense<0.000000e+00> : vector<16x128xf32>
    %45 = tpu.matmul %44, %42, %cst_30 {dimension_numbers = #tpu.dot_dimension_numbers<[1], [0], [0], [1], [0, 0, 1, 1], [], []>} : vector<16x16xbf16>, vector<16x128xbf16>, vector<16x128xf32> -> vector<16x128xf32>
    %46 = arith.addf %38, %45 : vector<16x128xf32>
    %47 = vector.extract_strided_slice %3 {offsets = [5, 0, 0], sizes = [1, 128, 128], strides = [1, 1, 1]} : vector<9x128x128xbf16> to vector<1x128x128xbf16>
    %48 = vector.shape_cast %47 : vector<1x128x128xbf16> to vector<128x128xbf16>
    %cst_31 = arith.constant dense<0.000000e+00> : vector<16x128xf32>
    %49 = tpu.matmul %5, %48, %cst_31 {dimension_numbers = #tpu.dot_dimension_numbers<[1], [0], [0], [1], [0, 0, 1, 1], [], []>} : vector<16x128xbf16>, vector<128x128xbf16>, vector<16x128xf32> -> vector<16x128xf32>
    %50 = arith.truncf %49 : vector<16x128xf32> to vector<16x128xbf16>
    %c0_32 = arith.constant 0 : index
    %c5 = arith.constant 5 : index
    %c0_33 = arith.constant 0 : index
    %c0_34 = arith.constant 0 : index
    %51 = vector.load %arg2[%c0_32, %c5, %c0_33, %c0_34] : memref<1x9x16x16xbf16, #tpu.memory_space<vmem>>, vector<1x1x16x16xbf16>
    %52 = vector.shape_cast %51 : vector<1x1x16x16xbf16> to vector<16x16xbf16>
    %cst_35 = arith.constant dense<0.000000e+00> : vector<16x128xf32>
    %53 = tpu.matmul %52, %50, %cst_35 {dimension_numbers = #tpu.dot_dimension_numbers<[1], [0], [0], [1], [0, 0, 1, 1], [], []>} : vector<16x16xbf16>, vector<16x128xbf16>, vector<16x128xf32> -> vector<16x128xf32>
    %54 = arith.addf %46, %53 : vector<16x128xf32>
    %55 = vector.extract_strided_slice %3 {offsets = [6, 0, 0], sizes = [1, 128, 128], strides = [1, 1, 1]} : vector<9x128x128xbf16> to vector<1x128x128xbf16>
    %56 = vector.shape_cast %55 : vector<1x128x128xbf16> to vector<128x128xbf16>
    %cst_36 = arith.constant dense<0.000000e+00> : vector<16x128xf32>
    %57 = tpu.matmul %5, %56, %cst_36 {dimension_numbers = #tpu.dot_dimension_numbers<[1], [0], [0], [1], [0, 0, 1, 1], [], []>} : vector<16x128xbf16>, vector<128x128xbf16>, vector<16x128xf32> -> vector<16x128xf32>
    %58 = arith.truncf %57 : vector<16x128xf32> to vector<16x128xbf16>
    %c0_37 = arith.constant 0 : index
    %c6 = arith.constant 6 : index
    %c0_38 = arith.constant 0 : index
    %c0_39 = arith.constant 0 : index
    %59 = vector.load %arg2[%c0_37, %c6, %c0_38, %c0_39] : memref<1x9x16x16xbf16, #tpu.memory_space<vmem>>, vector<1x1x16x16xbf16>
    %60 = vector.shape_cast %59 : vector<1x1x16x16xbf16> to vector<16x16xbf16>
    %cst_40 = arith.constant dense<0.000000e+00> : vector<16x128xf32>
    %61 = tpu.matmul %60, %58, %cst_40 {dimension_numbers = #tpu.dot_dimension_numbers<[1], [0], [0], [1], [0, 0, 1, 1], [], []>} : vector<16x16xbf16>, vector<16x128xbf16>, vector<16x128xf32> -> vector<16x128xf32>
    %62 = arith.addf %54, %61 : vector<16x128xf32>
    %63 = vector.extract_strided_slice %3 {offsets = [7, 0, 0], sizes = [1, 128, 128], strides = [1, 1, 1]} : vector<9x128x128xbf16> to vector<1x128x128xbf16>
    %64 = vector.shape_cast %63 : vector<1x128x128xbf16> to vector<128x128xbf16>
    %cst_41 = arith.constant dense<0.000000e+00> : vector<16x128xf32>
    %65 = tpu.matmul %5, %64, %cst_41 {dimension_numbers = #tpu.dot_dimension_numbers<[1], [0], [0], [1], [0, 0, 1, 1], [], []>} : vector<16x128xbf16>, vector<128x128xbf16>, vector<16x128xf32> -> vector<16x128xf32>
    %66 = arith.truncf %65 : vector<16x128xf32> to vector<16x128xbf16>
    %c0_42 = arith.constant 0 : index
    %c7 = arith.constant 7 : index
    %c0_43 = arith.constant 0 : index
    %c0_44 = arith.constant 0 : index
    %67 = vector.load %arg2[%c0_42, %c7, %c0_43, %c0_44] : memref<1x9x16x16xbf16, #tpu.memory_space<vmem>>, vector<1x1x16x16xbf16>
    %68 = vector.shape_cast %67 : vector<1x1x16x16xbf16> to vector<16x16xbf16>
    %cst_45 = arith.constant dense<0.000000e+00> : vector<16x128xf32>
    %69 = tpu.matmul %68, %66, %cst_45 {dimension_numbers = #tpu.dot_dimension_numbers<[1], [0], [0], [1], [0, 0, 1, 1], [], []>} : vector<16x16xbf16>, vector<16x128xbf16>, vector<16x128xf32> -> vector<16x128xf32>
    %70 = arith.addf %62, %69 : vector<16x128xf32>
    %71 = vector.extract_strided_slice %3 {offsets = [8, 0, 0], sizes = [1, 128, 128], strides = [1, 1, 1]} : vector<9x128x128xbf16> to vector<1x128x128xbf16>
    %72 = vector.shape_cast %71 : vector<1x128x128xbf16> to vector<128x128xbf16>
    %cst_46 = arith.constant dense<0.000000e+00> : vector<16x128xf32>
    %73 = tpu.matmul %5, %72, %cst_46 {dimension_numbers = #tpu.dot_dimension_numbers<[1], [0], [0], [1], [0, 0, 1, 1], [], []>} : vector<16x128xbf16>, vector<128x128xbf16>, vector<16x128xf32> -> vector<16x128xf32>
    %74 = arith.truncf %73 : vector<16x128xf32> to vector<16x128xbf16>
    %c0_47 = arith.constant 0 : index
    %c8 = arith.constant 8 : index
    %c0_48 = arith.constant 0 : index
    %c0_49 = arith.constant 0 : index
    %75 = vector.load %arg2[%c0_47, %c8, %c0_48, %c0_49] : memref<1x9x16x16xbf16, #tpu.memory_space<vmem>>, vector<1x1x16x16xbf16>
    %76 = vector.shape_cast %75 : vector<1x1x16x16xbf16> to vector<16x16xbf16>
    %cst_50 = arith.constant dense<0.000000e+00> : vector<16x128xf32>
    %77 = tpu.matmul %76, %74, %cst_50 {dimension_numbers = #tpu.dot_dimension_numbers<[1], [0], [0], [1], [0, 0, 1, 1], [], []>} : vector<16x16xbf16>, vector<16x128xbf16>, vector<16x128xf32> -> vector<16x128xf32>
    %78 = arith.addf %70, %77 : vector<16x128xf32>
    %c0_51 = arith.constant 0 : index
    %c0_52 = arith.constant 0 : index
    %c0_53 = arith.constant 0 : index
    %79 = vector.load %arg3[%c0_51, %c0_52, %c0_53] : memref<1x16x1xf32, #tpu.memory_space<vmem>>, vector<1x16x1xf32>
    %80 = vector.shape_cast %79 : vector<1x16x1xf32> to vector<16x1xf32>
    %81 = vector.broadcast %80 : vector<16x1xf32> to vector<16x128xf32>
    %82 = arith.addf %78, %81 : vector<16x128xf32>
    %cst_54 = arith.constant 0.000000e+00 : f32
    %83 = vector.broadcast %cst_54 : f32 to vector<16x128xf32>
    %84 = arith.maximumf %82, %83 : vector<16x128xf32>
    %85 = arith.truncf %84 : vector<16x128xf32> to vector<16x128xbf16>
    %cst_55 = arith.constant 0.000000e+00 : f32
    %86 = vector.broadcast %cst_55 : f32 to vector<16x128xf32>
    %87 = vector.extract_strided_slice %3 {offsets = [0, 0, 0], sizes = [1, 128, 128], strides = [1, 1, 1]} : vector<9x128x128xbf16> to vector<1x128x128xbf16>
    %88 = vector.shape_cast %87 : vector<1x128x128xbf16> to vector<128x128xbf16>
    %cst_56 = arith.constant dense<0.000000e+00> : vector<16x128xf32>
    %89 = tpu.matmul %85, %88, %cst_56 {dimension_numbers = #tpu.dot_dimension_numbers<[1], [0], [0], [1], [0, 0, 1, 1], [], []>} : vector<16x128xbf16>, vector<128x128xbf16>, vector<16x128xf32> -> vector<16x128xf32>
    %90 = arith.truncf %89 : vector<16x128xf32> to vector<16x128xbf16>
    %c0_57 = arith.constant 0 : index
    %c0_58 = arith.constant 0 : index
    %c0_59 = arith.constant 0 : index
    %c0_60 = arith.constant 0 : index
    %91 = vector.load %arg4[%c0_57, %c0_58, %c0_59, %c0_60] : memref<1x9x16x16xbf16, #tpu.memory_space<vmem>>, vector<1x1x16x16xbf16>
    %92 = vector.shape_cast %91 : vector<1x1x16x16xbf16> to vector<16x16xbf16>
    %cst_61 = arith.constant dense<0.000000e+00> : vector<16x128xf32>
    %93 = tpu.matmul %92, %90, %cst_61 {dimension_numbers = #tpu.dot_dimension_numbers<[1], [0], [0], [1], [0, 0, 1, 1], [], []>} : vector<16x16xbf16>, vector<16x128xbf16>, vector<16x128xf32> -> vector<16x128xf32>
    %94 = arith.addf %86, %93 : vector<16x128xf32>
    %95 = vector.extract_strided_slice %3 {offsets = [1, 0, 0], sizes = [1, 128, 128], strides = [1, 1, 1]} : vector<9x128x128xbf16> to vector<1x128x128xbf16>
    %96 = vector.shape_cast %95 : vector<1x128x128xbf16> to vector<128x128xbf16>
    %cst_62 = arith.constant dense<0.000000e+00> : vector<16x128xf32>
    %97 = tpu.matmul %85, %96, %cst_62 {dimension_numbers = #tpu.dot_dimension_numbers<[1], [0], [0], [1], [0, 0, 1, 1], [], []>} : vector<16x128xbf16>, vector<128x128xbf16>, vector<16x128xf32> -> vector<16x128xf32>
    %98 = arith.truncf %97 : vector<16x128xf32> to vector<16x128xbf16>
    %c0_63 = arith.constant 0 : index
    %c1_64 = arith.constant 1 : index
    %c0_65 = arith.constant 0 : index
    %c0_66 = arith.constant 0 : index
    %99 = vector.load %arg4[%c0_63, %c1_64, %c0_65, %c0_66] : memref<1x9x16x16xbf16, #tpu.memory_space<vmem>>, vector<1x1x16x16xbf16>
    %100 = vector.shape_cast %99 : vector<1x1x16x16xbf16> to vector<16x16xbf16>
    %cst_67 = arith.constant dense<0.000000e+00> : vector<16x128xf32>
    %101 = tpu.matmul %100, %98, %cst_67 {dimension_numbers = #tpu.dot_dimension_numbers<[1], [0], [0], [1], [0, 0, 1, 1], [], []>} : vector<16x16xbf16>, vector<16x128xbf16>, vector<16x128xf32> -> vector<16x128xf32>
    %102 = arith.addf %94, %101 : vector<16x128xf32>
    %103 = vector.extract_strided_slice %3 {offsets = [2, 0, 0], sizes = [1, 128, 128], strides = [1, 1, 1]} : vector<9x128x128xbf16> to vector<1x128x128xbf16>
    %104 = vector.shape_cast %103 : vector<1x128x128xbf16> to vector<128x128xbf16>
    %cst_68 = arith.constant dense<0.000000e+00> : vector<16x128xf32>
    %105 = tpu.matmul %85, %104, %cst_68 {dimension_numbers = #tpu.dot_dimension_numbers<[1], [0], [0], [1], [0, 0, 1, 1], [], []>} : vector<16x128xbf16>, vector<128x128xbf16>, vector<16x128xf32> -> vector<16x128xf32>
    %106 = arith.truncf %105 : vector<16x128xf32> to vector<16x128xbf16>
    %c0_69 = arith.constant 0 : index
    %c2_70 = arith.constant 2 : index
    %c0_71 = arith.constant 0 : index
    %c0_72 = arith.constant 0 : index
    %107 = vector.load %arg4[%c0_69, %c2_70, %c0_71, %c0_72] : memref<1x9x16x16xbf16, #tpu.memory_space<vmem>>, vector<1x1x16x16xbf16>
    %108 = vector.shape_cast %107 : vector<1x1x16x16xbf16> to vector<16x16xbf16>
    %cst_73 = arith.constant dense<0.000000e+00> : vector<16x128xf32>
    %109 = tpu.matmul %108, %106, %cst_73 {dimension_numbers = #tpu.dot_dimension_numbers<[1], [0], [0], [1], [0, 0, 1, 1], [], []>} : vector<16x16xbf16>, vector<16x128xbf16>, vector<16x128xf32> -> vector<16x128xf32>
    %110 = arith.addf %102, %109 : vector<16x128xf32>
    %111 = vector.extract_strided_slice %3 {offsets = [3, 0, 0], sizes = [1, 128, 128], strides = [1, 1, 1]} : vector<9x128x128xbf16> to vector<1x128x128xbf16>
    %112 = vector.shape_cast %111 : vector<1x128x128xbf16> to vector<128x128xbf16>
    %cst_74 = arith.constant dense<0.000000e+00> : vector<16x128xf32>
    %113 = tpu.matmul %85, %112, %cst_74 {dimension_numbers = #tpu.dot_dimension_numbers<[1], [0], [0], [1], [0, 0, 1, 1], [], []>} : vector<16x128xbf16>, vector<128x128xbf16>, vector<16x128xf32> -> vector<16x128xf32>
    %114 = arith.truncf %113 : vector<16x128xf32> to vector<16x128xbf16>
    %c0_75 = arith.constant 0 : index
    %c3_76 = arith.constant 3 : index
    %c0_77 = arith.constant 0 : index
    %c0_78 = arith.constant 0 : index
    %115 = vector.load %arg4[%c0_75, %c3_76, %c0_77, %c0_78] : memref<1x9x16x16xbf16, #tpu.memory_space<vmem>>, vector<1x1x16x16xbf16>
    %116 = vector.shape_cast %115 : vector<1x1x16x16xbf16> to vector<16x16xbf16>
    %cst_79 = arith.constant dense<0.000000e+00> : vector<16x128xf32>
    %117 = tpu.matmul %116, %114, %cst_79 {dimension_numbers = #tpu.dot_dimension_numbers<[1], [0], [0], [1], [0, 0, 1, 1], [], []>} : vector<16x16xbf16>, vector<16x128xbf16>, vector<16x128xf32> -> vector<16x128xf32>
    %118 = arith.addf %110, %117 : vector<16x128xf32>
    %119 = vector.extract_strided_slice %3 {offsets = [4, 0, 0], sizes = [1, 128, 128], strides = [1, 1, 1]} : vector<9x128x128xbf16> to vector<1x128x128xbf16>
    %120 = vector.shape_cast %119 : vector<1x128x128xbf16> to vector<128x128xbf16>
    %cst_80 = arith.constant dense<0.000000e+00> : vector<16x128xf32>
    %121 = tpu.matmul %85, %120, %cst_80 {dimension_numbers = #tpu.dot_dimension_numbers<[1], [0], [0], [1], [0, 0, 1, 1], [], []>} : vector<16x128xbf16>, vector<128x128xbf16>, vector<16x128xf32> -> vector<16x128xf32>
    %122 = arith.truncf %121 : vector<16x128xf32> to vector<16x128xbf16>
    %c0_81 = arith.constant 0 : index
    %c4_82 = arith.constant 4 : index
    %c0_83 = arith.constant 0 : index
    %c0_84 = arith.constant 0 : index
    %123 = vector.load %arg4[%c0_81, %c4_82, %c0_83, %c0_84] : memref<1x9x16x16xbf16, #tpu.memory_space<vmem>>, vector<1x1x16x16xbf16>
    %124 = vector.shape_cast %123 : vector<1x1x16x16xbf16> to vector<16x16xbf16>
    %cst_85 = arith.constant dense<0.000000e+00> : vector<16x128xf32>
    %125 = tpu.matmul %124, %122, %cst_85 {dimension_numbers = #tpu.dot_dimension_numbers<[1], [0], [0], [1], [0, 0, 1, 1], [], []>} : vector<16x16xbf16>, vector<16x128xbf16>, vector<16x128xf32> -> vector<16x128xf32>
    %126 = arith.addf %118, %125 : vector<16x128xf32>
    %127 = vector.extract_strided_slice %3 {offsets = [5, 0, 0], sizes = [1, 128, 128], strides = [1, 1, 1]} : vector<9x128x128xbf16> to vector<1x128x128xbf16>
    %128 = vector.shape_cast %127 : vector<1x128x128xbf16> to vector<128x128xbf16>
    %cst_86 = arith.constant dense<0.000000e+00> : vector<16x128xf32>
    %129 = tpu.matmul %85, %128, %cst_86 {dimension_numbers = #tpu.dot_dimension_numbers<[1], [0], [0], [1], [0, 0, 1, 1], [], []>} : vector<16x128xbf16>, vector<128x128xbf16>, vector<16x128xf32> -> vector<16x128xf32>
    %130 = arith.truncf %129 : vector<16x128xf32> to vector<16x128xbf16>
    %c0_87 = arith.constant 0 : index
    %c5_88 = arith.constant 5 : index
    %c0_89 = arith.constant 0 : index
    %c0_90 = arith.constant 0 : index
    %131 = vector.load %arg4[%c0_87, %c5_88, %c0_89, %c0_90] : memref<1x9x16x16xbf16, #tpu.memory_space<vmem>>, vector<1x1x16x16xbf16>
    %132 = vector.shape_cast %131 : vector<1x1x16x16xbf16> to vector<16x16xbf16>
    %cst_91 = arith.constant dense<0.000000e+00> : vector<16x128xf32>
    %133 = tpu.matmul %132, %130, %cst_91 {dimension_numbers = #tpu.dot_dimension_numbers<[1], [0], [0], [1], [0, 0, 1, 1], [], []>} : vector<16x16xbf16>, vector<16x128xbf16>, vector<16x128xf32> -> vector<16x128xf32>
    %134 = arith.addf %126, %133 : vector<16x128xf32>
    %135 = vector.extract_strided_slice %3 {offsets = [6, 0, 0], sizes = [1, 128, 128], strides = [1, 1, 1]} : vector<9x128x128xbf16> to vector<1x128x128xbf16>
    %136 = vector.shape_cast %135 : vector<1x128x128xbf16> to vector<128x128xbf16>
    %cst_92 = arith.constant dense<0.000000e+00> : vector<16x128xf32>
    %137 = tpu.matmul %85, %136, %cst_92 {dimension_numbers = #tpu.dot_dimension_numbers<[1], [0], [0], [1], [0, 0, 1, 1], [], []>} : vector<16x128xbf16>, vector<128x128xbf16>, vector<16x128xf32> -> vector<16x128xf32>
    %138 = arith.truncf %137 : vector<16x128xf32> to vector<16x128xbf16>
    %c0_93 = arith.constant 0 : index
    %c6_94 = arith.constant 6 : index
    %c0_95 = arith.constant 0 : index
    %c0_96 = arith.constant 0 : index
    %139 = vector.load %arg4[%c0_93, %c6_94, %c0_95, %c0_96] : memref<1x9x16x16xbf16, #tpu.memory_space<vmem>>, vector<1x1x16x16xbf16>
    %140 = vector.shape_cast %139 : vector<1x1x16x16xbf16> to vector<16x16xbf16>
    %cst_97 = arith.constant dense<0.000000e+00> : vector<16x128xf32>
    %141 = tpu.matmul %140, %138, %cst_97 {dimension_numbers = #tpu.dot_dimension_numbers<[1], [0], [0], [1], [0, 0, 1, 1], [], []>} : vector<16x16xbf16>, vector<16x128xbf16>, vector<16x128xf32> -> vector<16x128xf32>
    %142 = arith.addf %134, %141 : vector<16x128xf32>
    %143 = vector.extract_strided_slice %3 {offsets = [7, 0, 0], sizes = [1, 128, 128], strides = [1, 1, 1]} : vector<9x128x128xbf16> to vector<1x128x128xbf16>
    %144 = vector.shape_cast %143 : vector<1x128x128xbf16> to vector<128x128xbf16>
    %cst_98 = arith.constant dense<0.000000e+00> : vector<16x128xf32>
    %145 = tpu.matmul %85, %144, %cst_98 {dimension_numbers = #tpu.dot_dimension_numbers<[1], [0], [0], [1], [0, 0, 1, 1], [], []>} : vector<16x128xbf16>, vector<128x128xbf16>, vector<16x128xf32> -> vector<16x128xf32>
    %146 = arith.truncf %145 : vector<16x128xf32> to vector<16x128xbf16>
    %c0_99 = arith.constant 0 : index
    %c7_100 = arith.constant 7 : index
    %c0_101 = arith.constant 0 : index
    %c0_102 = arith.constant 0 : index
    %147 = vector.load %arg4[%c0_99, %c7_100, %c0_101, %c0_102] : memref<1x9x16x16xbf16, #tpu.memory_space<vmem>>, vector<1x1x16x16xbf16>
    %148 = vector.shape_cast %147 : vector<1x1x16x16xbf16> to vector<16x16xbf16>
    %cst_103 = arith.constant dense<0.000000e+00> : vector<16x128xf32>
    %149 = tpu.matmul %148, %146, %cst_103 {dimension_numbers = #tpu.dot_dimension_numbers<[1], [0], [0], [1], [0, 0, 1, 1], [], []>} : vector<16x16xbf16>, vector<16x128xbf16>, vector<16x128xf32> -> vector<16x128xf32>
    %150 = arith.addf %142, %149 : vector<16x128xf32>
    %151 = vector.extract_strided_slice %3 {offsets = [8, 0, 0], sizes = [1, 128, 128], strides = [1, 1, 1]} : vector<9x128x128xbf16> to vector<1x128x128xbf16>
    %152 = vector.shape_cast %151 : vector<1x128x128xbf16> to vector<128x128xbf16>
    %cst_104 = arith.constant dense<0.000000e+00> : vector<16x128xf32>
    %153 = tpu.matmul %85, %152, %cst_104 {dimension_numbers = #tpu.dot_dimension_numbers<[1], [0], [0], [1], [0, 0, 1, 1], [], []>} : vector<16x128xbf16>, vector<128x128xbf16>, vector<16x128xf32> -> vector<16x128xf32>
    %154 = arith.truncf %153 : vector<16x128xf32> to vector<16x128xbf16>
    %c0_105 = arith.constant 0 : index
    %c8_106 = arith.constant 8 : index
    %c0_107 = arith.constant 0 : index
    %c0_108 = arith.constant 0 : index
    %155 = vector.load %arg4[%c0_105, %c8_106, %c0_107, %c0_108] : memref<1x9x16x16xbf16, #tpu.memory_space<vmem>>, vector<1x1x16x16xbf16>
    %156 = vector.shape_cast %155 : vector<1x1x16x16xbf16> to vector<16x16xbf16>
    %cst_109 = arith.constant dense<0.000000e+00> : vector<16x128xf32>
    %157 = tpu.matmul %156, %154, %cst_109 {dimension_numbers = #tpu.dot_dimension_numbers<[1], [0], [0], [1], [0, 0, 1, 1], [], []>} : vector<16x16xbf16>, vector<16x128xbf16>, vector<16x128xf32> -> vector<16x128xf32>
    %158 = arith.addf %150, %157 : vector<16x128xf32>
    %c0_110 = arith.constant 0 : index
    %c0_111 = arith.constant 0 : index
    %c0_112 = arith.constant 0 : index
    %159 = vector.load %arg5[%c0_110, %c0_111, %c0_112] : memref<1x16x1xf32, #tpu.memory_space<vmem>>, vector<1x16x1xf32>
    %160 = vector.shape_cast %159 : vector<1x16x1xf32> to vector<16x1xf32>
    %161 = vector.broadcast %160 : vector<16x1xf32> to vector<16x128xf32>
    %162 = arith.addf %158, %161 : vector<16x128xf32>
    %163 = arith.addf %162, %4 : vector<16x128xf32>
    %c0_113 = arith.constant 0 : index
    %c0_114 = arith.constant 0 : index
    %164 = vector.load %arg8[%c0_113, %c0_114] : memref<16x128xf32, #tpu.memory_space<vmem>>, vector<16x128xf32>
    tpu.vector_store %arg8[%c0_113, %c0_114], %163 {strides = array<i32>} : memref<16x128xf32, #tpu.memory_space<vmem>>, vector<16x128xf32>,
    %165 = arith.truncf %163 : vector<16x128xf32> to vector<16x128xbf16>
    %c0_115 = arith.constant 0 : index
    %c0_116 = arith.constant 0 : index
    %166 = vector.load %arg7[%c0_115, %c0_116] : memref<16x128xbf16, #tpu.memory_space<vmem>>, vector<16x128xbf16>
    tpu.vector_store %arg7[%c0_115, %c0_116], %165 {strides = array<i32>} : memref<16x128xbf16, #tpu.memory_space<vmem>>, vector<16x128xbf16>,
    return
  }
  func.func @transform_0(%arg0: i32) -> (i32, i32) {
    %c0_i32 = arith.constant 0 : i32
    %c0_i32_0 = arith.constant 0 : i32
    %c0_i32_1 = arith.constant 0 : i32
    return %c0_i32, %c0_i32_0 : i32, i32
  }
  func.func @transform_1(%arg0: i32) -> (i32, i32, i32, i32) {
    %c0_i32 = arith.constant 0 : i32
    %c0_i32_0 = arith.constant 0 : i32
    %c0_i32_1 = arith.constant 0 : i32
    %c0_i32_2 = arith.constant 0 : i32
    return %arg0, %c0_i32, %c0_i32_0, %c0_i32_1 : i32, i32, i32, i32
  }
  func.func @transform_2(%arg0: i32) -> (i32, i32, i32) {
    %c0_i32 = arith.constant 0 : i32
    %c0_i32_0 = arith.constant 0 : i32
    %c0_i32_1 = arith.constant 0 : i32
    return %arg0, %c0_i32, %c0_i32_0 : i32, i32, i32
  }
  func.func @transform_3(%arg0: i32) -> (i32, i32, i32, i32) {
    %c0_i32 = arith.constant 0 : i32
    %c0_i32_0 = arith.constant 0 : i32
    %c0_i32_1 = arith.constant 0 : i32
    %c0_i32_2 = arith.constant 0 : i32
    return %arg0, %c0_i32, %c0_i32_0, %c0_i32_1 : i32, i32, i32, i32
  }
  func.func @transform_4(%arg0: i32) -> (i32, i32, i32) {
    %c0_i32 = arith.constant 0 : i32
    %c0_i32_0 = arith.constant 0 : i32
    %c0_i32_1 = arith.constant 0 : i32
    return %arg0, %c0_i32, %c0_i32_0 : i32, i32, i32
  }
  func.func @transform_5(%arg0: i32) -> (i32, i32, i32) {
    %c0_i32 = arith.constant 0 : i32
    %c0_i32_0 = arith.constant 0 : i32
    %c0_i32_1 = arith.constant 0 : i32
    %c0_i32_2 = arith.constant 0 : i32
    return %c0_i32, %c0_i32_0, %c0_i32_1 : i32, i32, i32
  }
  func.func @transform_6(%arg0: i32) -> (i32, i32) {
    %c0_i32 = arith.constant 0 : i32
    %c0_i32_0 = arith.constant 0 : i32
    %c0_i32_1 = arith.constant 0 : i32
    return %c0_i32, %c0_i32_0 : i32, i32
  }
}

module attributes {stable_mosaic.version = 11 : i64} {
  func.func @_conv_gemm_res_kernel(%arg0: i32, %arg1: memref<48x784xbf16, #tpu.memory_space<vmem>>, %arg2: memref<784x128xbf16, #tpu.memory_space<vmem>>, %arg3: memref<48x1xf32, #tpu.memory_space<vmem>>, %arg4: memref<48x128xf32, #tpu.memory_space<vmem>>, %arg5: memref<48x128xf32, #tpu.memory_space<vmem>>) attributes {dimension_semantics = [#tpu.dimension_semantics<parallel>], iteration_bounds = array<i64: 1>, scalar_prefetch = 0 : i64, scratch_operands = 0 : i64, tpu.core_type = #tpu.core_type<tc>, window_params = [{pipeline_mode = #tpu.pipeline_mode<synchronous>, transform_indices = @transform_0, window_bounds = array<i64: 48, 784>}, {transform_indices = @transform_1, window_bounds = array<i64: 784, 128>}, {pipeline_mode = #tpu.pipeline_mode<synchronous>, transform_indices = @transform_2, window_bounds = array<i64: 48, 1>}, {transform_indices = @transform_3, window_bounds = array<i64: 48, 128>}, {transform_indices = @transform_4, window_bounds = array<i64: 48, 128>}]} {
    %c0 = arith.constant 0 : index
    %c0_0 = arith.constant 0 : index
    %0 = vector.load %arg1[%c0, %c0_0] : memref<48x784xbf16, #tpu.memory_space<vmem>>, vector<48x784xbf16>
    %c0_1 = arith.constant 0 : index
    %c0_2 = arith.constant 0 : index
    %1 = vector.load %arg2[%c0_1, %c0_2] : memref<784x128xbf16, #tpu.memory_space<vmem>>, vector<784x128xbf16>
    %cst = arith.constant dense<0.000000e+00> : vector<48x128xf32>
    %2 = tpu.matmul %0, %1, %cst {dimension_numbers = #tpu.dot_dimension_numbers<[1], [0], [0], [1], [0, 0, 1, 1], [], []>} : vector<48x784xbf16>, vector<784x128xbf16>, vector<48x128xf32> -> vector<48x128xf32>
    %c0_3 = arith.constant 0 : index
    %c0_4 = arith.constant 0 : index
    %3 = vector.load %arg3[%c0_3, %c0_4] : memref<48x1xf32, #tpu.memory_space<vmem>>, vector<48x1xf32>
    %4 = vector.broadcast %3 : vector<48x1xf32> to vector<48x128xf32>
    %5 = arith.addf %2, %4 : vector<48x128xf32>
    %c0_5 = arith.constant 0 : index
    %c0_6 = arith.constant 0 : index
    %6 = vector.load %arg4[%c0_5, %c0_6] : memref<48x128xf32, #tpu.memory_space<vmem>>, vector<48x128xf32>
    %7 = arith.addf %5, %6 : vector<48x128xf32>
    %c0_7 = arith.constant 0 : index
    %c0_8 = arith.constant 0 : index
    %8 = vector.load %arg5[%c0_7, %c0_8] : memref<48x128xf32, #tpu.memory_space<vmem>>, vector<48x128xf32>
    tpu.vector_store %arg5[%c0_7, %c0_8], %7 {strides = array<i32>} : memref<48x128xf32, #tpu.memory_space<vmem>>, vector<48x128xf32>,
    return
  }
  func.func @transform_0(%arg0: i32) -> (i32, i32) {
    %c0_i32 = arith.constant 0 : i32
    %c0_i32_0 = arith.constant 0 : i32
    %c0_i32_1 = arith.constant 0 : i32
    return %c0_i32, %c0_i32_0 : i32, i32
  }
  func.func @transform_1(%arg0: i32) -> (i32, i32) {
    %c0_i32 = arith.constant 0 : i32
    %c0_i32_0 = arith.constant 0 : i32
    return %c0_i32, %arg0 : i32, i32
  }
  func.func @transform_2(%arg0: i32) -> (i32, i32) {
    %c0_i32 = arith.constant 0 : i32
    %c0_i32_0 = arith.constant 0 : i32
    %c0_i32_1 = arith.constant 0 : i32
    return %c0_i32, %c0_i32_0 : i32, i32
  }
  func.func @transform_3(%arg0: i32) -> (i32, i32) {
    %c0_i32 = arith.constant 0 : i32
    %c0_i32_0 = arith.constant 0 : i32
    return %c0_i32, %arg0 : i32, i32
  }
  func.func @transform_4(%arg0: i32) -> (i32, i32) {
    %c0_i32 = arith.constant 0 : i32
    %c0_i32_0 = arith.constant 0 : i32
    return %c0_i32, %arg0 : i32, i32
  }
}

</mosaic_0001>

<bundles_post_ra>
// kernel: _lambda_.17
= control target key start
LH: loop header
LB: loop body
LE: loop exit
PB: predicated region body
PF: predicated region fallthrough
CT: control target
= control target key end

     0   :  { %s794_s12 = smov 0   ;;  %s796_s13 = smov 0   ;;  %s964_s0 = inlined_call_operand.vmem [shape: bf16[16,160], index: 0, kind: input, shape index: {}]   ;;  %s965_s1 = inlined_call_operand.vmem [shape: bf16[160,512], index: 1, kind: input, shape index: {}]   ;;  %s966_s2 = inlined_call_operand.vmem [shape: f32[16,1], index: 2, kind: input, shape index: {}]   ;;  %s967_s3 = inlined_call_operand.vmem [shape: bf16[16,512], index: 3, kind: output, shape index: {}]  }
   0x1   :  { %s798_s14 = smov 0  }
   0x2 LB: > { %s594_s15 = sadd.s32 4294967295, %s771_s14   ;;  %s811_s16 = sadd.s32 1, %s771_s14   ;;  %s771_s14 = sphi %s798_s14, %s971_s14   ;;  %s767_s13 = sphi %s796_s13, %s970_s13   ;;  %s763_s12 = sphi %s794_s12, %s969_s12  }
   0x3   : > { %s38_s17 = ssub.s32 %s771_s14, %s811_s16  ;;  %s41_s18 = sadd.s32 1, %s767_s13 }
   0x4   : > { %p39_p0 = scmp.eq.s32.totalorder %s38_s17, 0  ;;  %p48_p1 = scmp.ne.s32.totalorder %s767_s13, %s763_s12 }
   0x5   : > { %p49_p2 = scmp.eq.s32.totalorder %s771_s14, 0  ;;  %p99_p3 = scmp.eq.s32.totalorder %s594_s15, 1 }
   0x6   : > { %s822_s19 = scalar_select %p39_p0, %s767_s13, %s41_s18  }
   0x7   : > { %p50_p4 = por %p49_p2, %p48_p1  ;;  %p824_p5 = por %p99_p3, %p48_p1 }
   0x8   : > { %p597_p6 = scmp.ge.s32.totalorder %s771_s14, 2 }
   0xa   : > { %127 = sbr.rel (%p597_p6) target bundleno = 39 (0x27), region = 24 }
   0xf   : > { %130 = sbr.rel (!%p50_p4) target bundleno = 39 (0x27), region = 28  ;;  %s132_s21 = sand.u32 (%p50_p4), 1, %s767_s13  }
  0x10   : > { %s697_s22 = sshll.u32 (%p50_p4), %s771_s14, 3  ;;  %s721_s23 = smul.u32 (%p50_p4), 160, %s132_s21 }
  0x11   : > { %s834_s26 = scalar_lea.vmem (%p50_p4), %s965_s1, %s697_s22 }
  0x12   : > { %v204_v0 = vld [vmem:[%s834_s26] sm:$0xff] (%p50_p4)  ;;  %v206_v1 = vld [vmem:[%s834_s26 + $0x10] sm:$0xff] (%p50_p4)  ;;  %s839_s27 = scalar_lea.vmem (%p50_p4), [#allocation2], %s721_s23 }
  0x13   : > { %v208_v2 = vld [vmem:[%s834_s26 + $0x20] sm:$0xff] (%p50_p4)  ;;  %205 = vst [vmem:[%s839_s27] sm:$0xff] (%p50_p4), %v204_v0  ;;  %v210_v3 = vld [vmem:[%s834_s26 + $0x30] sm:$0xff] (%p50_p4) }
  0x14   : > { %207 = vst [vmem:[%s839_s27 + $0x8] sm:$0xff] %v206_v1  ;;  %v212_v4 = vld [vmem:[%s834_s26 + $0x40] sm:$0xff]  ;;  %v214_v5 = vld [vmem:[%s834_s26 + $0x50] sm:$0xff] }
  0x15   : > { %209 = vst [vmem:[%s839_s27 + $0x10] sm:$0xff] %v208_v2  ;;  %v216_v6 = vld [vmem:[%s834_s26 + $0x60] sm:$0xff]  ;;  %v218_v7 = vld [vmem:[%s834_s26 + $0x70] sm:$0xff] }
  0x16   : > { %211 = vst [vmem:[%s839_s27 + $0x18] sm:$0xff] %v210_v3  ;;  %v220_v8 = vld [vmem:[%s834_s26 + $0x80] sm:$0xff]  ;;  %v222_v9 = vld [vmem:[%s834_s26 + $0x90] sm:$0xff] }
  0x17   : > { %213 = vst [vmem:[%s839_s27 + $0x20] sm:$0xff] %v212_v4  ;;  %v224_v10 = vld [vmem:[%s834_s26 + $0xa0] sm:$0xff]  ;;  %v226_v11 = vld [vmem:[%s834_s26 + $0xb0] sm:$0xff] }
  0x18   : > { %215 = vst [vmem:[%s839_s27 + $0x28] sm:$0xff] %v214_v5  ;;  %v228_v12 = vld [vmem:[%s834_s26 + $0xc0] sm:$0xff]  ;;  %v230_v13 = vld [vmem:[%s834_s26 + $0xd0] sm:$0xff] }
  0x19   : > { %217 = vst [vmem:[%s839_s27 + $0x30] sm:$0xff] %v216_v6  ;;  %v232_v14 = vld [vmem:[%s834_s26 + $0xe0] sm:$0xff]  ;;  %v234_v15 = vld [vmem:[%s834_s26 + $0xf0] sm:$0xff] }
  0x1a   : > { %219 = vst [vmem:[%s839_s27 + $0x38] sm:$0xff] %v218_v7  ;;  %v236_v16 = vld [vmem:[%s834_s26 + $0x100] sm:$0xff]  ;;  %v238_v17 = vld [vmem:[%s834_s26 + $0x110] sm:$0xff] }
  0x1b   : > { %221 = vst [vmem:[%s839_s27 + $0x40] sm:$0xff] %v220_v8  ;;  %v240_v18 = vld [vmem:[%s834_s26 + $0x120] sm:$0xff]  ;;  %v242_v19 = vld [vmem:[%s834_s26 + $0x130] sm:$0xff] }
  0x1c   : > { %223 = vst [vmem:[%s839_s27 + $0x48] sm:$0xff] %v222_v9 }
  0x1d   : > { %225 = vst [vmem:[%s839_s27 + $0x50] sm:$0xff] %v224_v10 }
  0x1e   : > { %227 = vst [vmem:[%s839_s27 + $0x58] sm:$0xff] %v226_v11 }
  0x1f   : > { %229 = vst [vmem:[%s839_s27 + $0x60] sm:$0xff] %v228_v12 }
  0x20   : > { %231 = vst [vmem:[%s839_s27 + $0x68] sm:$0xff] %v230_v13 }
  0x21   : > { %233 = vst [vmem:[%s839_s27 + $0x70] sm:$0xff] %v232_v14 }
  0x22   : > { %235 = vst [vmem:[%s839_s27 + $0x78] sm:$0xff] %v234_v15 }
  0x23   : > { %237 = vst [vmem:[%s839_s27 + $0x80] sm:$0xff] %v236_v16 }
  0x24   : > { %239 = vst [vmem:[%s839_s27 + $0x88] sm:$0xff] %v238_v17 }
  0x25   : > { %241 = vst [vmem:[%s839_s27 + $0x90] sm:$0xff] %v240_v18 }
  0x26   : > { %243 = vst [vmem:[%s839_s27 + $0x98] sm:$0xff] %v242_v19 }
  0x27 PF: > { %p600_p7 = scmp.ge.s32.totalorder %s771_s14, 1  ;;  %p248_p8 = scmp.lt.s32.totalorder %s771_s14, 3 }
  0x29   : > { %p249_p9 = pnand %p600_p7, %p248_p8 }
  0x2a   : > { %s255_s28 = sand.u32 (!%p249_p9), 1, %s763_s12  }
  0x2b   : > { %252 = sbr.rel (%p249_p9) target bundleno = 240 (0xf0), region = 66  ;;  %s601_s23 = sshll.u32 (!%p249_p9), %s255_s28, 4 }
  0x2c   : > { %s722_s29 = smul.u32 (!%p249_p9), 160, %s255_s28  ;;  %s276_s24 = scalar_lea.vmem (!%p249_p9), [#allocation3], %s601_s23 }
  0x2e   : > { %s883_s30 = scalar_lea.vmem (!%p249_p9), [#allocation2], %s722_s29 }
  0x30   : > { %v668_v20 = vld [vmem:[%s883_s30 + $0x70] sm:$0xf]  ;;  %v715_v21 = vld [vmem:[%s883_s30 + $0x74] sm:$0xf0]  ;;  %v714_v22 = vld [vmem:[%s883_s30 + $0x74] sm:$0xf] }
  0x31   : > { %v669_v23 = vor.u32 %v715_v21, %v668_v20  ;;  %v670_v24 = vld [vmem:[%s883_s30 + $0x78] sm:$0xf0]  ;;  %v660_v25 = vld [vmem:[%s883_s30 + $0x60] sm:$0xf]  ;;  %v713_v26 = vld [vmem:[%s883_s30 + $0x64] sm:$0xf0] }
  0x32   : > { %v673_v27 = vor.u32 %v714_v22, %v670_v24  ;;  %v712_v28 = vld [vmem:[%s883_s30 + $0x64] sm:$0xf]  ;;  %v662_v29 = vld [vmem:[%s883_s30 + $0x68] sm:$0xf0]  ;;  %v661_v30 = vor.u32 %v713_v26, %v660_v25  ;;  %v652_v32 = vld [vmem:[%s883_s30 + $0x50] sm:$0xf] }
  0x33   : > { %427 = vmatpush.bf16.msra.mxu0 %v669_v23  ;;  %v665_v31 = vor.u32 %v712_v28, %v662_v29  ;;  %v711_v33 = vld [vmem:[%s883_s30 + $0x54] sm:$0xf0]  ;;  %v710_v34 = vld [vmem:[%s883_s30 + $0x54] sm:$0xf]  ;;  %v654_v35 = vld [vmem:[%s883_s30 + $0x58] sm:$0xf0] }
  0x34   : > { %455 = vmatpush.bf16.msra.mxu2 %v673_v27  ;;  %v718_v36 = vld [vmem:[%s883_s30 + $0x94] sm:$0xf]  ;;  %v653_v37 = vor.u32 %v711_v33, %v652_v32  ;;  %v686_v38 = vld [vmem:[%s883_s30 + $0x98] sm:$0xf0]  ;;  %v657_v39 = vor.u32 %v710_v34, %v654_v35  ;;  %v644_v40 = vld [vmem:[%s883_s30 + $0x40] sm:$0xf] }
  0x35   : > { %v709_v41 = vld [vmem:[%s883_s30 + $0x44] sm:$0xf0]  ;;  %v689_v42 = vor.u32 %v718_v36, %v686_v38  ;;  %v716_v43 = vld [vmem:[%s883_s30 + $0x84] sm:$0xf]  ;;  %v646_v46 = vld [vmem:[%s883_s30 + $0x48] sm:$0xf0] }
  0x36   : > { %v698_v44 = vld [vmem:[%s964_s0 + $0x4] sm:$0xf]  ;;  %v678_v47 = vld [vmem:[%s883_s30 + $0x88] sm:$0xf0]  ;;  %v684_v49 = vld [vmem:[%s883_s30 + $0x90] sm:$0xf]  ;;  %v645_v52 = vor.u32 %v709_v41, %v644_v40 }
  0x37   : > { %428 = vmatpush.bf16.msra.mxu0 %v661_v30  ;;  %v708_v45 = vld [vmem:[%s883_s30 + $0x44] sm:$0xf]  ;;  %475 = vmatpush.bf16.msra.mxu3 %v689_v42  ;;  %v681_v48 = vor.u32 %v716_v43, %v678_v47  ;;  %v719_v50 = vld [vmem:[%s883_s30 + $0x94] sm:$0xf0]  ;;  %v606_v51 = vld [vmem:[%s964_s0 + $0x8] sm:$0xf0] }
  0x38   : > { %456 = vmatpush.bf16.msra.mxu2 %v665_v31  ;;  %v636_v53 = vld [vmem:[%s883_s30 + $0x30] sm:$0xf]  ;;  %v685_v54 = vor.u32 %v719_v50, %v684_v49  ;;  %v649_v55 = vor.u32 %v708_v45, %v646_v46  ;;  %v707_v56 = vld [vmem:[%s883_s30 + $0x34] sm:$0xf0]  ;;  %v676_v57 = vld [vmem:[%s883_s30 + $0x80] sm:$0xf]  ;;  %v609_v61 = vor.u32 %v698_v44, %v606_v51 }
  0x39   : > { %v717_v58 = vld [vmem:[%s883_s30 + $0x84] sm:$0xf0]  ;;  %v706_v59 = vld [vmem:[%s883_s30 + $0x34] sm:$0xf]  ;;  %v638_v60 = vld [vmem:[%s883_s30 + $0x38] sm:$0xf0]  ;;  %v637_v0 = vor.u32 %v707_v56, %v636_v53 }
  0x3a   : > { %447 = vmatpush.bf16.msra.mxu1 %v685_v54  ;;  %v677_v62 = vor.u32 %v717_v58, %v676_v57  ;;  %vm423_vm0 = vcmask 261120   ;;  %v302_v63 = vld [vmem:[%s966_s2] sm:$0xff]  ;;  %v773_v1 = vmov 0   ;;  %v641_v2 = vor.u32 %v706_v59, %v638_v60  ;;  %v705_v4 = vld [vmem:[%s883_s30 + $0x24] sm:$0xf0]  ;;  %s720_s12 = sshll.u32 (%p824_p5), %s594_s15, 3 }
  0x3b   : > { %429 = vmatpush.bf16.msra.mxu0 %v653_v37  ;;  %476 = vmatpush.bf16.msra.mxu3 %v681_v48  ;;  %v628_v3 = vld [vmem:[%s883_s30 + $0x20] sm:$0xf]  ;;  %v704_v5 = vld [vmem:[%s883_s30 + $0x24] sm:$0xf]  ;;  %v630_v6 = vld [vmem:[%s883_s30 + $0x28] sm:$0xf0]  ;;  %s500_s27 = scalar_lea.vmem (%p824_p5), %s967_s3, %s720_s12 }
  0x3c   : > { %457 = vmatpush.bf16.msra.mxu2 %v657_v39  ;;  %748 = vset.pattern.permute.xlu0 %v773_v1  ;;  %v629_v7 = vor.u32 %v705_v4, %v628_v3  ;;  %v633_v8 = vor.u32 %v704_v5, %v630_v6  ;;  %v620_v9 = vld [vmem:[%s883_s30 + $0x10] sm:$0xf]  ;;  %v703_v10 = vld [vmem:[%s883_s30 + $0x14] sm:$0xf0]  ;;  %v702_v11 = vld [vmem:[%s883_s30 + $0x14] sm:$0xf] }
  0x3d   : > { %306 = vperm.xlu0 %748, %v302_v63   ;;  %v622_v12 = vld [vmem:[%s883_s30 + $0x18] sm:$0xf0]  ;;  %v303_v13 = vld [vmem:[%s966_s2 + $0x8] sm:$0xff]  ;;  %v621_v14 = vor.u32 %v703_v10, %v620_v9  ;;  %v612_v16 = vld [vmem:[%s883_s30] sm:$0xf] }
  0x3e   : > { %691 = vmatmul.msk.bf16.vlgmr.msra.gmra.mxu3 %vm423_vm0, %v609_v61  ;;  %448 = vmatpush.bf16.msra.mxu1 %v677_v62  ;;  %v625_v15 = vor.u32 %v702_v11, %v622_v12  ;;  %v701_v17 = vld [vmem:[%s883_s30 + $0x4] sm:$0xf0]  ;;  %v700_v18 = vld [vmem:[%s883_s30 + $0x4] sm:$0xf]  ;;  %v614_v19 = vld [vmem:[%s883_s30 + $0x8] sm:$0xf0] }
  0x3f   : > { %430 = vmatpush.bf16.msra.mxu0 %v645_v52  ;;  %v613_v20 = vor.u32 %v701_v17, %v612_v16  ;;  %v604_v21 = vld [vmem:[%s964_s0] sm:$0xf]  ;;  %v699_v22 = vld [vmem:[%s964_s0 + $0x4] sm:$0xf0]  ;;  %v617_v23 = vor.u32 %v700_v18, %v614_v19 }
  0x40   : > { %458 = vmatpush.bf16.msra.mxu2 %v649_v55  ;;  %v605_v24 = vor.u32 %v699_v22, %v604_v21 }
  0x41   : > { %690 = vmatmul.msk.bf16.vlgmr.msra.gmra.mxu1 %vm423_vm0, %v609_v61 }
  0x43   : > { %431 = vmatpush.bf16.msra.mxu0 %v637_v0 }
  0x44   : > { %459 = vmatpush.bf16.msra.mxu2 %v641_v2 }
  0x45   : > { %311 = vperm.xlu0 %748, %v303_v13  }
  0x47   : > { %432 = vmatpush.bf16.msra.mxu0 %v629_v7 }
  0x48   : > { %460 = vmatpush.bf16.msra.mxu2 %v633_v8 }
  0x4b   : > { %433 = vmatpush.bf16.msra.mxu0 %v621_v14 }
  0x4c   : > { %461 = vmatpush.bf16.msra.mxu2 %v625_v15 }
  0x4f   : > { %434 = vmatpush.bf16.msra.mxu0 %v613_v20 }
  0x50   : > { %462 = vmatpush.bf16.msra.mxu2 %v617_v23 }
  0x52   : > { %435 = vmatmul.bf16.vlgmr.msra.gmra.mxu0 %v605_v24 }
  0x53   : > { %463 = vmatmul.bf16.vlgmr.msra.gmra.mxu2 %v605_v24 }
  0xaf   : > { %v307_v26 = vpop.permute.xlu0 %306 }
  0xb7   : > { %v312_v36 = vpop.permute.xlu0 %311 }
  0xbe   : > { %v450_v28 = vpop.f32.mrf.mxu1 }
  0xc1   : > { %v478_v30 = vpop.f32.mrf.mxu3 }
  0xc6   : > { %v452_v40 = vpop.f32.mrf.mxu1 }
  0xc9   : > { %v480_v44 = vpop.f32.mrf.mxu3 }
  0xcf   : > { %v436_v25 = vpop.f32.mrf.mxu0 }
  0xd0   : > { %v437_v27 = vadd.f32 %v436_v25, %v307_v26 }
  0xd2   : > { %v451_v29 = vadd.f32 %v450_v28, %v437_v27 }
  0xd4   : > { %v483_v34 = vmax.f32 %v451_v29, 0.0 }
  0xd6   : > { %v464_v31 = vpop.f32.mrf.mxu2 }
  0xd7   : > { %v465_v32 = vadd.f32 %v464_v31, %v307_v26  ;;  %v438_v33 = vpop.f32.mrf.mxu0 }
  0xd8   : > { %v439_v38 = vadd.f32 %v438_v33, %v312_v36 }
  0xd9   : > { %v479_v35 = vadd.f32 %v478_v30, %v465_v32 }
  0xda   : > { %v453_v42 = vadd.f32 %v452_v40, %v439_v38 }
  0xdb   : > { %v484_v37 = vmax.f32 %v479_v35, 0.0 }
  0xdc   : > { %v485_v46 = vmax.f32 %v453_v42, 0.0 }
  0xdd   : > { %v487_v39 = vpack.c.bf16 %v484_v37, %v483_v34 }
  0xde   : > { %v466_v41 = vpop.f32.mrf.mxu2 }
  0xdf   : > { %489 = vst [vmem:[%s276_s24] sm:$0xff] %v487_v39  ;;  %v467_v43 = vadd.f32 %v466_v41, %v312_v36 }
  0xe1   : > { %v481_v45 = vadd.f32 %v480_v44, %v467_v43 }
  0xe3   : > { %v486_v47 = vmax.f32 %v481_v45, 0.0  ;;  %497 = sbr.rel (!%p824_p5) target bundleno = 240 (0xf0), region = 74 }
  0xe5   : > { %v488_v48 = vpack.c.bf16 %v486_v47, %v485_v46 }
  0xe6   : > { %v531_v49 = vld [vmem:[%s276_s24] sm:$0xff] (%p824_p5) }
  0xe7   : > { %490 = vst [vmem:[%s276_s24 + $0x8] sm:$0xff] %v488_v48 }
  0xe8   : > { %532 = vst [vmem:[%s500_s27] sm:$0xff] %v531_v49 }
  0xee   : > { %v533_v50 = vld [vmem:[%s276_s24 + $0x8] sm:$0xff] }
  0xef   : > { %534 = vst [vmem:[%s500_s27 + $0x10] sm:$0xff] %v533_v50 }
  0xf0 PF: > { %p10_p10 = scmp.ge.s32.totalorder %s811_s16, 4   ;;  %s969_s12 = smov %s767_s13 }
  0xf1   : > { %s970_s13 = smov %s822_s19  ;;  %s971_s14 = smov %s811_s16 }
  0xf2   :  { %12 = sbr.rel (!%p10_p10) target bundleno = 2 (0x2), region = 143 }

// kernel: _lambda_.18
= control target key start
LH: loop header
LB: loop body
LE: loop exit
PB: predicated region body
PF: predicated region fallthrough
CT: control target
= control target key end

     0   :  { %v283_v6 = vmov 0   ;;  %vm133_vm0 = vcmask 130048   ;;  %s375_s1 = inlined_call_operand.vmem [shape: bf16[144,128], index: 1, kind: input, shape index: {}]   ;;  %s376_s0 = inlined_call_operand.vmem [shape: bf16[32,144], index: 0, kind: input, shape index: {}]   ;;  %s377_s2 = inlined_call_operand.vmem [shape: f32[32,1], index: 2, kind: input, shape index: {}]   ;;  %s378_s3 = inlined_call_operand.vmem [shape: bf16[32,128], index: 3, kind: output, shape index: {}]  }
   0x1   :  { %v259_v0 = vld [vmem:[%s375_s1 + $0x38] sm:$0xff]  ;;  %v260_v1 = vld [vmem:[%s375_s1 + $0x40] sm:$0xff]  ;;  %v258_v3 = vld [vmem:[%s375_s1 + $0x30] sm:$0xff]  ;;  %282 = vset.pattern.permute.xlu1 %v283_v6  ;;  %281 = vset.pattern.permute.xlu0 %v283_v6 }
   0x2   :  { %v248_v2 = vld [vmem:[%s376_s0 + $0x4] sm:$0xf]  ;;  %140 = vmatpush.bf16.msra.mxu0 %v259_v0  ;;  %272 = vmatpush.bf16.msra.mxu2 %v259_v0  ;;  %v198_v4 = vld [vmem:[%s376_s0 + $0x8] sm:$0xf0]  ;;  %v39_v7 = vld [vmem:[%s377_s2 + $0x10] sm:$0xff] }
   0x3   :  { %166 = vmatpush.bf16.msra.mxu1 %v260_v1  ;;  %v201_v5 = vor.u32 %v248_v2, %v198_v4  ;;  %v257_v8 = vld [vmem:[%s375_s1 + $0x28] sm:$0xff]  ;;  %v37_v9 = vld [vmem:[%s377_s2] sm:$0xff]  ;;  %53 = vperm.xlu1 %282, %v39_v7   ;;  %v40_v11 = vld [vmem:[%s377_s2 + $0x18] sm:$0xff] }
   0x4   :  { %43 = vperm.xlu0 %281, %v37_v9   ;;  %v256_v10 = vld [vmem:[%s375_s1 + $0x20] sm:$0xff]  ;;  %v38_v12 = vld [vmem:[%s377_s2 + $0x8] sm:$0xff]  ;;  %v255_v13 = vld [vmem:[%s375_s1 + $0x18] sm:$0xff] }
   0x5   :  { %v250_v14 = vld [vmem:[%s376_s0 + $0x14] sm:$0xf]  ;;  %v206_v15 = vld [vmem:[%s376_s0 + $0x18] sm:$0xf0]  ;;  %v253_v18 = vld [vmem:[%s375_s1 + $0x8] sm:$0xff] }
   0x6   :  { %141 = vmatpush.bf16.msra.mxu0 %v258_v3  ;;  %273 = vmatpush.bf16.msra.mxu2 %v258_v3  ;;  %v254_v16 = vld [vmem:[%s375_s1 + $0x10] sm:$0xff]  ;;  %v209_v17 = vor.u32 %v250_v14, %v206_v15  ;;  %v252_v19 = vld [vmem:[%s375_s1] sm:$0xff]  ;;  %v249_v21 = vld [vmem:[%s376_s0 + $0x4] sm:$0xf0] }
   0x7   :  { %246 = vmatmul.msk.bf16.vlgmr.msra.gmra.mxu1 %vm133_vm0, %v201_v5  ;;  %v196_v20 = vld [vmem:[%s376_s0] sm:$0xf]  ;;  %v204_v22 = vld [vmem:[%s376_s0 + $0x10] sm:$0xf]  ;;  %v251_v23 = vld [vmem:[%s376_s0 + $0x14] sm:$0xf0] }
   0x8   :  { %v197_v24 = vor.u32 %v249_v21, %v196_v20  ;;  %v205_v25 = vor.u32 %v251_v23, %v204_v22 }
   0xa   :  { %142 = vmatpush.bf16.msra.mxu0 %v257_v8  ;;  %274 = vmatpush.bf16.msra.mxu2 %v257_v8 }
   0xb   :  { %58 = vperm.xlu1 %282, %v40_v11  }
   0xc   :  { %48 = vperm.xlu0 %281, %v38_v12  }
   0xe   :  { %143 = vmatpush.bf16.msra.mxu0 %v256_v10  ;;  %275 = vmatpush.bf16.msra.mxu2 %v256_v10 }
  0x12   :  { %144 = vmatpush.bf16.msra.mxu0 %v255_v13  ;;  %276 = vmatpush.bf16.msra.mxu2 %v255_v13 }
  0x16   :  { %145 = vmatpush.bf16.msra.mxu0 %v254_v16  ;;  %277 = vmatpush.bf16.msra.mxu2 %v254_v16 }
  0x17   :  { %247 = vmatmul.msk.bf16.gmra.mxu1 %vm133_vm0, %v209_v17 }
  0x1a   :  { %146 = vmatpush.bf16.msra.mxu0 %v253_v18  ;;  %278 = vmatpush.bf16.msra.mxu2 %v253_v18 }
  0x1e   :  { %147 = vmatpush.bf16.msra.mxu0 %v252_v19  ;;  %279 = vmatpush.bf16.msra.mxu2 %v252_v19 }
  0x21   :  { %148 = vmatmul.bf16.vlgmr.msra.gmra.mxu0 %v197_v24  ;;  %153 = vmatmul.bf16.vlgmr.msra.gmra.mxu2 %v205_v25 }
  0x75   :  { %v54_v30 = vpop.permute.xlu1 %53 }
  0x76   :  { %v44_v28 = vpop.permute.xlu0 %43 }
  0x7d   :  { %v59_v42 = vpop.permute.xlu1 %58 }
  0x7e   :  { %v49_v34 = vpop.permute.xlu0 %48 }
  0x84   :  { %v168_v26 = vpop.f32.mrf.mxu1 }
  0x8c   :  { %v170_v27 = vpop.f32.mrf.mxu1 }
  0x94   :  { %v173_v32 = vpop.f32.mrf.mxu1 }
  0x9c   :  { %v175_v47 = vpop.f32.mrf.mxu1 }
  0x9e   :  { %v149_v29 = vpop.f32.mrf.mxu0 }
  0x9f   :  { %v150_v31 = vadd.f32 %v149_v29, %v44_v28 }
  0xa1   :  { %v169_v36 = vadd.f32 %v168_v26, %v150_v31 }
  0xa3   :  { %v178_v40 = vmax.f32 %v169_v36, 0.0 }
  0xa4   :  { %v154_v33 = vpop.f32.mrf.mxu2 }
  0xa5   :  { %v155_v38 = vadd.f32 %v154_v33, %v54_v30 }
  0xa6   :  { %v151_v35 = vpop.f32.mrf.mxu0 }
  0xa7   :  { %v152_v37 = vadd.f32 %v151_v35, %v49_v34  ;;  %v174_v44 = vadd.f32 %v173_v32, %v155_v38 }
  0xa9   :  { %v171_v39 = vadd.f32 %v170_v27, %v152_v37  ;;  %v180_v49 = vmax.f32 %v174_v44, 0.0 }
  0xab   :  { %v179_v41 = vmax.f32 %v171_v39, 0.0 }
  0xac   :  { %v156_v43 = vpop.f32.mrf.mxu2 }
  0xad   :  { %v264_v45 = vpack.c.bf16 %v179_v41, %v178_v40  ;;  %v157_v46 = vadd.f32 %v156_v43, %v59_v42 }
  0xaf   :  { %265 = vst [vmem:[%s378_s3] sm:$0xff] %v264_v45   ;;  %v176_v48 = vadd.f32 %v175_v47, %v157_v46 }
  0xb1   :  { %v181_v50 = vmax.f32 %v176_v48, 0.0 }
  0xb3   :  { %v269_v51 = vpack.c.bf16 %v181_v50, %v180_v49 }
  0xb5   :  { %271 = vst [vmem:[%s378_s3 + $0x8] sm:$0xff] %v269_v51  }

// kernel: _lambda_.19
= control target key start
LH: loop header
LB: loop body
LE: loop exit
PB: predicated region body
PF: predicated region fallthrough
CT: control target
= control target key end

     0   :  { %vm283_vm0 = vcmask 261120   ;;  %v586_v15 = vmov 0   ;;  %vm399_vm1 = vcmask 257024   ;;  %s813_s1 = inlined_call_operand.vmem [shape: bf16[288,32], index: 1, kind: input, shape index: {}]   ;;  %s814_s0 = inlined_call_operand.vmem [shape: bf16[64,288], index: 0, kind: input, shape index: {}]   ;;  %s815_s2 = inlined_call_operand.vmem [shape: f32[64,1], index: 2, kind: input, shape index: {}]   ;;  %s816_s3 = inlined_call_operand.vmem [shape: bf16[64,32], index: 3, kind: output, shape index: {}]  }
   0x1   :  { %v555_v0 = vld [vmem:[%s813_s1 + $0x38] sm:$0xff]  ;;  %v565_v2 = vld [vmem:[%s813_s1 + $0x88] sm:$0xff]  ;;  %v554_v3 = vld [vmem:[%s813_s1 + $0x30] sm:$0xff]  ;;  %584 = vset.pattern.permute.xlu1 %v586_v15  ;;  %583 = vset.pattern.permute.xlu0 %v586_v15 }
   0x2   :  { %v613_v1 = vld [vmem:[%s813_s1 + $0x78] sm:$0xff]  ;;  %296 = vmatpush.bf16.msra.mxu0 %v555_v0  ;;  %566 = vmatpush.bf16.msra.mxu3 %v555_v0  ;;  %v625_v4 = vld [vmem:[%s813_s1 + $0x70] sm:$0xff]  ;;  %v564_v5 = vld [vmem:[%s813_s1 + $0x80] sm:$0xff] }
   0x3   :  { %574 = vmatpush.bf16.msra.mxu1 %v613_v1  ;;  %360 = vmatpush.bf16.msra.mxu2 %v565_v2  ;;  %v422_v6 = vld [vmem:[%s814_s0 + $0x8] sm:$0xf]  ;;  %v538_v7 = vld [vmem:[%s814_s0 + $0x10] sm:$0xf0]  ;;  %v552_v11 = vld [vmem:[%s813_s1 + $0x20] sm:$0xff] }
   0x4   :  { %v553_v8 = vld [vmem:[%s813_s1 + $0x28] sm:$0xff]  ;;  %v423_v10 = vor.u32 %v538_v7, %v422_v6  ;;  %v653_v12 = vld [vmem:[%s813_s1 + $0x60] sm:$0xff]  ;;  %v551_v13 = vld [vmem:[%s813_s1 + $0x18] sm:$0xff]  ;;  %585 = vset.pattern.permute.xlu2 %v586_v15 }
   0x5   :  { %v643_v9 = vld [vmem:[%s813_s1 + $0x68] sm:$0xff]  ;;  %v662_v14 = vld [vmem:[%s813_s1 + $0x58] sm:$0xff]  ;;  %v550_v16 = vld [vmem:[%s813_s1 + $0x10] sm:$0xff] }
   0x6   :  { %297 = vmatpush.bf16.msra.mxu0 %v554_v3  ;;  %567 = vmatpush.bf16.msra.mxu3 %v554_v3  ;;  %v69_v17 = vld [vmem:[%s815_s2 + $0x10] sm:$0xff]  ;;  %v434_v19 = vld [vmem:[%s814_s0 + $0x20] sm:$0xf]  ;;  %v541_v20 = vld [vmem:[%s814_s0 + $0x28] sm:$0xf0] }
   0x7   :  { %575 = vmatpush.bf16.msra.mxu1 %v625_v4  ;;  %361 = vmatpush.bf16.msra.mxu2 %v564_v5  ;;  %v558_v18 = vld [vmem:[%s813_s1 + $0x50] sm:$0xff]  ;;  %v549_v21 = vld [vmem:[%s813_s1 + $0x8] sm:$0xff]  ;;  %v435_v23 = vor.u32 %v541_v20, %v434_v19  ;;  %v67_v24 = vld [vmem:[%s815_s2] sm:$0xff] }
   0x8   :  { %87 = vperm.xlu1 %584, %v69_v17   ;;  %v557_v22 = vld [vmem:[%s813_s1 + $0x48] sm:$0xff]  ;;  %77 = vperm.xlu0 %583, %v67_v24   ;;  %v548_v25 = vld [vmem:[%s813_s1] sm:$0xff]  ;;  %v426_v26 = vld [vmem:[%s814_s0 + $0x18] sm:$0xf] }
   0x9   :  { %v70_v27 = vld [vmem:[%s815_s2 + $0x18] sm:$0xff]  ;;  %v540_v28 = vld [vmem:[%s814_s0 + $0x20] sm:$0xf0]  ;;  %v414_v29 = vld [vmem:[%s814_s0] sm:$0xf] }
   0xa   :  { %298 = vmatpush.bf16.msra.mxu0 %v553_v8  ;;  %568 = vmatpush.bf16.msra.mxu3 %v553_v8  ;;  %v537_v30 = vld [vmem:[%s814_s0 + $0x8] sm:$0xf0]  ;;  %v556_v31 = vld [vmem:[%s813_s1 + $0x40] sm:$0xff]  ;;  %v539_v32 = vld [vmem:[%s814_s0 + $0x1c] sm:$0xf]  ;;  %v427_v34 = vor.u32 %v540_v28, %v426_v26 }
   0xb   :  { %576 = vmatpush.bf16.msra.mxu1 %v643_v9  ;;  %532 = vmatmul.msk.bf16.vlgmr.msra.gmra.mxu2 %vm283_vm0, %v423_v10  ;;  %v428_v33 = vld [vmem:[%s814_s0 + $0x24] sm:$0xf0]  ;;  %v415_v35 = vor.u32 %v537_v30, %v414_v29  ;;  %v74_v38 = vld [vmem:[%s815_s2 + $0x38] sm:$0xff]  ;;  %v71_v39 = vld [vmem:[%s815_s2 + $0x20] sm:$0xff] }
   0xc   :  { %v431_v36 = vor.u32 %v539_v32, %v428_v33  ;;  %v68_v37 = vld [vmem:[%s815_s2 + $0x8] sm:$0xff]  ;;  %v446_v40 = vld [vmem:[%s814_s0 + $0x38] sm:$0xf]  ;;  %v544_v41 = vld [vmem:[%s814_s0 + $0x40] sm:$0xf0]  ;;  %97 = vperm.xlu2 %585, %v71_v39  }
   0xd   :  { %v447_v42 = vor.u32 %v544_v41, %v446_v40  ;;  %v73_v43 = vld [vmem:[%s815_s2 + $0x30] sm:$0xff]  ;;  %v72_v44 = vld [vmem:[%s815_s2 + $0x28] sm:$0xff]  ;;  %v543_v46 = vld [vmem:[%s814_s0 + $0x38] sm:$0xf0] }
   0xe   :  { %299 = vmatpush.bf16.msra.mxu0 %v552_v11  ;;  %569 = vmatpush.bf16.msra.mxu3 %v552_v11  ;;  %v438_v45 = vld [vmem:[%s814_s0 + $0x30] sm:$0xf]  ;;  %v542_v47 = vld [vmem:[%s814_s0 + $0x34] sm:$0xf]  ;;  %v440_v48 = vld [vmem:[%s814_s0 + $0x3c] sm:$0xf0] }
   0xf   :  { %577 = vmatpush.bf16.msra.mxu1 %v653_v12  ;;  %v439_v49 = vor.u32 %v543_v46, %v438_v45  ;;  %v443_v50 = vor.u32 %v542_v47, %v440_v48  ;;  %v458_v51 = vld [vmem:[%s814_s0 + $0x50] sm:$0xf]  ;;  %v547_v52 = vld [vmem:[%s814_s0 + $0x58] sm:$0xf0]  ;;  %v536_v54 = vld [vmem:[%s814_s0 + $0x4] sm:$0xf] }
  0x10   :  { %92 = vperm.xlu1 %584, %v70_v27   ;;  %82 = vperm.xlu0 %583, %v68_v37   ;;  %v459_v53 = vor.u32 %v547_v52, %v458_v51  ;;  %v416_v55 = vld [vmem:[%s814_s0 + $0xc] sm:$0xf0]  ;;  %v450_v57 = vld [vmem:[%s814_s0 + $0x48] sm:$0xf]  ;;  %v546_v58 = vld [vmem:[%s814_s0 + $0x50] sm:$0xf0] }
  0x11   :  { %v419_v56 = vor.u32 %v536_v54, %v416_v55  ;;  %v545_v59 = vld [vmem:[%s814_s0 + $0x4c] sm:$0xf]  ;;  %v452_v60 = vld [vmem:[%s814_s0 + $0x54] sm:$0xf0]  ;;  %v451_v61 = vor.u32 %v546_v58, %v450_v57 }
  0x12   :  { %300 = vmatpush.bf16.msra.mxu0 %v551_v13  ;;  %570 = vmatpush.bf16.msra.mxu3 %v551_v13  ;;  %v455_v62 = vor.u32 %v545_v59, %v452_v60 }
  0x13   :  { %578 = vmatpush.bf16.msra.mxu1 %v662_v14 }
  0x14   :  { %102 = vperm.xlu2 %585, %v72_v44  }
  0x16   :  { %301 = vmatpush.bf16.msra.mxu0 %v550_v16  ;;  %571 = vmatpush.bf16.msra.mxu3 %v550_v16 }
  0x17   :  { %579 = vmatpush.bf16.msra.mxu1 %v558_v18 }
  0x18   :  { %112 = vperm.xlu1 %584, %v74_v38   ;;  %107 = vperm.xlu0 %583, %v73_v43  }
  0x1a   :  { %302 = vmatpush.bf16.msra.mxu0 %v549_v21  ;;  %572 = vmatpush.bf16.msra.mxu3 %v549_v21 }
  0x1b   :  { %580 = vmatpush.bf16.msra.mxu1 %v557_v22  ;;  %533 = vmatmul.msk.bf16.gmra.mxu2 %vm283_vm0, %v435_v23 }
  0x1e   :  { %303 = vmatpush.bf16.msra.mxu0 %v548_v25  ;;  %573 = vmatpush.bf16.msra.mxu3 %v548_v25 }
  0x1f   :  { %581 = vmatpush.bf16.msra.mxu1 %v556_v31 }
  0x21   :  { %309 = vmatmul.bf16.vlgmr.msra.gmra.mxu3 %v427_v34  ;;  %304 = vmatmul.bf16.vlgmr.msra.gmra.mxu0 %v415_v35 }
  0x22   :  { %325 = vmatpush.bf16.msrb.mxu0 %v613_v1  ;;  %338 = vmatmul.bf16.vlgmr.msra.gmra.mxu1 %v431_v36 }
  0x26   :  { %326 = vmatpush.bf16.msrb.mxu0 %v625_v4 }
  0x2a   :  { %327 = vmatpush.bf16.msrb.mxu0 %v643_v9 }
  0x2b   :  { %534 = vmatmul.msk.bf16.gmra.mxu2 %vm283_vm0, %v447_v42 }
  0x2e   :  { %328 = vmatpush.bf16.msrb.mxu0 %v653_v12 }
  0x31   :  { %314 = vmatmul.bf16.gmra.mxu3 %v439_v49 }
  0x32   :  { %329 = vmatpush.bf16.msrb.mxu0 %v662_v14  ;;  %343 = vmatmul.bf16.gmra.mxu1 %v443_v50 }
  0x36   :  { %330 = vmatpush.bf16.msrb.mxu0 %v558_v18 }
  0x3a   :  { %331 = vmatpush.bf16.msrb.mxu0 %v557_v22 }
  0x3b   :  { %535 = vmatmul.msk.bf16.gmra.mxu2 %vm283_vm0, %v459_v53 }
  0x3e   :  { %332 = vmatpush.bf16.msrb.mxu0 %v556_v31 }
  0x41   :  { %333 = vmatmul.bf16.vlgmr.msrb.gmra.mxu0 %v419_v56  ;;  %319 = vmatmul.bf16.gmra.mxu3 %v451_v61 }
  0x42   :  { %348 = vmatmul.bf16.gmra.mxu1 %v455_v62 }
  0x66   :  { %v98_v19 = vpop.permute.xlu2 %97 }
  0x6e   :  { %v103_v32 = vpop.permute.xlu2 %102 }
  0x7a   :  { %v88_v3 = vpop.permute.xlu1 %87  ;;  %v78_v16 = vpop.permute.xlu0 %77 }
  0x82   :  { %v93_v11 = vpop.permute.xlu1 %92  ;;  %v83_v28 = vpop.permute.xlu0 %82 }
  0x8a   :  { %v108_v46 = vpop.permute.xlu0 %107  ;;  %v113_v61 = vpop.permute.xlu1 %112 }
  0x8e   :  { %v363_v63 = vpop.f32.mrf.mxu2 }
  0x96   :  { %v365_v0 = vpop.f32.mrf.mxu2 }
  0x9e   :  { %v368_v1 = vpop.f32.mrf.mxu2  ;;  %v305_v8 = vpop.f32.mrf.mxu0 }
  0x9f   :  { %v339_v2 = vpop.f32.mrf.mxu1  ;;  %v306_v30 = vadd.f32 %v305_v8, %v78_v16 }
  0xa4   :  { %v310_v4 = vpop.f32.mrf.mxu3 }
  0xa5   :  { %v311_v5 = vadd.f32 %v310_v4, %v88_v3 }
  0xa6   :  { %v370_v9 = vpop.f32.mrf.mxu2  ;;  %v307_v21 = vpop.f32.mrf.mxu0 }
  0xa7   :  { %v340_v6 = vadd.f32 %v339_v2, %v311_v5  ;;  %v341_v7 = vpop.f32.mrf.mxu1  ;;  %v308_v44 = vadd.f32 %v307_v21, %v83_v28 }
  0xa9   :  { %v369_v10 = vadd.f32 %v368_v1, %v340_v6 }
  0xab   :  { %v385_v12 = vmax.f32 %v369_v10, 0.0 }
  0xac   :  { %v312_v13 = vpop.f32.mrf.mxu3 }
  0xad   :  { %v393_v14 = vpack.c.bf16 %v385_v12, %v385_v12  ;;  %v313_v15 = vadd.f32 %v312_v13, %v93_v11 }
  0xae   :  { %v373_v22 = vpop.f32.mrf.mxu2 }
  0xaf   :  { %402 = vst.msk [vmem:[%s816_s3 + $0x8] sm:$0xf] %vm399_vm1, %v393_v14  ;;  %v342_v17 = vadd.f32 %v341_v7, %v313_v15  ;;  %v344_v18 = vpop.f32.mrf.mxu1 }
  0xb1   :  { %v371_v20 = vadd.f32 %v370_v9, %v342_v17 }
  0xb3   :  { %v386_v23 = vmax.f32 %v371_v20, 0.0 }
  0xb4   :  { %v315_v24 = vpop.f32.mrf.mxu3 }
  0xb5   :  { %v394_v25 = vpack.c.bf16 %v386_v23, %v386_v23  ;;  %v316_v26 = vadd.f32 %v315_v24, %v98_v19 }
  0xb6   :  { %v375_v35 = vpop.f32.mrf.mxu2 }
  0xb7   :  { %403 = vst.msk [vmem:[%s816_s3 + $0xc] sm:$0xf] %vm399_vm1, %v394_v25  ;;  %v345_v27 = vadd.f32 %v344_v18, %v316_v26  ;;  %v346_v31 = vpop.f32.mrf.mxu1 }
  0xb9   :  { %v374_v29 = vadd.f32 %v373_v22, %v345_v27 }
  0xbb   :  { %v387_v33 = vmax.f32 %v374_v29, 0.0 }
  0xbc   :  { %v317_v37 = vpop.f32.mrf.mxu3 }
  0xbd   :  { %v395_v38 = vpack.c.bf16 %v387_v33, %v387_v33  ;;  %v318_v39 = vadd.f32 %v317_v37, %v103_v32 }
  0xbe   :  { %v334_v34 = vpop.f32.mrf.mxu0  ;;  %v378_v54 = vpop.f32.mrf.mxu2 }
  0xbf   :  { %v335_v36 = vadd.f32 %v334_v34, %v306_v30  ;;  %404 = vst.msk [vmem:[%s816_s3 + $0x10] sm:$0xf] %vm399_vm1, %v395_v38  ;;  %v347_v41 = vadd.f32 %v346_v31, %v318_v39  ;;  %v349_v49 = vpop.f32.mrf.mxu1 }
  0xc1   :  { %v364_v40 = vadd.f32 %v363_v63, %v335_v36  ;;  %v376_v43 = vadd.f32 %v375_v35, %v347_v41 }
  0xc3   :  { %v383_v42 = vmax.f32 %v364_v40, 0.0  ;;  %v388_v47 = vmax.f32 %v376_v43, 0.0 }
  0xc4   :  { %v320_v51 = vpop.f32.mrf.mxu3 }
  0xc5   :  { %v391_v45 = vpack.c.bf16 %v383_v42, %v383_v42  ;;  %v396_v52 = vpack.c.bf16 %v388_v47, %v388_v47  ;;  %v321_v53 = vadd.f32 %v320_v51, %v108_v46 }
  0xc6   :  { %v336_v48 = vpop.f32.mrf.mxu0  ;;  %v380_v3 = vpop.f32.mrf.mxu2 }
  0xc7   :  { %400 = vst.msk [vmem:[%s816_s3] sm:$0xf] %vm399_vm1, %v391_v45  ;;  %v337_v50 = vadd.f32 %v336_v48, %v308_v44  ;;  %v350_v56 = vadd.f32 %v349_v49, %v321_v53 }
  0xc8   :  { %405 = vst.msk [vmem:[%s816_s3 + $0x14] sm:$0xf] %vm399_vm1, %v396_v52 }
  0xc9   :  { %v366_v55 = vadd.f32 %v365_v0, %v337_v50  ;;  %v379_v58 = vadd.f32 %v378_v54, %v350_v56  ;;  %v351_v0 = vpop.f32.mrf.mxu1 }
  0xcb   :  { %v384_v57 = vmax.f32 %v366_v55, 0.0  ;;  %v389_v60 = vmax.f32 %v379_v58, 0.0 }
  0xcc   :  { %v322_v62 = vpop.f32.mrf.mxu3 }
  0xcd   :  { %v392_v59 = vpack.c.bf16 %v384_v57, %v384_v57  ;;  %v397_v63 = vpack.c.bf16 %v389_v60, %v389_v60  ;;  %v323_v1 = vadd.f32 %v322_v62, %v113_v61 }
  0xcf   :  { %401 = vst.msk [vmem:[%s816_s3 + $0x4] sm:$0xf] %vm399_vm1, %v392_v59  ;;  %v352_v2 = vadd.f32 %v351_v0, %v323_v1 }
  0xd0   :  { %406 = vst.msk [vmem:[%s816_s3 + $0x18] sm:$0xf] %vm399_vm1, %v397_v63 }
  0xd1   :  { %v381_v4 = vadd.f32 %v380_v3, %v352_v2 }
  0xd3   :  { %v390_v5 = vmax.f32 %v381_v4, 0.0 }
  0xd5   :  { %v398_v6 = vpack.c.bf16 %v390_v5, %v390_v5 }
  0xd7   :  { %407 = vst.msk [vmem:[%s816_s3 + $0x1c] sm:$0xf] %vm399_vm1, %v398_v6 }

// kernel: _lambda_.20
= control target key start
LH: loop header
LB: loop body
LE: loop exit
PB: predicated region body
PF: predicated region fallthrough
CT: control target
= control target key end

     0   :  { %s3515_s21 = smov 0   ;;  %s4214_s0 = inlined_call_operand.vmem [shape: bf16[64,32], index: 0, kind: input, shape index: {}]   ;;  %s4215_s1 = inlined_call_operand.vmem [shape: bf16[6,9,64,64], index: 1, kind: input, shape index: {}]   ;;  %s4216_s2 = inlined_call_operand.vmem [shape: f32[6,64,1], index: 2, kind: input, shape index: {}]   ;;  %s4217_s3 = inlined_call_operand.vmem [shape: bf16[6,9,64,64], index: 3, kind: input, shape index: {}]   ;;  %s4218_s4 = inlined_call_operand.vmem [shape: f32[6,64,1], index: 4, kind: input, shape index: {}]   ;;  %s4219_s5 = inlined_call_operand.vmem [shape: bf16[9,32,32], index: 5, kind: input, shape index: {}]   ;;  %s4220_s6 = inlined_call_operand.vmem [shape: bf16[64,32], index: 6, kind: output, shape index: {}]  }
   0x1 LB: > { %s2694_s22 = sadd.s32 4294967295, %s3477_s21   ;;  %p2697_p0 = scmp.ge.s32.totalorder %s3477_s21, 1  ;;  %s3477_s21 = sphi %s3515_s21, %s16_s21  }
   0x2   : > { %p237_p1 = scmp.lt.s32.totalorder %s3477_s21, 7 }
   0x4   : > { %p238_p2 = pnand %p2697_p0, %p237_p1 }
   0x5   : > { %p277_p3 = scmp.lt.s32.totalorder (!%p238_p2), %s2694_s22, 5  ;;  %p2704_p4 = scmp.ne.s32.totalorder (!%p238_p2), %s2694_s22, 0 }
   0x6   : > { %241 = sbr.rel (%p238_p2) target bundleno = 1571 (0x623), region = 44 }
   0xb   : > { %s278_s23 = scalar_select %p277_p3, %s2694_s22, 5 }
   0xc   : > { %301 = sbr.rel (%p2704_p4) target bundleno = 28 (0x1c), region = 48 }
   0xd   : > { %s3450_s24 = smul.u32 288, %s278_s23  ;;  %s3339_s25 = sshll.u32 %s278_s23, 6 }
   0xe   : > { %s3526_s28 = scalar_lea.vmem %s4216_s2, %s3339_s25  ;;  %s3531_s7 = scalar_lea.vmem %s4218_s4, %s3339_s25 }
   0xf   : > { %s3536_s10 = scalar_lea.vmem %s4215_s1, %s3450_s24  ;;  %s3541_s13 = scalar_lea.vmem %s4217_s3, %s3450_s24 }
  0x11   : > { %v3432_v0 = vld [vmem:[%s4214_s0] sm:$0xff]   ;;  %vm318_vm0 = vcmask 261120   ;;  %v3447_v1 = vld [vmem:[%s4214_s0 + $0x8] sm:$0xff]   ;;  %v3448_v2 = vld [vmem:[%s4214_s0 + $0x10] sm:$0xff]  }
  0x12   : > { %v3433_v3 = vunpack.c.l.bf16 %v3432_v0  ;;  %v3434_v4 = vunpack.c.h.bf16 %v3432_v0  ;;  %v3437_v5 = vunpack.c.l.bf16 %v3447_v1  ;;  %v3438_v6 = vunpack.c.h.bf16 %v3447_v1  ;;  %v3449_v7 = vld [vmem:[%s4214_s0 + $0x18] sm:$0xff]  }
  0x13   : > { %v3441_v8 = vunpack.c.l.bf16 %v3448_v2  ;;  %v3442_v9 = vunpack.c.h.bf16 %v3448_v2  ;;  %v3445_v10 = vunpack.c.l.bf16 %v3449_v7  ;;  %v3446_v11 = vunpack.c.h.bf16 %v3449_v7 }
  0x14   : > { %319 = vst.msk [vmem:[#allocation2] sm:$0xff] %vm318_vm0, %v3433_v3 }
  0x15   : > { %320 = vst.msk [vmem:[#allocation2 + $0x8] sm:$0xff] %vm318_vm0, %v3434_v4 }
  0x16   : > { %321 = vst.msk [vmem:[#allocation2 + $0x10] sm:$0xff] %vm318_vm0, %v3437_v5 }
  0x17   : > { %322 = vst.msk [vmem:[#allocation2 + $0x18] sm:$0xff] %vm318_vm0, %v3438_v6 }
  0x18   : > { %323 = vst.msk [vmem:[#allocation2 + $0x20] sm:$0xff] %vm318_vm0, %v3441_v8 }
  0x19   : > { %324 = vst.msk [vmem:[#allocation2 + $0x28] sm:$0xff] %vm318_vm0, %v3442_v9 }
  0x1a   : > { %325 = vst.msk [vmem:[#allocation2 + $0x30] sm:$0xff] %vm318_vm0, %v3445_v10 }
  0x1b   : > { %326 = vst.msk [vmem:[#allocation2 + $0x38] sm:$0xff] %vm318_vm0, %v3446_v11 }
  0x1c PF: > { %v3566_v12 = vld [vmem:[%s4219_s5 + $0x8] sm:$0xff]  ;;  %v3571_v13 = vld [vmem:[%s4219_s5 + $0x18] sm:$0xff]  ;;  %v3576_v14 = vld [vmem:[%s4219_s5] sm:$0xff]  ;;  %vm387_vm1 = vcmask 261120   ;;  %vm515_vm2 = vcmask 523264   ;;  %vm2621_vm3 = vcmask 257024  }
  0x1d   : > { %406 = vmatpush.bf16.msra.mxu0 %v3566_v12  ;;  %459 = vmatpush.bf16.msra.mxu1 %v3571_v13  ;;  %v3583_v15 = vld [vmem:[%s4219_s5 + $0x10] sm:$0xff]  ;;  %v363_v16 = vld [vmem:[#allocation2] sm:$0xff]  ;;  %v364_v17 = vld [vmem:[#allocation2 + $0x8] sm:$0xff] }
  0x1e   : > { %v3585_v18 = vpack.c.bf16 %v364_v17, %v363_v16  ;;  %v365_v19 = vld [vmem:[#allocation2 + $0x10] sm:$0xff]  ;;  %v366_v20 = vld [vmem:[#allocation2 + $0x18] sm:$0xff]  ;;  %v3602_v22 = vld [vmem:[%s4219_s5 + $0x28] sm:$0xff] }
  0x1f   : > { %v3593_v21 = vpack.c.bf16 %v366_v20, %v365_v19  ;;  %v3608_v23 = vld [vmem:[%s4219_s5 + $0x20] sm:$0xff]  ;;  %v3634_v42 = vld [vmem:[%s4219_s5 + $0x48] sm:$0xff]  ;;  %v3660_v0 = vld [vmem:[%s4219_s5 + $0x38] sm:$0xff] }
  0x20   : > { %v367_v24 = vld [vmem:[#allocation2 + $0x20] sm:$0xff]  ;;  %v368_v25 = vld [vmem:[#allocation2 + $0x28] sm:$0xff]  ;;  %v3668_v2 = vld [vmem:[%s4219_s5 + $0x30] sm:$0xff] }
  0x21   : > { %407 = vmatpush.bf16.msra.mxu0 %v3576_v14  ;;  %460 = vmatpush.bf16.msra.mxu1 %v3583_v15  ;;  %v3611_v26 = vpack.c.bf16 %v368_v25, %v367_v24  ;;  %v369_v27 = vld [vmem:[#allocation2 + $0x30] sm:$0xff]  ;;  %v3640_v43 = vld [vmem:[%s4219_s5 + $0x40] sm:$0xff]  ;;  %v3364_v61 = vld [vmem:[%s3536_s10 + $0x28] sm:$0xff] }
  0x22   : > { %v370_v28 = vld [vmem:[#allocation2 + $0x38] sm:$0xff]  ;;  %v3363_v57 = vld [vmem:[%s3536_s10 + $0x20] sm:$0xff]  ;;  %v3360_v62 = vld [vmem:[%s3536_s10 + $0x8] sm:$0xff] }
  0x23   : > { %v3617_v29 = vpack.c.bf16 %v370_v28, %v369_v27  ;;  %v3359_v58 = vld [vmem:[%s3536_s10] sm:$0xff]  ;;  %v3365_v3 = vld [vmem:[%s3536_s10 + $0x30] sm:$0xff]  ;;  %v3678_v6 = vld [vmem:[%s4219_s5 + $0x68] sm:$0xff] }
  0x24   : > { %2713 = vmatmul.msk.bf16.vlgmr.msra.gmra.mxu0 %vm387_vm1, %v3585_v18  ;;  %2725 = vmatmul.msk.bf16.vlgmr.msra.gmra.mxu1 %vm387_vm1, %v3585_v18  ;;  %v3361_v4 = vld [vmem:[%s3536_s10 + $0x10] sm:$0xff]  ;;  %v3684_v7 = vld [vmem:[%s4219_s5 + $0x60] sm:$0xff]  ;;  %v3366_v9 = vld [vmem:[%s3536_s10 + $0x38] sm:$0xff] }
  0x25   : > { %636 = vmatpush.bf16.msrb.mxu0 %v3602_v22  ;;  %v3362_v10 = vld [vmem:[%s3536_s10 + $0x18] sm:$0xff]  ;;  %v3367_v24 = vld [vmem:[%s3536_s10 + $0x40] sm:$0xff]  ;;  %v3368_v25 = vld [vmem:[%s3536_s10 + $0x48] sm:$0xff] }
  0x26   : > { %v3708_v27 = vld [vmem:[%s4219_s5 + $0x58] sm:$0xff]  ;;  %v3714_v28 = vld [vmem:[%s4219_s5 + $0x50] sm:$0xff] }
  0x29   : > { %637 = vmatpush.bf16.msrb.mxu0 %v3608_v23 }
  0x2d   : > { %882 = vmatpush.bf16.msra.mxu0 %v3634_v42 }
  0x31   : > { %883 = vmatpush.bf16.msra.mxu0 %v3640_v43 }
  0x34   : > { %2714 = vmatmul.msk.bf16.gmra.mxu0 %vm387_vm1, %v3593_v21  ;;  %2726 = vmatmul.msk.bf16.gmra.mxu1 %vm387_vm1, %v3593_v21 }
  0x44   : > { %2715 = vmatmul.msk.bf16.gmra.mxu0 %vm387_vm1, %v3611_v26  ;;  %2727 = vmatmul.msk.bf16.gmra.mxu1 %vm387_vm1, %v3611_v26 }
  0x54   : > { %2716 = vmatmul.msk.bf16.gmra.mxu0 %vm387_vm1, %v3617_v29  ;;  %2728 = vmatmul.msk.bf16.gmra.mxu1 %vm387_vm1, %v3617_v29 }
  0x64   : > { %2785 = vmatmul.msk.bf16.vlgmr.msrb.gmra.mxu0 %vm387_vm1, %v3585_v18 }
  0x65   : > { %1128 = vmatpush.bf16.msrb.mxu0 %v3678_v6 }
  0x69   : > { %1129 = vmatpush.bf16.msrb.mxu0 %v3684_v7 }
  0x74   : > { %2786 = vmatmul.msk.bf16.gmra.mxu0 %vm387_vm1, %v3593_v21 }
  0x84   : > { %2787 = vmatmul.msk.bf16.gmra.mxu0 %vm387_vm1, %v3611_v26 }
  0x94   : > { %2788 = vmatmul.msk.bf16.gmra.mxu0 %vm387_vm1, %v3617_v29 }
  0xa1   : > { %v409_v30 = vpop.f32.mrf.mxu0  ;;  %v462_v31 = vpop.f32.mrf.mxu1 }
  0xa4   : > { %2865 = vmatmul.msk.bf16.vlgmr.msra.gmra.mxu0 %vm387_vm1, %v3585_v18 }
  0xa9   : > { %v411_v32 = vpop.f32.mrf.mxu0  ;;  %v464_v33 = vpop.f32.mrf.mxu1 }
  0xaa   : > { %v429_v55 = vpack.c.bf16 %v411_v32, %v409_v30  ;;  %v482_v56 = vpack.c.bf16 %v464_v33, %v462_v31  ;;  %v3369_v30 = vld [vmem:[%s3536_s10 + $0x50] sm:$0xff]  ;;  %v3726_v31 = vld [vmem:[%s4219_s5 + $0x88] sm:$0xff]  ;;  %v3732_v32 = vld [vmem:[%s4219_s5 + $0x80] sm:$0xff] }
  0xab   : > { %1374 = vmatpush.bf16.msra.mxu0 %v3726_v31 }
  0xaf   : > { %1375 = vmatpush.bf16.msra.mxu0 %v3732_v32 }
  0xb1   : > { %v414_v34 = vpop.f32.mrf.mxu0  ;;  %v467_v35 = vpop.f32.mrf.mxu1 }
  0xb4   : > { %2866 = vmatmul.msk.bf16.gmra.mxu0 %vm387_vm1, %v3593_v21 }
  0xb9   : > { %v416_v36 = vpop.f32.mrf.mxu0  ;;  %v469_v37 = vpop.f32.mrf.mxu1 }
  0xba   : > { %v430_v52 = vpack.c.bf16 %v416_v36, %v414_v34  ;;  %v483_v54 = vpack.c.bf16 %v469_v37, %v467_v35  ;;  %v3370_v34 = vld [vmem:[%s3536_s10 + $0x58] sm:$0xff] }
  0xc1   : > { %v419_v38 = vpop.f32.mrf.mxu0  ;;  %v472_v39 = vpop.f32.mrf.mxu1 }
  0xc4   : > { %2867 = vmatmul.msk.bf16.gmra.mxu0 %vm387_vm1, %v3611_v26 }
  0xc9   : > { %v421_v40 = vpop.f32.mrf.mxu0  ;;  %v474_v41 = vpop.f32.mrf.mxu1 }
  0xca   : > { %v431_v50 = vpack.c.bf16 %v421_v40, %v419_v38  ;;  %v484_v51 = vpack.c.bf16 %v474_v41, %v472_v39 }
  0xd1   : > { %v424_v44 = vpop.f32.mrf.mxu0  ;;  %v477_v45 = vpop.f32.mrf.mxu1 }
  0xd4   : > { %2868 = vmatmul.msk.bf16.gmra.mxu0 %vm387_vm1, %v3617_v29 }
  0xd9   : > { %v426_v46 = vpop.f32.mrf.mxu0  ;;  %v479_v47 = vpop.f32.mrf.mxu1 }
  0xda   : > { %v485_v48 = vpack.c.bf16 %v479_v47, %v477_v45  ;;  %v432_v49 = vpack.c.bf16 %v426_v46, %v424_v44  ;;  %v3756_v47 = vld [vmem:[%s4219_s5 + $0x78] sm:$0xff] }
  0xdc   : > { %532 = vmatpush.bf16.msra.mxu2 %v485_v48  ;;  %593 = vmatpush.bf16.msra.mxu3 %v432_v49 }
  0xe0   : > { %533 = vmatpush.bf16.msra.mxu2 %v484_v51  ;;  %594 = vmatpush.bf16.msra.mxu3 %v431_v50 }
  0xe1   : > { %v639_v53 = vpop.f32.mrf.mxu0 }
  0xe4   : > { %534 = vmatpush.bf16.msra.mxu2 %v483_v54  ;;  %595 = vmatpush.bf16.msra.mxu3 %v430_v52  ;;  %v3768_v54 = vld [vmem:[%s4219_s5 + $0x70] sm:$0xff] }
  0xe5   : > { %2945 = vmatmul.msk.bf16.vlgmr.msrb.gmra.mxu0 %vm387_vm1, %v3585_v18 }
  0xe8   : > { %535 = vmatpush.bf16.msra.mxu2 %v482_v56  ;;  %596 = vmatpush.bf16.msra.mxu3 %v429_v55 }
  0xe9   : > { %v641_v59 = vpop.f32.mrf.mxu0 }
  0xea   : > { %v659_v20 = vpack.c.bf16 %v641_v59, %v639_v53 }
  0xeb   : > { %2753 = vmatmul.msk.bf16.vlgmr.msra.gmra.mxu2 %vm515_vm2, %v3363_v57  ;;  %2773 = vmatmul.msk.bf16.vlgmr.msra.gmra.mxu3 %vm515_vm2, %v3359_v58 }
  0xec   : > { %759 = vmatpush.bf16.msrb.mxu2 %v3660_v0 }
  0xf0   : > { %760 = vmatpush.bf16.msrb.mxu2 %v3668_v2 }
  0xf1   : > { %v644_v60 = vpop.f32.mrf.mxu0 }
  0xf4   : > { %1005 = vmatpush.bf16.msra.mxu2 %v3708_v27 }
  0xf5   : > { %2946 = vmatmul.msk.bf16.gmra.mxu0 %vm387_vm1, %v3593_v21 }
  0xf8   : > { %1006 = vmatpush.bf16.msra.mxu2 %v3714_v28 }
  0xf9   : > { %v646_v63 = vpop.f32.mrf.mxu0 }
  0xfa   : > { %v660_v19 = vpack.c.bf16 %v646_v63, %v644_v60 }
  0xfb   : > { %2754 = vmatmul.msk.bf16.gmra.mxu2 %vm515_vm2, %v3364_v61  ;;  %2774 = vmatmul.msk.bf16.gmra.mxu3 %vm515_vm2, %v3360_v62 }
 0x101   : > { %v649_v1 = vpop.f32.mrf.mxu0 }
 0x105   : > { %2947 = vmatmul.msk.bf16.gmra.mxu0 %vm387_vm1, %v3611_v26 }
 0x109   : > { %v651_v5 = vpop.f32.mrf.mxu0 }
 0x10a   : > { %v661_v17 = vpack.c.bf16 %v651_v5, %v649_v1 }
 0x10b   : > { %2755 = vmatmul.msk.bf16.gmra.mxu2 %vm515_vm2, %v3365_v3  ;;  %2775 = vmatmul.msk.bf16.gmra.mxu3 %vm515_vm2, %v3361_v4 }
 0x111   : > { %v654_v8 = vpop.f32.mrf.mxu0 }
 0x115   : > { %2948 = vmatmul.msk.bf16.gmra.mxu0 %vm387_vm1, %v3617_v29 }
 0x119   : > { %v656_v11 = vpop.f32.mrf.mxu0 }
 0x11a   : > { %v662_v16 = vpack.c.bf16 %v656_v11, %v654_v8 }
 0x11b   : > { %2756 = vmatmul.msk.bf16.gmra.mxu2 %vm515_vm2, %v3366_v9  ;;  %2776 = vmatmul.msk.bf16.gmra.mxu3 %vm515_vm2, %v3362_v10 }
 0x11c   : > { %708 = vmatpush.bf16.msrb.mxu1 %v662_v16 }
 0x120   : > { %709 = vmatpush.bf16.msrb.mxu1 %v661_v17 }
 0x121   : > { %v885_v33 = vpop.f32.mrf.mxu0 }
 0x124   : > { %710 = vmatpush.bf16.msrb.mxu1 %v660_v19 }
 0x125   : > { %3025 = vmatmul.msk.bf16.vlgmr.msra.gmra.mxu0 %vm387_vm1, %v3585_v18 }
 0x128   : > { %711 = vmatpush.bf16.msrb.mxu1 %v659_v20 }
 0x129   : > { %v887_v35 = vpop.f32.mrf.mxu0 }
 0x12a   : > { %v905_v63 = vpack.c.bf16 %v887_v35, %v885_v33 }
 0x12b   : > { %2813 = vmatmul.msk.bf16.vlgmr.msrb.gmra.mxu1 %vm515_vm2, %v3367_v24  ;;  %2825 = vmatmul.msk.bf16.vlgmr.msrb.gmra.mxu2 %vm387_vm1, %v3585_v18 }
 0x12c   : > { %1251 = vmatpush.bf16.msrb.mxu2 %v3756_v47 }
 0x130   : > { %1252 = vmatpush.bf16.msrb.mxu2 %v3768_v54 }
 0x131   : > { %v890_v36 = vpop.f32.mrf.mxu0 }
 0x135   : > { %3026 = vmatmul.msk.bf16.gmra.mxu0 %vm387_vm1, %v3593_v21 }
 0x139   : > { %v892_v37 = vpop.f32.mrf.mxu0 }
 0x13a   : > { %v906_v61 = vpack.c.bf16 %v892_v37, %v890_v36 }
 0x13b   : > { %2814 = vmatmul.msk.bf16.gmra.mxu1 %vm515_vm2, %v3368_v25  ;;  %2826 = vmatmul.msk.bf16.gmra.mxu2 %vm387_vm1, %v3593_v21 }
 0x141   : > { %v895_v41 = vpop.f32.mrf.mxu0 }
 0x145   : > { %3027 = vmatmul.msk.bf16.gmra.mxu0 %vm387_vm1, %v3611_v26 }
 0x149   : > { %v897_v46 = vpop.f32.mrf.mxu0 }
 0x14a   : > { %v907_v57 = vpack.c.bf16 %v897_v46, %v895_v41 }
 0x14b   : > { %2815 = vmatmul.msk.bf16.gmra.mxu1 %vm515_vm2, %v3369_v30  ;;  %2827 = vmatmul.msk.bf16.gmra.mxu2 %vm387_vm1, %v3611_v26 }
 0x151   : > { %v900_v51 = vpop.f32.mrf.mxu0 }
 0x155   : > { %3028 = vmatmul.msk.bf16.gmra.mxu0 %vm387_vm1, %v3617_v29 }
 0x159   : > { %v902_v55 = vpop.f32.mrf.mxu0 }
 0x15a   : > { %v908_v56 = vpack.c.bf16 %v902_v55, %v900_v51 }
 0x15b   : > { %2816 = vmatmul.msk.bf16.gmra.mxu1 %vm515_vm2, %v3370_v34  ;;  %2828 = vmatmul.msk.bf16.gmra.mxu2 %vm387_vm1, %v3617_v29 }
 0x15c   : > { %954 = vmatpush.bf16.msra.mxu1 %v908_v56 }
 0x160   : > { %955 = vmatpush.bf16.msra.mxu1 %v907_v57 }
 0x162   : > { %v1131_v62 = vpop.f32.mrf.mxu0 }
 0x164   : > { %956 = vmatpush.bf16.msra.mxu1 %v906_v61 }
 0x168   : > { %957 = vmatpush.bf16.msra.mxu1 %v905_v63 }
 0x16a   : > { %v1133_v3 = vpop.f32.mrf.mxu0 }
 0x16b   : > { %2905 = vmatmul.msk.bf16.vlgmr.msra.gmra.mxu2 %vm387_vm1, %v3585_v18 }
 0x16c   : > { %1565 = vmatpush.bf16.msra.mxu2 %v3566_v12 }
 0x16e   : > { %v537_v38 = vpop.f32.mrf.mxu2  ;;  %v598_v39 = vpop.f32.mrf.mxu3 }
 0x16f   : > { %v599_v40 = vadd.f32 %v598_v39, %v537_v38 }
 0x170   : > { %1566 = vmatpush.bf16.msra.mxu2 %v3576_v14 }
 0x172   : > { %v1136_v8 = vpop.f32.mrf.mxu0 }
 0x176   : > { %v3747_v44 = vpop.f32.mrf.mxu2  ;;  %v3749_v45 = vpop.f32.mrf.mxu3 }
 0x17a   : > { %v1138_v16 = vpop.f32.mrf.mxu0 }
 0x17b   : > { %2906 = vmatmul.msk.bf16.gmra.mxu2 %vm387_vm1, %v3593_v21 }
 0x17e   : > { %v542_v48 = vpop.f32.mrf.mxu2  ;;  %v603_v49 = vpop.f32.mrf.mxu3 }
 0x17f   : > { %v604_v50 = vadd.f32 %v603_v49, %v542_v48  ;;  %v1151_v48 = vpack.c.bf16 %v1133_v3, %v1131_v62 }
 0x182   : > { %v1141_v20 = vpop.f32.mrf.mxu0 }
 0x186   : > { %v3761_v52 = vpop.f32.mrf.mxu2  ;;  %v3763_v53 = vpop.f32.mrf.mxu3 }
 0x18a   : > { %v1143_v33 = vpop.f32.mrf.mxu0 }
 0x18b   : > { %2907 = vmatmul.msk.bf16.gmra.mxu2 %vm387_vm1, %v3611_v26  ;;  %v1153_v39 = vpack.c.bf16 %v1143_v33, %v1141_v20 }
 0x18e   : > { %v547_v58 = vpop.f32.mrf.mxu2  ;;  %v608_v59 = vpop.f32.mrf.mxu3 }
 0x18f   : > { %v609_v60 = vadd.f32 %v608_v59, %v547_v58  ;;  %v3376_v59 = vld [vmem:[%s3536_s10 + $0x88] sm:$0xff] }
 0x196   : > { %v3775_v1 = vpop.f32.mrf.mxu2  ;;  %v3777_v12 = vpop.f32.mrf.mxu3 }
 0x19b   : > { %2908 = vmatmul.msk.bf16.gmra.mxu2 %vm387_vm1, %v3617_v29 }
 0x19e   : > { %v552_v4 = vpop.f32.mrf.mxu2  ;;  %v613_v5 = vpop.f32.mrf.mxu3 }
 0x19f   : > { %v614_v14 = vadd.f32 %v613_v5, %v552_v4  ;;  %v3371_v5 = vld [vmem:[%s3536_s10 + $0x60] sm:$0xff] }
 0x1a6   : > { %v3781_v9 = vpop.f32.mrf.mxu2 }
 0x1a8   : > { %v713_v10 = vpop.f32.mrf.mxu1 }
 0x1a9   : > { %v3783_v11 = vadd.f32 %v713_v10, %v599_v40 }
 0x1ab   : > { %2985 = vmatmul.msk.bf16.vlgmr.msrb.gmra.mxu2 %vm387_vm1, %v3585_v18  ;;  %v1146_v18 = vpop.f32.mrf.mxu0 }
 0x1ac   : > { %1770 = vmatpush.bf16.msrb.mxu2 %v3602_v22 }
 0x1ae   : > { %v762_v17 = vpop.f32.mrf.mxu2 }
 0x1b0   : > { %v3788_v19 = vpop.f32.mrf.mxu1  ;;  %1771 = vmatpush.bf16.msrb.mxu2 %v3608_v23 }
 0x1b3   : > { %v1148_v38 = vpop.f32.mrf.mxu0 }
 0x1b4   : > { %v1154_v23 = vpack.c.bf16 %v1148_v38, %v1146_v18  ;;  %v3378_v18 = vld [vmem:[%s3536_s10 + $0x98] sm:$0xff]  ;;  %v3373_v38 = vld [vmem:[%s3536_s10 + $0x70] sm:$0xff] }
 0x1b6   : > { %v764_v24 = vpop.f32.mrf.mxu2  ;;  %1200 = vmatpush.bf16.msrb.mxu1 %v1154_v23 }
 0x1b8   : > { %v718_v25 = vpop.f32.mrf.mxu1 }
 0x1b9   : > { %v3791_v30 = vadd.f32 %v718_v25, %v604_v50  ;;  %v3375_v50 = vld [vmem:[%s3536_s10 + $0x80] sm:$0xff]  ;;  %v3372_v25 = vld [vmem:[%s3536_s10 + $0x68] sm:$0xff] }
 0x1ba   : > { %1201 = vmatpush.bf16.msrb.mxu1 %v1153_v39 }
 0x1bb   : > { %2986 = vmatmul.msk.bf16.gmra.mxu2 %vm387_vm1, %v3593_v21  ;;  %v1152_v21 = vpack.c.bf16 %v1138_v16, %v1136_v8  ;;  %v1377_v46 = vpop.f32.mrf.mxu0  ;;  %2893 = vmatmul.msk.bf16.vlgmr.msra.gmra.mxu1 %vm515_vm2, %v3375_v50  ;;  %v3377_v8 = vld [vmem:[%s3536_s10 + $0x90] sm:$0xff]  ;;  %v3384_v50 = vld [vmem:[%s3536_s10 + $0xc8] sm:$0xff] }
 0x1be   : > { %v767_v34 = vpop.f32.mrf.mxu2  ;;  %1202 = vmatpush.bf16.msrb.mxu1 %v1152_v21 }
 0x1c0   : > { %v3795_v35 = vpop.f32.mrf.mxu1 }
 0x1c2   : > { %1203 = vmatpush.bf16.msrb.mxu1 %v1151_v48  ;;  %v3374_v48 = vld [vmem:[%s3536_s10 + $0x78] sm:$0xff] }
 0x1c6   : > { %v769_v36 = vpop.f32.mrf.mxu2 }
 0x1c7   : > { %v783_v3 = vpack.c.bf16 %v769_v36, %v767_v34 }
 0x1c8   : > { %v723_v22 = vpop.f32.mrf.mxu1 }
 0x1c9   : > { %v3797_v37 = vadd.f32 %v723_v22, %v609_v60 }
 0x1cb   : > { %2987 = vmatmul.msk.bf16.gmra.mxu2 %vm387_vm1, %v3611_v26  ;;  %v1379_v26 = vpop.f32.mrf.mxu0  ;;  %2894 = vmatmul.msk.bf16.gmra.mxu1 %vm515_vm2, %v3376_v59 }
 0x1cc   : > { %v1397_v23 = vpack.c.bf16 %v1379_v26, %v1377_v46 }
 0x1ce   : > { %v772_v40 = vpop.f32.mrf.mxu2 }
 0x1d0   : > { %v3801_v41 = vpop.f32.mrf.mxu1 }
 0x1d3   : > { %v1382_v57 = vpop.f32.mrf.mxu0 }
 0x1d6   : > { %v774_v49 = vpop.f32.mrf.mxu2 }
 0x1d7   : > { %v784_v62 = vpack.c.bf16 %v774_v49, %v772_v40  ;;  %v3383_v40 = vld [vmem:[%s3536_s10 + $0xc0] sm:$0xff] }
 0x1d8   : > { %v728_v51 = vpop.f32.mrf.mxu1 }
 0x1d9   : > { %v3805_v55 = vadd.f32 %v728_v51, %v614_v14 }
 0x1db   : > { %2988 = vmatmul.msk.bf16.gmra.mxu2 %vm387_vm1, %v3617_v29  ;;  %v1384_v61 = vpop.f32.mrf.mxu0  ;;  %v782_v29 = vpack.c.bf16 %v764_v24, %v762_v17  ;;  %2895 = vmatmul.msk.bf16.gmra.mxu1 %vm515_vm2, %v3377_v8 }
 0x1dc   : > { %v1398_v22 = vpack.c.bf16 %v1384_v61, %v1382_v57 }
 0x1de   : > { %v777_v56 = vpop.f32.mrf.mxu2 }
 0x1e3   : > { %v1387_v4 = vpop.f32.mrf.mxu0 }
 0x1e6   : > { %v779_v58 = vpop.f32.mrf.mxu2 }
 0x1e7   : > { %v785_v60 = vpack.c.bf16 %v779_v58, %v777_v56  ;;  %v3379_v58 = vld [vmem:[%s3536_s10 + $0xa0] sm:$0xff] }
 0x1e9   : > { %831 = vmatpush.bf16.msrb.mxu3 %v785_v60  ;;  %v3385_v60 = vld [vmem:[%s3536_s10 + $0xd0] sm:$0xff] }
 0x1eb   : > { %v1389_v10 = vpop.f32.mrf.mxu0  ;;  %2896 = vmatmul.msk.bf16.gmra.mxu1 %vm515_vm2, %v3378_v18  ;;  %v1481_v18 = vld [vmem:[%s3526_s28 + $0x10] sm:$0xff] }
 0x1ec   : > { %v1399_v34 = vpack.c.bf16 %v1389_v10, %v1387_v4  ;;  %v1485_v10 = vld [vmem:[%s3526_s28 + $0x30] sm:$0xff] }
 0x1ed   : > { %832 = vmatpush.bf16.msrb.mxu3 %v784_v62  ;;  %v1479_v62 = vld [vmem:[%s3526_s28] sm:$0xff] }
 0x1ee   : > { %v1008_v63 = vpop.f32.mrf.mxu2 }
 0x1f1   : > { %833 = vmatpush.bf16.msrb.mxu3 %v783_v3  ;;  %v3479_v3 = vmov 0  }
 0x1f2   : > { %3460 = vset.pattern.permute.xlu0 %v3479_v3  ;;  %3461 = vset.pattern.permute.xlu1 %v3479_v3 }
 0x1f3   : > { %v1392_v20 = vpop.f32.mrf.mxu0  ;;  %1489 = vperm.xlu0 %3460, %v1479_v62   ;;  %3462 = vset.pattern.permute.xlu2 %v3479_v3  ;;  %v3393_v62 = vld [vmem:[%s3536_s10 + $0x110] sm:$0xff] }
 0x1f4   : > { %1499 = vperm.xlu1 %3461, %v1481_v18   ;;  %v2541_v18 = vld [vmem:[%s3531_s7] sm:$0xff] }
 0x1f5   : > { %834 = vmatpush.bf16.msrb.mxu3 %v782_v29  ;;  %v3386_v29 = vld [vmem:[%s3536_s10 + $0xd8] sm:$0xff] }
 0x1f6   : > { %v1010_v14 = vpop.f32.mrf.mxu2 }
 0x1f7   : > { %v1028_v57 = vpack.c.bf16 %v1010_v14, %v1008_v63  ;;  %v3380_v63 = vld [vmem:[%s3536_s10 + $0xa8] sm:$0xff]  ;;  %v3839_v14 = vpop.f32.mrf.mxu1 }
 0x1f8   : > { %2853 = vmatmul.msk.bf16.vlgmr.msrb.gmra.mxu3 %vm515_vm2, %v3371_v5  ;;  %v1480_v5 = vld [vmem:[%s3526_s28 + $0x8] sm:$0xff] }
 0x1fb   : > { %v1394_v17 = vpop.f32.mrf.mxu0  ;;  %2973 = vmatmul.msk.bf16.vlgmr.msrb.gmra.mxu1 %vm515_vm2, %v3383_v40  ;;  %1494 = vperm.xlu0 %3460, %v1480_v5   ;;  %v3392_v40 = vld [vmem:[%s3536_s10 + $0x108] sm:$0xff]  ;;  %v1483_v5 = vld [vmem:[%s3526_s28 + $0x20] sm:$0xff] }
 0x1fc   : > { %v1400_v24 = vpack.c.bf16 %v1394_v17, %v1392_v20  ;;  %v2542_v17 = vld [vmem:[%s3531_s7 + $0x8] sm:$0xff]  ;;  %1509 = vperm.xlu2 %3462, %v1483_v5  }
 0x1fe   : > { %v1013_v16 = vpop.f32.mrf.mxu2  ;;  %1446 = vmatpush.bf16.msra.mxu1 %v1400_v24 }
 0x202   : > { %1447 = vmatpush.bf16.msra.mxu1 %v1399_v34 }
 0x203   : > { %1519 = vperm.xlu0 %3460, %v1485_v10  }
 0x206   : > { %v1015_v33 = vpop.f32.mrf.mxu2  ;;  %1448 = vmatpush.bf16.msra.mxu1 %v1398_v22  ;;  %v1482_v22 = vld [vmem:[%s3526_s28 + $0x18] sm:$0xff] }
 0x207   : > { %v1029_v56 = vpack.c.bf16 %v1015_v33, %v1013_v16  ;;  %v3381_v16 = vld [vmem:[%s3536_s10 + $0xb0] sm:$0xff]  ;;  %v3391_v33 = vld [vmem:[%s3536_s10 + $0x100] sm:$0xff]  ;;  %1504 = vperm.xlu1 %3461, %v1482_v22   ;;  %v2544_v22 = vld [vmem:[%s3531_s7 + $0x18] sm:$0xff] }
 0x208   : > { %2854 = vmatmul.msk.bf16.gmra.mxu3 %vm515_vm2, %v3372_v25 }
 0x20a   : > { %1449 = vmatpush.bf16.msra.mxu1 %v1397_v23 }
 0x20b   : > { %2974 = vmatmul.msk.bf16.gmra.mxu1 %vm515_vm2, %v3384_v50  ;;  %2556 = vperm.xlu0 %3460, %v2542_v17   ;;  %v2548_v50 = vld [vmem:[%s3531_s7 + $0x38] sm:$0xff] }
 0x20e   : > { %v1018_v36 = vpop.f32.mrf.mxu2 }
 0x216   : > { %v1020_v39 = vpop.f32.mrf.mxu2 }
 0x217   : > { %v1030_v46 = vpack.c.bf16 %v1020_v39, %v1018_v36  ;;  %v3382_v36 = vld [vmem:[%s3536_s10 + $0xb8] sm:$0xff] }
 0x218   : > { %2855 = vmatmul.msk.bf16.gmra.mxu3 %vm515_vm2, %v3373_v38  ;;  %v2545_v38 = vld [vmem:[%s3531_s7 + $0x20] sm:$0xff] }
 0x219   : > { %2571 = vperm.xlu0 %3460, %v2545_v38  }
 0x21b   : > { %2975 = vmatmul.msk.bf16.gmra.mxu1 %vm515_vm2, %v3385_v60  ;;  %v2543_v60 = vld [vmem:[%s3531_s7 + $0x10] sm:$0xff] }
 0x21e   : > { %v1023_v21 = vpop.f32.mrf.mxu2 }
 0x221   : > { %2586 = vperm.xlu0 %3460, %v2548_v50  }
 0x226   : > { %v1025_v49 = vpop.f32.mrf.mxu2 }
 0x227   : > { %v1031_v51 = vpack.c.bf16 %v1025_v49, %v1023_v21  ;;  %v1486_v49 = vld [vmem:[%s3526_s28 + $0x38] sm:$0xff] }
 0x228   : > { %2856 = vmatmul.msk.bf16.gmra.mxu3 %vm515_vm2, %v3374_v48  ;;  %1524 = vperm.xlu1 %3461, %v1486_v49  }
 0x229   : > { %1077 = vmatpush.bf16.msra.mxu3 %v1031_v51 }
 0x22b   : > { %2976 = vmatmul.msk.bf16.gmra.mxu1 %vm515_vm2, %v3386_v29 }
 0x22d   : > { %1078 = vmatpush.bf16.msra.mxu3 %v1030_v46 }
 0x22e   : > { %v3827_v26 = vpop.f32.mrf.mxu2 }
 0x230   : > { %2561 = vperm.xlu1 %3461, %v2543_v60  }
 0x231   : > { %1079 = vmatpush.bf16.msra.mxu3 %v1029_v56  ;;  %v3860_v56 = vpop.f32.mrf.mxu3 }
 0x235   : > { %1080 = vmatpush.bf16.msra.mxu3 %v1028_v57 }
 0x236   : > { %v1256_v59 = vpop.f32.mrf.mxu2 }
 0x237   : > { %v1274_v57 = vpack.c.bf16 %v1256_v59, %v3827_v26  ;;  %v2546_v59 = vld [vmem:[%s3531_s7 + $0x28] sm:$0xff] }
 0x238   : > { %2933 = vmatmul.msk.bf16.vlgmr.msra.gmra.mxu3 %vm515_vm2, %v3379_v58  ;;  %v959_v20 = vpop.f32.mrf.mxu1  ;;  %v3387_v58 = vld [vmem:[%s3536_s10 + $0xe0] sm:$0xff]  ;;  %2576 = vperm.xlu1 %3461, %v2546_v59  }
 0x23b   : > { %3053 = vmatmul.msk.bf16.vlgmr.msra.gmra.mxu1 %vm515_vm2, %v3391_v33  ;;  %v3389_v33 = vld [vmem:[%s3536_s10 + $0xf0] sm:$0xff] }
 0x23e   : > { %v1259_v61 = vpop.f32.mrf.mxu2 }
 0x240   : > { %v3848_v24 = vpop.f32.mrf.mxu1 }
 0x246   : > { %v1261_v4 = vpop.f32.mrf.mxu2 }
 0x247   : > { %v1275_v46 = vpack.c.bf16 %v1261_v4, %v1259_v61 }
 0x248   : > { %2934 = vmatmul.msk.bf16.gmra.mxu3 %vm515_vm2, %v3380_v63  ;;  %v964_v23 = vpop.f32.mrf.mxu1 }
 0x24b   : > { %3054 = vmatmul.msk.bf16.gmra.mxu1 %vm515_vm2, %v3392_v40  ;;  %v3390_v40 = vld [vmem:[%s3536_s10 + $0xf8] sm:$0xff] }
 0x24e   : > { %v1264_v8 = vpop.f32.mrf.mxu2 }
 0x250   : > { %v3858_v51 = vpop.f32.mrf.mxu1 }
 0x256   : > { %v1266_v25 = vpop.f32.mrf.mxu2 }
 0x257   : > { %v1276_v48 = vpack.c.bf16 %v1266_v25, %v1264_v8  ;;  %v3394_v8 = vld [vmem:[%s3536_s10 + $0x118] sm:$0xff] }
 0x258   : > { %2935 = vmatmul.msk.bf16.gmra.mxu3 %vm515_vm2, %v3381_v16  ;;  %v969_v3 = vpop.f32.mrf.mxu1  ;;  %v1484_v16 = vld [vmem:[%s3526_s28 + $0x28] sm:$0xff] }
 0x259   : > { %1514 = vperm.xlu2 %3462, %v1484_v16  }
 0x25b   : > { %3055 = vmatmul.msk.bf16.gmra.mxu1 %vm515_vm2, %v3393_v62 }
 0x25e   : > { %v1269_v34 = vpop.f32.mrf.mxu2 }
 0x260   : > { %v3872_v4 = vpop.f32.mrf.mxu1 }
 0x261   : > { %2551 = vperm.xlu2 %3462, %v2541_v18  }
 0x266   : > { %v1271_v39 = vpop.f32.mrf.mxu2 }
 0x267   : > { %v1277_v21 = vpack.c.bf16 %v1271_v39, %v1269_v34 }
 0x268   : > { %2936 = vmatmul.msk.bf16.gmra.mxu3 %vm515_vm2, %v3382_v36  ;;  %v974_v10 = vpop.f32.mrf.mxu1 }
 0x269   : > { %1323 = vmatpush.bf16.msrb.mxu3 %v1277_v21  ;;  %2566 = vperm.xlu2 %3462, %v2544_v22  }
 0x26b   : > { %3056 = vmatmul.msk.bf16.gmra.mxu1 %vm515_vm2, %v3394_v8 }
 0x26d   : > { %1324 = vmatpush.bf16.msrb.mxu3 %v1276_v48 }
 0x270   : > { %v3885_v17 = vpop.f32.mrf.mxu1 }
 0x271   : > { %1325 = vmatpush.bf16.msrb.mxu3 %v1275_v46 }
 0x275   : > { %1326 = vmatpush.bf16.msrb.mxu3 %v1274_v57 }
 0x278   : > { %3013 = vmatmul.msk.bf16.vlgmr.msrb.gmra.mxu3 %vm515_vm2, %v3387_v58  ;;  %v1205_v38 = vpop.f32.mrf.mxu1 }
 0x279   : > { %1606 = vmatpush.bf16.msra.mxu3 %v3571_v13  ;;  %v3388_v13 = vld [vmem:[%s3536_s10 + $0xe8] sm:$0xff] }
 0x27b   : > { %v836_v61 = vpop.f32.mrf.mxu3 }
 0x27c   : > { %v856_v26 = vadd.f32 %v836_v61, %v3783_v11 }
 0x27d   : > { %1607 = vmatpush.bf16.msra.mxu3 %v3583_v15 }
 0x27e   : > { %v979_v63 = vadd.f32 %v959_v20, %v856_v26 }
 0x280   : > { %v1207_v21 = vpop.f32.mrf.mxu1 }
 0x283   : > { %v838_v29 = vpop.f32.mrf.mxu3 }
 0x288   : > { %3014 = vmatmul.msk.bf16.gmra.mxu3 %vm515_vm2, %v3388_v13  ;;  %v1210_v57 = vpop.f32.mrf.mxu1 }
 0x28b   : > { %v841_v15 = vpop.f32.mrf.mxu3 }
 0x28c   : > { %v858_v11 = vadd.f32 %v841_v15, %v3791_v30 }
 0x28e   : > { %v981_v20 = vadd.f32 %v964_v23, %v858_v11  ;;  %v2547_v23 = vld [vmem:[%s3531_s7 + $0x30] sm:$0xff] }
 0x28f   : > { %2581 = vperm.xlu2 %3462, %v2547_v23  }
 0x290   : > { %v1212_v60 = vpop.f32.mrf.mxu1 }
 0x293   : > { %v3881_v25 = vpop.f32.mrf.mxu3 }
 0x298   : > { %3015 = vmatmul.msk.bf16.gmra.mxu3 %vm515_vm2, %v3389_v33  ;;  %v1215_v61 = vpop.f32.mrf.mxu1 }
 0x29b   : > { %v846_v34 = vpop.f32.mrf.mxu3 }
 0x29c   : > { %v860_v36 = vadd.f32 %v846_v34, %v3797_v37 }
 0x29e   : > { %v983_v30 = vadd.f32 %v969_v3, %v860_v36 }
 0x2a0   : > { %v3898_v5 = vpop.f32.mrf.mxu1 }
 0x2a3   : > { %v3890_v39 = vpop.f32.mrf.mxu3 }
 0x2a8   : > { %3016 = vmatmul.msk.bf16.gmra.mxu3 %vm515_vm2, %v3390_v40  ;;  %v1220_v11 = vpop.f32.mrf.mxu1 }
 0x2ab   : > { %v851_v48 = vpop.f32.mrf.mxu3 }
 0x2ac   : > { %v862_v49 = vadd.f32 %v851_v48, %v3805_v55 }
 0x2ae   : > { %v985_v50 = vadd.f32 %v974_v10, %v862_v49  ;;  %v1490_v49 = vpop.permute.xlu0 %1489 }
 0x2b0   : > { %v3900_v33 = vpop.f32.mrf.mxu1 }
 0x2b3   : > { %v3896_v46 = vpop.f32.mrf.mxu3 }
 0x2b8   : > { %v1451_v36 = vpop.f32.mrf.mxu1 }
 0x2bb   : > { %v1082_v37 = vpop.f32.mrf.mxu3 }
 0x2bc   : > { %v1102_v58 = vadd.f32 %v1082_v37, %v979_v63 }
 0x2be   : > { %v1225_v62 = vadd.f32 %v1205_v38, %v1102_v58 }
 0x2c0   : > { %v1453_v23 = vpop.f32.mrf.mxu1 }
 0x2c3   : > { %v1084_v3 = vpop.f32.mrf.mxu3 }
 0x2cb   : > { %v1087_v26 = vpop.f32.mrf.mxu3 }
 0x2cc   : > { %v1104_v59 = vadd.f32 %v1087_v26, %v981_v20  ;;  %v601_v20 = vadd.f32 %v3749_v45, %v3747_v44  ;;  %v1456_v26 = vpop.f32.mrf.mxu1 }
 0x2ce   : > { %v1227_v13 = vadd.f32 %v1210_v57, %v1104_v59  ;;  %v734_v38 = vadd.f32 %v3788_v19, %v601_v20  ;;  %v606_v59 = vadd.f32 %v3763_v53, %v3761_v52 }
 0x2d0   : > { %v857_v40 = vadd.f32 %v838_v29, %v734_v38  ;;  %v736_v44 = vadd.f32 %v3795_v35, %v606_v59  ;;  %v1495_v29 = vpop.permute.xlu0 %1494 }
 0x2d3   : > { %v1089_v8 = vpop.f32.mrf.mxu3 }
 0x2db   : > { %v1092_v15 = vpop.f32.mrf.mxu3 }
 0x2dc   : > { %v1106_v16 = vadd.f32 %v1092_v15, %v983_v30  ;;  %v980_v30 = vadd.f32 %v3848_v24, %v857_v40 }
 0x2de   : > { %v1229_v55 = vadd.f32 %v1215_v61, %v1106_v16  ;;  %v1103_v57 = vadd.f32 %v1084_v3, %v980_v30 }
 0x2e3   : > { %v1094_v10 = vpop.f32.mrf.mxu3 }
 0x2eb   : > { %v1097_v18 = vpop.f32.mrf.mxu3 }
 0x2ec   : > { %v1108_v34 = vadd.f32 %v1097_v18, %v985_v50  ;;  %v1226_v50 = vadd.f32 %v1207_v21, %v1103_v57 }
 0x2ee   : > { %v3902_v63 = vadd.f32 %v1220_v11, %v1108_v34  ;;  %v859_v11 = vadd.f32 %v3881_v25, %v736_v44  ;;  %v1500_v34 = vpop.permute.xlu1 %1499 }
 0x2f3   : > { %v3904_v22 = vpop.f32.mrf.mxu3 }
 0x2fb   : > { %v1328_v48 = vpop.f32.mrf.mxu3 }
 0x2fc   : > { %v1348_v37 = vadd.f32 %v1328_v48, %v1225_v62  ;;  %v982_v62 = vadd.f32 %v3858_v51, %v859_v11  ;;  %v611_v51 = vadd.f32 %v3777_v12, %v3775_v1 }
 0x2fe   : > { %v1471_v58 = vadd.f32 %v1451_v36, %v1348_v37  ;;  %v1458_v36 = vpop.f32.mrf.mxu1  ;;  %v1105_v20 = vadd.f32 %v1089_v8, %v982_v62  ;;  %v738_v8 = vadd.f32 %v3801_v41, %v611_v51  ;;  %v1520_v62 = vpop.permute.xlu0 %1519 }
 0x300   : > { %v1527_v45 = vadd.f32 %v1490_v49, %v1471_v58  ;;  %v1228_v35 = vadd.f32 %v1212_v60, %v1105_v20  ;;  %v861_v30 = vadd.f32 %v3890_v39, %v738_v8 }
 0x302   : > { %v1535_v24 = vmax.f32 %v1527_v45, 0.0  ;;  %v984_v60 = vadd.f32 %v3872_v4, %v861_v30 }
 0x303   : > { %v1330_v61 = vpop.f32.mrf.mxu3 }
 0x304   : > { %v1349_v15 = vadd.f32 %v1330_v61, %v1226_v50  ;;  %v1107_v50 = vadd.f32 %v1094_v10, %v984_v60 }
 0x306   : > { %v1472_v19 = vadd.f32 %v1453_v23, %v1349_v15  ;;  %v1505_v23 = vpop.permute.xlu1 %1504  ;;  %v1461_v48 = vpop.f32.mrf.mxu1  ;;  %v1230_v39 = vadd.f32 %v3898_v5, %v1107_v50 }
 0x308   : > { %v1528_v16 = vadd.f32 %v1495_v29, %v1472_v19 }
 0x30a   : > { %v1536_v18 = vmax.f32 %v1528_v16, 0.0 }
 0x30b   : > { %v1333_v3 = vpop.f32.mrf.mxu3 }
 0x30c   : > { %v3915_v21 = vpack.c.bf16 %v1536_v18, %v1535_v24  ;;  %v1350_v52 = vadd.f32 %v1333_v3, %v1227_v13 }
 0x30e   : > { %3057 = vmatmul.msk.bf16.vlgmr.msra.gmra.mxu2 %vm387_vm1, %v3915_v21  ;;  %3061 = vmatmul.msk.bf16.vlgmr.msra.gmra.mxu3 %vm387_vm1, %v3915_v21  ;;  %v1473_v53 = vadd.f32 %v1456_v26, %v1350_v52  ;;  %v1463_v12 = vpop.f32.mrf.mxu1  ;;  %v616_v26 = vadd.f32 %v3860_v56, %v3781_v9  ;;  %v1525_v20 = vpop.permute.xlu1 %1524 }
 0x30f   : > { %1992 = vmatpush.bf16.msra.mxu2 %v3634_v42 }
 0x310   : > { %v1529_v13 = vadd.f32 %v1500_v34, %v1473_v53  ;;  %v740_v59 = vadd.f32 %v3839_v14, %v616_v26 }
 0x312   : > { %v1537_v57 = vmax.f32 %v1529_v13, 0.0  ;;  %v863_v44 = vadd.f32 %v3896_v46, %v740_v59  ;;  %v3400_v59 = vld [vmem:[%s3541_s13 + $0x28] sm:$0xff] }
 0x313   : > { %v1335_v25 = vpop.f32.mrf.mxu3  ;;  %1993 = vmatpush.bf16.msra.mxu2 %v3640_v43  ;;  %v1510_v43 = vpop.permute.xlu2 %1509 }
 0x314   : > { %v1351_v38 = vadd.f32 %v1335_v25, %v1228_v35  ;;  %v986_v24 = vadd.f32 %v3885_v17, %v863_v44 }
 0x316   : > { %v1474_v40 = vadd.f32 %v1458_v36, %v1351_v38  ;;  %v1466_v11 = vpop.f32.mrf.mxu1  ;;  %v1109_v18 = vadd.f32 %v3904_v22, %v986_v24 }
 0x318   : > { %v1530_v49 = vadd.f32 %v1505_v23, %v1474_v40  ;;  %v1232_v56 = vadd.f32 %v3900_v33, %v1109_v18 }
 0x31a   : > { %v1538_v42 = vmax.f32 %v1530_v49, 0.0 }
 0x31b   : > { %v1338_v37 = vpop.f32.mrf.mxu3 }
 0x31c   : > { %v3928_v58 = vpack.c.bf16 %v1538_v42, %v1537_v57  ;;  %v1352_v1 = vadd.f32 %v1338_v37, %v1229_v55  ;;  %v1515_v55 = vpop.permute.xlu2 %1514 }
 0x31e   : > { %3058 = vmatmul.msk.bf16.gmra.mxu2 %vm387_vm1, %v3928_v58  ;;  %3062 = vmatmul.msk.bf16.gmra.mxu3 %vm387_vm1, %v3928_v58  ;;  %v1475_v41 = vadd.f32 %v1461_v48, %v1352_v1  ;;  %v1468_v34 = vpop.f32.mrf.mxu1 }
 0x320   : > { %v1531_v15 = vadd.f32 %v1510_v43, %v1475_v41 }
 0x322   : > { %v1539_v19 = vmax.f32 %v1531_v15, 0.0  ;;  %v3396_v15 = vld [vmem:[%s3541_s13 + $0x8] sm:$0xff] }
 0x323   : > { %v1340_v61 = vpop.f32.mrf.mxu3 }
 0x324   : > { %v1353_v4 = vadd.f32 %v1340_v61, %v1230_v39  ;;  %v3399_v39 = vld [vmem:[%s3541_s13 + $0x20] sm:$0xff] }
 0x325   : > { %v3395_v61 = vld [vmem:[%s3541_s13] sm:$0xff] }
 0x326   : > { %v1476_v10 = vadd.f32 %v1463_v12, %v1353_v4 }
 0x328   : > { %v1532_v45 = vadd.f32 %v1515_v55, %v1476_v10  ;;  %v3401_v10 = vld [vmem:[%s3541_s13 + $0x30] sm:$0xff] }
 0x329   : > { %v3397_v55 = vld [vmem:[%s3541_s13 + $0x10] sm:$0xff] }
 0x32a   : > { %v1540_v29 = vmax.f32 %v1532_v45, 0.0  ;;  %v3398_v45 = vld [vmem:[%s3541_s13 + $0x18] sm:$0xff] }
 0x32b   : > { %v1343_v16 = vpop.f32.mrf.mxu3 }
 0x32c   : > { %v3940_v5 = vpack.c.bf16 %v1540_v29, %v1539_v19  ;;  %v1354_v9 = vadd.f32 %v1343_v16, %v3902_v63 }
 0x32e   : > { %3059 = vmatmul.msk.bf16.gmra.mxu2 %vm387_vm1, %v3940_v5  ;;  %3063 = vmatmul.msk.bf16.gmra.mxu3 %vm387_vm1, %v3940_v5  ;;  %v1477_v14 = vadd.f32 %v1466_v11, %v1354_v9  ;;  %v3403_v9 = vld [vmem:[%s3541_s13 + $0x40] sm:$0xff] }
 0x330   : > { %v1533_v17 = vadd.f32 %v1520_v62, %v1477_v14 }
 0x332   : > { %v1541_v22 = vmax.f32 %v1533_v17, 0.0  ;;  %v3406_v17 = vld [vmem:[%s3541_s13 + $0x58] sm:$0xff] }
 0x333   : > { %v1345_v46 = vpop.f32.mrf.mxu3 }
 0x334   : > { %v1355_v3 = vadd.f32 %v1345_v46, %v1232_v56  ;;  %v3404_v46 = vld [vmem:[%s3541_s13 + $0x48] sm:$0xff] }
 0x336   : > { %v1478_v36 = vadd.f32 %v1468_v34, %v1355_v3  ;;  %v3405_v34 = vld [vmem:[%s3541_s13 + $0x50] sm:$0xff] }
 0x338   : > { %v1534_v52 = vadd.f32 %v1525_v20, %v1478_v36 }
 0x33a   : > { %v1542_v53 = vmax.f32 %v1534_v52, 0.0 }
 0x33c   : > { %v3949_v63 = vpack.c.bf16 %v1542_v53, %v1541_v22 }
 0x33e   : > { %3060 = vmatmul.msk.bf16.gmra.mxu2 %vm387_vm1, %v3949_v63  ;;  %3064 = vmatmul.msk.bf16.gmra.mxu3 %vm387_vm1, %v3949_v63 }
 0x34e   : > { %3113 = vmatmul.msk.bf16.vlgmr.msrb.gmra.mxu2 %vm387_vm1, %v3915_v21 }
 0x34f   : > { %2214 = vmatpush.bf16.msrb.mxu2 %v3678_v6 }
 0x353   : > { %2215 = vmatpush.bf16.msrb.mxu2 %v3684_v7 }
 0x35e   : > { %3114 = vmatmul.msk.bf16.gmra.mxu2 %vm387_vm1, %v3928_v58 }
 0x36e   : > { %3115 = vmatmul.msk.bf16.gmra.mxu2 %vm387_vm1, %v3940_v5 }
 0x37e   : > { %3116 = vmatmul.msk.bf16.gmra.mxu2 %vm387_vm1, %v3949_v63 }
 0x38e   : > { %3177 = vmatmul.msk.bf16.vlgmr.msra.gmra.mxu2 %vm387_vm1, %v3915_v21 }
 0x38f   : > { %2436 = vmatpush.bf16.msra.mxu2 %v3726_v31 }
 0x391   : > { %v1568_v33 = vpop.f32.mrf.mxu2  ;;  %v1609_v35 = vpop.f32.mrf.mxu3 }
 0x393   : > { %2437 = vmatpush.bf16.msra.mxu2 %v3732_v32 }
 0x399   : > { %v1570_v6 = vpop.f32.mrf.mxu2  ;;  %v1611_v7 = vpop.f32.mrf.mxu3 }
 0x39a   : > { %v1588_v12 = vpack.c.bf16 %v1570_v6, %v1568_v33  ;;  %v1629_v41 = vpack.c.bf16 %v1611_v7, %v1609_v35 }
 0x39e   : > { %3178 = vmatmul.msk.bf16.gmra.mxu2 %vm387_vm1, %v3928_v58 }
 0x3a1   : > { %v1573_v25 = vpop.f32.mrf.mxu2  ;;  %v1614_v51 = vpop.f32.mrf.mxu3 }
 0x3a9   : > { %v1575_v38 = vpop.f32.mrf.mxu2  ;;  %v1616_v8 = vpop.f32.mrf.mxu3 }
 0x3aa   : > { %v1589_v50 = vpack.c.bf16 %v1575_v38, %v1573_v25  ;;  %v1630_v1 = vpack.c.bf16 %v1616_v8, %v1614_v51 }
 0x3ae   : > { %3179 = vmatmul.msk.bf16.gmra.mxu2 %vm387_vm1, %v3940_v5 }
 0x3b1   : > { %v1578_v13 = vpop.f32.mrf.mxu2  ;;  %v1619_v40 = vpop.f32.mrf.mxu3 }
 0x3b9   : > { %v1580_v23 = vpop.f32.mrf.mxu2  ;;  %v1621_v31 = vpop.f32.mrf.mxu3 }
 0x3ba   : > { %v1590_v37 = vpack.c.bf16 %v1580_v23, %v1578_v13  ;;  %v1631_v60 = vpack.c.bf16 %v1621_v31, %v1619_v40 }
 0x3be   : > { %3180 = vmatmul.msk.bf16.gmra.mxu2 %vm387_vm1, %v3949_v63 }
 0x3c1   : > { %v1583_v32 = vpop.f32.mrf.mxu2  ;;  %v1624_v48 = vpop.f32.mrf.mxu3 }
 0x3c9   : > { %v1585_v30 = vpop.f32.mrf.mxu2  ;;  %v1626_v49 = vpop.f32.mrf.mxu3 }
 0x3ca   : > { %v1591_v57 = vpack.c.bf16 %v1585_v30, %v1583_v32  ;;  %v1632_v42 = vpack.c.bf16 %v1626_v49, %v1624_v48 }
 0x3cc   : > { %1678 = vmatpush.bf16.msrb.mxu0 %v1632_v42  ;;  %1739 = vmatpush.bf16.msrb.mxu1 %v1591_v57 }
 0x3ce   : > { %3241 = vmatmul.msk.bf16.vlgmr.msrb.gmra.mxu2 %vm387_vm1, %v3915_v21 }
 0x3d0   : > { %1679 = vmatpush.bf16.msrb.mxu0 %v1631_v60  ;;  %1740 = vmatpush.bf16.msrb.mxu1 %v1590_v37 }
 0x3d1   : > { %v1773_v43 = vpop.f32.mrf.mxu2 }
 0x3d4   : > { %1680 = vmatpush.bf16.msrb.mxu0 %v1630_v1  ;;  %1741 = vmatpush.bf16.msrb.mxu1 %v1589_v50 }
 0x3d8   : > { %1681 = vmatpush.bf16.msrb.mxu0 %v1629_v41  ;;  %1742 = vmatpush.bf16.msrb.mxu1 %v1588_v12 }
 0x3d9   : > { %v1775_v26 = vpop.f32.mrf.mxu2 }
 0x3da   : > { %v1793_v18 = vpack.c.bf16 %v1775_v26, %v1773_v43 }
 0x3db   : > { %3089 = vmatmul.msk.bf16.vlgmr.msrb.gmra.mxu0 %vm515_vm2, %v3399_v39  ;;  %3109 = vmatmul.msk.bf16.vlgmr.msrb.gmra.mxu1 %vm515_vm2, %v3395_v61 }
 0x3dc   : > { %1881 = vmatpush.bf16.msra.mxu0 %v3660_v0 }
 0x3de   : > { %3242 = vmatmul.msk.bf16.gmra.mxu2 %vm387_vm1, %v3928_v58 }
 0x3e0   : > { %1882 = vmatpush.bf16.msra.mxu0 %v3668_v2 }
 0x3e1   : > { %v1778_v4 = vpop.f32.mrf.mxu2 }
 0x3e4   : > { %2103 = vmatpush.bf16.msrb.mxu0 %v3708_v27 }
 0x3e8   : > { %2104 = vmatpush.bf16.msrb.mxu0 %v3714_v28  ;;  %v3402_v28 = vld [vmem:[%s3541_s13 + $0x38] sm:$0xff] }
 0x3e9   : > { %v1780_v0 = vpop.f32.mrf.mxu2 }
 0x3ea   : > { %v1794_v24 = vpack.c.bf16 %v1780_v0, %v1778_v4 }
 0x3eb   : > { %3090 = vmatmul.msk.bf16.gmra.mxu0 %vm515_vm2, %v3400_v59  ;;  %3110 = vmatmul.msk.bf16.gmra.mxu1 %vm515_vm2, %v3396_v15 }
 0x3ee   : > { %3243 = vmatmul.msk.bf16.gmra.mxu2 %vm387_vm1, %v3940_v5 }
 0x3f1   : > { %v1783_v2 = vpop.f32.mrf.mxu2 }
 0x3f9   : > { %v1785_v44 = vpop.f32.mrf.mxu2 }
 0x3fa   : > { %v1795_v11 = vpack.c.bf16 %v1785_v44, %v1783_v2 }
 0x3fb   : > { %3091 = vmatmul.msk.bf16.gmra.mxu0 %vm515_vm2, %v3401_v10  ;;  %3111 = vmatmul.msk.bf16.gmra.mxu1 %vm515_vm2, %v3397_v55 }
 0x3fe   : > { %3244 = vmatmul.msk.bf16.gmra.mxu2 %vm387_vm1, %v3949_v63 }
 0x401   : > { %v1788_v27 = vpop.f32.mrf.mxu2 }
 0x409   : > { %v1790_v19 = vpop.f32.mrf.mxu2 }
 0x40a   : > { %v1796_v29 = vpack.c.bf16 %v1790_v19, %v1788_v27 }
 0x40b   : > { %3092 = vmatmul.msk.bf16.gmra.mxu0 %vm515_vm2, %v3402_v28  ;;  %3112 = vmatmul.msk.bf16.gmra.mxu1 %vm515_vm2, %v3398_v45 }
 0x40c   : > { %1842 = vmatpush.bf16.msrb.mxu3 %v1796_v29 }
 0x40e   : > { %3305 = vmatmul.msk.bf16.vlgmr.msra.gmra.mxu2 %vm387_vm1, %v3915_v21 }
 0x410   : > { %1843 = vmatpush.bf16.msrb.mxu3 %v1795_v11  ;;  %v3411_v11 = vld [vmem:[%s3541_s13 + $0x80] sm:$0xff] }
 0x411   : > { %v1995_v16 = vpop.f32.mrf.mxu2 }
 0x414   : > { %1844 = vmatpush.bf16.msrb.mxu3 %v1794_v24 }
 0x418   : > { %1845 = vmatpush.bf16.msrb.mxu3 %v1793_v18 }
 0x419   : > { %v1997_v14 = vpop.f32.mrf.mxu2 }
 0x41a   : > { %v2015_v33 = vpack.c.bf16 %v1997_v14, %v1995_v16 }
 0x41b   : > { %3141 = vmatmul.msk.bf16.vlgmr.msrb.gmra.mxu3 %vm515_vm2, %v3403_v9  ;;  %3145 = vmatmul.msk.bf16.vlgmr.msra.gmra.mxu0 %vm387_vm1, %v3915_v21 }
 0x41c   : > { %2325 = vmatpush.bf16.msra.mxu0 %v3756_v47 }
 0x41e   : > { %3306 = vmatmul.msk.bf16.gmra.mxu2 %vm387_vm1, %v3928_v58 }
 0x420   : > { %2326 = vmatpush.bf16.msra.mxu0 %v3768_v54 }
 0x421   : > { %v2000_v56 = vpop.f32.mrf.mxu2 }
 0x429   : > { %v2002_v3 = vpop.f32.mrf.mxu2 }
 0x42a   : > { %v2016_v53 = vpack.c.bf16 %v2002_v3, %v2000_v56 }
 0x42b   : > { %3142 = vmatmul.msk.bf16.gmra.mxu3 %vm515_vm2, %v3404_v46  ;;  %3146 = vmatmul.msk.bf16.gmra.mxu0 %vm387_vm1, %v3928_v58 }
 0x42e   : > { %3307 = vmatmul.msk.bf16.gmra.mxu2 %vm387_vm1, %v3940_v5 }
 0x431   : > { %v2005_v62 = vpop.f32.mrf.mxu2 }
 0x439   : > { %v2007_v47 = vpop.f32.mrf.mxu2 }
 0x43a   : > { %v2017_v52 = vpack.c.bf16 %v2007_v47, %v2005_v62 }
 0x43b   : > { %3143 = vmatmul.msk.bf16.gmra.mxu3 %vm515_vm2, %v3405_v34  ;;  %3147 = vmatmul.msk.bf16.gmra.mxu0 %vm387_vm1, %v3940_v5 }
 0x43e   : > { %3308 = vmatmul.msk.bf16.gmra.mxu2 %vm387_vm1, %v3949_v63 }
 0x441   : > { %v2010_v54 = vpop.f32.mrf.mxu2 }
 0x449   : > { %v2012_v36 = vpop.f32.mrf.mxu2 }
 0x44a   : > { %v2018_v20 = vpack.c.bf16 %v2012_v36, %v2010_v54 }
 0x44b   : > { %3144 = vmatmul.msk.bf16.gmra.mxu3 %vm515_vm2, %v3406_v17  ;;  %3148 = vmatmul.msk.bf16.gmra.mxu0 %vm387_vm1, %v3949_v63 }
 0x44c   : > { %2064 = vmatpush.bf16.msra.mxu3 %v2018_v20 }
 0x450   : > { %2065 = vmatpush.bf16.msra.mxu3 %v2017_v52 }
 0x451   : > { %v2217_v22 = vpop.f32.mrf.mxu2 }
 0x454   : > { %2066 = vmatpush.bf16.msra.mxu3 %v2016_v53 }
 0x458   : > { %v1683_v35 = vpop.f32.mrf.mxu0  ;;  %v1744_v6 = vpop.f32.mrf.mxu1  ;;  %2067 = vmatpush.bf16.msra.mxu3 %v2015_v33 }
 0x459   : > { %v1745_v7 = vadd.f32 %v1744_v6, %v1683_v35  ;;  %v2219_v25 = vpop.f32.mrf.mxu2  ;;  %v3413_v35 = vld [vmem:[%s3541_s13 + $0x90] sm:$0xff] }
 0x45a   : > { %v2237_v0 = vpack.c.bf16 %v2219_v25, %v2217_v22 }
 0x45b   : > { %3209 = vmatmul.msk.bf16.vlgmr.msrb.gmra.mxu0 %vm387_vm1, %v3915_v21  ;;  %3205 = vmatmul.msk.bf16.vlgmr.msra.gmra.mxu3 %vm515_vm2, %v3411_v11 }
 0x460   : > { %v4031_v51 = vpop.f32.mrf.mxu0  ;;  %v4033_v38 = vpop.f32.mrf.mxu1 }
 0x461   : > { %v2222_v8 = vpop.f32.mrf.mxu2 }
 0x468   : > { %v1688_v13 = vpop.f32.mrf.mxu0  ;;  %v1749_v40 = vpop.f32.mrf.mxu1 }
 0x469   : > { %v1750_v23 = vadd.f32 %v1749_v40, %v1688_v13  ;;  %v2224_v31 = vpop.f32.mrf.mxu2  ;;  %v3407_v13 = vld [vmem:[%s3541_s13 + $0x60] sm:$0xff] }
 0x46a   : > { %v2238_v15 = vpack.c.bf16 %v2224_v31, %v2222_v8 }
 0x46b   : > { %3210 = vmatmul.msk.bf16.gmra.mxu0 %vm387_vm1, %v3928_v58 }
 0x470   : > { %v4037_v32 = vpop.f32.mrf.mxu0  ;;  %v4039_v48 = vpop.f32.mrf.mxu1 }
 0x471   : > { %v2227_v30 = vpop.f32.mrf.mxu2 }
 0x478   : > { %v1693_v49 = vpop.f32.mrf.mxu0  ;;  %v1754_v57 = vpop.f32.mrf.mxu1 }
 0x479   : > { %v1755_v42 = vadd.f32 %v1754_v57, %v1693_v49  ;;  %v2229_v37 = vpop.f32.mrf.mxu2  ;;  %v3419_v57 = vld [vmem:[%s3541_s13 + $0xc0] sm:$0xff] }
 0x47a   : > { %v2239_v26 = vpack.c.bf16 %v2229_v37, %v2227_v30  ;;  %v3408_v30 = vld [vmem:[%s3541_s13 + $0x68] sm:$0xff]  ;;  %v3409_v37 = vld [vmem:[%s3541_s13 + $0x70] sm:$0xff] }
 0x47b   : > { %3211 = vmatmul.msk.bf16.gmra.mxu0 %vm387_vm1, %v3940_v5 }
 0x480   : > { %v4043_v60 = vpop.f32.mrf.mxu0  ;;  %v4045_v43 = vpop.f32.mrf.mxu1 }
 0x481   : > { %v2232_v50 = vpop.f32.mrf.mxu2 }
 0x488   : > { %v1698_v1 = vpop.f32.mrf.mxu0  ;;  %v1759_v12 = vpop.f32.mrf.mxu1 }
 0x489   : > { %v1760_v41 = vadd.f32 %v1759_v12, %v1698_v1  ;;  %v2234_v39 = vpop.f32.mrf.mxu2  ;;  %v3420_v1 = vld [vmem:[%s3541_s13 + $0xc8] sm:$0xff] }
 0x48a   : > { %v2240_v61 = vpack.c.bf16 %v2234_v39, %v2232_v50 }
 0x48b   : > { %3212 = vmatmul.msk.bf16.gmra.mxu0 %vm387_vm1, %v3949_v63 }
 0x48c   : > { %2286 = vmatpush.bf16.msrb.mxu3 %v2240_v61 }
 0x490   : > { %v4049_v4 = vpop.f32.mrf.mxu0  ;;  %2287 = vmatpush.bf16.msrb.mxu3 %v2239_v26  ;;  %v3421_v26 = vld [vmem:[%s3541_s13 + $0xd0] sm:$0xff] }
 0x491   : > { %v2439_v59 = vpop.f32.mrf.mxu2 }
 0x494   : > { %2288 = vmatpush.bf16.msrb.mxu3 %v2238_v15 }
 0x498   : > { %v1884_v2 = vpop.f32.mrf.mxu0  ;;  %2289 = vmatpush.bf16.msrb.mxu3 %v2237_v0 }
 0x499   : > { %v2441_v10 = vpop.f32.mrf.mxu2 }
 0x49b   : > { %3273 = vmatmul.msk.bf16.vlgmr.msra.gmra.mxu0 %vm387_vm1, %v3915_v21 }
 0x49e   : > { %v1847_v55 = vpop.f32.mrf.mxu3 }
 0x49f   : > { %v4053_v44 = vadd.f32 %v1847_v55, %v1745_v7  ;;  %v2459_v7 = vpack.c.bf16 %v2441_v10, %v2439_v59  ;;  %v3415_v10 = vld [vmem:[%s3541_s13 + $0xa0] sm:$0xff] }
 0x4a0   : > { %v1886_v27 = vpop.f32.mrf.mxu0 }
 0x4a1   : > { %v2444_v28 = vpop.f32.mrf.mxu2  ;;  %v1904_v8 = vpack.c.bf16 %v1886_v27, %v1884_v2  ;;  %v3422_v27 = vld [vmem:[%s3541_s13 + $0xd8] sm:$0xff] }
 0x4a6   : > { %v4055_v45 = vpop.f32.mrf.mxu3 }
 0x4a8   : > { %v1889_v19 = vpop.f32.mrf.mxu0 }
 0x4a9   : > { %v2446_v29 = vpop.f32.mrf.mxu2 }
 0x4aa   : > { %v2460_v33 = vpack.c.bf16 %v2446_v29, %v2444_v28 }
 0x4ab   : > { %3274 = vmatmul.msk.bf16.gmra.mxu0 %vm387_vm1, %v3928_v58  ;;  %v3412_v58 = vld [vmem:[%s3541_s13 + $0x88] sm:$0xff] }
 0x4ac   : > { %3206 = vmatmul.msk.bf16.gmra.mxu3 %vm515_vm2, %v3412_v58 }
 0x4ae   : > { %v1852_v16 = vpop.f32.mrf.mxu3 }
 0x4af   : > { %v4061_v24 = vadd.f32 %v1852_v16, %v1750_v23  ;;  %v3414_v23 = vld [vmem:[%s3541_s13 + $0x98] sm:$0xff]  ;;  %v3427_v16 = vld [vmem:[%s3541_s13 + $0x100] sm:$0xff] }
 0x4b0   : > { %v1891_v21 = vpop.f32.mrf.mxu0 }
 0x4b1   : > { %v2449_v18 = vpop.f32.mrf.mxu2  ;;  %v1905_v25 = vpack.c.bf16 %v1891_v21, %v1889_v19  ;;  %v3416_v19 = vld [vmem:[%s3541_s13 + $0xa8] sm:$0xff] }
 0x4b6   : > { %v4063_v9 = vpop.f32.mrf.mxu3 }
 0x4b8   : > { %v1894_v14 = vpop.f32.mrf.mxu0 }
 0x4b9   : > { %v2451_v56 = vpop.f32.mrf.mxu2 }
 0x4ba   : > { %v2461_v20 = vpack.c.bf16 %v2451_v56, %v2449_v18 }
 0x4bb   : > { %3275 = vmatmul.msk.bf16.gmra.mxu0 %vm387_vm1, %v3940_v5 }
 0x4bc   : > { %3207 = vmatmul.msk.bf16.gmra.mxu3 %vm515_vm2, %v3413_v35 }
 0x4be   : > { %v1857_v46 = vpop.f32.mrf.mxu3 }
 0x4bf   : > { %v4067_v3 = vadd.f32 %v1857_v46, %v1755_v42 }
 0x4c0   : > { %v1896_v62 = vpop.f32.mrf.mxu0 }
 0x4c1   : > { %v2454_v34 = vpop.f32.mrf.mxu2  ;;  %v1906_v6 = vpack.c.bf16 %v1896_v62, %v1894_v14  ;;  %v3417_v14 = vld [vmem:[%s3541_s13 + $0xb0] sm:$0xff]  ;;  %v3428_v62 = vld [vmem:[%s3541_s13 + $0x108] sm:$0xff] }
 0x4c6   : > { %v4070_v47 = vpop.f32.mrf.mxu3 }
 0x4c8   : > { %v1899_v54 = vpop.f32.mrf.mxu0 }
 0x4c9   : > { %v2456_v17 = vpop.f32.mrf.mxu2 }
 0x4ca   : > { %v2462_v36 = vpack.c.bf16 %v2456_v17, %v2454_v34 }
 0x4cb   : > { %3276 = vmatmul.msk.bf16.gmra.mxu0 %vm387_vm1, %v3949_v63 }
 0x4cc   : > { %2508 = vmatpush.bf16.msra.mxu3 %v2462_v36 }
 0x4cd   : > { %3208 = vmatmul.msk.bf16.gmra.mxu3 %vm515_vm2, %v3414_v23 }
 0x4ce   : > { %v1862_v5 = vpop.f32.mrf.mxu3 }
 0x4cf   : > { %v4075_v52 = vadd.f32 %v1862_v5, %v1760_v41  ;;  %v3410_v41 = vld [vmem:[%s3541_s13 + $0x78] sm:$0xff]  ;;  %v3429_v5 = vld [vmem:[%s3541_s13 + $0x110] sm:$0xff] }
 0x4d0   : > { %v1901_v22 = vpop.f32.mrf.mxu0  ;;  %2509 = vmatpush.bf16.msra.mxu3 %v2461_v20 }
 0x4d1   : > { %v1907_v53 = vpack.c.bf16 %v1901_v22, %v1899_v54  ;;  %v3418_v54 = vld [vmem:[%s3541_s13 + $0xb8] sm:$0xff] }
 0x4d3   : > { %1953 = vmatpush.bf16.msra.mxu1 %v1907_v53  ;;  %v1761_v53 = vpop.f32.mrf.mxu1 }
 0x4d4   : > { %2510 = vmatpush.bf16.msra.mxu3 %v2460_v33 }
 0x4d6   : > { %v4100_v11 = vpop.f32.mrf.mxu3 }
 0x4d7   : > { %1954 = vmatpush.bf16.msra.mxu1 %v1906_v6 }
 0x4d8   : > { %v2106_v63 = vpop.f32.mrf.mxu0  ;;  %2511 = vmatpush.bf16.msra.mxu3 %v2459_v7  ;;  %v3423_v7 = vld [vmem:[%s3541_s13 + $0xe0] sm:$0xff] }
 0x4db   : > { %1955 = vmatpush.bf16.msra.mxu1 %v1905_v25 }
 0x4dd   : > { %3269 = vmatmul.msk.bf16.vlgmr.msrb.gmra.mxu3 %vm515_vm2, %v3419_v57 }
 0x4de   : > { %v2069_v18 = vpop.f32.mrf.mxu3 }
 0x4df   : > { %1956 = vmatpush.bf16.msra.mxu1 %v1904_v8 }
 0x4e0   : > { %v2108_v40 = vpop.f32.mrf.mxu0 }
 0x4e1   : > { %v2126_v2 = vpack.c.bf16 %v2108_v40, %v2106_v63  ;;  %v3430_v40 = vld [vmem:[%s3541_s13 + $0x118] sm:$0xff] }
 0x4e2   : > { %3173 = vmatmul.msk.bf16.vlgmr.msra.gmra.mxu1 %vm515_vm2, %v3407_v13  ;;  %v1747_v13 = vadd.f32 %v4033_v38, %v4031_v51  ;;  %v1752_v51 = vadd.f32 %v4039_v48, %v4037_v32  ;;  %v1757_v32 = vadd.f32 %v4045_v43, %v4043_v60 }
 0x4e4   : > { %v1870_v38 = vadd.f32 %v4063_v9, %v1752_v51  ;;  %v1872_v48 = vadd.f32 %v4070_v47, %v1757_v32  ;;  %v3465_v32 = vld [vmem:[#allocation2 + $0x10] sm:$0xff] }
 0x4e6   : > { %v2071_v46 = vpop.f32.mrf.mxu3 }
 0x4e8   : > { %v2111_v31 = vpop.f32.mrf.mxu0 }
 0x4ed   : > { %3270 = vmatmul.msk.bf16.gmra.mxu3 %vm515_vm2, %v3420_v1 }
 0x4f0   : > { %v2113_v49 = vpop.f32.mrf.mxu0 }
 0x4f1   : > { %v2127_v0 = vpack.c.bf16 %v2113_v49, %v2111_v31  ;;  %v1868_v31 = vadd.f32 %v4055_v45, %v1747_v13  ;;  %v3463_v13 = vld [vmem:[#allocation2] sm:$0xff] }
 0x4f2   : > { %3174 = vmatmul.msk.bf16.gmra.mxu1 %vm515_vm2, %v3408_v30 }
 0x4f8   : > { %v2116_v42 = vpop.f32.mrf.mxu0 }
 0x4fd   : > { %3271 = vmatmul.msk.bf16.gmra.mxu3 %vm515_vm2, %v3421_v26 }
 0x500   : > { %v2118_v50 = vpop.f32.mrf.mxu0 }
 0x501   : > { %v2128_v59 = vpack.c.bf16 %v2118_v50, %v2116_v42  ;;  %v3424_v42 = vld [vmem:[%s3541_s13 + $0xe8] sm:$0xff] }
 0x502   : > { %3175 = vmatmul.msk.bf16.gmra.mxu1 %vm515_vm2, %v3409_v37 }
 0x508   : > { %v2121_v12 = vpop.f32.mrf.mxu0 }
 0x50d   : > { %3272 = vmatmul.msk.bf16.gmra.mxu3 %vm515_vm2, %v3422_v27 }
 0x510   : > { %v2123_v39 = vpop.f32.mrf.mxu0 }
 0x511   : > { %v2129_v61 = vpack.c.bf16 %v2123_v39, %v2121_v12 }
 0x512   : > { %3176 = vmatmul.msk.bf16.gmra.mxu1 %vm515_vm2, %v3410_v41 }
 0x513   : > { %2175 = vmatpush.bf16.msrb.mxu1 %v2129_v61  ;;  %v3425_v61 = vld [vmem:[%s3541_s13 + $0xf0] sm:$0xff] }
 0x517   : > { %2176 = vmatpush.bf16.msrb.mxu1 %v2128_v59 }
 0x518   : > { %v2328_v15 = vpop.f32.mrf.mxu0 }
 0x51b   : > { %2177 = vmatpush.bf16.msrb.mxu1 %v2127_v0 }
 0x51d   : > { %3333 = vmatmul.msk.bf16.vlgmr.msra.gmra.mxu3 %vm515_vm2, %v3427_v16 }
 0x51f   : > { %2178 = vmatpush.bf16.msrb.mxu1 %v2126_v2 }
 0x520   : > { %v2330_v55 = vpop.f32.mrf.mxu0 }
 0x521   : > { %v2348_v6 = vpack.c.bf16 %v2330_v55, %v2328_v15  ;;  %v3426_v55 = vld [vmem:[%s3541_s13 + $0xf8] sm:$0xff] }
 0x522   : > { %3237 = vmatmul.msk.bf16.vlgmr.msrb.gmra.mxu1 %vm515_vm2, %v3415_v10 }
 0x528   : > { %v2333_v28 = vpop.f32.mrf.mxu0 }
 0x52d   : > { %3334 = vmatmul.msk.bf16.gmra.mxu3 %vm515_vm2, %v3428_v62 }
 0x52f   : > { %v2074_v58 = vpop.f32.mrf.mxu3 }
 0x530   : > { %v2335_v29 = vpop.f32.mrf.mxu0 }
 0x531   : > { %v2349_v33 = vpack.c.bf16 %v2335_v29, %v2333_v28 }
 0x532   : > { %3238 = vmatmul.msk.bf16.gmra.mxu1 %vm515_vm2, %v3416_v19  ;;  %v1762_v19 = vadd.f32 %v1761_v53, %v4049_v4 }
 0x534   : > { %v1874_v29 = vadd.f32 %v4100_v11, %v1762_v19 }
 0x537   : > { %v2076_v20 = vpop.f32.mrf.mxu3 }
 0x538   : > { %v2338_v21 = vpop.f32.mrf.mxu0 }
 0x53d   : > { %3335 = vmatmul.msk.bf16.gmra.mxu3 %vm515_vm2, %v3429_v5 }
 0x53f   : > { %v2079_v35 = vpop.f32.mrf.mxu3 }
 0x540   : > { %v2340_v56 = vpop.f32.mrf.mxu0 }
 0x541   : > { %v2350_v22 = vpack.c.bf16 %v2340_v56, %v2338_v21 }
 0x542   : > { %3239 = vmatmul.msk.bf16.gmra.mxu1 %vm515_vm2, %v3417_v14 }
 0x547   : > { %v2081_v23 = vpop.f32.mrf.mxu3 }
 0x548   : > { %v2343_v34 = vpop.f32.mrf.mxu0 }
 0x54d   : > { %3336 = vmatmul.msk.bf16.gmra.mxu3 %vm515_vm2, %v3430_v40 }
 0x550   : > { %v2345_v17 = vpop.f32.mrf.mxu0  ;;  %v2084_v50 = vpop.f32.mrf.mxu3 }
 0x551   : > { %v2351_v36 = vpack.c.bf16 %v2345_v17, %v2343_v34 }
 0x552   : > { %3240 = vmatmul.msk.bf16.gmra.mxu1 %vm515_vm2, %v3418_v54 }
 0x553   : > { %2397 = vmatpush.bf16.msra.mxu1 %v2351_v36 }
 0x557   : > { %2398 = vmatpush.bf16.msra.mxu1 %v2350_v22 }
 0x558   : > { %v2086_v41 = vpop.f32.mrf.mxu3 }
 0x55b   : > { %2399 = vmatpush.bf16.msra.mxu1 %v2349_v33 }
 0x55f   : > { %v1958_v63 = vpop.f32.mrf.mxu1  ;;  %2400 = vmatpush.bf16.msra.mxu1 %v2348_v6 }
 0x560   : > { %v1978_v25 = vadd.f32 %v1958_v63, %v4053_v44  ;;  %v2291_v15 = vpop.f32.mrf.mxu3 }
 0x562   : > { %v2089_v8 = vadd.f32 %v2069_v18, %v1978_v25  ;;  %3301 = vmatmul.msk.bf16.vlgmr.msra.gmra.mxu1 %vm515_vm2, %v3423_v7  ;;  %v2552_v7 = vpop.permute.xlu2 %2551 }
 0x567   : > { %v1960_v30 = vpop.f32.mrf.mxu1 }
 0x568   : > { %v1979_v49 = vadd.f32 %v1960_v30, %v1868_v31  ;;  %v2293_v10 = vpop.f32.mrf.mxu3 }
 0x56a   : > { %v2090_v57 = vadd.f32 %v2071_v46, %v1979_v49 }
 0x56f   : > { %v1963_v37 = vpop.f32.mrf.mxu1 }
 0x570   : > { %v1980_v44 = vadd.f32 %v1963_v37, %v4061_v24  ;;  %v2296_v43 = vpop.f32.mrf.mxu3 }
 0x572   : > { %v4123_v1 = vadd.f32 %v2074_v58, %v1980_v44  ;;  %3302 = vmatmul.msk.bf16.gmra.mxu1 %vm515_vm2, %v3424_v42  ;;  %v2557_v42 = vpop.permute.xlu0 %2556  ;;  %v3464_v44 = vld [vmem:[#allocation2 + $0x8] sm:$0xff] }
 0x577   : > { %v1965_v45 = vpop.f32.mrf.mxu1 }
 0x578   : > { %v1981_v12 = vadd.f32 %v1965_v45, %v1870_v38  ;;  %v2298_v18 = vpop.f32.mrf.mxu3 }
 0x57a   : > { %v4129_v39 = vadd.f32 %v2076_v20, %v1981_v12 }
 0x57f   : > { %v1968_v26 = vpop.f32.mrf.mxu1 }
 0x580   : > { %v1982_v59 = vadd.f32 %v1968_v26, %v4067_v3  ;;  %v2301_v56 = vpop.f32.mrf.mxu3  ;;  %v2562_v26 = vpop.permute.xlu1 %2561 }
 0x582   : > { %v4133_v24 = vadd.f32 %v2079_v35, %v1982_v59  ;;  %3303 = vmatmul.msk.bf16.gmra.mxu1 %vm515_vm2, %v3425_v61 }
 0x587   : > { %v1970_v9 = vpop.f32.mrf.mxu1 }
 0x588   : > { %v1983_v0 = vadd.f32 %v1970_v9, %v1872_v48  ;;  %v4150_v62 = vpop.f32.mrf.mxu3 }
 0x58a   : > { %v4139_v2 = vadd.f32 %v2081_v23, %v1983_v0 }
 0x58f   : > { %v1973_v27 = vpop.f32.mrf.mxu1 }
 0x590   : > { %v1984_v28 = vadd.f32 %v1973_v27, %v4075_v52  ;;  %v4152_v58 = vpop.f32.mrf.mxu3  ;;  %v2567_v27 = vpop.permute.xlu2 %2566 }
 0x592   : > { %v4143_v3 = vadd.f32 %v2084_v50, %v1984_v28  ;;  %3304 = vmatmul.msk.bf16.gmra.mxu1 %vm515_vm2, %v3426_v55 }
 0x597   : > { %v1975_v60 = vpop.f32.mrf.mxu1 }
 0x598   : > { %v1985_v47 = vadd.f32 %v1975_v60, %v1874_v29  ;;  %v4154_v4 = vpop.f32.mrf.mxu3  ;;  %v3466_v60 = vld [vmem:[#allocation2 + $0x18] sm:$0xff] }
 0x59a   : > { %v4148_v16 = vadd.f32 %v2086_v41, %v1985_v47 }
 0x59f   : > { %v2180_v21 = vpop.f32.mrf.mxu1 }
 0x5a0   : > { %v2513_v17 = vpop.f32.mrf.mxu3  ;;  %v2200_v20 = vadd.f32 %v2180_v21, %v2089_v8 }
 0x5a2   : > { %v2311_v22 = vadd.f32 %v2291_v15, %v2200_v20 }
 0x5a7   : > { %v2182_v14 = vpop.f32.mrf.mxu1 }
 0x5a8   : > { %v2515_v5 = vpop.f32.mrf.mxu3  ;;  %v2201_v35 = vadd.f32 %v2182_v14, %v2090_v57 }
 0x5aa   : > { %v2312_v25 = vadd.f32 %v2293_v10, %v2201_v35 }
 0x5af   : > { %v2185_v46 = vpop.f32.mrf.mxu1 }
 0x5b0   : > { %v2518_v31 = vpop.f32.mrf.mxu3  ;;  %v2202_v8 = vadd.f32 %v2185_v46, %v4123_v1  ;;  %v2572_v46 = vpop.permute.xlu0 %2571 }
 0x5b2   : > { %v2313_v50 = vadd.f32 %v2296_v43, %v2202_v8 }
 0x5b7   : > { %v2187_v52 = vpop.f32.mrf.mxu1 }
 0x5b8   : > { %v2520_v41 = vpop.f32.mrf.mxu3  ;;  %v2203_v61 = vadd.f32 %v2187_v52, %v4129_v39 }
 0x5ba   : > { %v2314_v15 = vadd.f32 %v2298_v18, %v2203_v61 }
 0x5bf   : > { %v2190_v34 = vpop.f32.mrf.mxu1 }
 0x5c0   : > { %v2204_v55 = vadd.f32 %v2190_v34, %v4133_v24  ;;  %v2523_v28 = vpop.f32.mrf.mxu3 }
 0x5c2   : > { %v2315_v29 = vadd.f32 %v2301_v56, %v2204_v55 }
 0x5c7   : > { %v2192_v54 = vpop.f32.mrf.mxu1 }
 0x5c8   : > { %v2205_v14 = vadd.f32 %v2192_v54, %v4139_v2  ;;  %v2525_v34 = vpop.f32.mrf.mxu3 }
 0x5ca   : > { %v2316_v56 = vadd.f32 %v4150_v62, %v2205_v14 }
 0x5cf   : > { %v4156_v11 = vpop.f32.mrf.mxu1 }
 0x5d0   : > { %v2206_v2 = vadd.f32 %v4156_v11, %v4143_v3 }
 0x5d2   : > { %v2317_v62 = vadd.f32 %v4152_v58, %v2206_v2 }
 0x5d7   : > { %v4158_v36 = vpop.f32.mrf.mxu1 }
 0x5d8   : > { %v2207_v3 = vadd.f32 %v4158_v36, %v4148_v16  ;;  %v2587_v36 = vpop.permute.xlu0 %2586 }
 0x5da   : > { %v2318_v58 = vadd.f32 %v4154_v4, %v2207_v3 }
 0x5df   : > { %v2402_v53 = vpop.f32.mrf.mxu1 }
 0x5e0   : > { %v2422_v33 = vadd.f32 %v2402_v53, %v2311_v22 }
 0x5e2   : > { %v2533_v6 = vadd.f32 %v2513_v17, %v2422_v33  ;;  %v3467_v17 = vld [vmem:[#allocation2 + $0x20] sm:$0xff]  ;;  %v2577_v33 = vpop.permute.xlu1 %2576 }
 0x5e4   : > { %v2589_v63 = vadd.f32 %v2552_v7, %v2533_v6  ;;  %v3468_v6 = vld [vmem:[#allocation2 + $0x28] sm:$0xff] }
 0x5e6   : > { %v2597_v40 = vadd.f32 %v3463_v13, %v2589_v63 }
 0x5e7   : > { %v2404_v23 = vpop.f32.mrf.mxu1 }
 0x5e8   : > { %2605 = vst.msk [vmem:[#allocation2] sm:$0xff] %vm387_vm1, %v2597_v40  ;;  %v2613_v30 = vpack.c.bf16 %v2597_v40, %v2597_v40  ;;  %v2423_v49 = vadd.f32 %v2404_v23, %v2312_v25  ;;  %v2528_v25 = vpop.f32.mrf.mxu3  ;;  %v2582_v23 = vpop.permute.xlu2 %2581 }
 0x5ea   : > { %2622 = vst.msk [vmem:[%s4220_s6] sm:$0xf] %vm2621_vm3, %v2613_v30  ;;  %v2534_v57 = vadd.f32 %v2515_v5, %v2423_v49  ;;  %v3469_v30 = vld [vmem:[#allocation2 + $0x30] sm:$0xff] }
 0x5ec   : > { %v2590_v37 = vadd.f32 %v2557_v42, %v2534_v57 }
 0x5ee   : > { %v2598_v51 = vadd.f32 %v3464_v44, %v2590_v37  ;;  %v3470_v44 = vld [vmem:[#allocation2 + $0x38] sm:$0xff] }
 0x5ef   : > { %v2407_v38 = vpop.f32.mrf.mxu1 }
 0x5f0   : > { %2606 = vst.msk [vmem:[#allocation2 + $0x8] sm:$0xff] %vm387_vm1, %v2598_v51  ;;  %v2614_v45 = vpack.c.bf16 %v2598_v51, %v2598_v51  ;;  %v2424_v12 = vadd.f32 %v2407_v38, %v2313_v50  ;;  %v2530_v37 = vpop.f32.mrf.mxu3 }
 0x5f2   : > { %2623 = vst.msk [vmem:[%s4220_s6 + $0x4] sm:$0xf] %vm2621_vm3, %v2614_v45  ;;  %v2535_v1 = vadd.f32 %v2518_v31, %v2424_v12 }
 0x5f4   : > { %v2591_v59 = vadd.f32 %v2562_v26, %v2535_v1 }
 0x5f6   : > { %v2599_v48 = vadd.f32 %v3465_v32, %v2591_v59 }
 0x5f7   : > { %v2409_v9 = vpop.f32.mrf.mxu1 }
 0x5f8   : > { %2607 = vst.msk [vmem:[#allocation2 + $0x10] sm:$0xff] %vm387_vm1, %v2599_v48  ;;  %v2615_v0 = vpack.c.bf16 %v2599_v48, %v2599_v48  ;;  %v2425_v10 = vadd.f32 %v2409_v9, %v2314_v15 }
 0x5fa   : > { %2624 = vst.msk [vmem:[%s4220_s6 + $0x8] sm:$0xf] %vm2621_vm3, %v2615_v0  ;;  %v2536_v39 = vadd.f32 %v2520_v41, %v2425_v10 }
 0x5fc   : > { %v2592_v19 = vadd.f32 %v2567_v27, %v2536_v39 }
 0x5fe   : > { %v2600_v43 = vadd.f32 %v3466_v60, %v2592_v19 }
 0x5ff   : > { %v2412_v47 = vpop.f32.mrf.mxu1 }
 0x600   : > { %2608 = vst.msk [vmem:[#allocation2 + $0x18] sm:$0xff] %vm387_vm1, %v2600_v43  ;;  %v2616_v21 = vpack.c.bf16 %v2600_v43, %v2600_v43  ;;  %v2426_v18 = vadd.f32 %v2412_v47, %v2315_v29 }
 0x602   : > { %2625 = vst.msk [vmem:[%s4220_s6 + $0xc] sm:$0xf] %vm2621_vm3, %v2616_v21  ;;  %v2537_v24 = vadd.f32 %v2523_v28, %v2426_v18 }
 0x604   : > { %v2593_v52 = vadd.f32 %v2572_v46, %v2537_v24 }
 0x606   : > { %v2601_v20 = vadd.f32 %v3467_v17, %v2593_v52 }
 0x607   : > { %v2414_v5 = vpop.f32.mrf.mxu1 }
 0x608   : > { %2609 = vst.msk [vmem:[#allocation2 + $0x20] sm:$0xff] %vm387_vm1, %v2601_v20  ;;  %v2617_v22 = vpack.c.bf16 %v2601_v20, %v2601_v20  ;;  %v2427_v53 = vadd.f32 %v2414_v5, %v2316_v56 }
 0x60a   : > { %2626 = vst.msk [vmem:[%s4220_s6 + $0x10] sm:$0xf] %vm2621_vm3, %v2617_v22  ;;  %v2538_v54 = vadd.f32 %v2525_v34, %v2427_v53 }
 0x60c   : > { %v2594_v35 = vadd.f32 %v2577_v33, %v2538_v54 }
 0x60e   : > { %v2602_v7 = vadd.f32 %v3468_v6, %v2594_v35 }
 0x60f   : > { %v2417_v63 = vpop.f32.mrf.mxu1 }
 0x610   : > { %2610 = vst.msk [vmem:[#allocation2 + $0x28] sm:$0xff] %vm387_vm1, %v2602_v7  ;;  %v2618_v13 = vpack.c.bf16 %v2602_v7, %v2602_v7  ;;  %v2428_v40 = vadd.f32 %v2417_v63, %v2317_v62 }
 0x612   : > { %2627 = vst.msk [vmem:[%s4220_s6 + $0x14] sm:$0xf] %vm2621_vm3, %v2618_v13  ;;  %v2539_v11 = vadd.f32 %v2528_v25, %v2428_v40 }
 0x614   : > { %v2595_v31 = vadd.f32 %v2582_v23, %v2539_v11 }
 0x616   : > { %v2603_v49 = vadd.f32 %v3469_v30, %v2595_v31 }
 0x617   : > { %v2419_v8 = vpop.f32.mrf.mxu1 }
 0x618   : > { %2611 = vst.msk [vmem:[#allocation2 + $0x30] sm:$0xff] %vm387_vm1, %v2603_v49  ;;  %v2619_v57 = vpack.c.bf16 %v2603_v49, %v2603_v49  ;;  %v2429_v42 = vadd.f32 %v2419_v8, %v2318_v58 }
 0x61a   : > { %2628 = vst.msk [vmem:[%s4220_s6 + $0x18] sm:$0xf] %vm2621_vm3, %v2619_v57  ;;  %v2540_v16 = vadd.f32 %v2530_v37, %v2429_v42 }
 0x61c   : > { %v2596_v50 = vadd.f32 %v2587_v36, %v2540_v16 }
 0x61e   : > { %v2604_v51 = vadd.f32 %v3470_v44, %v2596_v50 }
 0x620   : > { %2612 = vst.msk [vmem:[#allocation2 + $0x38] sm:$0xff] %vm387_vm1, %v2604_v51  ;;  %v2620_v4 = vpack.c.bf16 %v2604_v51, %v2604_v51 }
 0x622   : > { %2629 = vst.msk [vmem:[%s4220_s6 + $0x1c] sm:$0xf] %vm2621_vm3, %v2620_v4 }
 0x623 PF: > { %s16_s21 = sadd.s32 1, %s3477_s21  }
 0x624   : > { %p13_p5 = scmp.ge.s32.totalorder %s16_s21, 8  }
 0x626   :  { %15 = sbr.rel (!%p13_p5) target bundleno = 1 (0x1), region = 99 }

// kernel: _lambda_.21
= control target key start
LH: loop header
LB: loop body
LE: loop exit
PB: predicated region body
PF: predicated region fallthrough
CT: control target
= control target key end

     0   :  { %v757_v8 = vmov 0   ;;  %vm389_vm0 = vcmask 523264   ;;  %s964_s1 = inlined_call_operand.vmem [shape: bf16[576,128], index: 1, kind: input, shape index: {}]   ;;  %s965_s2 = inlined_call_operand.vmem [shape: f32[32,1], index: 2, kind: input, shape index: {}]   ;;  %s966_s0 = inlined_call_operand.vmem [shape: bf16[32,576], index: 0, kind: input, shape index: {}]   ;;  %s967_s3 = inlined_call_operand.vmem [shape: bf16[32,128], index: 3, kind: output, shape index: {}]  }
   0x1   :  { %v710_v0 = vld [vmem:[%s964_s1 + $0x38] sm:$0xff]  ;;  %v709_v4 = vld [vmem:[%s964_s1 + $0x30] sm:$0xff]  ;;  %755 = vset.pattern.permute.xlu0 %v757_v8  ;;  %756 = vset.pattern.permute.xlu1 %v757_v8  ;;  %v708_v9 = vld [vmem:[%s964_s1 + $0x28] sm:$0xff] }
   0x2   :  { %v718_v1 = vld [vmem:[%s964_s1 + $0x78] sm:$0xff]  ;;  %396 = vmatpush.bf16.msra.mxu0 %v710_v0  ;;  %v717_v5 = vld [vmem:[%s964_s1 + $0x70] sm:$0xff]  ;;  %v716_v10 = vld [vmem:[%s964_s1 + $0x68] sm:$0xff] }
   0x3   :  { %v726_v2 = vld [vmem:[%s964_s1 + $0xb8] sm:$0xff]  ;;  %415 = vmatpush.bf16.msra.mxu1 %v718_v1  ;;  %v725_v6 = vld [vmem:[%s964_s1 + $0xb0] sm:$0xff]  ;;  %v724_v11 = vld [vmem:[%s964_s1 + $0xa8] sm:$0xff] }
   0x4   :  { %v734_v3 = vld [vmem:[%s964_s1 + $0xf8] sm:$0xff]  ;;  %434 = vmatpush.bf16.msra.mxu2 %v726_v2  ;;  %v733_v7 = vld [vmem:[%s964_s1 + $0xf0] sm:$0xff]  ;;  %v732_v12 = vld [vmem:[%s964_s1 + $0xe8] sm:$0xff] }
   0x5   :  { %453 = vmatpush.bf16.msra.mxu3 %v734_v3  ;;  %v707_v13 = vld [vmem:[%s964_s1 + $0x20] sm:$0xff]  ;;  %v706_v17 = vld [vmem:[%s964_s1 + $0x18] sm:$0xff]  ;;  %v705_v22 = vld [vmem:[%s964_s1 + $0x10] sm:$0xff] }
   0x6   :  { %397 = vmatpush.bf16.msra.mxu0 %v709_v4  ;;  %v715_v14 = vld [vmem:[%s964_s1 + $0x60] sm:$0xff]  ;;  %v714_v18 = vld [vmem:[%s964_s1 + $0x58] sm:$0xff]  ;;  %v713_v23 = vld [vmem:[%s964_s1 + $0x50] sm:$0xff] }
   0x7   :  { %416 = vmatpush.bf16.msra.mxu1 %v717_v5  ;;  %v723_v15 = vld [vmem:[%s964_s1 + $0xa0] sm:$0xff]  ;;  %v722_v20 = vld [vmem:[%s964_s1 + $0x98] sm:$0xff]  ;;  %v721_v24 = vld [vmem:[%s964_s1 + $0x90] sm:$0xff] }
   0x8   :  { %435 = vmatpush.bf16.msra.mxu2 %v725_v6  ;;  %v731_v16 = vld [vmem:[%s964_s1 + $0xe0] sm:$0xff]  ;;  %v730_v21 = vld [vmem:[%s964_s1 + $0xd8] sm:$0xff]  ;;  %v729_v25 = vld [vmem:[%s964_s1 + $0xd0] sm:$0xff] }
   0x9   :  { %454 = vmatpush.bf16.msra.mxu3 %v733_v7  ;;  %v99_v19 = vld [vmem:[%s965_s2] sm:$0xff]  ;;  %v101_v26 = vld [vmem:[%s965_s2 + $0x10] sm:$0xff]  ;;  %v100_v27 = vld [vmem:[%s965_s2 + $0x8] sm:$0xff] }
   0xa   :  { %398 = vmatpush.bf16.msra.mxu0 %v708_v9  ;;  %105 = vperm.xlu0 %755, %v99_v19   ;;  %v704_v28 = vld [vmem:[%s964_s1 + $0x8] sm:$0xff]  ;;  %v703_v32 = vld [vmem:[%s964_s1] sm:$0xff]  ;;  %v695_v37 = vld [vmem:[%s966_s0 + $0x10] sm:$0xf0] }
   0xb   :  { %417 = vmatpush.bf16.msra.mxu1 %v716_v10  ;;  %115 = vperm.xlu1 %756, %v101_v26   ;;  %v712_v29 = vld [vmem:[%s964_s1 + $0x48] sm:$0xff]  ;;  %v711_v33 = vld [vmem:[%s964_s1 + $0x40] sm:$0xff]  ;;  %v511_v39 = vld [vmem:[%s966_s0 + $0x14] sm:$0xf0] }
   0xc   :  { %436 = vmatpush.bf16.msra.mxu2 %v724_v11  ;;  %v720_v30 = vld [vmem:[%s964_s1 + $0x88] sm:$0xff]  ;;  %v719_v34 = vld [vmem:[%s964_s1 + $0x80] sm:$0xff]  ;;  %v696_v41 = vld [vmem:[%s966_s0 + $0x18] sm:$0xf0] }
   0xd   :  { %455 = vmatpush.bf16.msra.mxu3 %v732_v12  ;;  %v728_v31 = vld [vmem:[%s964_s1 + $0xc8] sm:$0xff]  ;;  %v727_v35 = vld [vmem:[%s964_s1 + $0xc0] sm:$0xff]  ;;  %v738_v44 = vld [vmem:[%s964_s1 + $0x118] sm:$0xff] }
   0xe   :  { %399 = vmatpush.bf16.msra.mxu0 %v707_v13  ;;  %v509_v36 = vld [vmem:[%s966_s0] sm:$0xf]  ;;  %v693_v38 = vld [vmem:[%s966_s0 + $0x4] sm:$0xf]  ;;  %v517_v40 = vld [vmem:[%s966_s0 + $0x8] sm:$0xf] }
   0xf   :  { %418 = vmatpush.bf16.msra.mxu1 %v715_v14  ;;  %v694_v42 = vld [vmem:[%s966_s0 + $0xc] sm:$0xf]  ;;  %v519_v43 = vld [vmem:[%s966_s0 + $0x1c] sm:$0xf0]  ;;  %v510_v45 = vor.u32 %v695_v37, %v509_v36  ;;  %v514_v46 = vor.u32 %v693_v38, %v511_v39  ;;  %v518_v47 = vor.u32 %v696_v41, %v517_v40  ;;  %v737_v49 = vld [vmem:[%s964_s1 + $0x110] sm:$0xff] }
  0x10   :  { %437 = vmatpush.bf16.msra.mxu2 %v723_v15  ;;  %v522_v48 = vor.u32 %v694_v42, %v519_v43  ;;  %v102_v50 = vld [vmem:[%s965_s2 + $0x18] sm:$0xff]  ;;  %v736_v51 = vld [vmem:[%s964_s1 + $0x108] sm:$0xff]  ;;  %v735_v52 = vld [vmem:[%s964_s1 + $0x100] sm:$0xff] }
  0x11   :  { %456 = vmatpush.bf16.msra.mxu3 %v731_v16  ;;  %v529_v53 = vld [vmem:[%s966_s0 + $0x28] sm:$0xf]  ;;  %v700_v54 = vld [vmem:[%s966_s0 + $0x38] sm:$0xf0]  ;;  %v698_v55 = vld [vmem:[%s966_s0 + $0x2c] sm:$0xf] }
  0x12   :  { %400 = vmatpush.bf16.msra.mxu0 %v706_v17  ;;  %110 = vperm.xlu0 %755, %v100_v27   ;;  %v531_v56 = vld [vmem:[%s966_s0 + $0x3c] sm:$0xf0]  ;;  %v537_v57 = vld [vmem:[%s966_s0 + $0x30] sm:$0xf]  ;;  %v701_v58 = vld [vmem:[%s966_s0 + $0x40] sm:$0xf0]  ;;  %v530_v61 = vor.u32 %v700_v54, %v529_v53 }
  0x13   :  { %419 = vmatpush.bf16.msra.mxu1 %v714_v18  ;;  %120 = vperm.xlu1 %756, %v102_v50   ;;  %v699_v59 = vld [vmem:[%s966_s0 + $0x34] sm:$0xf]  ;;  %v539_v60 = vld [vmem:[%s966_s0 + $0x44] sm:$0xf0]  ;;  %v534_v62 = vor.u32 %v698_v55, %v531_v56  ;;  %v538_v63 = vor.u32 %v701_v58, %v537_v57  ;;  %v525_v1 = vld [vmem:[%s966_s0 + $0x10] sm:$0xf] }
  0x14   :  { %438 = vmatpush.bf16.msra.mxu2 %v722_v20  ;;  %v542_v0 = vor.u32 %v699_v59, %v539_v60  ;;  %v697_v2 = vld [vmem:[%s966_s0 + $0x20] sm:$0xf0]  ;;  %v545_v3 = vld [vmem:[%s966_s0 + $0x38] sm:$0xf]  ;;  %v702_v4 = vld [vmem:[%s966_s0 + $0x48] sm:$0xf0] }
  0x15   :  { %457 = vmatpush.bf16.msra.mxu3 %v730_v21  ;;  %v526_v5 = vor.u32 %v697_v2, %v525_v1  ;;  %v546_v6 = vor.u32 %v702_v4, %v545_v3 }
  0x16   :  { %401 = vmatpush.bf16.msra.mxu0 %v705_v22 }
  0x17   :  { %420 = vmatpush.bf16.msra.mxu1 %v713_v23 }
  0x18   :  { %439 = vmatpush.bf16.msra.mxu2 %v721_v24 }
  0x19   :  { %458 = vmatpush.bf16.msra.mxu3 %v729_v25 }
  0x1a   :  { %402 = vmatpush.bf16.msra.mxu0 %v704_v28 }
  0x1b   :  { %421 = vmatpush.bf16.msra.mxu1 %v712_v29 }
  0x1c   :  { %440 = vmatpush.bf16.msra.mxu2 %v720_v30 }
  0x1d   :  { %459 = vmatpush.bf16.msra.mxu3 %v728_v31 }
  0x1e   :  { %403 = vmatpush.bf16.msra.mxu0 %v703_v32 }
  0x1f   :  { %422 = vmatpush.bf16.msra.mxu1 %v711_v33 }
  0x20   :  { %441 = vmatpush.bf16.msra.mxu2 %v719_v34 }
  0x21   :  { %460 = vmatpush.bf16.msra.mxu3 %v727_v35  ;;  %404 = vmatmul.bf16.vlgmr.msra.gmra.mxu0 %v510_v45 }
  0x22   :  { %476 = vmatpush.bf16.msrb.mxu0 %v738_v44  ;;  %423 = vmatmul.bf16.vlgmr.msra.gmra.mxu1 %v514_v46 }
  0x23   :  { %750 = vmatpush.bf16.msrb.mxu1 %v738_v44  ;;  %442 = vmatmul.bf16.vlgmr.msra.gmra.mxu2 %v518_v47 }
  0x24   :  { %461 = vmatmul.bf16.vlgmr.msra.gmra.mxu3 %v522_v48 }
  0x26   :  { %477 = vmatpush.bf16.msrb.mxu0 %v737_v49 }
  0x27   :  { %751 = vmatpush.bf16.msrb.mxu1 %v737_v49 }
  0x2a   :  { %478 = vmatpush.bf16.msrb.mxu0 %v736_v51 }
  0x2b   :  { %752 = vmatpush.bf16.msrb.mxu1 %v736_v51 }
  0x2e   :  { %479 = vmatpush.bf16.msrb.mxu0 %v735_v52 }
  0x2f   :  { %753 = vmatpush.bf16.msrb.mxu1 %v735_v52 }
  0x31   :  { %409 = vmatmul.bf16.gmra.mxu0 %v530_v61 }
  0x32   :  { %428 = vmatmul.bf16.gmra.mxu1 %v534_v62 }
  0x33   :  { %447 = vmatmul.bf16.gmra.mxu2 %v538_v63 }
  0x34   :  { %466 = vmatmul.bf16.gmra.mxu3 %v542_v0 }
  0x41   :  { %691 = vmatmul.msk.bf16.vlgmr.msrb.gmra.mxu0 %vm389_vm0, %v526_v5 }
  0x42   :  { %692 = vmatmul.msk.bf16.vlgmr.msrb.gmra.mxu1 %vm389_vm0, %v546_v6 }
  0x7c   :  { %v106_v13 = vpop.permute.xlu0 %105 }
  0x7d   :  { %v116_v15 = vpop.permute.xlu1 %115 }
  0x84   :  { %v111_v22 = vpop.permute.xlu0 %110 }
  0x85   :  { %v121_v23 = vpop.permute.xlu1 %120 }
  0x9e   :  { %v405_v7 = vpop.f32.mrf.mxu0 }
  0x9f   :  { %v424_v8 = vpop.f32.mrf.mxu1  ;;  %v406_v24 = vadd.f32 %v405_v7, %v106_v13 }
  0xa1   :  { %v425_v29 = vadd.f32 %v424_v8, %v406_v24 }
  0xa6   :  { %v443_v9 = vpop.f32.mrf.mxu2  ;;  %v407_v11 = vpop.f32.mrf.mxu0 }
  0xa7   :  { %v462_v10 = vpop.f32.mrf.mxu3  ;;  %v426_v12 = vpop.f32.mrf.mxu1  ;;  %v408_v27 = vadd.f32 %v407_v11, %v111_v22  ;;  %v444_v34 = vadd.f32 %v443_v9, %v425_v29 }
  0xa9   :  { %v427_v35 = vadd.f32 %v426_v12, %v408_v27  ;;  %v463_v40 = vadd.f32 %v462_v10, %v444_v34 }
  0xae   :  { %v445_v14 = vpop.f32.mrf.mxu2  ;;  %v410_v16 = vpop.f32.mrf.mxu0 }
  0xaf   :  { %v429_v17 = vpop.f32.mrf.mxu1  ;;  %v464_v18 = vpop.f32.mrf.mxu3  ;;  %v411_v25 = vadd.f32 %v410_v16, %v116_v15  ;;  %v446_v38 = vadd.f32 %v445_v14, %v427_v35 }
  0xb1   :  { %v430_v30 = vadd.f32 %v429_v17, %v411_v25  ;;  %v465_v43 = vadd.f32 %v464_v18, %v446_v38 }
  0xb6   :  { %v448_v19 = vpop.f32.mrf.mxu2  ;;  %v412_v20 = vpop.f32.mrf.mxu0 }
  0xb7   :  { %v431_v21 = vpop.f32.mrf.mxu1  ;;  %v467_v26 = vpop.f32.mrf.mxu3  ;;  %v413_v28 = vadd.f32 %v412_v20, %v121_v23  ;;  %v449_v36 = vadd.f32 %v448_v19, %v430_v30 }
  0xb9   :  { %v432_v37 = vadd.f32 %v431_v21, %v413_v28  ;;  %v468_v41 = vadd.f32 %v467_v26, %v449_v36 }
  0xbe   :  { %v450_v31 = vpop.f32.mrf.mxu2  ;;  %v481_v32 = vpop.f32.mrf.mxu0 }
  0xbf   :  { %v486_v33 = vpop.f32.mrf.mxu1  ;;  %v451_v39 = vadd.f32 %v450_v31, %v432_v37  ;;  %v469_v42 = vpop.f32.mrf.mxu3  ;;  %v482_v45 = vadd.f32 %v481_v32, %v463_v40 }
  0xc0   :  { %v487_v46 = vadd.f32 %v486_v33, %v468_v41 }
  0xc1   :  { %v470_v44 = vadd.f32 %v469_v42, %v451_v39  ;;  %v491_v51 = vmax.f32 %v482_v45, 0.0 }
  0xc2   :  { %v493_v52 = vmax.f32 %v487_v46, 0.0 }
  0xc6   :  { %v483_v47 = vpop.f32.mrf.mxu0 }
  0xc7   :  { %v488_v48 = vpop.f32.mrf.mxu1  ;;  %v484_v49 = vadd.f32 %v483_v47, %v465_v43 }
  0xc8   :  { %v489_v50 = vadd.f32 %v488_v48, %v470_v44 }
  0xc9   :  { %v492_v53 = vmax.f32 %v484_v49, 0.0 }
  0xca   :  { %v494_v54 = vmax.f32 %v489_v50, 0.0 }
  0xcb   :  { %v742_v55 = vpack.c.bf16 %v492_v53, %v491_v51 }
  0xcc   :  { %v747_v56 = vpack.c.bf16 %v494_v54, %v493_v52 }
  0xcd   :  { %743 = vst [vmem:[%s967_s3] sm:$0xff] %v742_v55  }
  0xce   :  { %749 = vst [vmem:[%s967_s3 + $0x8] sm:$0xff] %v747_v56  }

// kernel: _lambda_.22
= control target key start
LH: loop header
LB: loop body
LE: loop exit
PB: predicated region body
PF: predicated region fallthrough
CT: control target
= control target key end

     0   :  { %s1075_s12 = smov 0   ;;  %s1077_s13 = smov 0   ;;  %s1319_s0 = inlined_call_operand.vmem [shape: bf16[16,288], index: 0, kind: input, shape index: {}]   ;;  %s1320_s1 = inlined_call_operand.vmem [shape: bf16[288,512], index: 1, kind: input, shape index: {}]   ;;  %s1321_s2 = inlined_call_operand.vmem [shape: f32[16,1], index: 2, kind: input, shape index: {}]   ;;  %s1322_s3 = inlined_call_operand.vmem [shape: bf16[16,512], index: 3, kind: output, shape index: {}]  }
   0x1   :  { %s1079_s14 = smov 0  }
   0x2 LB: > { %s790_s15 = sadd.s32 4294967295, %s1052_s14   ;;  %s1092_s16 = sadd.s32 1, %s1052_s14   ;;  %s1052_s14 = sphi %s1079_s14, %s1326_s14   ;;  %s1048_s13 = sphi %s1077_s13, %s1325_s13   ;;  %s1044_s12 = sphi %s1075_s12, %s1324_s12  }
   0x3   : > { %s38_s17 = ssub.s32 %s1052_s14, %s1092_s16  ;;  %s41_s18 = sadd.s32 1, %s1048_s13 }
   0x4   : > { %p39_p0 = scmp.eq.s32.totalorder %s38_s17, 0  ;;  %p48_p1 = scmp.ne.s32.totalorder %s1048_s13, %s1044_s12 }
   0x5   : > { %p49_p2 = scmp.eq.s32.totalorder %s1052_s14, 0  ;;  %p99_p3 = scmp.eq.s32.totalorder %s790_s15, 1 }
   0x6   : > { %s1103_s19 = scalar_select %p39_p0, %s1048_s13, %s41_s18  }
   0x7   : > { %p50_p4 = por %p49_p2, %p48_p1  ;;  %p1105_p5 = por %p99_p3, %p48_p1 }
   0x8   : > { %p793_p6 = scmp.ge.s32.totalorder %s1052_s14, 2 }
   0xa   : > { %127 = sbr.rel (%p793_p6) target bundleno = 55 (0x37), region = 24 }
   0xf   : > { %130 = sbr.rel (!%p50_p4) target bundleno = 55 (0x37), region = 28  ;;  %s132_s21 = sand.u32 (%p50_p4), 1, %s1048_s13  }
  0x10   : > { %s961_s22 = sshll.u32 (%p50_p4), %s1052_s14, 3  ;;  %s1002_s23 = smul.u32 (%p50_p4), 288, %s132_s21 }
  0x11   : > { %s1115_s26 = scalar_lea.vmem (%p50_p4), %s1320_s1, %s961_s22 }
  0x12   : > { %v236_v0 = vld [vmem:[%s1115_s26] sm:$0xff] (%p50_p4)  ;;  %v238_v1 = vld [vmem:[%s1115_s26 + $0x10] sm:$0xff] (%p50_p4)  ;;  %s1120_s27 = scalar_lea.vmem (%p50_p4), [#allocation2], %s1002_s23 }
  0x13   : > { %v240_v2 = vld [vmem:[%s1115_s26 + $0x20] sm:$0xff] (%p50_p4)  ;;  %237 = vst [vmem:[%s1120_s27] sm:$0xff] (%p50_p4), %v236_v0  ;;  %v242_v3 = vld [vmem:[%s1115_s26 + $0x30] sm:$0xff] (%p50_p4) }
  0x14   : > { %239 = vst [vmem:[%s1120_s27 + $0x8] sm:$0xff] %v238_v1  ;;  %v244_v4 = vld [vmem:[%s1115_s26 + $0x40] sm:$0xff]  ;;  %v246_v5 = vld [vmem:[%s1115_s26 + $0x50] sm:$0xff] }
  0x15   : > { %241 = vst [vmem:[%s1120_s27 + $0x10] sm:$0xff] %v240_v2  ;;  %v248_v6 = vld [vmem:[%s1115_s26 + $0x60] sm:$0xff]  ;;  %v250_v7 = vld [vmem:[%s1115_s26 + $0x70] sm:$0xff] }
  0x16   : > { %243 = vst [vmem:[%s1120_s27 + $0x18] sm:$0xff] %v242_v3  ;;  %v252_v8 = vld [vmem:[%s1115_s26 + $0x80] sm:$0xff]  ;;  %v254_v9 = vld [vmem:[%s1115_s26 + $0x90] sm:$0xff] }
  0x17   : > { %245 = vst [vmem:[%s1120_s27 + $0x20] sm:$0xff] %v244_v4  ;;  %v256_v10 = vld [vmem:[%s1115_s26 + $0xa0] sm:$0xff]  ;;  %v258_v11 = vld [vmem:[%s1115_s26 + $0xb0] sm:$0xff] }
  0x18   : > { %247 = vst [vmem:[%s1120_s27 + $0x28] sm:$0xff] %v246_v5  ;;  %v260_v12 = vld [vmem:[%s1115_s26 + $0xc0] sm:$0xff]  ;;  %v262_v13 = vld [vmem:[%s1115_s26 + $0xd0] sm:$0xff] }
  0x19   : > { %249 = vst [vmem:[%s1120_s27 + $0x30] sm:$0xff] %v248_v6  ;;  %v264_v14 = vld [vmem:[%s1115_s26 + $0xe0] sm:$0xff]  ;;  %v266_v15 = vld [vmem:[%s1115_s26 + $0xf0] sm:$0xff] }
  0x1a   : > { %251 = vst [vmem:[%s1120_s27 + $0x38] sm:$0xff] %v250_v7  ;;  %v268_v16 = vld [vmem:[%s1115_s26 + $0x100] sm:$0xff]  ;;  %v270_v17 = vld [vmem:[%s1115_s26 + $0x110] sm:$0xff] }
  0x1b   : > { %253 = vst [vmem:[%s1120_s27 + $0x40] sm:$0xff] %v252_v8  ;;  %v272_v18 = vld [vmem:[%s1115_s26 + $0x120] sm:$0xff]  ;;  %v274_v19 = vld [vmem:[%s1115_s26 + $0x130] sm:$0xff] }
  0x1c   : > { %255 = vst [vmem:[%s1120_s27 + $0x48] sm:$0xff] %v254_v9  ;;  %v276_v20 = vld [vmem:[%s1115_s26 + $0x140] sm:$0xff]  ;;  %v278_v21 = vld [vmem:[%s1115_s26 + $0x150] sm:$0xff] }
  0x1d   : > { %257 = vst [vmem:[%s1120_s27 + $0x50] sm:$0xff] %v256_v10  ;;  %v280_v22 = vld [vmem:[%s1115_s26 + $0x160] sm:$0xff]  ;;  %v282_v23 = vld [vmem:[%s1115_s26 + $0x170] sm:$0xff] }
  0x1e   : > { %259 = vst [vmem:[%s1120_s27 + $0x58] sm:$0xff] %v258_v11  ;;  %v284_v24 = vld [vmem:[%s1115_s26 + $0x180] sm:$0xff]  ;;  %v286_v25 = vld [vmem:[%s1115_s26 + $0x190] sm:$0xff] }
  0x1f   : > { %261 = vst [vmem:[%s1120_s27 + $0x60] sm:$0xff] %v260_v12  ;;  %v288_v26 = vld [vmem:[%s1115_s26 + $0x1a0] sm:$0xff]  ;;  %v290_v27 = vld [vmem:[%s1115_s26 + $0x1b0] sm:$0xff] }
  0x20   : > { %263 = vst [vmem:[%s1120_s27 + $0x68] sm:$0xff] %v262_v13  ;;  %v292_v28 = vld [vmem:[%s1115_s26 + $0x1c0] sm:$0xff]  ;;  %v294_v29 = vld [vmem:[%s1115_s26 + $0x1d0] sm:$0xff] }
  0x21   : > { %265 = vst [vmem:[%s1120_s27 + $0x70] sm:$0xff] %v264_v14  ;;  %v296_v30 = vld [vmem:[%s1115_s26 + $0x1e0] sm:$0xff]  ;;  %v298_v31 = vld [vmem:[%s1115_s26 + $0x1f0] sm:$0xff] }
  0x22   : > { %267 = vst [vmem:[%s1120_s27 + $0x78] sm:$0xff] %v266_v15  ;;  %v300_v32 = vld [vmem:[%s1115_s26 + $0x200] sm:$0xff]  ;;  %v302_v33 = vld [vmem:[%s1115_s26 + $0x210] sm:$0xff] }
  0x23   : > { %269 = vst [vmem:[%s1120_s27 + $0x80] sm:$0xff] %v268_v16  ;;  %v304_v34 = vld [vmem:[%s1115_s26 + $0x220] sm:$0xff]  ;;  %v306_v35 = vld [vmem:[%s1115_s26 + $0x230] sm:$0xff] }
  0x24   : > { %271 = vst [vmem:[%s1120_s27 + $0x88] sm:$0xff] %v270_v17 }
  0x25   : > { %273 = vst [vmem:[%s1120_s27 + $0x90] sm:$0xff] %v272_v18 }
  0x26   : > { %275 = vst [vmem:[%s1120_s27 + $0x98] sm:$0xff] %v274_v19 }
  0x27   : > { %277 = vst [vmem:[%s1120_s27 + $0xa0] sm:$0xff] %v276_v20 }
  0x28   : > { %279 = vst [vmem:[%s1120_s27 + $0xa8] sm:$0xff] %v278_v21 }
  0x29   : > { %281 = vst [vmem:[%s1120_s27 + $0xb0] sm:$0xff] %v280_v22 }
  0x2a   : > { %283 = vst [vmem:[%s1120_s27 + $0xb8] sm:$0xff] %v282_v23 }
  0x2b   : > { %285 = vst [vmem:[%s1120_s27 + $0xc0] sm:$0xff] %v284_v24 }
  0x2c   : > { %287 = vst [vmem:[%s1120_s27 + $0xc8] sm:$0xff] %v286_v25 }
  0x2d   : > { %289 = vst [vmem:[%s1120_s27 + $0xd0] sm:$0xff] %v288_v26 }
  0x2e   : > { %291 = vst [vmem:[%s1120_s27 + $0xd8] sm:$0xff] %v290_v27 }
  0x2f   : > { %293 = vst [vmem:[%s1120_s27 + $0xe0] sm:$0xff] %v292_v28 }
  0x30   : > { %295 = vst [vmem:[%s1120_s27 + $0xe8] sm:$0xff] %v294_v29 }
  0x31   : > { %297 = vst [vmem:[%s1120_s27 + $0xf0] sm:$0xff] %v296_v30 }
  0x32   : > { %299 = vst [vmem:[%s1120_s27 + $0xf8] sm:$0xff] %v298_v31 }
  0x33   : > { %301 = vst [vmem:[%s1120_s27 + $0x100] sm:$0xff] %v300_v32 }
  0x34   : > { %303 = vst [vmem:[%s1120_s27 + $0x108] sm:$0xff] %v302_v33 }
  0x35   : > { %305 = vst [vmem:[%s1120_s27 + $0x110] sm:$0xff] %v304_v34 }
  0x36   : > { %307 = vst [vmem:[%s1120_s27 + $0x118] sm:$0xff] %v306_v35 }
  0x37 PF: > { %p796_p7 = scmp.ge.s32.totalorder %s1052_s14, 1  ;;  %p312_p8 = scmp.lt.s32.totalorder %s1052_s14, 3 }
  0x39   : > { %p313_p9 = pnand %p796_p7, %p312_p8 }
  0x3a   : > { %s319_s28 = sand.u32 (!%p313_p9), 1, %s1044_s12  }
  0x3b   : > { %316 = sbr.rel (%p313_p9) target bundleno = 264 (0x108), region = 66  ;;  %s797_s27 = sshll.u32 (!%p313_p9), %s319_s28, 4 }
  0x3c   : > { %s1003_s29 = smul.u32 (!%p313_p9), 288, %s319_s28 }
  0x3e   : > { %s1196_s30 = scalar_lea.vmem (!%p313_p9), [#allocation2], %s1003_s29  ;;  %s340_s29 = scalar_lea.vmem (!%p313_p9), [#allocation3], %s797_s27 }
  0x40   : > { %v868_v36 = vld [vmem:[%s1196_s30 + $0x70] sm:$0xf]  ;;  %v980_v37 = vld [vmem:[%s1196_s30 + $0x74] sm:$0xf0]  ;;  %vm591_vm0 = vcmask 261120   ;;  %s1001_s12 = sshll.u32 (%p1105_p5), %s790_s15, 3 }
  0x41   : > { %v948_v38 = vld [vmem:[%s1196_s30 + $0x110] sm:$0xf]  ;;  %v869_v39 = vor.u32 %v980_v37, %v868_v36  ;;  %v1000_v40 = vld [vmem:[%s1196_s30 + $0x114] sm:$0xf0]  ;;  %v979_v41 = vld [vmem:[%s1196_s30 + $0x74] sm:$0xf]  ;;  %s696_s4 = scalar_lea.vmem (%p1105_p5), %s1322_s3, %s1001_s12 }
  0x42   : > { %v870_v42 = vld [vmem:[%s1196_s30 + $0x78] sm:$0xf0]  ;;  %v949_v43 = vor.u32 %v1000_v40, %v948_v38  ;;  %v932_v45 = vld [vmem:[%s1196_s30 + $0xf0] sm:$0xf]  ;;  %v996_v46 = vld [vmem:[%s1196_s30 + $0xf4] sm:$0xf0] }
  0x43   : > { %v873_v44 = vor.u32 %v979_v41, %v870_v42  ;;  %v860_v47 = vld [vmem:[%s1196_s30 + $0x60] sm:$0xf]  ;;  %v808_v48 = vld [vmem:[%s1319_s0 + $0x8] sm:$0xf]  ;;  %v964_v49 = vld [vmem:[%s1319_s0 + $0x10] sm:$0xf0]  ;;  %595 = vmatpush.bf16.msra.mxu0 %v869_v39  ;;  %v933_v50 = vor.u32 %v996_v46, %v932_v45 }
  0x44   : > { %v978_v51 = vld [vmem:[%s1196_s30 + $0x64] sm:$0xf0]  ;;  %v940_v52 = vld [vmem:[%s1196_s30 + $0x100] sm:$0xf]  ;;  %629 = vmatpush.bf16.msra.mxu2 %v949_v43  ;;  %v977_v56 = vld [vmem:[%s1196_s30 + $0x64] sm:$0xf]  ;;  %v1228_v8 = vor.u32 %v964_v49, %v808_v48 }
  0x45   : > { %v998_v53 = vld [vmem:[%s1196_s30 + $0x104] sm:$0xf0]  ;;  %637 = vmatpush.bf16.msra.mxu3 %v873_v44  ;;  %v861_v54 = vor.u32 %v978_v51, %v860_v47  ;;  %v862_v57 = vld [vmem:[%s1196_s30 + $0x68] sm:$0xf0]  ;;  %v995_v58 = vld [vmem:[%s1196_s30 + $0xf4] sm:$0xf]  ;;  %609 = vmatpush.bf16.msra.mxu1 %v933_v50 }
  0x46   : > { %v941_v55 = vor.u32 %v998_v53, %v940_v52  ;;  %v865_v59 = vor.u32 %v977_v56, %v862_v57  ;;  %v934_v60 = vld [vmem:[%s1196_s30 + $0xf8] sm:$0xf0]  ;;  %v924_v61 = vld [vmem:[%s1196_s30 + $0xe0] sm:$0xf]  ;;  %v994_v62 = vld [vmem:[%s1196_s30 + $0xe4] sm:$0xf0] }
  0x47   : > { %v937_v63 = vor.u32 %v995_v58, %v934_v60  ;;  %v925_v0 = vor.u32 %v994_v62, %v924_v61  ;;  %v852_v1 = vld [vmem:[%s1196_s30 + $0x50] sm:$0xf]  ;;  %v976_v2 = vld [vmem:[%s1196_s30 + $0x54] sm:$0xf0]  ;;  %v975_v3 = vld [vmem:[%s1196_s30 + $0x54] sm:$0xf]  ;;  %596 = vmatpush.bf16.msra.mxu0 %v861_v54 }
  0x48   : > { %v853_v4 = vor.u32 %v976_v2, %v852_v1  ;;  %v854_v5 = vld [vmem:[%s1196_s30 + $0x58] sm:$0xf0]  ;;  %v993_v6 = vld [vmem:[%s1196_s30 + $0xe4] sm:$0xf]  ;;  %v926_v7 = vld [vmem:[%s1196_s30 + $0xe8] sm:$0xf0]  ;;  %630 = vmatpush.bf16.msra.mxu2 %v941_v55 }
  0x49   : > { %638 = vmatpush.bf16.msra.mxu3 %v865_v59  ;;  %v857_v9 = vor.u32 %v975_v3, %v854_v5  ;;  %v916_v10 = vld [vmem:[%s1196_s30 + $0xd0] sm:$0xf]  ;;  %v992_v11 = vld [vmem:[%s1196_s30 + $0xd4] sm:$0xf0]  ;;  %v844_v12 = vld [vmem:[%s1196_s30 + $0x40] sm:$0xf]  ;;  %610 = vmatpush.bf16.msra.mxu1 %v925_v0  ;;  %v929_v13 = vor.u32 %v993_v6, %v926_v7 }
  0x4a   : > { %v917_v14 = vor.u32 %v992_v11, %v916_v10  ;;  %v974_v15 = vld [vmem:[%s1196_s30 + $0x44] sm:$0xf0]  ;;  %v973_v16 = vld [vmem:[%s1196_s30 + $0x44] sm:$0xf]  ;;  %v846_v17 = vld [vmem:[%s1196_s30 + $0x48] sm:$0xf0] }
  0x4b   : > { %v991_v18 = vld [vmem:[%s1196_s30 + $0xd4] sm:$0xf]  ;;  %v918_v19 = vld [vmem:[%s1196_s30 + $0xd8] sm:$0xf0]  ;;  %v908_v20 = vld [vmem:[%s1196_s30 + $0xc0] sm:$0xf]  ;;  %597 = vmatpush.bf16.msra.mxu0 %v853_v4  ;;  %v845_v21 = vor.u32 %v974_v15, %v844_v12  ;;  %954 = vmatmul.msk.bf16.vlgmr.msra.gmra.mxu2 %vm591_vm0, %v1228_v8  ;;  %v849_v23 = vor.u32 %v973_v16, %v846_v17 }
  0x4c   : > { %651 = vmatpush.bf16.msrb.mxu2 %v937_v63  ;;  %v990_v22 = vld [vmem:[%s1196_s30 + $0xc4] sm:$0xf0]  ;;  %v836_v24 = vld [vmem:[%s1196_s30 + $0x30] sm:$0xf]  ;;  %v972_v25 = vld [vmem:[%s1196_s30 + $0x34] sm:$0xf0]  ;;  %v921_v26 = vor.u32 %v991_v18, %v918_v19 }
  0x4d   : > { %639 = vmatpush.bf16.msra.mxu3 %v857_v9  ;;  %611 = vmatpush.bf16.msra.mxu1 %v917_v14  ;;  %v909_v27 = vor.u32 %v990_v22, %v908_v20  ;;  %v971_v28 = vld [vmem:[%s1196_s30 + $0x34] sm:$0xf]  ;;  %v838_v29 = vld [vmem:[%s1196_s30 + $0x38] sm:$0xf0]  ;;  %v989_v30 = vld [vmem:[%s1196_s30 + $0xc4] sm:$0xf]  ;;  %v837_v34 = vor.u32 %v972_v25, %v836_v24 }
  0x4e   : > { %v910_v31 = vld [vmem:[%s1196_s30 + $0xc8] sm:$0xf0]  ;;  %v900_v32 = vld [vmem:[%s1196_s30 + $0xb0] sm:$0xf]  ;;  %v988_v33 = vld [vmem:[%s1196_s30 + $0xb4] sm:$0xf0]  ;;  %v841_v35 = vor.u32 %v971_v28, %v838_v29 }
  0x4f   : > { %598 = vmatpush.bf16.msra.mxu0 %v845_v21  ;;  %v828_v36 = vld [vmem:[%s1196_s30 + $0x20] sm:$0xf]  ;;  %v970_v37 = vld [vmem:[%s1196_s30 + $0x24] sm:$0xf0]  ;;  %v913_v38 = vor.u32 %v989_v30, %v910_v31  ;;  %v901_v39 = vor.u32 %v988_v33, %v900_v32  ;;  %v969_v40 = vld [vmem:[%s1196_s30 + $0x24] sm:$0xf] }
  0x50   : > { %652 = vmatpush.bf16.msrb.mxu2 %v929_v13  ;;  %v830_v41 = vld [vmem:[%s1196_s30 + $0x28] sm:$0xf0]  ;;  %v987_v42 = vld [vmem:[%s1196_s30 + $0xb4] sm:$0xf]  ;;  %v902_v43 = vld [vmem:[%s1196_s30 + $0xb8] sm:$0xf0]  ;;  %v829_v46 = vor.u32 %v970_v37, %v828_v36 }
  0x51   : > { %640 = vmatpush.bf16.msra.mxu3 %v849_v23  ;;  %612 = vmatpush.bf16.msra.mxu1 %v909_v27  ;;  %v892_v44 = vld [vmem:[%s1196_s30 + $0xa0] sm:$0xf]  ;;  %v986_v45 = vld [vmem:[%s1196_s30 + $0xa4] sm:$0xf0]  ;;  %v833_v47 = vor.u32 %v969_v40, %v830_v41  ;;  %v820_v48 = vld [vmem:[%s1196_s30 + $0x10] sm:$0xf]  ;;  %v905_v50 = vor.u32 %v987_v42, %v902_v43 }
  0x52   : > { %v968_v49 = vld [vmem:[%s1196_s30 + $0x14] sm:$0xf0]  ;;  %v893_v51 = vor.u32 %v986_v45, %v892_v44  ;;  %v967_v52 = vld [vmem:[%s1196_s30 + $0x14] sm:$0xf]  ;;  %v822_v53 = vld [vmem:[%s1196_s30 + $0x18] sm:$0xf0] }
  0x53   : > { %599 = vmatpush.bf16.msra.mxu0 %v837_v34  ;;  %v985_v54 = vld [vmem:[%s1196_s30 + $0xa4] sm:$0xf]  ;;  %v894_v55 = vld [vmem:[%s1196_s30 + $0xa8] sm:$0xf0]  ;;  %v884_v56 = vld [vmem:[%s1196_s30 + $0x90] sm:$0xf]  ;;  %v821_v58 = vor.u32 %v968_v49, %v820_v48  ;;  %v825_v61 = vor.u32 %v967_v52, %v822_v53 }
  0x54   : > { %653 = vmatpush.bf16.msrb.mxu2 %v921_v26  ;;  %v984_v57 = vld [vmem:[%s1196_s30 + $0x94] sm:$0xf0]  ;;  %v812_v59 = vld [vmem:[%s1196_s30] sm:$0xf]  ;;  %v966_v60 = vld [vmem:[%s1196_s30 + $0x4] sm:$0xf0]  ;;  %v897_v1 = vor.u32 %v985_v54, %v894_v55 }
  0x55   : > { %641 = vmatpush.bf16.msra.mxu3 %v841_v35  ;;  %613 = vmatpush.bf16.msra.mxu1 %v901_v39  ;;  %v965_v62 = vld [vmem:[%s1196_s30 + $0x4] sm:$0xf]  ;;  %v814_v63 = vld [vmem:[%s1196_s30 + $0x8] sm:$0xf0]  ;;  %v983_v0 = vld [vmem:[%s1196_s30 + $0x94] sm:$0xf]  ;;  %v885_v2 = vor.u32 %v984_v57, %v884_v56  ;;  %v813_v11 = vor.u32 %v966_v60, %v812_v59 }
  0x56   : > { %v999_v3 = vld [vmem:[%s1196_s30 + $0x114] sm:$0xf]  ;;  %v950_v4 = vld [vmem:[%s1196_s30 + $0x118] sm:$0xf0]  ;;  %v384_v5 = vld [vmem:[%s1321_s2] sm:$0xff]  ;;  %v1054_v10 = vmov 0   ;;  %v817_v14 = vor.u32 %v965_v62, %v814_v63 }
  0x57   : > { %600 = vmatpush.bf16.msra.mxu0 %v829_v46  ;;  %v886_v6 = vld [vmem:[%s1196_s30 + $0x98] sm:$0xf0]  ;;  %v876_v7 = vld [vmem:[%s1196_s30 + $0x80] sm:$0xf]  ;;  %v982_v9 = vld [vmem:[%s1196_s30 + $0x84] sm:$0xf0]  ;;  %1029 = vset.pattern.permute.xlu0 %v1054_v10  ;;  %v953_v15 = vor.u32 %v999_v3, %v950_v4 }
  0x58   : > { %654 = vmatpush.bf16.msrb.mxu2 %v913_v38  ;;  %v800_v12 = vld [vmem:[%s1319_s0] sm:$0xf]  ;;  %v963_v13 = vld [vmem:[%s1319_s0 + $0x8] sm:$0xf0]  ;;  %388 = vperm.xlu0 %1029, %v384_v5   ;;  %v962_v16 = vld [vmem:[%s1319_s0 + $0x4] sm:$0xf]  ;;  %v889_v17 = vor.u32 %v983_v0, %v886_v6  ;;  %v877_v18 = vor.u32 %v982_v9, %v876_v7 }
  0x59   : > { %642 = vmatpush.bf16.msra.mxu3 %v833_v47  ;;  %614 = vmatpush.bf16.msra.mxu1 %v893_v51  ;;  %v802_v19 = vld [vmem:[%s1319_s0 + $0xc] sm:$0xf0]  ;;  %v997_v20 = vld [vmem:[%s1196_s30 + $0x104] sm:$0xf]  ;;  %v942_v21 = vld [vmem:[%s1196_s30 + $0x108] sm:$0xf0]  ;;  %v801_v22 = vor.u32 %v963_v13, %v800_v12 }
  0x5a   : > { %v981_v23 = vld [vmem:[%s1196_s30 + $0x84] sm:$0xf]  ;;  %v878_v24 = vld [vmem:[%s1196_s30 + $0x88] sm:$0xf0]  ;;  %v805_v25 = vor.u32 %v962_v16, %v802_v19  ;;  %v945_v26 = vor.u32 %v997_v20, %v942_v21 }
  0x5b   : > { %601 = vmatpush.bf16.msra.mxu0 %v821_v58  ;;  %v385_v27 = vld [vmem:[%s1321_s2 + $0x8] sm:$0xff]  ;;  %v881_v28 = vor.u32 %v981_v23, %v878_v24 }
  0x5c   : > { %655 = vmatpush.bf16.msrb.mxu2 %v905_v50 }
  0x5d   : > { %643 = vmatpush.bf16.msra.mxu3 %v825_v61  ;;  %615 = vmatpush.bf16.msra.mxu1 %v885_v2 }
  0x5f   : > { %602 = vmatpush.bf16.msra.mxu0 %v813_v11 }
  0x60   : > { %656 = vmatpush.bf16.msrb.mxu2 %v897_v1  ;;  %393 = vperm.xlu0 %1029, %v385_v27  }
  0x61   : > { %644 = vmatpush.bf16.msra.mxu3 %v817_v14  ;;  %616 = vmatpush.bf16.msra.mxu1 %v877_v18 }
  0x62   : > { %603 = vmatmul.bf16.vlgmr.msra.gmra.mxu0 %v801_v22 }
  0x63   : > { %671 = vmatpush.bf16.msrb.mxu0 %v953_v15 }
  0x64   : > { %657 = vmatpush.bf16.msrb.mxu2 %v889_v17  ;;  %645 = vmatmul.bf16.vlgmr.msra.gmra.mxu3 %v801_v22 }
  0x65   : > { %617 = vmatmul.bf16.vlgmr.msra.gmra.mxu1 %v805_v25 }
  0x67   : > { %672 = vmatpush.bf16.msrb.mxu0 %v945_v26 }
  0x68   : > { %658 = vmatpush.bf16.msrb.mxu2 %v881_v28 }
  0x6b   : > { %659 = vmatmul.bf16.vlgmr.msrb.gmra.mxu2 %v805_v25 }
  0x72   : > { %955 = vmatmul.msk.bf16.vlgmr.msrb.gmra.mxu0 %vm591_vm0, %v1228_v8 }
  0xca   : > { %v389_v31 = vpop.permute.xlu0 %388 }
  0xce   : > { %v632_v29 = vpop.f32.mrf.mxu2 }
  0xd2   : > { %v394_v39 = vpop.permute.xlu0 %393 }
  0xd6   : > { %v634_v32 = vpop.f32.mrf.mxu2 }
  0xdf   : > { %v604_v30 = vpop.f32.mrf.mxu0 }
  0xe0   : > { %v605_v34 = vadd.f32 %v604_v30, %v389_v31 }
  0xe2   : > { %v618_v33 = vpop.f32.mrf.mxu1 }
  0xe3   : > { %v619_v38 = vadd.f32 %v618_v33, %v605_v34 }
  0xe5   : > { %v633_v42 = vadd.f32 %v632_v29, %v619_v38 }
  0xe7   : > { %v646_v35 = vpop.f32.mrf.mxu3  ;;  %v606_v36 = vpop.f32.mrf.mxu0  ;;  %v679_v47 = vmax.f32 %v633_v42, 0.0 }
  0xe8   : > { %v647_v37 = vadd.f32 %v646_v35, %v389_v31  ;;  %v607_v43 = vadd.f32 %v606_v36, %v394_v39 }
  0xea   : > { %v620_v44 = vpop.f32.mrf.mxu1 }
  0xeb   : > { %v621_v48 = vadd.f32 %v620_v44, %v607_v43 }
  0xed   : > { %v635_v53 = vadd.f32 %v634_v32, %v621_v48 }
  0xee   : > { %v660_v40 = vpop.f32.mrf.mxu2 }
  0xef   : > { %v661_v41 = vadd.f32 %v660_v40, %v647_v37  ;;  %v674_v45 = vpop.f32.mrf.mxu0  ;;  %v648_v46 = vpop.f32.mrf.mxu3  ;;  %v681_v57 = vmax.f32 %v635_v53, 0.0 }
  0xf0   : > { %v649_v51 = vadd.f32 %v648_v46, %v394_v39 }
  0xf1   : > { %v675_v8 = vadd.f32 %v674_v45, %v661_v41 }
  0xf3   : > { %v680_v49 = vmax.f32 %v675_v8, 0.0 }
  0xf5   : > { %v683_v52 = vpack.c.bf16 %v680_v49, %v679_v47 }
  0xf6   : > { %v662_v50 = vpop.f32.mrf.mxu2 }
  0xf7   : > { %685 = vst [vmem:[%s340_s29] sm:$0xff] %v683_v52  ;;  %v663_v54 = vadd.f32 %v662_v50, %v649_v51  ;;  %v676_v55 = vpop.f32.mrf.mxu0 }
  0xf9   : > { %v677_v56 = vadd.f32 %v676_v55, %v663_v54 }
  0xfb   : > { %v682_v58 = vmax.f32 %v677_v56, 0.0  ;;  %693 = sbr.rel (!%p1105_p5) target bundleno = 264 (0x108), region = 74 }
  0xfd   : > { %v684_v59 = vpack.c.bf16 %v682_v58, %v681_v57 }
  0xfe   : > { %v727_v60 = vld [vmem:[%s340_s29] sm:$0xff] (%p1105_p5) }
  0xff   : > { %686 = vst [vmem:[%s340_s29 + $0x8] sm:$0xff] %v684_v59 }
 0x100   : > { %728 = vst [vmem:[%s696_s4] sm:$0xff] %v727_v60 }
 0x106   : > { %v729_v61 = vld [vmem:[%s340_s29 + $0x8] sm:$0xff] }
 0x107   : > { %730 = vst [vmem:[%s696_s4 + $0x10] sm:$0xff] %v729_v61 }
 0x108 PF: > { %p10_p10 = scmp.ge.s32.totalorder %s1092_s16, 4   ;;  %s1324_s12 = smov %s1048_s13 }
 0x109   : > { %s1325_s13 = smov %s1103_s19  ;;  %s1326_s14 = smov %s1092_s16 }
 0x10a   :  { %12 = sbr.rel (!%p10_p10) target bundleno = 2 (0x2), region = 143 }

// kernel: _lambda_.23
= control target key start
LH: loop header
LB: loop body
LE: loop exit
PB: predicated region body
PF: predicated region fallthrough
CT: control target
= control target key end

     0   :  { %s2047_s12 = smov 0   ;;  %s2049_s13 = smov 0   ;;  %s2546_s0 = inlined_call_operand.vmem [shape: bf16[6,784], index: 0, kind: input, shape index: {}]   ;;  %s2547_s1 = inlined_call_operand.vmem [shape: bf16[784,512], index: 1, kind: input, shape index: {}]   ;;  %s2548_s2 = inlined_call_operand.vmem [shape: f32[6,1], index: 2, kind: input, shape index: {}]   ;;  %s2549_s3 = inlined_call_operand.vmem [shape: f32[6,512], index: 3, kind: output, shape index: {}]  }
   0x1   :  { %s2051_s14 = smov 0  }
   0x2 LB: > { %s1470_s15 = sadd.s32 4294967295, %s2024_s14   ;;  %s2064_s16 = sadd.s32 1, %s2024_s14   ;;  %s2024_s14 = sphi %s2051_s14, %s2552_s14   ;;  %s2020_s13 = sphi %s2049_s13, %s2551_s13   ;;  %s2016_s12 = sphi %s2047_s12, %s2550_s12  }
   0x3   : > { %s38_s17 = ssub.s32 %s2024_s14, %s2064_s16  ;;  %s41_s18 = sadd.s32 1, %s2020_s13 }
   0x4   : > { %p39_p0 = scmp.eq.s32.totalorder %s38_s17, 0  ;;  %p48_p1 = scmp.ne.s32.totalorder %s2020_s13, %s2016_s12 }
   0x5   : > { %p49_p2 = scmp.eq.s32.totalorder %s2024_s14, 0  ;;  %p1473_p4 = scmp.ge.s32.totalorder %s2024_s14, 2 }
   0x6   : > { %s2073_s19 = scalar_select %p39_p0, %s2020_s13, %s41_s18  }
   0x7   : > { %p50_p3 = por %p49_p2, %p48_p1  ;;  %127 = sbr.rel (%p1473_p4) target bundleno = 114 (0x72), region = 24 }
   0xc   : > { %130 = sbr.rel (!%p50_p3) target bundleno = 114 (0x72), region = 28  ;;  %s132_s20 = sand.u32 (%p50_p3), 1, %s2020_s13  }
   0xd   : > { %s1875_s21 = sshll.u32 (%p50_p3), %s2024_s14, 3  ;;  %s1974_s22 = smul.u32 (%p50_p3), 784, %s132_s20 }
   0xe   : > { %s2081_s25 = scalar_lea.vmem (%p50_p3), %s2547_s1, %s1875_s21 }
   0xf   : > { %v360_v0 = vld [vmem:[%s2081_s25] sm:$0xff] (%p50_p3)  ;;  %v362_v1 = vld [vmem:[%s2081_s25 + $0x10] sm:$0xff] (%p50_p3)  ;;  %s2086_s26 = scalar_lea.vmem (%p50_p3), [#allocation2], %s1974_s22 }
  0x10   : > { %v364_v2 = vld [vmem:[%s2081_s25 + $0x20] sm:$0xff] (%p50_p3)  ;;  %361 = vst [vmem:[%s2086_s26] sm:$0xff] (%p50_p3), %v360_v0  ;;  %v366_v3 = vld [vmem:[%s2081_s25 + $0x30] sm:$0xff] (%p50_p3) }
  0x11   : > { %363 = vst [vmem:[%s2086_s26 + $0x8] sm:$0xff] %v362_v1  ;;  %v368_v4 = vld [vmem:[%s2081_s25 + $0x40] sm:$0xff]  ;;  %v370_v5 = vld [vmem:[%s2081_s25 + $0x50] sm:$0xff] }
  0x12   : > { %365 = vst [vmem:[%s2086_s26 + $0x10] sm:$0xff] %v364_v2  ;;  %v372_v6 = vld [vmem:[%s2081_s25 + $0x60] sm:$0xff]  ;;  %v374_v7 = vld [vmem:[%s2081_s25 + $0x70] sm:$0xff] }
  0x13   : > { %367 = vst [vmem:[%s2086_s26 + $0x18] sm:$0xff] %v366_v3  ;;  %v376_v8 = vld [vmem:[%s2081_s25 + $0x80] sm:$0xff]  ;;  %v378_v9 = vld [vmem:[%s2081_s25 + $0x90] sm:$0xff] }
  0x14   : > { %369 = vst [vmem:[%s2086_s26 + $0x20] sm:$0xff] %v368_v4  ;;  %v380_v10 = vld [vmem:[%s2081_s25 + $0xa0] sm:$0xff]  ;;  %v382_v11 = vld [vmem:[%s2081_s25 + $0xb0] sm:$0xff] }
  0x15   : > { %371 = vst [vmem:[%s2086_s26 + $0x28] sm:$0xff] %v370_v5  ;;  %v384_v12 = vld [vmem:[%s2081_s25 + $0xc0] sm:$0xff]  ;;  %v386_v13 = vld [vmem:[%s2081_s25 + $0xd0] sm:$0xff] }
  0x16   : > { %373 = vst [vmem:[%s2086_s26 + $0x30] sm:$0xff] %v372_v6  ;;  %v388_v14 = vld [vmem:[%s2081_s25 + $0xe0] sm:$0xff]  ;;  %v390_v15 = vld [vmem:[%s2081_s25 + $0xf0] sm:$0xff] }
  0x17   : > { %375 = vst [vmem:[%s2086_s26 + $0x38] sm:$0xff] %v374_v7  ;;  %v392_v16 = vld [vmem:[%s2081_s25 + $0x100] sm:$0xff]  ;;  %v394_v17 = vld [vmem:[%s2081_s25 + $0x110] sm:$0xff] }
  0x18   : > { %377 = vst [vmem:[%s2086_s26 + $0x40] sm:$0xff] %v376_v8  ;;  %v396_v18 = vld [vmem:[%s2081_s25 + $0x120] sm:$0xff]  ;;  %v398_v19 = vld [vmem:[%s2081_s25 + $0x130] sm:$0xff] }
  0x19   : > { %379 = vst [vmem:[%s2086_s26 + $0x48] sm:$0xff] %v378_v9  ;;  %v400_v20 = vld [vmem:[%s2081_s25 + $0x140] sm:$0xff]  ;;  %v402_v21 = vld [vmem:[%s2081_s25 + $0x150] sm:$0xff] }
  0x1a   : > { %381 = vst [vmem:[%s2086_s26 + $0x50] sm:$0xff] %v380_v10  ;;  %v404_v22 = vld [vmem:[%s2081_s25 + $0x160] sm:$0xff]  ;;  %v406_v23 = vld [vmem:[%s2081_s25 + $0x170] sm:$0xff] }
  0x1b   : > { %383 = vst [vmem:[%s2086_s26 + $0x58] sm:$0xff] %v382_v11  ;;  %v408_v24 = vld [vmem:[%s2081_s25 + $0x180] sm:$0xff]  ;;  %v410_v25 = vld [vmem:[%s2081_s25 + $0x190] sm:$0xff] }
  0x1c   : > { %385 = vst [vmem:[%s2086_s26 + $0x60] sm:$0xff] %v384_v12  ;;  %v412_v26 = vld [vmem:[%s2081_s25 + $0x1a0] sm:$0xff]  ;;  %v414_v27 = vld [vmem:[%s2081_s25 + $0x1b0] sm:$0xff] }
  0x1d   : > { %387 = vst [vmem:[%s2086_s26 + $0x68] sm:$0xff] %v386_v13  ;;  %v416_v28 = vld [vmem:[%s2081_s25 + $0x1c0] sm:$0xff]  ;;  %v418_v29 = vld [vmem:[%s2081_s25 + $0x1d0] sm:$0xff] }
  0x1e   : > { %389 = vst [vmem:[%s2086_s26 + $0x70] sm:$0xff] %v388_v14  ;;  %v420_v30 = vld [vmem:[%s2081_s25 + $0x1e0] sm:$0xff]  ;;  %v422_v31 = vld [vmem:[%s2081_s25 + $0x1f0] sm:$0xff] }
  0x1f   : > { %391 = vst [vmem:[%s2086_s26 + $0x78] sm:$0xff] %v390_v15  ;;  %v424_v32 = vld [vmem:[%s2081_s25 + $0x200] sm:$0xff]  ;;  %v426_v33 = vld [vmem:[%s2081_s25 + $0x210] sm:$0xff] }
  0x20   : > { %393 = vst [vmem:[%s2086_s26 + $0x80] sm:$0xff] %v392_v16  ;;  %v428_v34 = vld [vmem:[%s2081_s25 + $0x220] sm:$0xff]  ;;  %v430_v35 = vld [vmem:[%s2081_s25 + $0x230] sm:$0xff] }
  0x21   : > { %395 = vst [vmem:[%s2086_s26 + $0x88] sm:$0xff] %v394_v17  ;;  %v432_v36 = vld [vmem:[%s2081_s25 + $0x240] sm:$0xff]  ;;  %v434_v37 = vld [vmem:[%s2081_s25 + $0x250] sm:$0xff] }
  0x22   : > { %397 = vst [vmem:[%s2086_s26 + $0x90] sm:$0xff] %v396_v18  ;;  %v436_v38 = vld [vmem:[%s2081_s25 + $0x260] sm:$0xff]  ;;  %v438_v39 = vld [vmem:[%s2081_s25 + $0x270] sm:$0xff] }
  0x23   : > { %399 = vst [vmem:[%s2086_s26 + $0x98] sm:$0xff] %v398_v19  ;;  %v440_v40 = vld [vmem:[%s2081_s25 + $0x280] sm:$0xff]  ;;  %v442_v41 = vld [vmem:[%s2081_s25 + $0x290] sm:$0xff] }
  0x24   : > { %401 = vst [vmem:[%s2086_s26 + $0xa0] sm:$0xff] %v400_v20  ;;  %v444_v42 = vld [vmem:[%s2081_s25 + $0x2a0] sm:$0xff]  ;;  %v446_v43 = vld [vmem:[%s2081_s25 + $0x2b0] sm:$0xff] }
  0x25   : > { %403 = vst [vmem:[%s2086_s26 + $0xa8] sm:$0xff] %v402_v21  ;;  %v448_v44 = vld [vmem:[%s2081_s25 + $0x2c0] sm:$0xff]  ;;  %v450_v45 = vld [vmem:[%s2081_s25 + $0x2d0] sm:$0xff] }
  0x26   : > { %405 = vst [vmem:[%s2086_s26 + $0xb0] sm:$0xff] %v404_v22  ;;  %v452_v46 = vld [vmem:[%s2081_s25 + $0x2e0] sm:$0xff]  ;;  %v454_v47 = vld [vmem:[%s2081_s25 + $0x2f0] sm:$0xff] }
  0x27   : > { %407 = vst [vmem:[%s2086_s26 + $0xb8] sm:$0xff] %v406_v23  ;;  %v456_v48 = vld [vmem:[%s2081_s25 + $0x300] sm:$0xff]  ;;  %v458_v49 = vld [vmem:[%s2081_s25 + $0x310] sm:$0xff] }
  0x28   : > { %409 = vst [vmem:[%s2086_s26 + $0xc0] sm:$0xff] %v408_v24  ;;  %v460_v50 = vld [vmem:[%s2081_s25 + $0x320] sm:$0xff]  ;;  %v462_v51 = vld [vmem:[%s2081_s25 + $0x330] sm:$0xff] }
  0x29   : > { %411 = vst [vmem:[%s2086_s26 + $0xc8] sm:$0xff] %v410_v25  ;;  %v464_v52 = vld [vmem:[%s2081_s25 + $0x340] sm:$0xff]  ;;  %v466_v53 = vld [vmem:[%s2081_s25 + $0x350] sm:$0xff] }
  0x2a   : > { %413 = vst [vmem:[%s2086_s26 + $0xd0] sm:$0xff] %v412_v26  ;;  %v468_v54 = vld [vmem:[%s2081_s25 + $0x360] sm:$0xff]  ;;  %v470_v55 = vld [vmem:[%s2081_s25 + $0x370] sm:$0xff] }
  0x2b   : > { %415 = vst [vmem:[%s2086_s26 + $0xd8] sm:$0xff] %v414_v27  ;;  %v472_v56 = vld [vmem:[%s2081_s25 + $0x380] sm:$0xff]  ;;  %v474_v57 = vld [vmem:[%s2081_s25 + $0x390] sm:$0xff] }
  0x2c   : > { %417 = vst [vmem:[%s2086_s26 + $0xe0] sm:$0xff] %v416_v28  ;;  %v476_v58 = vld [vmem:[%s2081_s25 + $0x3a0] sm:$0xff]  ;;  %v478_v59 = vld [vmem:[%s2081_s25 + $0x3b0] sm:$0xff] }
  0x2d   : > { %419 = vst [vmem:[%s2086_s26 + $0xe8] sm:$0xff] %v418_v29  ;;  %v480_v60 = vld [vmem:[%s2081_s25 + $0x3c0] sm:$0xff]  ;;  %v482_v61 = vld [vmem:[%s2081_s25 + $0x3d0] sm:$0xff] }
  0x2e   : > { %421 = vst [vmem:[%s2086_s26 + $0xf0] sm:$0xff] %v420_v30  ;;  %v484_v62 = vld [vmem:[%s2081_s25 + $0x3e0] sm:$0xff]  ;;  %v486_v63 = vld [vmem:[%s2081_s25 + $0x3f0] sm:$0xff] }
  0x2f   : > { %423 = vst [vmem:[%s2086_s26 + $0xf8] sm:$0xff] %v422_v31  ;;  %v488_v0 = vld [vmem:[%s2081_s25 + $0x400] sm:$0xff]  ;;  %v490_v1 = vld [vmem:[%s2081_s25 + $0x410] sm:$0xff] }
  0x30   : > { %425 = vst [vmem:[%s2086_s26 + $0x100] sm:$0xff] %v424_v32  ;;  %v492_v2 = vld [vmem:[%s2081_s25 + $0x420] sm:$0xff]  ;;  %v494_v3 = vld [vmem:[%s2081_s25 + $0x430] sm:$0xff] }
  0x31   : > { %427 = vst [vmem:[%s2086_s26 + $0x108] sm:$0xff] %v426_v33  ;;  %v496_v4 = vld [vmem:[%s2081_s25 + $0x440] sm:$0xff]  ;;  %v498_v5 = vld [vmem:[%s2081_s25 + $0x450] sm:$0xff] }
  0x32   : > { %429 = vst [vmem:[%s2086_s26 + $0x110] sm:$0xff] %v428_v34  ;;  %v500_v6 = vld [vmem:[%s2081_s25 + $0x460] sm:$0xff]  ;;  %v502_v7 = vld [vmem:[%s2081_s25 + $0x470] sm:$0xff] }
  0x33   : > { %431 = vst [vmem:[%s2086_s26 + $0x118] sm:$0xff] %v430_v35  ;;  %v504_v8 = vld [vmem:[%s2081_s25 + $0x480] sm:$0xff]  ;;  %v506_v9 = vld [vmem:[%s2081_s25 + $0x490] sm:$0xff] }
  0x34   : > { %433 = vst [vmem:[%s2086_s26 + $0x120] sm:$0xff] %v432_v36  ;;  %v508_v10 = vld [vmem:[%s2081_s25 + $0x4a0] sm:$0xff]  ;;  %v510_v11 = vld [vmem:[%s2081_s25 + $0x4b0] sm:$0xff] }
  0x35   : > { %435 = vst [vmem:[%s2086_s26 + $0x128] sm:$0xff] %v434_v37  ;;  %v512_v12 = vld [vmem:[%s2081_s25 + $0x4c0] sm:$0xff]  ;;  %v514_v13 = vld [vmem:[%s2081_s25 + $0x4d0] sm:$0xff] }
  0x36   : > { %437 = vst [vmem:[%s2086_s26 + $0x130] sm:$0xff] %v436_v38  ;;  %v516_v14 = vld [vmem:[%s2081_s25 + $0x4e0] sm:$0xff]  ;;  %v518_v15 = vld [vmem:[%s2081_s25 + $0x4f0] sm:$0xff] }
  0x37   : > { %439 = vst [vmem:[%s2086_s26 + $0x138] sm:$0xff] %v438_v39  ;;  %v520_v16 = vld [vmem:[%s2081_s25 + $0x500] sm:$0xff]  ;;  %v522_v17 = vld [vmem:[%s2081_s25 + $0x510] sm:$0xff] }
  0x38   : > { %441 = vst [vmem:[%s2086_s26 + $0x140] sm:$0xff] %v440_v40  ;;  %v524_v18 = vld [vmem:[%s2081_s25 + $0x520] sm:$0xff]  ;;  %v526_v19 = vld [vmem:[%s2081_s25 + $0x530] sm:$0xff] }
  0x39   : > { %443 = vst [vmem:[%s2086_s26 + $0x148] sm:$0xff] %v442_v41  ;;  %v528_v20 = vld [vmem:[%s2081_s25 + $0x540] sm:$0xff]  ;;  %v530_v21 = vld [vmem:[%s2081_s25 + $0x550] sm:$0xff] }
  0x3a   : > { %445 = vst [vmem:[%s2086_s26 + $0x150] sm:$0xff] %v444_v42  ;;  %v532_v22 = vld [vmem:[%s2081_s25 + $0x560] sm:$0xff]  ;;  %v534_v23 = vld [vmem:[%s2081_s25 + $0x570] sm:$0xff] }
  0x3b   : > { %447 = vst [vmem:[%s2086_s26 + $0x158] sm:$0xff] %v446_v43  ;;  %v536_v24 = vld [vmem:[%s2081_s25 + $0x580] sm:$0xff]  ;;  %v538_v25 = vld [vmem:[%s2081_s25 + $0x590] sm:$0xff] }
  0x3c   : > { %449 = vst [vmem:[%s2086_s26 + $0x160] sm:$0xff] %v448_v44  ;;  %v540_v26 = vld [vmem:[%s2081_s25 + $0x5a0] sm:$0xff]  ;;  %v542_v27 = vld [vmem:[%s2081_s25 + $0x5b0] sm:$0xff] }
  0x3d   : > { %451 = vst [vmem:[%s2086_s26 + $0x168] sm:$0xff] %v450_v45  ;;  %v544_v28 = vld [vmem:[%s2081_s25 + $0x5c0] sm:$0xff]  ;;  %v546_v29 = vld [vmem:[%s2081_s25 + $0x5d0] sm:$0xff] }
  0x3e   : > { %453 = vst [vmem:[%s2086_s26 + $0x170] sm:$0xff] %v452_v46  ;;  %v548_v30 = vld [vmem:[%s2081_s25 + $0x5e0] sm:$0xff]  ;;  %v550_v31 = vld [vmem:[%s2081_s25 + $0x5f0] sm:$0xff] }
  0x3f   : > { %455 = vst [vmem:[%s2086_s26 + $0x178] sm:$0xff] %v454_v47  ;;  %v552_v32 = vld [vmem:[%s2081_s25 + $0x600] sm:$0xff]  ;;  %v554_v33 = vld [vmem:[%s2081_s25 + $0x610] sm:$0xff] }
  0x40   : > { %457 = vst [vmem:[%s2086_s26 + $0x180] sm:$0xff] %v456_v48 }
  0x41   : > { %459 = vst [vmem:[%s2086_s26 + $0x188] sm:$0xff] %v458_v49 }
  0x42   : > { %461 = vst [vmem:[%s2086_s26 + $0x190] sm:$0xff] %v460_v50 }
  0x43   : > { %463 = vst [vmem:[%s2086_s26 + $0x198] sm:$0xff] %v462_v51 }
  0x44   : > { %465 = vst [vmem:[%s2086_s26 + $0x1a0] sm:$0xff] %v464_v52 }
  0x45   : > { %467 = vst [vmem:[%s2086_s26 + $0x1a8] sm:$0xff] %v466_v53 }
  0x46   : > { %469 = vst [vmem:[%s2086_s26 + $0x1b0] sm:$0xff] %v468_v54 }
  0x47   : > { %471 = vst [vmem:[%s2086_s26 + $0x1b8] sm:$0xff] %v470_v55 }
  0x48   : > { %473 = vst [vmem:[%s2086_s26 + $0x1c0] sm:$0xff] %v472_v56 }
  0x49   : > { %475 = vst [vmem:[%s2086_s26 + $0x1c8] sm:$0xff] %v474_v57 }
  0x4a   : > { %477 = vst [vmem:[%s2086_s26 + $0x1d0] sm:$0xff] %v476_v58 }
  0x4b   : > { %479 = vst [vmem:[%s2086_s26 + $0x1d8] sm:$0xff] %v478_v59 }
  0x4c   : > { %481 = vst [vmem:[%s2086_s26 + $0x1e0] sm:$0xff] %v480_v60 }
  0x4d   : > { %483 = vst [vmem:[%s2086_s26 + $0x1e8] sm:$0xff] %v482_v61 }
  0x4e   : > { %485 = vst [vmem:[%s2086_s26 + $0x1f0] sm:$0xff] %v484_v62 }
  0x4f   : > { %487 = vst [vmem:[%s2086_s26 + $0x1f8] sm:$0xff] %v486_v63 }
  0x50   : > { %489 = vst [vmem:[%s2086_s26 + $0x200] sm:$0xff] %v488_v0 }
  0x51   : > { %491 = vst [vmem:[%s2086_s26 + $0x208] sm:$0xff] %v490_v1 }
  0x52   : > { %493 = vst [vmem:[%s2086_s26 + $0x210] sm:$0xff] %v492_v2 }
  0x53   : > { %495 = vst [vmem:[%s2086_s26 + $0x218] sm:$0xff] %v494_v3 }
  0x54   : > { %497 = vst [vmem:[%s2086_s26 + $0x220] sm:$0xff] %v496_v4 }
  0x55   : > { %499 = vst [vmem:[%s2086_s26 + $0x228] sm:$0xff] %v498_v5 }
  0x56   : > { %501 = vst [vmem:[%s2086_s26 + $0x230] sm:$0xff] %v500_v6 }
  0x57   : > { %503 = vst [vmem:[%s2086_s26 + $0x238] sm:$0xff] %v502_v7 }
  0x58   : > { %505 = vst [vmem:[%s2086_s26 + $0x240] sm:$0xff] %v504_v8 }
  0x59   : > { %507 = vst [vmem:[%s2086_s26 + $0x248] sm:$0xff] %v506_v9 }
  0x5a   : > { %509 = vst [vmem:[%s2086_s26 + $0x250] sm:$0xff] %v508_v10 }
  0x5b   : > { %511 = vst [vmem:[%s2086_s26 + $0x258] sm:$0xff] %v510_v11 }
  0x5c   : > { %513 = vst [vmem:[%s2086_s26 + $0x260] sm:$0xff] %v512_v12 }
  0x5d   : > { %515 = vst [vmem:[%s2086_s26 + $0x268] sm:$0xff] %v514_v13 }
  0x5e   : > { %517 = vst [vmem:[%s2086_s26 + $0x270] sm:$0xff] %v516_v14 }
  0x5f   : > { %519 = vst [vmem:[%s2086_s26 + $0x278] sm:$0xff] %v518_v15 }
  0x60   : > { %521 = vst [vmem:[%s2086_s26 + $0x280] sm:$0xff] %v520_v16 }
  0x61   : > { %523 = vst [vmem:[%s2086_s26 + $0x288] sm:$0xff] %v522_v17 }
  0x62   : > { %525 = vst [vmem:[%s2086_s26 + $0x290] sm:$0xff] %v524_v18 }
  0x63   : > { %527 = vst [vmem:[%s2086_s26 + $0x298] sm:$0xff] %v526_v19 }
  0x64   : > { %529 = vst [vmem:[%s2086_s26 + $0x2a0] sm:$0xff] %v528_v20 }
  0x65   : > { %531 = vst [vmem:[%s2086_s26 + $0x2a8] sm:$0xff] %v530_v21 }
  0x66   : > { %533 = vst [vmem:[%s2086_s26 + $0x2b0] sm:$0xff] %v532_v22 }
  0x67   : > { %535 = vst [vmem:[%s2086_s26 + $0x2b8] sm:$0xff] %v534_v23 }
  0x68   : > { %537 = vst [vmem:[%s2086_s26 + $0x2c0] sm:$0xff] %v536_v24 }
  0x69   : > { %539 = vst [vmem:[%s2086_s26 + $0x2c8] sm:$0xff] %v538_v25 }
  0x6a   : > { %541 = vst [vmem:[%s2086_s26 + $0x2d0] sm:$0xff] %v540_v26 }
  0x6b   : > { %543 = vst [vmem:[%s2086_s26 + $0x2d8] sm:$0xff] %v542_v27 }
  0x6c   : > { %545 = vst [vmem:[%s2086_s26 + $0x2e0] sm:$0xff] %v544_v28 }
  0x6d   : > { %547 = vst [vmem:[%s2086_s26 + $0x2e8] sm:$0xff] %v546_v29 }
  0x6e   : > { %549 = vst [vmem:[%s2086_s26 + $0x2f0] sm:$0xff] %v548_v30 }
  0x6f   : > { %551 = vst [vmem:[%s2086_s26 + $0x2f8] sm:$0xff] %v550_v31 }
  0x70   : > { %553 = vst [vmem:[%s2086_s26 + $0x300] sm:$0xff] %v552_v32 }
  0x71   : > { %555 = vst [vmem:[%s2086_s26 + $0x308] sm:$0xff] %v554_v33 }
  0x72 PF: > { %p1476_p5 = scmp.ge.s32.totalorder %s2024_s14, 1  ;;  %p560_p6 = scmp.lt.s32.totalorder %s2024_s14, 3 }
  0x74   : > { %p561_p7 = pnand %p1476_p5, %p560_p6 }
  0x75   : > { %s567_s27 = sand.u32 (!%p561_p7), 1, %s2016_s12   ;;  %s1477_s17 = sshll.u32 (!%p561_p7), %s1470_s15, 1 }
  0x76   : > { %564 = sbr.rel (%p561_p7) target bundleno = 371 (0x173), region = 66  ;;  %p592_p8 = scmp.lt.s32.totalorder (!%p561_p7), %s1477_s17, 3 }
  0x77   : > { %s1975_s28 = smul.u32 (!%p561_p7), 784, %s567_s27 }
  0x79   : > { %s2284_s29 = scalar_lea.vmem (!%p561_p7), [#allocation2], %s1975_s28 }
  0x7b   : > { %v1537_v34 = vld [vmem:[%s2284_s29 + $0x70] sm:$0xf]  ;;  %v1891_v35 = vld [vmem:[%s2284_s29 + $0x74] sm:$0xf0]  ;;  %v1529_v45 = vld [vmem:[%s2284_s29 + $0x60] sm:$0xf] }
  0x7c   : > { %v1665_v36 = vld [vmem:[%s2284_s29 + $0x170] sm:$0xf]  ;;  %v1538_v37 = vor.u32 %v1891_v35, %v1537_v34  ;;  %v1923_v38 = vld [vmem:[%s2284_s29 + $0x174] sm:$0xf0]  ;;  %v1889_v47 = vld [vmem:[%s2284_s29 + $0x64] sm:$0xf0] }
  0x7d   : > { %v1729_v39 = vld [vmem:[%s2284_s29 + $0x1f0] sm:$0xf]  ;;  %v1939_v40 = vld [vmem:[%s2284_s29 + $0x1f4] sm:$0xf0]  ;;  %v1666_v41 = vor.u32 %v1923_v38, %v1665_v36  ;;  %v1657_v48 = vld [vmem:[%s2284_s29 + $0x160] sm:$0xf]  ;;  %v1530_v50 = vor.u32 %v1889_v47, %v1529_v45 }
  0x7e   : > { %v1730_v42 = vor.u32 %v1939_v40, %v1729_v39  ;;  %v1601_v43 = vld [vmem:[%s2284_s29 + $0xf0] sm:$0xf]  ;;  %v1907_v44 = vld [vmem:[%s2284_s29 + $0xf4] sm:$0xf0]  ;;  %1224 = vmatpush.bf16.msra.mxu0 %v1538_v37  ;;  %v1921_v49 = vld [vmem:[%s2284_s29 + $0x164] sm:$0xf0] }
  0x7f   : > { %v1602_v46 = vor.u32 %v1907_v44, %v1601_v43  ;;  %1250 = vmatpush.bf16.msra.mxu2 %v1666_v41  ;;  %v1658_v51 = vor.u32 %v1921_v49, %v1657_v48  ;;  %v1721_v52 = vld [vmem:[%s2284_s29 + $0x1e0] sm:$0xf]  ;;  %v1937_v53 = vld [vmem:[%s2284_s29 + $0x1e4] sm:$0xf0]  ;;  %v1521_v57 = vld [vmem:[%s2284_s29 + $0x50] sm:$0xf] }
  0x80   : > { %1263 = vmatpush.bf16.msra.mxu3 %v1730_v42  ;;  %v1593_v54 = vld [vmem:[%s2284_s29 + $0xe0] sm:$0xf]  ;;  %v1722_v55 = vor.u32 %v1937_v53, %v1721_v52  ;;  %v1905_v56 = vld [vmem:[%s2284_s29 + $0xe4] sm:$0xf0]  ;;  %v1887_v58 = vld [vmem:[%s2284_s29 + $0x54] sm:$0xf0] }
  0x81   : > { %1237 = vmatpush.bf16.msra.mxu1 %v1602_v46  ;;  %v1594_v59 = vor.u32 %v1905_v56, %v1593_v54  ;;  %v1649_v60 = vld [vmem:[%s2284_s29 + $0x150] sm:$0xf]  ;;  %v1919_v61 = vld [vmem:[%s2284_s29 + $0x154] sm:$0xf0]  ;;  %v1522_v63 = vor.u32 %v1887_v58, %v1521_v57  ;;  %v1513_v5 = vld [vmem:[%s2284_s29 + $0x40] sm:$0xf] }
  0x82   : > { %v1713_v62 = vld [vmem:[%s2284_s29 + $0x1d0] sm:$0xf]  ;;  %1225 = vmatpush.bf16.msra.mxu0 %v1530_v50  ;;  %v1935_v0 = vld [vmem:[%s2284_s29 + $0x1d4] sm:$0xf0]  ;;  %v1650_v3 = vor.u32 %v1919_v61, %v1649_v60  ;;  %v1885_v6 = vld [vmem:[%s2284_s29 + $0x44] sm:$0xf0] }
  0x83   : > { %v1585_v1 = vld [vmem:[%s2284_s29 + $0xd0] sm:$0xf]  ;;  %v1903_v2 = vld [vmem:[%s2284_s29 + $0xd4] sm:$0xf0]  ;;  %1251 = vmatpush.bf16.msra.mxu2 %v1658_v51  ;;  %v1714_v4 = vor.u32 %v1935_v0, %v1713_v62  ;;  %v1641_v7 = vld [vmem:[%s2284_s29 + $0x140] sm:$0xf]  ;;  %v1514_v14 = vor.u32 %v1885_v6, %v1513_v5 }
  0x84   : > { %1264 = vmatpush.bf16.msra.mxu3 %v1722_v55  ;;  %v1586_v8 = vor.u32 %v1903_v2, %v1585_v1  ;;  %v1917_v9 = vld [vmem:[%s2284_s29 + $0x144] sm:$0xf0]  ;;  %v1705_v10 = vld [vmem:[%s2284_s29 + $0x1c0] sm:$0xf]  ;;  %v1505_v17 = vld [vmem:[%s2284_s29 + $0x30] sm:$0xf] }
  0x85   : > { %1238 = vmatpush.bf16.msra.mxu1 %v1594_v59  ;;  %v1933_v11 = vld [vmem:[%s2284_s29 + $0x1c4] sm:$0xf0]  ;;  %v1577_v12 = vld [vmem:[%s2284_s29 + $0xc0] sm:$0xf]  ;;  %v1642_v15 = vor.u32 %v1917_v9, %v1641_v7  ;;  %v1883_v18 = vld [vmem:[%s2284_s29 + $0x34] sm:$0xf0] }
  0x86   : > { %v1901_v13 = vld [vmem:[%s2284_s29 + $0xc4] sm:$0xf0]  ;;  %1226 = vmatpush.bf16.msra.mxu0 %v1522_v63  ;;  %v1706_v16 = vor.u32 %v1933_v11, %v1705_v10  ;;  %v1633_v19 = vld [vmem:[%s2284_s29 + $0x130] sm:$0xf]  ;;  %v1915_v21 = vld [vmem:[%s2284_s29 + $0x134] sm:$0xf0]  ;;  %v1506_v26 = vor.u32 %v1883_v18, %v1505_v17 }
  0x87   : > { %1252 = vmatpush.bf16.msra.mxu2 %v1650_v3  ;;  %v1578_v20 = vor.u32 %v1901_v13, %v1577_v12  ;;  %v1697_v22 = vld [vmem:[%s2284_s29 + $0x1b0] sm:$0xf]  ;;  %v1931_v23 = vld [vmem:[%s2284_s29 + $0x1b4] sm:$0xf0]  ;;  %v1634_v27 = vor.u32 %v1915_v21, %v1633_v19  ;;  %v1497_v29 = vld [vmem:[%s2284_s29 + $0x20] sm:$0xf] }
  0x88   : > { %1265 = vmatpush.bf16.msra.mxu3 %v1714_v4  ;;  %v1569_v24 = vld [vmem:[%s2284_s29 + $0xb0] sm:$0xf]  ;;  %v1899_v25 = vld [vmem:[%s2284_s29 + $0xb4] sm:$0xf0]  ;;  %v1698_v28 = vor.u32 %v1931_v23, %v1697_v22  ;;  %v1881_v30 = vld [vmem:[%s2284_s29 + $0x24] sm:$0xf0] }
  0x89   : > { %1239 = vmatpush.bf16.msra.mxu1 %v1586_v8  ;;  %v1625_v31 = vld [vmem:[%s2284_s29 + $0x120] sm:$0xf]  ;;  %v1570_v32 = vor.u32 %v1899_v25, %v1569_v24  ;;  %v1913_v33 = vld [vmem:[%s2284_s29 + $0x124] sm:$0xf0]  ;;  %v1498_v38 = vor.u32 %v1881_v30, %v1497_v29  ;;  %v1489_v41 = vld [vmem:[%s2284_s29 + $0x10] sm:$0xf] }
  0x8a   : > { %1227 = vmatpush.bf16.msra.mxu0 %v1514_v14  ;;  %v1689_v34 = vld [vmem:[%s2284_s29 + $0x1a0] sm:$0xf]  ;;  %v1929_v35 = vld [vmem:[%s2284_s29 + $0x1a4] sm:$0xf0]  ;;  %v1626_v39 = vor.u32 %v1913_v33, %v1625_v31  ;;  %v1879_v42 = vld [vmem:[%s2284_s29 + $0x14] sm:$0xf0] }
  0x8b   : > { %1253 = vmatpush.bf16.msra.mxu2 %v1642_v15  ;;  %v1561_v36 = vld [vmem:[%s2284_s29 + $0xa0] sm:$0xf]  ;;  %v1897_v37 = vld [vmem:[%s2284_s29 + $0xa4] sm:$0xf0]  ;;  %v1690_v40 = vor.u32 %v1929_v35, %v1689_v34  ;;  %v1617_v43 = vld [vmem:[%s2284_s29 + $0x110] sm:$0xf]  ;;  %v1490_v50 = vor.u32 %v1879_v42, %v1489_v41 }
  0x8c   : > { %1266 = vmatpush.bf16.msra.mxu3 %v1706_v16  ;;  %v1562_v44 = vor.u32 %v1897_v37, %v1561_v36  ;;  %v1911_v45 = vld [vmem:[%s2284_s29 + $0x114] sm:$0xf0]  ;;  %v1681_v46 = vld [vmem:[%s2284_s29 + $0x190] sm:$0xf]  ;;  %v1481_v51 = vld [vmem:[%s2284_s29] sm:$0xf] }
  0x8d   : > { %1240 = vmatpush.bf16.msra.mxu1 %v1578_v20  ;;  %v1927_v47 = vld [vmem:[%s2284_s29 + $0x194] sm:$0xf0]  ;;  %v1553_v48 = vld [vmem:[%s2284_s29 + $0x90] sm:$0xf]  ;;  %v1877_v52 = vld [vmem:[%s2284_s29 + $0x4] sm:$0xf0]  ;;  %v1618_v54 = vor.u32 %v1911_v45, %v1617_v43 }
  0x8e   : > { %1228 = vmatpush.bf16.msra.mxu0 %v1506_v26  ;;  %v1895_v49 = vld [vmem:[%s2284_s29 + $0x94] sm:$0xf0]  ;;  %v1682_v55 = vor.u32 %v1927_v47, %v1681_v46  ;;  %v1609_v56 = vld [vmem:[%s2284_s29 + $0x100] sm:$0xf]  ;;  %v1909_v57 = vld [vmem:[%s2284_s29 + $0x104] sm:$0xf0]  ;;  %v1482_v2 = vor.u32 %v1877_v52, %v1481_v51 }
  0x8f   : > { %1254 = vmatpush.bf16.msra.mxu2 %v1634_v27  ;;  %v2347_v53 = vld [vmem:[%s2546_s0 + $0x8] sm:$0x77]  ;;  %v1673_v58 = vld [vmem:[%s2284_s29 + $0x180] sm:$0xf]  ;;  %v1554_v59 = vor.u32 %v1895_v49, %v1553_v48  ;;  %v1793_v61 = vld [vmem:[%s2284_s29 + $0x270] sm:$0xf]  ;;  %v1610_v7 = vor.u32 %v1909_v57, %v1609_v56 }
  0x90   : > { %1267 = vmatpush.bf16.msra.mxu3 %v1698_v28  ;;  %v1925_v60 = vld [vmem:[%s2284_s29 + $0x184] sm:$0xf0]  ;;  %v1955_v62 = vld [vmem:[%s2284_s29 + $0x274] sm:$0xf0]  ;;  %v1890_v63 = vld [vmem:[%s2284_s29 + $0x74] sm:$0xf]  ;;  %v712_v4 = vunpack.c.l.b16 %v2347_v53  ;;  %v713_v22 = vunpack.c.h.b16 %v2347_v53 }
  0x91   : > { %1241 = vmatpush.bf16.msra.mxu1 %v1570_v32  ;;  %v1539_v0 = vld [vmem:[%s2284_s29 + $0x78] sm:$0xf0]  ;;  %v1545_v1 = vld [vmem:[%s2284_s29 + $0x80] sm:$0xf]  ;;  %v1893_v3 = vld [vmem:[%s2284_s29 + $0x84] sm:$0xf0]  ;;  %v1674_v8 = vor.u32 %v1925_v60, %v1673_v58  ;;  %v1794_v12 = vor.u32 %v1955_v62, %v1793_v61 }
  0x92   : > { %1229 = vmatpush.bf16.msra.mxu0 %v1498_v38  ;;  %v1865_v5 = vld [vmem:[%s2284_s29 + $0x300] sm:$0xf]  ;;  %v1973_v6 = vld [vmem:[%s2284_s29 + $0x304] sm:$0xf0]  ;;  %v1857_v9 = vld [vmem:[%s2284_s29 + $0x2f0] sm:$0xf]  ;;  %v1542_v13 = vor.u32 %v1890_v63, %v1539_v0  ;;  %v1546_v17 = vor.u32 %v1893_v3, %v1545_v1  ;;  %v2374_v23 = vpack.c.b16 %v712_v4, %v712_v4 }
  0x93   : > { %1255 = vmatpush.bf16.msra.mxu2 %v1626_v39  ;;  %v1971_v10 = vld [vmem:[%s2284_s29 + $0x2f4] sm:$0xf0]  ;;  %v1906_v11 = vld [vmem:[%s2284_s29 + $0xf4] sm:$0xf]  ;;  %v1603_v14 = vld [vmem:[%s2284_s29 + $0xf8] sm:$0xf0]  ;;  %v1866_v18 = vor.u32 %v1973_v6, %v1865_v5  ;;  %v2386_v39 = vpack.c.b16 %v713_v22, %v713_v22 }
  0x94   : > { %1268 = vmatpush.bf16.msra.mxu3 %v1690_v40  ;;  %v1785_v15 = vld [vmem:[%s2284_s29 + $0x260] sm:$0xf]  ;;  %v1953_v16 = vld [vmem:[%s2284_s29 + $0x264] sm:$0xf0]  ;;  %v1888_v19 = vld [vmem:[%s2284_s29 + $0x64] sm:$0xf]  ;;  %v1858_v24 = vor.u32 %v1971_v10, %v1857_v9  ;;  %v1606_v27 = vor.u32 %v1906_v11, %v1603_v14 }
  0x95   : > { %1242 = vmatpush.bf16.msra.mxu1 %v1562_v44  ;;  %v1531_v20 = vld [vmem:[%s2284_s29 + $0x68] sm:$0xf0]  ;;  %v598_v21 = vld [vmem:[%s2546_s0] sm:$0x77]  ;;  %v1969_v29 = vld [vmem:[%s2284_s29 + $0x2e4] sm:$0xf0]  ;;  %v1786_v30 = vor.u32 %v1953_v16, %v1785_v15 }
  0x96   : > { %1230 = vmatpush.bf16.msra.mxu0 %v1490_v50  ;;  %v710_v25 = vunpack.c.l.b16 %v598_v21  ;;  %v711_v26 = vunpack.c.h.b16 %v598_v21  ;;  %v1849_v28 = vld [vmem:[%s2284_s29 + $0x2e0] sm:$0xf]  ;;  %v1534_v31 = vor.u32 %v1888_v19, %v1531_v20  ;;  %v1904_v32 = vld [vmem:[%s2284_s29 + $0xe4] sm:$0xf]  ;;  %v1595_v33 = vld [vmem:[%s2284_s29 + $0xe8] sm:$0xf0] }
  0x97   : > { %1256 = vmatpush.bf16.msra.mxu2 %v1618_v54  ;;  %v1777_v34 = vld [vmem:[%s2284_s29 + $0x250] sm:$0xf]  ;;  %v1951_v36 = vld [vmem:[%s2284_s29 + $0x254] sm:$0xf0]  ;;  %v1886_v37 = vld [vmem:[%s2284_s29 + $0x54] sm:$0xf]  ;;  %v1850_v41 = vor.u32 %v1969_v29, %v1849_v28  ;;  %v1598_v43 = vor.u32 %v1904_v32, %v1595_v33 }
  0x98   : > { %1269 = vmatpush.bf16.msra.mxu3 %v1682_v55  ;;  %v2381_v35 = vpack.c.b16 %v710_v25, %v710_v25  ;;  %v1523_v38 = vld [vmem:[%s2284_s29 + $0x58] sm:$0xf0]  ;;  %v2388_v40 = vpack.c.b16 %v711_v26, %v711_v26  ;;  %v1841_v42 = vld [vmem:[%s2284_s29 + $0x2d0] sm:$0xf]  ;;  %v1967_v44 = vld [vmem:[%s2284_s29 + $0x2d4] sm:$0xf0]  ;;  %v1778_v47 = vor.u32 %v1951_v36, %v1777_v34 }
  0x99   : > { %1243 = vmatpush.bf16.msra.mxu1 %v1554_v59  ;;  %v1902_v45 = vld [vmem:[%s2284_s29 + $0xd4] sm:$0xf]  ;;  %v1587_v46 = vld [vmem:[%s2284_s29 + $0xd8] sm:$0xf0]  ;;  %v1526_v48 = vor.u32 %v1886_v37, %v1523_v38  ;;  %v1769_v49 = vld [vmem:[%s2284_s29 + $0x240] sm:$0xf]  ;;  %v1842_v54 = vor.u32 %v1967_v44, %v1841_v42 }
  0x9a   : > { %1231 = vmatpush.bf16.msra.mxu0 %v1482_v2  ;;  %v1949_v50 = vld [vmem:[%s2284_s29 + $0x244] sm:$0xf0]  ;;  %v1884_v51 = vld [vmem:[%s2284_s29 + $0x44] sm:$0xf]  ;;  %v1515_v52 = vld [vmem:[%s2284_s29 + $0x48] sm:$0xf0]  ;;  %v1590_v56 = vor.u32 %v1902_v45, %v1587_v46 }
  0x9b   : > { %1257 = vmatpush.bf16.msra.mxu2 %v1610_v7  ;;  %v700_v53 = vld [vmem:[%s2548_s2] sm:$0x3f]  ;;  %v2026_v55 = vmov 0   ;;  %v1965_v58 = vld [vmem:[%s2284_s29 + $0x2c4] sm:$0xf0]  ;;  %v1770_v59 = vor.u32 %v1949_v50, %v1769_v49  ;;  %v1518_v60 = vor.u32 %v1884_v51, %v1515_v52  ;;  %vm1220_vm0 = vcmask 130048  }
  0x9c   : > { %1270 = vmatpush.bf16.msra.mxu3 %v1674_v8  ;;  %2001 = vset.pattern.permute.xlu0 %v2026_v55  ;;  %v1833_v57 = vld [vmem:[%s2284_s29 + $0x2c0] sm:$0xf]  ;;  %v1900_v61 = vld [vmem:[%s2284_s29 + $0xc4] sm:$0xf]  ;;  %v1579_v62 = vld [vmem:[%s2284_s29 + $0xc8] sm:$0xf0] }
  0x9d   : > { %1244 = vmatpush.bf16.msra.mxu1 %v1546_v17  ;;  %1232 = vmatmul.bf16.vlgmr.msra.gmra.mxu0 %v2381_v35  ;;  %v1761_v63 = vld [vmem:[%s2284_s29 + $0x230] sm:$0xf]  ;;  %v1947_v0 = vld [vmem:[%s2284_s29 + $0x234] sm:$0xf0]  ;;  %v1882_v1 = vld [vmem:[%s2284_s29 + $0x34] sm:$0xf]  ;;  %v1834_v3 = vor.u32 %v1965_v58, %v1833_v57  ;;  %v1582_v5 = vor.u32 %v1900_v61, %v1579_v62 }
  0x9e   : > { %1276 = vmatpush.bf16.msrb.mxu0 %v1794_v12  ;;  %1258 = vmatmul.bf16.vlgmr.msra.gmra.mxu2 %v2374_v23  ;;  %v1507_v2 = vld [vmem:[%s2284_s29 + $0x38] sm:$0xf0]  ;;  %v601_v4 = vld [vmem:[%s2546_s0 + $0x18] sm:$0x7]  ;;  %v1825_v6 = vld [vmem:[%s2284_s29 + $0x2b0] sm:$0xf]  ;;  %v1762_v9 = vor.u32 %v1947_v0, %v1761_v63 }
  0x9f   : > { %1309 = vmatpush.bf16.msrb.mxu2 %v1866_v18  ;;  %1271 = vmatmul.bf16.vlgmr.msra.gmra.mxu3 %v2386_v39  ;;  %v1963_v7 = vld [vmem:[%s2284_s29 + $0x2b4] sm:$0xf0]  ;;  %v716_v8 = vunpack.c.l.b16 %v601_v4  ;;  %v1510_v10 = vor.u32 %v1882_v1, %v1507_v2  ;;  %v1898_v11 = vld [vmem:[%s2284_s29 + $0xb4] sm:$0xf]  ;;  %v1571_v12 = vld [vmem:[%s2284_s29 + $0xb8] sm:$0xf0] }
  0xa0   : > { %1315 = vmatpush.bf16.msrb.mxu3 %v1542_v13  ;;  %1245 = vmatmul.bf16.vlgmr.msra.gmra.mxu1 %v2388_v40  ;;  %v1753_v13 = vld [vmem:[%s2284_s29 + $0x220] sm:$0xf]  ;;  %v1945_v14 = vld [vmem:[%s2284_s29 + $0x224] sm:$0xf0]  ;;  %v1880_v15 = vld [vmem:[%s2284_s29 + $0x24] sm:$0xf]  ;;  %v1826_v17 = vor.u32 %v1963_v7, %v1825_v6  ;;  %v1574_v19 = vor.u32 %v1898_v11, %v1571_v12 }
  0xa1   : > { %1289 = vmatpush.bf16.msrb.mxu1 %v1858_v24  ;;  %703 = vperm.xlu0 %2001, %v700_v53   ;;  %v1499_v16 = vld [vmem:[%s2284_s29 + $0x28] sm:$0xf0]  ;;  %v2424_v18 = vpack.c.b16 %v716_v8, %v716_v8  ;;  %v1817_v20 = vld [vmem:[%s2284_s29 + $0x2a0] sm:$0xf]  ;;  %v1961_v21 = vld [vmem:[%s2284_s29 + $0x2a4] sm:$0xf0]  ;;  %v1754_v22 = vor.u32 %v1945_v14, %v1753_v13 }
  0xa2   : > { %1277 = vmatpush.bf16.msrb.mxu0 %v1786_v30  ;;  %v1502_v24 = vor.u32 %v1880_v15, %v1499_v16  ;;  %v1896_v25 = vld [vmem:[%s2284_s29 + $0xa4] sm:$0xf]  ;;  %v1563_v26 = vld [vmem:[%s2284_s29 + $0xa8] sm:$0xf0]  ;;  %v1943_v28 = vld [vmem:[%s2284_s29 + $0x214] sm:$0xf0] }
  0xa3   : > { %1328 = vmatpush.bf16.msra.mxu2 %v1606_v27  ;;  %v1745_v27 = vld [vmem:[%s2284_s29 + $0x210] sm:$0xf]  ;;  %v1878_v29 = vld [vmem:[%s2284_s29 + $0x14] sm:$0xf]  ;;  %v1491_v30 = vld [vmem:[%s2284_s29 + $0x18] sm:$0xf0]  ;;  %v1566_v33 = vor.u32 %v1896_v25, %v1563_v26 }
  0xa4   : > { %1316 = vmatpush.bf16.msrb.mxu3 %v1534_v31  ;;  %v1818_v31 = vor.u32 %v1961_v21, %v1817_v20  ;;  %v1809_v32 = vld [vmem:[%s2284_s29 + $0x290] sm:$0xf]  ;;  %v1959_v34 = vld [vmem:[%s2284_s29 + $0x294] sm:$0xf0]  ;;  %v1894_v36 = vld [vmem:[%s2284_s29 + $0x94] sm:$0xf]  ;;  %v1746_v38 = vor.u32 %v1943_v28, %v1745_v27 }
  0xa5   : > { %1290 = vmatpush.bf16.msrb.mxu1 %v1850_v41  ;;  %v1555_v37 = vld [vmem:[%s2284_s29 + $0x98] sm:$0xf0]  ;;  %v1494_v41 = vor.u32 %v1878_v29, %v1491_v30  ;;  %v1737_v42 = vld [vmem:[%s2284_s29 + $0x200] sm:$0xf]  ;;  %v1876_v45 = vld [vmem:[%s2284_s29 + $0x4] sm:$0xf] }
  0xa6   : > { %1278 = vmatpush.bf16.msrb.mxu0 %v1778_v47  ;;  %v600_v44 = vld [vmem:[%s2546_s0 + $0x10] sm:$0x77]  ;;  %v1483_v46 = vld [vmem:[%s2284_s29 + $0x8] sm:$0xf0]  ;;  %v1667_v49 = vld [vmem:[%s2284_s29 + $0x178] sm:$0xf0]  ;;  %v1558_v52 = vor.u32 %v1894_v36, %v1555_v37 }
  0xa7   : > { %1329 = vmatpush.bf16.msra.mxu2 %v1598_v43  ;;  %v1941_v43 = vld [vmem:[%s2284_s29 + $0x204] sm:$0xf0]  ;;  %v1922_v47 = vld [vmem:[%s2284_s29 + $0x174] sm:$0xf]  ;;  %v1795_v51 = vld [vmem:[%s2284_s29 + $0x278] sm:$0xf0]  ;;  %v714_v55 = vunpack.c.l.b16 %v600_v44  ;;  %v1486_v57 = vor.u32 %v1876_v45, %v1483_v46  ;;  %v715_v2 = vunpack.c.h.b16 %v600_v44 }
  0xa8   : > { %1317 = vmatpush.bf16.msrb.mxu3 %v1526_v48  ;;  %v1810_v48 = vor.u32 %v1959_v34, %v1809_v32  ;;  %v1954_v50 = vld [vmem:[%s2284_s29 + $0x274] sm:$0xf]  ;;  %v1801_v53 = vld [vmem:[%s2284_s29 + $0x280] sm:$0xf]  ;;  %v1892_v58 = vld [vmem:[%s2284_s29 + $0x84] sm:$0xf]  ;;  %v1670_v61 = vor.u32 %v1922_v47, %v1667_v49 }
  0xa9   : > { %1291 = vmatpush.bf16.msrb.mxu1 %v1842_v54  ;;  %v1957_v54 = vld [vmem:[%s2284_s29 + $0x284] sm:$0xf0]  ;;  %v1798_v62 = vor.u32 %v1954_v50, %v1795_v51  ;;  %v1731_v63 = vld [vmem:[%s2284_s29 + $0x1f8] sm:$0xf0]  ;;  %v1970_v0 = vld [vmem:[%s2284_s29 + $0x2f4] sm:$0xf]  ;;  %v2461_v6 = vpack.c.b16 %v714_v55, %v714_v55  ;;  %v2466_v13 = vpack.c.b16 %v715_v2, %v715_v2 }
  0xaa   : > { %1279 = vmatpush.bf16.msrb.mxu0 %v1770_v59  ;;  %v1547_v59 = vld [vmem:[%s2284_s29 + $0x88] sm:$0xf0]  ;;  %v1859_v1 = vld [vmem:[%s2284_s29 + $0x2f8] sm:$0xf0]  ;;  %v1920_v4 = vld [vmem:[%s2284_s29 + $0x164] sm:$0xf] }
  0xab   : > { %1330 = vmatpush.bf16.msra.mxu2 %v1590_v56  ;;  %v1738_v56 = vor.u32 %v1941_v43, %v1737_v42  ;;  %v1550_v7 = vor.u32 %v1892_v58, %v1547_v59  ;;  %v1952_v8 = vld [vmem:[%s2284_s29 + $0x264] sm:$0xf]  ;;  %v1862_v11 = vor.u32 %v1970_v0, %v1859_v1  ;;  %v1723_v15 = vld [vmem:[%s2284_s29 + $0x1e8] sm:$0xf0]  ;;  %v1918_v20 = vld [vmem:[%s2284_s29 + $0x154] sm:$0xf] }
  0xac   : > { %1318 = vmatpush.bf16.msrb.mxu3 %v1518_v60  ;;  %v1938_v60 = vld [vmem:[%s2284_s29 + $0x1f4] sm:$0xf]  ;;  %v1936_v12 = vld [vmem:[%s2284_s29 + $0x1e4] sm:$0xf]  ;;  %v1651_v21 = vld [vmem:[%s2284_s29 + $0x158] sm:$0xf0] }
  0xad   : > { %1292 = vmatpush.bf16.msrb.mxu1 %v1834_v3  ;;  %v1802_v3 = vor.u32 %v1957_v54, %v1801_v53  ;;  %v1968_v16 = vld [vmem:[%s2284_s29 + $0x2e4] sm:$0xf]  ;;  %v1726_v25 = vor.u32 %v1936_v12, %v1723_v15  ;;  %v1934_v27 = vld [vmem:[%s2284_s29 + $0x1d4] sm:$0xf]  ;;  %v1654_v28 = vor.u32 %v1918_v20, %v1651_v21  ;;  %v1715_v29 = vld [vmem:[%s2284_s29 + $0x1d8] sm:$0xf0] }
  0xae   : > { %1280 = vmatpush.bf16.msrb.mxu0 %v1762_v9  ;;  %1871 = vmatmul.msk.bf16.vlgmr.msrb.gmra.mxu2 %vm1220_vm0, %v2424_v18  ;;  %v1787_v9 = vld [vmem:[%s2284_s29 + $0x268] sm:$0xf0]  ;;  %v1966_v30 = vld [vmem:[%s2284_s29 + $0x2d4] sm:$0xf]  ;;  %v1948_v36 = vld [vmem:[%s2284_s29 + $0x244] sm:$0xf] }
  0xaf   : > { %1331 = vmatpush.bf16.msra.mxu2 %v1582_v5  ;;  %v1659_v5 = vld [vmem:[%s2284_s29 + $0x168] sm:$0xf0]  ;;  %v1932_v42 = vld [vmem:[%s2284_s29 + $0x1c4] sm:$0xf]  ;;  %v1914_v47 = vld [vmem:[%s2284_s29 + $0x134] sm:$0xf] }
  0xb0   : > { %1319 = vmatpush.bf16.msrb.mxu3 %v1510_v10  ;;  %v1734_v10 = vor.u32 %v1938_v60, %v1731_v63  ;;  %v1662_v14 = vor.u32 %v1920_v4, %v1659_v5  ;;  %v1643_v34 = vld [vmem:[%s2284_s29 + $0x148] sm:$0xf0]  ;;  %v1964_v45 = vld [vmem:[%s2284_s29 + $0x2c4] sm:$0xf]  ;;  %v1763_v49 = vld [vmem:[%s2284_s29 + $0x238] sm:$0xf0] }
  0xb1   : > { %1293 = vmatpush.bf16.msrb.mxu1 %v1826_v17  ;;  %v1851_v17 = vld [vmem:[%s2284_s29 + $0x2e8] sm:$0xf0]  ;;  %v1699_v54 = vld [vmem:[%s2284_s29 + $0x1b8] sm:$0xf0]  ;;  %v1962_v55 = vld [vmem:[%s2284_s29 + $0x2b4] sm:$0xf] }
  0xb2   : > { %1281 = vmatpush.bf16.msrb.mxu0 %v1754_v22  ;;  %v1950_v22 = vld [vmem:[%s2284_s29 + $0x254] sm:$0xf]  ;;  %v1854_v26 = vor.u32 %v1968_v16, %v1851_v17  ;;  %v1771_v37 = vld [vmem:[%s2284_s29 + $0x248] sm:$0xf0]  ;;  %v1912_v58 = vld [vmem:[%s2284_s29 + $0x124] sm:$0xf] }
  0xb3   : > { %1332 = vmatpush.bf16.msra.mxu2 %v1574_v19  ;;  %v1790_v19 = vor.u32 %v1952_v8, %v1787_v9  ;;  %v1707_v44 = vld [vmem:[%s2284_s29 + $0x1c8] sm:$0xf0]  ;;  %v1774_v46 = vor.u32 %v1948_v36, %v1771_v37  ;;  %v1944_v60 = vld [vmem:[%s2284_s29 + $0x224] sm:$0xf]  ;;  %v1619_v8 = vld [vmem:[%s2284_s29 + $0x118] sm:$0xf0] }
  0xb4   : > { %1320 = vmatpush.bf16.msrb.mxu3 %v1502_v24  ;;  %v1779_v24 = vld [vmem:[%s2284_s29 + $0x258] sm:$0xf0]  ;;  %v1710_v50 = vor.u32 %v1932_v42, %v1707_v44  ;;  %v1627_v59 = vld [vmem:[%s2284_s29 + $0x128] sm:$0xf0]  ;;  %v1928_v0 = vld [vmem:[%s2284_s29 + $0x1a4] sm:$0xf] }
  0xb5   : > { %1294 = vmatpush.bf16.msrb.mxu1 %v1818_v31  ;;  %v1843_v31 = vld [vmem:[%s2284_s29 + $0x2d8] sm:$0xf0]  ;;  %v1782_v32 = vor.u32 %v1950_v22, %v1779_v24  ;;  %v1630_v1 = vor.u32 %v1912_v58, %v1627_v59  ;;  %v1691_v2 = vld [vmem:[%s2284_s29 + $0x1a8] sm:$0xf0]  ;;  %v1942_v9 = vld [vmem:[%s2284_s29 + $0x214] sm:$0xf] }
  0xb6   : > { %1282 = vmatpush.bf16.msrb.mxu0 %v1746_v38  ;;  %v1718_v38 = vor.u32 %v1934_v27, %v1715_v29  ;;  %v1819_v4 = vld [vmem:[%s2284_s29 + $0x2a8] sm:$0xf0]  ;;  %v1683_v16 = vld [vmem:[%s2284_s29 + $0x198] sm:$0xf0]  ;;  %v1958_v17 = vld [vmem:[%s2284_s29 + $0x294] sm:$0xf] }
  0xb7   : > { %1333 = vmatpush.bf16.msra.mxu2 %v1566_v33  ;;  %v1916_v33 = vld [vmem:[%s2284_s29 + $0x144] sm:$0xf]  ;;  %v1611_v22 = vld [vmem:[%s2284_s29 + $0x108] sm:$0xf0]  ;;  %s2554_s17 = smov (!%p592_p8, %s1477_s17), 3 }
  0xb8   : > { %1321 = vmatpush.bf16.msrb.mxu3 %v1494_v41  ;;  %v1846_v41 = vor.u32 %v1966_v30, %v1843_v31  ;;  %v1646_v43 = vor.u32 %v1916_v33, %v1643_v34  ;;  %v1908_v21 = vld [vmem:[%s2284_s29 + $0x104] sm:$0xf]  ;;  %v1867_v27 = vld [vmem:[%s2284_s29 + $0x308] sm:$0xf0]  ;;  %s1478_s18 = sshll.u32 %s2554_s17, 3 }
  0xb9   : > { %1295 = vmatpush.bf16.msrb.mxu1 %v1810_v48  ;;  %v1946_v48 = vld [vmem:[%s2284_s29 + $0x234] sm:$0xf]  ;;  %v1940_v24 = vld [vmem:[%s2284_s29 + $0x204] sm:$0xf]  ;;  %v1614_v30 = vor.u32 %v1908_v21, %v1611_v22  ;;  %v1803_v36 = vld [vmem:[%s2284_s29 + $0x288] sm:$0xf0]  ;;  %s595_s22 = scalar_lea.vmem %s2549_s3, %s1478_s18 }
  0xba   : > { %1283 = vmatpush.bf16.msrb.mxu0 %v1738_v56  ;;  %v1827_v56 = vld [vmem:[%s2284_s29 + $0x2b8] sm:$0xf0]  ;;  %v1924_v31 = vld [vmem:[%s2284_s29 + $0x184] sm:$0xf] }
  0xbb   : > { %1334 = vmatpush.bf16.msra.mxu2 %v1558_v52  ;;  %v1930_v52 = vld [vmem:[%s2284_s29 + $0x1b4] sm:$0xf]  ;;  %v1830_v63 = vor.u32 %v1962_v55, %v1827_v56  ;;  %v1956_v34 = vld [vmem:[%s2284_s29 + $0x284] sm:$0xf] }
  0xbc   : > { %1322 = vmatpush.bf16.msrb.mxu3 %v1486_v57  ;;  %v1766_v57 = vor.u32 %v1946_v48, %v1763_v49 }
  0xbd   : > { %1296 = vmatpush.bf16.msrb.mxu1 %v1802_v3  ;;  %1284 = vmatmul.bf16.vlgmr.msrb.gmra.mxu0 %v2461_v6  ;;  %v1960_v3 = vld [vmem:[%s2284_s29 + $0x2a4] sm:$0xf] }
  0xbe   : > { %1341 = vmatpush.bf16.msra.mxu0 %v1670_v61  ;;  %v1755_v61 = vld [vmem:[%s2284_s29 + $0x228] sm:$0xf0]  ;;  %v1822_v12 = vor.u32 %v1960_v3, %v1819_v4 }
  0xbf   : > { %1335 = vmatpush.bf16.msra.mxu2 %v1550_v7  ;;  %1323 = vmatmul.bf16.vlgmr.msrb.gmra.mxu3 %v2381_v35  ;;  %v1635_v35 = vld [vmem:[%s2284_s29 + $0x138] sm:$0xf0]  ;;  %v1758_v5 = vor.u32 %v1944_v60, %v1755_v61  ;;  %v1910_v7 = vld [vmem:[%s2284_s29 + $0x114] sm:$0xf] }
  0xc0   : > { %1367 = vmatpush.bf16.msra.mxu3 %v1798_v62  ;;  %1297 = vmatmul.bf16.vlgmr.msrb.gmra.mxu1 %v2466_v13  ;;  %v1638_v53 = vor.u32 %v1914_v47, %v1635_v35  ;;  %v1702_v62 = vor.u32 %v1930_v52, %v1699_v54  ;;  %v1622_v15 = vor.u32 %v1910_v7, %v1619_v8 }
  0xc1   : > { %1354 = vmatpush.bf16.msra.mxu1 %v1734_v10  ;;  %v1747_v10 = vld [vmem:[%s2284_s29 + $0x218] sm:$0xf0] }
  0xc2   : > { %1342 = vmatpush.bf16.msra.mxu0 %v1662_v14  ;;  %1336 = vmatmul.bf16.vlgmr.msra.gmra.mxu2 %v2388_v40  ;;  %v1835_v40 = vld [vmem:[%s2284_s29 + $0x2c8] sm:$0xf0]  ;;  %v1926_v14 = vld [vmem:[%s2284_s29 + $0x194] sm:$0xf]  ;;  %v1750_v20 = vor.u32 %v1942_v9, %v1747_v10 }
  0xc3   : > { %1380 = vmatpush.bf16.msrb.mxu2 %v1862_v11  ;;  %v1838_v51 = vor.u32 %v1964_v45, %v1835_v40  ;;  %v1694_v11 = vor.u32 %v1928_v0, %v1691_v2 }
  0xc4   : > { %1368 = vmatpush.bf16.msra.mxu3 %v1790_v19  ;;  %v1811_v19 = vld [vmem:[%s2284_s29 + $0x298] sm:$0xf0] }
  0xc5   : > { %1355 = vmatpush.bf16.msra.mxu1 %v1726_v25  ;;  %v1739_v25 = vld [vmem:[%s2284_s29 + $0x208] sm:$0xf0]  ;;  %v1814_v29 = vor.u32 %v1958_v17, %v1811_v19 }
  0xc6   : > { %1343 = vmatpush.bf16.msra.mxu0 %v1654_v28  ;;  %v1686_v28 = vor.u32 %v1926_v14, %v1683_v16  ;;  %v1742_v33 = vor.u32 %v1940_v24, %v1739_v25 }
  0xc7   : > { %1381 = vmatpush.bf16.msrb.mxu2 %v1854_v26  ;;  %v1972_v26 = vld [vmem:[%s2284_s29 + $0x304] sm:$0xf] }
  0xc8   : > { %1369 = vmatpush.bf16.msra.mxu3 %v1782_v32  ;;  %v1675_v32 = vld [vmem:[%s2284_s29 + $0x188] sm:$0xf0]  ;;  %v1870_v37 = vor.u32 %v1972_v26, %v1867_v27 }
  0xc9   : > { %1356 = vmatpush.bf16.msra.mxu1 %v1718_v38  ;;  %v1678_v38 = vor.u32 %v1924_v31, %v1675_v32 }
  0xca   : > { %1344 = vmatpush.bf16.msra.mxu0 %v1646_v43 }
  0xcb   : > { %1382 = vmatpush.bf16.msrb.mxu2 %v1846_v41  ;;  %v1806_v41 = vor.u32 %v1956_v34, %v1803_v36 }
  0xcc   : > { %1370 = vmatpush.bf16.msra.mxu3 %v1774_v46 }
  0xcd   : > { %1357 = vmatpush.bf16.msra.mxu1 %v1710_v50 }
  0xce   : > { %1345 = vmatpush.bf16.msra.mxu0 %v1638_v53 }
  0xcf   : > { %1383 = vmatpush.bf16.msrb.mxu2 %v1838_v51 }
  0xd0   : > { %1371 = vmatpush.bf16.msra.mxu3 %v1766_v57 }
  0xd1   : > { %1358 = vmatpush.bf16.msra.mxu1 %v1702_v62 }
  0xd2   : > { %1346 = vmatpush.bf16.msra.mxu0 %v1630_v1 }
  0xd3   : > { %1384 = vmatpush.bf16.msrb.mxu2 %v1830_v63 }
  0xd4   : > { %1372 = vmatpush.bf16.msra.mxu3 %v1758_v5 }
  0xd5   : > { %1359 = vmatpush.bf16.msra.mxu1 %v1694_v11 }
  0xd6   : > { %1347 = vmatpush.bf16.msra.mxu0 %v1622_v15 }
  0xd7   : > { %1385 = vmatpush.bf16.msrb.mxu2 %v1822_v12 }
  0xd8   : > { %1373 = vmatpush.bf16.msra.mxu3 %v1750_v20 }
  0xd9   : > { %1360 = vmatpush.bf16.msra.mxu1 %v1686_v28 }
  0xda   : > { %1348 = vmatpush.bf16.msra.mxu0 %v1614_v30 }
  0xdb   : > { %1386 = vmatpush.bf16.msrb.mxu2 %v1814_v29 }
  0xdc   : > { %1374 = vmatpush.bf16.msra.mxu3 %v1742_v33 }
  0xdd   : > { %1361 = vmatpush.bf16.msra.mxu1 %v1678_v38  ;;  %1349 = vmatmul.bf16.vlgmr.msra.gmra.mxu0 %v2374_v23 }
  0xde   : > { %1400 = vmatpush.bf16.msrb.mxu0 %v1870_v37 }
  0xdf   : > { %1375 = vmatmul.bf16.vlgmr.msra.gmra.mxu3 %v2461_v6  ;;  %1387 = vmatpush.bf16.msrb.mxu2 %v1806_v41 }
  0xe0   : > { %1362 = vmatmul.bf16.vlgmr.msra.gmra.mxu1 %v2386_v39 }
  0xe2   : > { %1388 = vmatmul.bf16.vlgmr.msrb.gmra.mxu2 %v2466_v13 }
  0xed   : > { %1872 = vmatmul.msk.bf16.vlgmr.msrb.gmra.mxu0 %vm1220_vm0, %v2424_v18 }
 0x113   : > { %v704_v47 = vpop.permute.xlu0 %703 }
 0x11a   : > { %v1233_v42 = vpop.f32.mrf.mxu0 }
 0x11b   : > { %v1234_v23 = vadd.f32 %v1233_v42, %v704_v47 }
 0x11d   : > { %v1246_v43 = vpop.f32.mrf.mxu1 }
 0x11e   : > { %v1247_v6 = vadd.f32 %v1246_v43, %v1234_v23 }
 0x121   : > { %v1259_v44 = vpop.f32.mrf.mxu2 }
 0x122   : > { %v1272_v45 = vpop.f32.mrf.mxu3  ;;  %v1235_v40 = vpop.f32.mrf.mxu0  ;;  %v1260_v49 = vadd.f32 %v1259_v44, %v1247_v6 }
 0x124   : > { %v1273_v13 = vadd.f32 %v1272_v45, %v1260_v49 }
 0x125   : > { %v1248_v46 = vpop.f32.mrf.mxu1 }
 0x129   : > { %v1261_v35 = vpop.f32.mrf.mxu2 }
 0x12a   : > { %v1274_v48 = vpop.f32.mrf.mxu3 }
 0x131   : > { %v1311_v39 = vpop.f32.mrf.mxu2 }
 0x139   : > { %v1313_v51 = vpop.f32.mrf.mxu2 }
 0x13a   : > { %v1285_v50 = vpop.f32.mrf.mxu0 }
 0x13b   : > { %v1286_v18 = vadd.f32 %v1285_v50, %v1273_v13 }
 0x13d   : > { %v1298_v52 = vpop.f32.mrf.mxu1 }
 0x13e   : > { %v1299_v53 = vadd.f32 %v1298_v52, %v1286_v18 }
 0x140   : > { %v1312_v54 = vadd.f32 %v1311_v39, %v1299_v53 }
 0x142   : > { %1406 = vst [vmem:[%s595_s22] sm:$0x3f] %v1312_v54  ;;  %v1287_v55 = vpop.f32.mrf.mxu0  ;;  %v1324_v57 = vpop.f32.mrf.mxu3 }
 0x143   : > { %v1325_v61 = vadd.f32 %v1324_v57, %v704_v47 }
 0x145   : > { %v1337_v56 = vpop.f32.mrf.mxu2  ;;  %v1300_v58 = vpop.f32.mrf.mxu1 }
 0x146   : > { %v1338_v63 = vadd.f32 %v1337_v56, %v1325_v61 }
 0x14a   : > { %v1326_v60 = vpop.f32.mrf.mxu3 }
 0x14d   : > { %v1339_v59 = vpop.f32.mrf.mxu2 }
 0x15a   : > { %v1350_v62 = vpop.f32.mrf.mxu0 }
 0x15b   : > { %v1351_v1 = vadd.f32 %v1350_v62, %v1338_v63 }
 0x15d   : > { %v1363_v0 = vpop.f32.mrf.mxu1 }
 0x15e   : > { %v1364_v4 = vadd.f32 %v1363_v0, %v1351_v1 }
 0x162   : > { %v1376_v2 = vpop.f32.mrf.mxu3  ;;  %v1352_v3 = vpop.f32.mrf.mxu0 }
 0x163   : > { %v1377_v7 = vadd.f32 %v1376_v2, %v1364_v4 }
 0x165   : > { %v1389_v5 = vpop.f32.mrf.mxu2  ;;  %v1365_v8 = vpop.f32.mrf.mxu1 }
 0x166   : > { %v1390_v9 = vadd.f32 %v1389_v5, %v1377_v7 }
 0x16a   : > { %v1378_v10 = vpop.f32.mrf.mxu3  ;;  %v1402_v11 = vpop.f32.mrf.mxu0 }
 0x16b   : > { %v1403_v12 = vadd.f32 %v1402_v11, %v1390_v9 }
 0x16d   : > { %v1391_v14 = vpop.f32.mrf.mxu2  ;;  %1407 = vst [vmem:[%s595_s22 + $0x8] sm:$0x3f] %v1403_v12 }
 0x172   : > { %v1404_v15 = vpop.f32.mrf.mxu0 }
 0x173 PF: > { %p10_p9 = scmp.ge.s32.totalorder %s2064_s16, 4   ;;  %s2550_s12 = smov %s2020_s13 }
 0x174   : > { %s2551_s13 = smov %s2073_s19  ;;  %s2552_s14 = smov %s2064_s16 }
 0x175   :  { %12 = sbr.rel (!%p10_p9) target bundleno = 2 (0x2), region = 105 }

// kernel: _lambda_.24
= control target key start
LH: loop header
LB: loop body
LE: loop exit
PB: predicated region body
PF: predicated region fallthrough
CT: control target
= control target key end

     0   :  { %v465_v7 = vmov 0   ;;  %vm260_vm0 = vcmask 523264   ;;  %s582_s1 = inlined_call_operand.vmem [shape: bf16[448,128], index: 1, kind: input, shape index: {}]   ;;  %s583_s0 = inlined_call_operand.vmem [shape: bf16[8,448], index: 0, kind: input, shape index: {}]   ;;  %s584_s2 = inlined_call_operand.vmem [shape: f32[8,1], index: 2, kind: input, shape index: {}]   ;;  %s585_s3 = inlined_call_operand.vmem [shape: bf16[8,128], index: 3, kind: output, shape index: {}]  }
   0x1   :  { %v442_v0 = vld [vmem:[%s582_s1 + $0x38] sm:$0xff]  ;;  %v441_v3 = vld [vmem:[%s582_s1 + $0x30] sm:$0xff]  ;;  %464 = vset.pattern.permute.xlu0 %v465_v7  ;;  %v440_v9 = vld [vmem:[%s582_s1 + $0x28] sm:$0xff] }
   0x2   :  { %v450_v1 = vld [vmem:[%s582_s1 + $0x78] sm:$0xff]  ;;  %264 = vmatpush.bf16.msra.mxu0 %v442_v0  ;;  %v449_v4 = vld [vmem:[%s582_s1 + $0x70] sm:$0xff]  ;;  %v448_v10 = vld [vmem:[%s582_s1 + $0x68] sm:$0xff] }
   0x3   :  { %v458_v2 = vld [vmem:[%s582_s1 + $0xb8] sm:$0xff]  ;;  %277 = vmatpush.bf16.msra.mxu1 %v450_v1  ;;  %v457_v5 = vld [vmem:[%s582_s1 + $0xb0] sm:$0xff]  ;;  %v456_v11 = vld [vmem:[%s582_s1 + $0xa8] sm:$0xff] }
   0x4   :  { %290 = vmatpush.bf16.msra.mxu2 %v458_v2  ;;  %v462_v6 = vld [vmem:[%s582_s1 + $0xd8] sm:$0xff]  ;;  %v461_v8 = vld [vmem:[%s582_s1 + $0xd0] sm:$0xff]  ;;  %v460_v12 = vld [vmem:[%s582_s1 + $0xc8] sm:$0xff] }
   0x5   :  { %307 = vmatpush.bf16.msra.mxu3 %v462_v6  ;;  %v16_v13 = vld [vmem:[%s583_s0 + $0x8] sm:$0xff]  ;;  %v439_v14 = vld [vmem:[%s582_s1 + $0x20] sm:$0xff]  ;;  %v438_v20 = vld [vmem:[%s582_s1 + $0x18] sm:$0xff] }
   0x6   :  { %265 = vmatpush.bf16.msra.mxu0 %v441_v3  ;;  %v447_v15 = vld [vmem:[%s582_s1 + $0x60] sm:$0xff]  ;;  %v84_v18 = vunpack.c.h.b16 %v16_v13  ;;  %v446_v21 = vld [vmem:[%s582_s1 + $0x58] sm:$0xff]  ;;  %v437_v24 = vld [vmem:[%s582_s1 + $0x10] sm:$0xff]  ;;  %v83_v35 = vunpack.c.l.b16 %v16_v13 }
   0x7   :  { %278 = vmatpush.bf16.msra.mxu1 %v449_v4  ;;  %v73_v16 = vld [vmem:[%s584_s2] sm:$0xff]  ;;  %v454_v22 = vld [vmem:[%s582_s1 + $0x98] sm:$0xff]  ;;  %v445_v25 = vld [vmem:[%s582_s1 + $0x50] sm:$0xff] }
   0x8   :  { %291 = vmatpush.bf16.msra.mxu2 %v457_v5  ;;  %v455_v17 = vld [vmem:[%s582_s1 + $0xa0] sm:$0xff]  ;;  %76 = vperm.xlu0 %464, %v73_v16   ;;  %v88_v23 = vpack.c.b16 %v84_v18, %v84_v18  ;;  %v453_v26 = vld [vmem:[%s582_s1 + $0x90] sm:$0xff]  ;;  %v436_v27 = vld [vmem:[%s582_s1 + $0x8] sm:$0xff]  ;;  %v87_v39 = vpack.c.b16 %v83_v35, %v83_v35 }
   0x9   :  { %308 = vmatpush.bf16.msra.mxu3 %v461_v8  ;;  %v459_v19 = vld [vmem:[%s582_s1 + $0xc0] sm:$0xff]  ;;  %v444_v28 = vld [vmem:[%s582_s1 + $0x48] sm:$0xff] }
   0xa   :  { %266 = vmatpush.bf16.msra.mxu0 %v440_v9  ;;  %v15_v29 = vld [vmem:[%s583_s0] sm:$0xff]  ;;  %v452_v30 = vld [vmem:[%s582_s1 + $0x88] sm:$0xff] }
   0xb   :  { %279 = vmatpush.bf16.msra.mxu1 %v448_v10  ;;  %v81_v31 = vunpack.c.l.b16 %v15_v29  ;;  %v82_v32 = vunpack.c.h.b16 %v15_v29  ;;  %v435_v33 = vld [vmem:[%s582_s1] sm:$0xff] }
   0xc   :  { %292 = vmatpush.bf16.msra.mxu2 %v456_v11  ;;  %v443_v34 = vld [vmem:[%s582_s1 + $0x40] sm:$0xff] }
   0xd   :  { %309 = vmatpush.bf16.msra.mxu3 %v460_v12  ;;  %v451_v36 = vld [vmem:[%s582_s1 + $0x80] sm:$0xff]  ;;  %v85_v37 = vpack.c.b16 %v81_v31, %v81_v31  ;;  %v86_v38 = vpack.c.b16 %v82_v32, %v82_v32 }
   0xe   :  { %267 = vmatpush.bf16.msra.mxu0 %v439_v14 }
   0xf   :  { %280 = vmatpush.bf16.msra.mxu1 %v447_v15 }
  0x10   :  { %293 = vmatpush.bf16.msra.mxu2 %v455_v17 }
  0x11   :  { %310 = vmatpush.bf16.msra.mxu3 %v459_v19 }
  0x12   :  { %268 = vmatpush.bf16.msra.mxu0 %v438_v20 }
  0x13   :  { %281 = vmatpush.bf16.msra.mxu1 %v446_v21 }
  0x14   :  { %294 = vmatpush.bf16.msra.mxu2 %v454_v22  ;;  %434 = vmatmul.msk.bf16.vlgmr.msra.gmra.mxu3 %vm260_vm0, %v88_v23 }
  0x16   :  { %269 = vmatpush.bf16.msra.mxu0 %v437_v24 }
  0x17   :  { %282 = vmatpush.bf16.msra.mxu1 %v445_v25 }
  0x18   :  { %295 = vmatpush.bf16.msra.mxu2 %v453_v26 }
  0x1a   :  { %270 = vmatpush.bf16.msra.mxu0 %v436_v27 }
  0x1b   :  { %283 = vmatpush.bf16.msra.mxu1 %v444_v28 }
  0x1c   :  { %296 = vmatpush.bf16.msra.mxu2 %v452_v30 }
  0x1e   :  { %271 = vmatpush.bf16.msra.mxu0 %v435_v33 }
  0x1f   :  { %284 = vmatpush.bf16.msra.mxu1 %v443_v34 }
  0x20   :  { %297 = vmatpush.bf16.msra.mxu2 %v451_v36 }
  0x21   :  { %272 = vmatmul.bf16.vlgmr.msra.gmra.mxu0 %v85_v37 }
  0x22   :  { %285 = vmatmul.bf16.vlgmr.msra.gmra.mxu1 %v86_v38 }
  0x23   :  { %298 = vmatmul.bf16.vlgmr.msra.gmra.mxu2 %v87_v39 }
  0x7a   :  { %v77_v41 = vpop.permute.xlu0 %76 }
  0x97   :  { %v312_v40 = vpop.f32.mrf.mxu3 }
  0x9e   :  { %v273_v42 = vpop.f32.mrf.mxu0 }
  0x9f   :  { %v286_v43 = vpop.f32.mrf.mxu1  ;;  %v274_v44 = vadd.f32 %v273_v42, %v77_v41  ;;  %v314_v45 = vpop.f32.mrf.mxu3 }
  0xa1   :  { %v287_v46 = vadd.f32 %v286_v43, %v274_v44 }
  0xa6   :  { %v299_v47 = vpop.f32.mrf.mxu2  ;;  %v275_v49 = vpop.f32.mrf.mxu0 }
  0xa7   :  { %v300_v48 = vadd.f32 %v299_v47, %v287_v46  ;;  %v288_v50 = vpop.f32.mrf.mxu1 }
  0xa9   :  { %v313_v51 = vadd.f32 %v312_v40, %v300_v48 }
  0xab   :  { %v316_v52 = vpack.c.bf16 %v313_v51, %v313_v51 }
  0xad   :  { %317 = vst [vmem:[%s585_s3] sm:$0xf] %v316_v52 }
  0xae   :  { %v301_v53 = vpop.f32.mrf.mxu2 }

// kernel: sub.1
= control target key start
LH: loop header
LB: loop body
LE: loop exit
PB: predicated region body
PF: predicated region fallthrough
CT: control target
= control target key end

     0   :  { %s540_s0 = inlined_call_operand.vmem [shape: f32[2,3,32,32], index: 0, kind: input, shape index: {}]   ;;  %s541_s1 = inlined_call_operand.vmem [shape: f32[2,3,32,32], index: 1, kind: input, shape index: {}]   ;;  %s542_s2 = inlined_call_operand.vmem [shape: f32[2,3,32,32], index: 2, kind: output, shape index: {}]  }
   0x1   :  { %v3_v0 = vld [vmem:[%s540_s0] sm:$0xff]  ;;  %v255_v18 = vld [vmem:[%s540_s0 + $0x8] sm:$0xff]  ;;  %v273_v36 = vld [vmem:[%s540_s0 + $0x10] sm:$0xff] }
   0x2   :  { %v4_v1 = vld [vmem:[%s541_s1] sm:$0xff]  ;;  %v256_v19 = vld [vmem:[%s541_s1 + $0x8] sm:$0xff]  ;;  %v274_v37 = vld [vmem:[%s541_s1 + $0x10] sm:$0xff] }
   0x3   :  { %v240_v2 = vld [vmem:[%s540_s0 + $0x60] sm:$0xff]  ;;  %v7_v3 = vsub.f32 %v3_v0, %v4_v1  ;;  %v258_v20 = vld [vmem:[%s540_s0 + $0x68] sm:$0xff]  ;;  %v66_v21 = vsub.f32 %v255_v18, %v256_v19  ;;  %v276_v38 = vld [vmem:[%s540_s0 + $0x70] sm:$0xff]  ;;  %v126_v39 = vsub.f32 %v273_v36, %v274_v37 }
   0x4   :  { %v241_v4 = vld [vmem:[%s541_s1 + $0x60] sm:$0xff]  ;;  %v259_v22 = vld [vmem:[%s541_s1 + $0x68] sm:$0xff]  ;;  %v277_v40 = vld [vmem:[%s541_s1 + $0x70] sm:$0xff] }
   0x5   :  { %v243_v5 = vld [vmem:[%s540_s0 + $0x20] sm:$0xff]  ;;  %v16_v7 = vsub.f32 %v240_v2, %v241_v4  ;;  %9 = vst [vmem:[%s542_s2] sm:$0xff] %v7_v3  ;;  %v261_v23 = vld [vmem:[%s540_s0 + $0x28] sm:$0xff]  ;;  %v76_v25 = vsub.f32 %v258_v20, %v259_v22  ;;  %v279_v41 = vld [vmem:[%s540_s0 + $0x30] sm:$0xff]  ;;  %v136_v43 = vsub.f32 %v276_v38, %v277_v40 }
   0x6   :  { %v244_v6 = vld [vmem:[%s541_s1 + $0x20] sm:$0xff]  ;;  %v262_v24 = vld [vmem:[%s541_s1 + $0x28] sm:$0xff]  ;;  %257 = vst [vmem:[%s542_s2 + $0x8] sm:$0xff] %v66_v21  ;;  %v280_v42 = vld [vmem:[%s541_s1 + $0x30] sm:$0xff] }
   0x7   :  { %v26_v8 = vsub.f32 %v243_v5, %v244_v6  ;;  %v246_v9 = vld [vmem:[%s540_s0 + $0x80] sm:$0xff]  ;;  %242 = vst [vmem:[%s542_s2 + $0x60] sm:$0xff] %v16_v7  ;;  %v86_v26 = vsub.f32 %v261_v23, %v262_v24  ;;  %v264_v27 = vld [vmem:[%s540_s0 + $0x88] sm:$0xff]  ;;  %v146_v44 = vsub.f32 %v279_v41, %v280_v42  ;;  %v282_v45 = vld [vmem:[%s540_s0 + $0x90] sm:$0xff] }
   0x8   :  { %v247_v10 = vld [vmem:[%s541_s1 + $0x80] sm:$0xff]  ;;  %v265_v28 = vld [vmem:[%s541_s1 + $0x88] sm:$0xff]  ;;  %260 = vst [vmem:[%s542_s2 + $0x68] sm:$0xff] %v76_v25  ;;  %v283_v46 = vld [vmem:[%s541_s1 + $0x90] sm:$0xff] }
   0x9   :  { %v249_v11 = vld [vmem:[%s540_s0 + $0x40] sm:$0xff]  ;;  %v36_v12 = vsub.f32 %v246_v9, %v247_v10  ;;  %245 = vst [vmem:[%s542_s2 + $0x20] sm:$0xff] %v26_v8  ;;  %v267_v29 = vld [vmem:[%s540_s0 + $0x48] sm:$0xff]  ;;  %v96_v30 = vsub.f32 %v264_v27, %v265_v28  ;;  %v285_v47 = vld [vmem:[%s540_s0 + $0x50] sm:$0xff]  ;;  %v156_v48 = vsub.f32 %v282_v45, %v283_v46 }
   0xa   :  { %v250_v13 = vld [vmem:[%s541_s1 + $0x40] sm:$0xff]  ;;  %v268_v31 = vld [vmem:[%s541_s1 + $0x48] sm:$0xff]  ;;  %263 = vst [vmem:[%s542_s2 + $0x28] sm:$0xff] %v86_v26  ;;  %v286_v49 = vld [vmem:[%s541_s1 + $0x50] sm:$0xff] }
   0xb   :  { %v252_v14 = vld [vmem:[%s540_s0 + $0xa0] sm:$0xff]  ;;  %v46_v16 = vsub.f32 %v249_v11, %v250_v13  ;;  %248 = vst [vmem:[%s542_s2 + $0x80] sm:$0xff] %v36_v12  ;;  %v270_v32 = vld [vmem:[%s540_s0 + $0xa8] sm:$0xff]  ;;  %v106_v34 = vsub.f32 %v267_v29, %v268_v31  ;;  %v288_v50 = vld [vmem:[%s540_s0 + $0xb0] sm:$0xff]  ;;  %v166_v52 = vsub.f32 %v285_v47, %v286_v49 }
   0xc   :  { %v253_v15 = vld [vmem:[%s541_s1 + $0xa0] sm:$0xff]  ;;  %v271_v33 = vld [vmem:[%s541_s1 + $0xa8] sm:$0xff]  ;;  %v289_v51 = vld [vmem:[%s541_s1 + $0xb0] sm:$0xff]  ;;  %266 = vst [vmem:[%s542_s2 + $0x88] sm:$0xff] %v96_v30 }
   0xd   :  { %v56_v17 = vsub.f32 %v252_v14, %v253_v15  ;;  %251 = vst [vmem:[%s542_s2 + $0x40] sm:$0xff] %v46_v16  ;;  %v116_v35 = vsub.f32 %v270_v32, %v271_v33  ;;  %v176_v53 = vsub.f32 %v288_v50, %v289_v51  ;;  %v291_v54 = vld [vmem:[%s540_s0 + $0x18] sm:$0xff] }
   0xe   :  { %v292_v55 = vld [vmem:[%s541_s1 + $0x18] sm:$0xff]  ;;  %269 = vst [vmem:[%s542_s2 + $0x48] sm:$0xff] %v106_v34 }
   0xf   :  { %254 = vst [vmem:[%s542_s2 + $0xa0] sm:$0xff] %v56_v17  ;;  %v294_v56 = vld [vmem:[%s540_s0 + $0x78] sm:$0xff]  ;;  %v186_v57 = vsub.f32 %v291_v54, %v292_v55 }
  0x10   :  { %v295_v58 = vld [vmem:[%s541_s1 + $0x78] sm:$0xff]  ;;  %272 = vst [vmem:[%s542_s2 + $0xa8] sm:$0xff] %v116_v35 }
  0x11   :  { %v297_v59 = vld [vmem:[%s540_s0 + $0x38] sm:$0xff]  ;;  %v196_v61 = vsub.f32 %v294_v56, %v295_v58  ;;  %275 = vst [vmem:[%s542_s2 + $0x10] sm:$0xff] %v126_v39 }
  0x12   :  { %v298_v60 = vld [vmem:[%s541_s1 + $0x38] sm:$0xff]  ;;  %278 = vst [vmem:[%s542_s2 + $0x70] sm:$0xff] %v136_v43 }
  0x13   :  { %v206_v62 = vsub.f32 %v297_v59, %v298_v60  ;;  %v300_v63 = vld [vmem:[%s540_s0 + $0x98] sm:$0xff]  ;;  %281 = vst [vmem:[%s542_s2 + $0x30] sm:$0xff] %v146_v44 }
  0x14   :  { %v301_v0 = vld [vmem:[%s541_s1 + $0x98] sm:$0xff]  ;;  %284 = vst [vmem:[%s542_s2 + $0x90] sm:$0xff] %v156_v48 }
  0x15   :  { %v303_v1 = vld [vmem:[%s540_s0 + $0x58] sm:$0xff]  ;;  %v216_v2 = vsub.f32 %v300_v63, %v301_v0  ;;  %287 = vst [vmem:[%s542_s2 + $0x50] sm:$0xff] %v166_v52 }
  0x16   :  { %v304_v3 = vld [vmem:[%s541_s1 + $0x58] sm:$0xff]  ;;  %290 = vst [vmem:[%s542_s2 + $0xb0] sm:$0xff] %v176_v53 }
  0x17   :  { %v306_v4 = vld [vmem:[%s540_s0 + $0xb8] sm:$0xff]  ;;  %v226_v6 = vsub.f32 %v303_v1, %v304_v3  ;;  %293 = vst [vmem:[%s542_s2 + $0x18] sm:$0xff] %v186_v57 }
  0x18   :  { %v307_v5 = vld [vmem:[%s541_s1 + $0xb8] sm:$0xff]  ;;  %296 = vst [vmem:[%s542_s2 + $0x78] sm:$0xff] %v196_v61 }
  0x19   :  { %v236_v7 = vsub.f32 %v306_v4, %v307_v5  ;;  %299 = vst [vmem:[%s542_s2 + $0x38] sm:$0xff] %v206_v62 }
  0x1a   :  { %302 = vst [vmem:[%s542_s2 + $0x98] sm:$0xff] %v216_v2 }
  0x1b   :  { %305 = vst [vmem:[%s542_s2 + $0x58] sm:$0xff] %v226_v6 }
  0x1c   :  { %308 = vst [vmem:[%s542_s2 + $0xb8] sm:$0xff] %v236_v7 }

// kernel: squeeze.18
= control target key start
LH: loop header
LB: loop body
LE: loop exit
PB: predicated region body
PF: predicated region fallthrough
CT: control target
= control target key end

     0   :  { %s2250_s12 = smov 124   ;;  %vm3_vm0 = vcmask 31744   ;;  %s2252_s27 = smov 116   ;;  %s3382_s0 = inlined_call_operand.vmem [shape: f32[2,3,16,1,32], index: 0, kind: input, shape index: {}]   ;;  %s3383_s1 = inlined_call_operand.vmem [shape: f32[2,3,4,4,16,2], index: 1, kind: output, shape index: {}]  }
   0x1   :  { %v2266_v0 = vld [vmem:[%s3382_s0 + $0x20] sm:$0xff]   ;;  %v2271_v1 = vld [vmem:[%s3382_s0 + $0x10] sm:$0xff]   ;;  %v2287_v3 = vld [vmem:[%s3382_s0 + $0x28] sm:$0xff]  }
   0x2   :  { %v2276_v2 = vld [vmem:[%s3382_s0] sm:$0xff]   ;;  %204 = vrot.lane.b32.xlu2 %v2266_v0, %s2250_s12  ;;  %186 = vrot.lane.b32.xlu1 %v2271_v1, %s2250_s12  ;;  %v2292_v4 = vld [vmem:[%s3382_s0 + $0x18] sm:$0xff]   ;;  %38 = vst.msk [vmem:[#allocation0 + $0x140] ss:$8 sm:$0xf] %vm3_vm0, %v2287_v3  }
   0x3   :  { %168 = vrot.lane.b32.xlu0 %v2276_v2, %s2250_s12  ;;  %v2297_v5 = vld [vmem:[%s3382_s0 + $0x8] sm:$0xff]   ;;  %v2308_v6 = vld [vmem:[%s3382_s0 + $0x40] sm:$0xff]   ;;  %v2313_v7 = vld [vmem:[%s3382_s0 + $0x38] sm:$0xff]   ;;  %40 = vst.msk [vmem:[#allocation0 + $0x140] ss:$8 sm:$0xf0] %vm3_vm0, %v2287_v3  }
   0x4   :  { %v2318_v8 = vld [vmem:[%s3382_s0 + $0x30] sm:$0xff]   ;;  %v2329_v9 = vld [vmem:[%s3382_s0 + $0x58] sm:$0xff]   ;;  %v2339_v11 = vld [vmem:[%s3382_s0 + $0x48] sm:$0xff]   ;;  %59 = vst.msk [vmem:[#allocation0 + $0x200] ss:$8 sm:$0xf] %vm3_vm0, %v2308_v6  }
   0x5   :  { %v2334_v10 = vld [vmem:[%s3382_s0 + $0x50] sm:$0xff]   ;;  %v2355_v13 = vld [vmem:[%s3382_s0 + $0x68] sm:$0xff]   ;;  %v2360_v14 = vld [vmem:[%s3382_s0 + $0x60] sm:$0xff]   ;;  %61 = vst.msk [vmem:[#allocation0 + $0x200] ss:$8 sm:$0xf0] %vm3_vm0, %v2308_v6  }
   0x6   :  { %v2350_v12 = vld [vmem:[%s3382_s0 + $0x70] sm:$0xff]   ;;  %v2371_v15 = vld [vmem:[%s3382_s0 + $0x88] sm:$0xff]   ;;  %v2376_v16 = vld [vmem:[%s3382_s0 + $0x80] sm:$0xff]   ;;  %45 = vst.msk [vmem:[#allocation0 + $0x180] ss:$8 sm:$0xf] %vm3_vm0, %v2318_v8  }
   0x7   :  { %v2381_v17 = vld [vmem:[%s3382_s0 + $0x78] sm:$0xff]   ;;  %v2392_v18 = vld [vmem:[%s3382_s0 + $0xa0] sm:$0xff]   ;;  %v2402_v20 = vld [vmem:[%s3382_s0 + $0x90] sm:$0xff]   ;;  %47 = vst.msk [vmem:[#allocation0 + $0x180] ss:$8 sm:$0xf0] %vm3_vm0, %v2318_v8  }
   0x8   :  { %v2397_v19 = vld [vmem:[%s3382_s0 + $0x98] sm:$0xff]   ;;  %v2418_v22 = vld [vmem:[%s3382_s0 + $0xb0] sm:$0xff]   ;;  %v2423_v23 = vld [vmem:[%s3382_s0 + $0xa8] sm:$0xff]   ;;  %17 = vst.msk [vmem:[#allocation0 + $0x80] ss:$8 sm:$0xf] %vm3_vm0, %v2271_v1  }
   0x9   :  { %v2413_v21 = vld [vmem:[%s3382_s0 + $0xb8] sm:$0xff]   ;;  %19 = vst.msk [vmem:[#allocation0 + $0x80] ss:$8 sm:$0xf0] %vm3_vm0, %v2271_v1  }
   0xa   :  { %213 = vrot.lane.b32.xlu2 %v2287_v3, %s2250_s12  ;;  %195 = vrot.lane.b32.xlu1 %v2292_v4, %s2250_s12  ;;  %80 = vst.msk [vmem:[#allocation0 + $0x2c0] ss:$8 sm:$0xf] %vm3_vm0, %v2329_v9  }
   0xb   :  { %177 = vrot.lane.b32.xlu0 %v2297_v5, %s2250_s12  ;;  %82 = vst.msk [vmem:[#allocation0 + $0x2c0] ss:$8 sm:$0xf0] %vm3_vm0, %v2329_v9  }
   0xc   :  { %10 = vst.msk [vmem:[#allocation0 + $0x40] ss:$8 sm:$0xf] %vm3_vm0, %v2297_v5  }
   0xd   :  { %12 = vst.msk [vmem:[#allocation0 + $0x40] ss:$8 sm:$0xf0] %vm3_vm0, %v2297_v5  }
   0xe   :  { %4 = vst.msk [vmem:[#allocation0] ss:$8 sm:$0xf] %vm3_vm0, %v2276_v2  }
   0xf   :  { %5 = vst.msk [vmem:[#allocation0] ss:$8 sm:$0xf0] %vm3_vm0, %v2276_v2  }
  0x10   :  { %101 = vst.msk [vmem:[#allocation0 + $0x380] ss:$8 sm:$0xf] %vm3_vm0, %v2350_v12  }
  0x11   :  { %103 = vst.msk [vmem:[#allocation0 + $0x380] ss:$8 sm:$0xf0] %vm3_vm0, %v2350_v12  }
  0x12   :  { %240 = vrot.lane.b32.xlu2 %v2308_v6, %s2250_s12  ;;  %231 = vrot.lane.b32.xlu1 %v2313_v7, %s2250_s12  ;;  %31 = vst.msk [vmem:[#allocation0 + $0x100] ss:$8 sm:$0xf] %vm3_vm0, %v2266_v0  }
  0x13   :  { %222 = vrot.lane.b32.xlu0 %v2318_v8, %s2250_s12  ;;  %33 = vst.msk [vmem:[#allocation0 + $0x100] ss:$8 sm:$0xf0] %vm3_vm0, %v2266_v0  }
  0x14   :  { %24 = vst.msk [vmem:[#allocation0 + $0xc0] ss:$8 sm:$0xf] %vm3_vm0, %v2292_v4  }
  0x15   :  { %26 = vst.msk [vmem:[#allocation0 + $0xc0] ss:$8 sm:$0xf0] %vm3_vm0, %v2292_v4  }
  0x16   :  { %122 = vst.msk [vmem:[#allocation0 + $0x440] ss:$8 sm:$0xf] %vm3_vm0, %v2371_v15  }
  0x17   :  { %124 = vst.msk [vmem:[#allocation0 + $0x440] ss:$8 sm:$0xf0] %vm3_vm0, %v2371_v15  }
  0x18   :  { %52 = vst.msk [vmem:[#allocation0 + $0x1c0] ss:$8 sm:$0xf] %vm3_vm0, %v2313_v7  }
  0x19   :  { %54 = vst.msk [vmem:[#allocation0 + $0x1c0] ss:$8 sm:$0xf0] %vm3_vm0, %v2313_v7  }
  0x1a   :  { %267 = vrot.lane.b32.xlu2 %v2329_v9, %s2250_s12  ;;  %258 = vrot.lane.b32.xlu1 %v2334_v10, %s2250_s12  ;;  %143 = vst.msk [vmem:[#allocation0 + $0x500] ss:$8 sm:$0xf] %vm3_vm0, %v2392_v18  }
  0x1b   :  { %249 = vrot.lane.b32.xlu0 %v2339_v11, %s2250_s12  ;;  %145 = vst.msk [vmem:[#allocation0 + $0x500] ss:$8 sm:$0xf0] %vm3_vm0, %v2392_v18  }
  0x22   :  { %294 = vrot.lane.b32.xlu2 %v2350_v12, %s2250_s12  ;;  %285 = vrot.lane.b32.xlu1 %v2355_v13, %s2250_s12 }
  0x23   :  { %276 = vrot.lane.b32.xlu0 %v2360_v14, %s2250_s12 }
  0x2a   :  { %321 = vrot.lane.b32.xlu2 %v2371_v15, %s2250_s12  ;;  %312 = vrot.lane.b32.xlu1 %v2376_v16, %s2250_s12 }
  0x2b   :  { %303 = vrot.lane.b32.xlu0 %v2381_v17, %s2250_s12 }
  0x32   :  { %348 = vrot.lane.b32.xlu2 %v2392_v18, %s2250_s12  ;;  %339 = vrot.lane.b32.xlu1 %v2397_v19, %s2250_s12 }
  0x33   :  { %330 = vrot.lane.b32.xlu0 %v2402_v20, %s2250_s12 }
  0x3a   :  { %375 = vrot.lane.b32.xlu2 %v2413_v21, %s2250_s12  ;;  %366 = vrot.lane.b32.xlu1 %v2418_v22, %s2250_s12 }
  0x3b   :  { %357 = vrot.lane.b32.xlu0 %v2423_v23, %s2250_s12  ;;  %s2251_s12 = smov 120  }
  0x42   :  { %401 = vrot.lane.b32.xlu2 %v2271_v1, %s2251_s12  ;;  %392 = vrot.lane.b32.xlu1 %v2297_v5, %s2251_s12 }
  0x43   :  { %383 = vrot.lane.b32.xlu0 %v2276_v2, %s2251_s12 }
  0x4a   :  { %428 = vrot.lane.b32.xlu2 %v2287_v3, %s2251_s12  ;;  %419 = vrot.lane.b32.xlu1 %v2266_v0, %s2251_s12 }
  0x4b   :  { %410 = vrot.lane.b32.xlu0 %v2292_v4, %s2251_s12 }
  0x52   :  { %455 = vrot.lane.b32.xlu2 %v2308_v6, %s2251_s12  ;;  %446 = vrot.lane.b32.xlu1 %v2313_v7, %s2251_s12 }
  0x53   :  { %437 = vrot.lane.b32.xlu0 %v2318_v8, %s2251_s12 }
  0x5a   :  { %482 = vrot.lane.b32.xlu2 %v2329_v9, %s2251_s12  ;;  %473 = vrot.lane.b32.xlu1 %v2334_v10, %s2251_s12 }
  0x5b   :  { %464 = vrot.lane.b32.xlu0 %v2339_v11, %s2251_s12 }
  0x5c   :  { %v205_v24 = vpop.permute.xlu2 %204  }
  0x5d   :  { %208 = vst.msk [vmem:[#allocation0 + $0x101] ss:$8 sm:$0xf] %vm3_vm0, %v205_v24  }
  0x5e   :  { %210 = vst.msk [vmem:[#allocation0 + $0x101] ss:$8 sm:$0xf0] %vm3_vm0, %v205_v24  }
  0x62   :  { %509 = vrot.lane.b32.xlu2 %v2350_v12, %s2251_s12  ;;  %500 = vrot.lane.b32.xlu1 %v2355_v13, %s2251_s12 }
  0x63   :  { %491 = vrot.lane.b32.xlu0 %v2360_v14, %s2251_s12 }
  0x64   :  { %v214_v25 = vpop.permute.xlu2 %213  }
  0x65   :  { %217 = vst.msk [vmem:[#allocation0 + $0x141] ss:$8 sm:$0xf] %vm3_vm0, %v214_v25  }
  0x66   :  { %219 = vst.msk [vmem:[#allocation0 + $0x141] ss:$8 sm:$0xf0] %vm3_vm0, %v214_v25  }
  0x6a   :  { %536 = vrot.lane.b32.xlu2 %v2371_v15, %s2251_s12  ;;  %527 = vrot.lane.b32.xlu1 %v2376_v16, %s2251_s12 }
  0x6b   :  { %518 = vrot.lane.b32.xlu0 %v2381_v17, %s2251_s12 }
  0x6c   :  { %v241_v26 = vpop.permute.xlu2 %240  }
  0x6d   :  { %244 = vst.msk [vmem:[#allocation0 + $0x201] ss:$8 sm:$0xf] %vm3_vm0, %v241_v26  }
  0x6e   :  { %246 = vst.msk [vmem:[#allocation0 + $0x201] ss:$8 sm:$0xf0] %vm3_vm0, %v241_v26  }
  0x72   :  { %563 = vrot.lane.b32.xlu2 %v2392_v18, %s2251_s12  ;;  %554 = vrot.lane.b32.xlu1 %v2397_v19, %s2251_s12 }
  0x73   :  { %545 = vrot.lane.b32.xlu0 %v2402_v20, %s2251_s12 }
  0x74   :  { %v268_v27 = vpop.permute.xlu2 %267   ;;  %v187_v28 = vpop.permute.xlu1 %186  }
  0x75   :  { %271 = vst.msk [vmem:[#allocation0 + $0x2c1] ss:$8 sm:$0xf] %vm3_vm0, %v268_v27   ;;  %v169_v29 = vpop.permute.xlu0 %168  }
  0x76   :  { %273 = vst.msk [vmem:[#allocation0 + $0x2c1] ss:$8 sm:$0xf0] %vm3_vm0, %v268_v27  }
  0x77   :  { %190 = vst.msk [vmem:[#allocation0 + $0x81] ss:$8 sm:$0xf] %vm3_vm0, %v187_v28  }
  0x78   :  { %192 = vst.msk [vmem:[#allocation0 + $0x81] ss:$8 sm:$0xf0] %vm3_vm0, %v187_v28  }
  0x79   :  { %172 = vst.msk [vmem:[#allocation0 + $0x1] ss:$8 sm:$0xf] %vm3_vm0, %v169_v29  }
  0x7a   :  { %174 = vst.msk [vmem:[#allocation0 + $0x1] ss:$8 sm:$0xf0] %vm3_vm0, %v169_v29   ;;  %590 = vrot.lane.b32.xlu2 %v2413_v21, %s2251_s12  ;;  %581 = vrot.lane.b32.xlu1 %v2418_v22, %s2251_s12 }
  0x7b   :  { %572 = vrot.lane.b32.xlu0 %v2423_v23, %s2251_s12 }
  0x7c   :  { %v295_v30 = vpop.permute.xlu2 %294   ;;  %v196_v31 = vpop.permute.xlu1 %195  }
  0x7d   :  { %298 = vst.msk [vmem:[#allocation0 + $0x381] ss:$8 sm:$0xf] %vm3_vm0, %v295_v30   ;;  %v178_v32 = vpop.permute.xlu0 %177  }
  0x7e   :  { %300 = vst.msk [vmem:[#allocation0 + $0x381] ss:$8 sm:$0xf0] %vm3_vm0, %v295_v30  }
  0x7f   :  { %199 = vst.msk [vmem:[#allocation0 + $0xc1] ss:$8 sm:$0xf] %vm3_vm0, %v196_v31  }
  0x80   :  { %201 = vst.msk [vmem:[#allocation0 + $0xc1] ss:$8 sm:$0xf0] %vm3_vm0, %v196_v31  }
  0x81   :  { %181 = vst.msk [vmem:[#allocation0 + $0x41] ss:$8 sm:$0xf] %vm3_vm0, %v178_v32  }
  0x82   :  { %183 = vst.msk [vmem:[#allocation0 + $0x41] ss:$8 sm:$0xf0] %vm3_vm0, %v178_v32   ;;  %616 = vrot.lane.b32.xlu2 %v2271_v1, %s2252_s27  ;;  %607 = vrot.lane.b32.xlu1 %v2297_v5, %s2252_s27 }
  0x83   :  { %598 = vrot.lane.b32.xlu0 %v2276_v2, %s2252_s27 }
  0x84   :  { %v322_v33 = vpop.permute.xlu2 %321   ;;  %v232_v34 = vpop.permute.xlu1 %231  }
  0x85   :  { %325 = vst.msk [vmem:[#allocation0 + $0x441] ss:$8 sm:$0xf] %vm3_vm0, %v322_v33   ;;  %v223_v35 = vpop.permute.xlu0 %222  }
  0x86   :  { %327 = vst.msk [vmem:[#allocation0 + $0x441] ss:$8 sm:$0xf0] %vm3_vm0, %v322_v33  }
  0x87   :  { %235 = vst.msk [vmem:[#allocation0 + $0x1c1] ss:$8 sm:$0xf] %vm3_vm0, %v232_v34  }
  0x88   :  { %237 = vst.msk [vmem:[#allocation0 + $0x1c1] ss:$8 sm:$0xf0] %vm3_vm0, %v232_v34  }
  0x89   :  { %226 = vst.msk [vmem:[#allocation0 + $0x181] ss:$8 sm:$0xf] %vm3_vm0, %v223_v35  }
  0x8a   :  { %228 = vst.msk [vmem:[#allocation0 + $0x181] ss:$8 sm:$0xf0] %vm3_vm0, %v223_v35   ;;  %643 = vrot.lane.b32.xlu2 %v2287_v3, %s2252_s27  ;;  %634 = vrot.lane.b32.xlu1 %v2266_v0, %s2252_s27 }
  0x8b   :  { %625 = vrot.lane.b32.xlu0 %v2292_v4, %s2252_s27 }
  0x8c   :  { %v349_v36 = vpop.permute.xlu2 %348   ;;  %v259_v37 = vpop.permute.xlu1 %258  }
  0x8d   :  { %352 = vst.msk [vmem:[#allocation0 + $0x501] ss:$8 sm:$0xf] %vm3_vm0, %v349_v36   ;;  %v250_v38 = vpop.permute.xlu0 %249  }
  0x8e   :  { %354 = vst.msk [vmem:[#allocation0 + $0x501] ss:$8 sm:$0xf0] %vm3_vm0, %v349_v36  }
  0x8f   :  { %262 = vst.msk [vmem:[#allocation0 + $0x281] ss:$8 sm:$0xf] %vm3_vm0, %v259_v37  }
  0x90   :  { %264 = vst.msk [vmem:[#allocation0 + $0x281] ss:$8 sm:$0xf0] %vm3_vm0, %v259_v37  }
  0x91   :  { %253 = vst.msk [vmem:[#allocation0 + $0x241] ss:$8 sm:$0xf] %vm3_vm0, %v250_v38  }
  0x92   :  { %255 = vst.msk [vmem:[#allocation0 + $0x241] ss:$8 sm:$0xf0] %vm3_vm0, %v250_v38   ;;  %670 = vrot.lane.b32.xlu2 %v2308_v6, %s2252_s27  ;;  %661 = vrot.lane.b32.xlu1 %v2313_v7, %s2252_s27 }
  0x93   :  { %652 = vrot.lane.b32.xlu0 %v2318_v8, %s2252_s27 }
  0x94   :  { %v376_v39 = vpop.permute.xlu2 %375   ;;  %v286_v40 = vpop.permute.xlu1 %285  }
  0x95   :  { %379 = vst.msk [vmem:[#allocation0 + $0x5c1] ss:$8 sm:$0xf] %vm3_vm0, %v376_v39   ;;  %v277_v41 = vpop.permute.xlu0 %276  }
  0x96   :  { %381 = vst.msk [vmem:[#allocation0 + $0x5c1] ss:$8 sm:$0xf0] %vm3_vm0, %v376_v39  }
  0x97   :  { %289 = vst.msk [vmem:[#allocation0 + $0x341] ss:$8 sm:$0xf] %vm3_vm0, %v286_v40  }
  0x98   :  { %291 = vst.msk [vmem:[#allocation0 + $0x341] ss:$8 sm:$0xf0] %vm3_vm0, %v286_v40  }
  0x99   :  { %280 = vst.msk [vmem:[#allocation0 + $0x301] ss:$8 sm:$0xf] %vm3_vm0, %v277_v41  }
  0x9a   :  { %282 = vst.msk [vmem:[#allocation0 + $0x301] ss:$8 sm:$0xf0] %vm3_vm0, %v277_v41   ;;  %697 = vrot.lane.b32.xlu2 %v2329_v9, %s2252_s27  ;;  %688 = vrot.lane.b32.xlu1 %v2334_v10, %s2252_s27 }
  0x9b   :  { %679 = vrot.lane.b32.xlu0 %v2339_v11, %s2252_s27 }
  0x9c   :  { %v402_v42 = vpop.permute.xlu2 %401   ;;  %v313_v43 = vpop.permute.xlu1 %312  }
  0x9d   :  { %405 = vst.msk [vmem:[#allocation0 + $0x82] ss:$8 sm:$0xf] %vm3_vm0, %v402_v42   ;;  %v304_v44 = vpop.permute.xlu0 %303  }
  0x9e   :  { %407 = vst.msk [vmem:[#allocation0 + $0x82] ss:$8 sm:$0xf0] %vm3_vm0, %v402_v42  }
  0x9f   :  { %316 = vst.msk [vmem:[#allocation0 + $0x401] ss:$8 sm:$0xf] %vm3_vm0, %v313_v43  }
  0xa0   :  { %318 = vst.msk [vmem:[#allocation0 + $0x401] ss:$8 sm:$0xf0] %vm3_vm0, %v313_v43  }
  0xa1   :  { %307 = vst.msk [vmem:[#allocation0 + $0x3c1] ss:$8 sm:$0xf] %vm3_vm0, %v304_v44  }
  0xa2   :  { %309 = vst.msk [vmem:[#allocation0 + $0x3c1] ss:$8 sm:$0xf0] %vm3_vm0, %v304_v44   ;;  %724 = vrot.lane.b32.xlu2 %v2350_v12, %s2252_s27  ;;  %715 = vrot.lane.b32.xlu1 %v2355_v13, %s2252_s27 }
  0xa3   :  { %706 = vrot.lane.b32.xlu0 %v2360_v14, %s2252_s27 }
  0xa4   :  { %v429_v45 = vpop.permute.xlu2 %428   ;;  %v340_v46 = vpop.permute.xlu1 %339  }
  0xa5   :  { %432 = vst.msk [vmem:[#allocation0 + $0x142] ss:$8 sm:$0xf] %vm3_vm0, %v429_v45   ;;  %v331_v47 = vpop.permute.xlu0 %330  }
  0xa6   :  { %434 = vst.msk [vmem:[#allocation0 + $0x142] ss:$8 sm:$0xf0] %vm3_vm0, %v429_v45  }
  0xa7   :  { %343 = vst.msk [vmem:[#allocation0 + $0x4c1] ss:$8 sm:$0xf] %vm3_vm0, %v340_v46  }
  0xa8   :  { %345 = vst.msk [vmem:[#allocation0 + $0x4c1] ss:$8 sm:$0xf0] %vm3_vm0, %v340_v46  }
  0xa9   :  { %334 = vst.msk [vmem:[#allocation0 + $0x481] ss:$8 sm:$0xf] %vm3_vm0, %v331_v47  }
  0xaa   :  { %336 = vst.msk [vmem:[#allocation0 + $0x481] ss:$8 sm:$0xf0] %vm3_vm0, %v331_v47   ;;  %751 = vrot.lane.b32.xlu2 %v2371_v15, %s2252_s27  ;;  %742 = vrot.lane.b32.xlu1 %v2376_v16, %s2252_s27 }
  0xab   :  { %733 = vrot.lane.b32.xlu0 %v2381_v17, %s2252_s27 }
  0xac   :  { %v456_v48 = vpop.permute.xlu2 %455   ;;  %v367_v49 = vpop.permute.xlu1 %366  }
  0xad   :  { %459 = vst.msk [vmem:[#allocation0 + $0x202] ss:$8 sm:$0xf] %vm3_vm0, %v456_v48   ;;  %v358_v50 = vpop.permute.xlu0 %357  }
  0xae   :  { %461 = vst.msk [vmem:[#allocation0 + $0x202] ss:$8 sm:$0xf0] %vm3_vm0, %v456_v48  }
  0xaf   :  { %370 = vst.msk [vmem:[#allocation0 + $0x581] ss:$8 sm:$0xf] %vm3_vm0, %v367_v49  }
  0xb0   :  { %372 = vst.msk [vmem:[#allocation0 + $0x581] ss:$8 sm:$0xf0] %vm3_vm0, %v367_v49  }
  0xb1   :  { %361 = vst.msk [vmem:[#allocation0 + $0x541] ss:$8 sm:$0xf] %vm3_vm0, %v358_v50  }
  0xb2   :  { %363 = vst.msk [vmem:[#allocation0 + $0x541] ss:$8 sm:$0xf0] %vm3_vm0, %v358_v50   ;;  %778 = vrot.lane.b32.xlu2 %v2392_v18, %s2252_s27  ;;  %769 = vrot.lane.b32.xlu1 %v2397_v19, %s2252_s27 }
  0xb3   :  { %760 = vrot.lane.b32.xlu0 %v2402_v20, %s2252_s27 }
  0xb4   :  { %v483_v51 = vpop.permute.xlu2 %482   ;;  %v393_v52 = vpop.permute.xlu1 %392  }
  0xb5   :  { %486 = vst.msk [vmem:[#allocation0 + $0x2c2] ss:$8 sm:$0xf] %vm3_vm0, %v483_v51   ;;  %v384_v53 = vpop.permute.xlu0 %383  }
  0xb6   :  { %488 = vst.msk [vmem:[#allocation0 + $0x2c2] ss:$8 sm:$0xf0] %vm3_vm0, %v483_v51  }
  0xb7   :  { %396 = vst.msk [vmem:[#allocation0 + $0x42] ss:$8 sm:$0xf] %vm3_vm0, %v393_v52  }
  0xb8   :  { %398 = vst.msk [vmem:[#allocation0 + $0x42] ss:$8 sm:$0xf0] %vm3_vm0, %v393_v52  }
  0xb9   :  { %387 = vst.msk [vmem:[#allocation0 + $0x2] ss:$8 sm:$0xf] %vm3_vm0, %v384_v53  }
  0xba   :  { %389 = vst.msk [vmem:[#allocation0 + $0x2] ss:$8 sm:$0xf0] %vm3_vm0, %v384_v53   ;;  %805 = vrot.lane.b32.xlu2 %v2413_v21, %s2252_s27  ;;  %796 = vrot.lane.b32.xlu1 %v2418_v22, %s2252_s27 }
  0xbb   :  { %787 = vrot.lane.b32.xlu0 %v2423_v23, %s2252_s27 }
  0xbc   :  { %v510_v54 = vpop.permute.xlu2 %509   ;;  %v420_v55 = vpop.permute.xlu1 %419  }
  0xbd   :  { %513 = vst.msk [vmem:[#allocation0 + $0x382] ss:$8 sm:$0xf] %vm3_vm0, %v510_v54   ;;  %v411_v56 = vpop.permute.xlu0 %410  }
  0xbe   :  { %515 = vst.msk [vmem:[#allocation0 + $0x382] ss:$8 sm:$0xf0] %vm3_vm0, %v510_v54  }
  0xbf   :  { %423 = vst.msk [vmem:[#allocation0 + $0x102] ss:$8 sm:$0xf] %vm3_vm0, %v420_v55  }
  0xc0   :  { %425 = vst.msk [vmem:[#allocation0 + $0x102] ss:$8 sm:$0xf0] %vm3_vm0, %v420_v55  }
  0xc1   :  { %414 = vst.msk [vmem:[#allocation0 + $0xc2] ss:$8 sm:$0xf] %vm3_vm0, %v411_v56  }
  0xc2   :  { %416 = vst.msk [vmem:[#allocation0 + $0xc2] ss:$8 sm:$0xf0] %vm3_vm0, %v411_v56  }
  0xc4   :  { %v537_v57 = vpop.permute.xlu2 %536   ;;  %v447_v58 = vpop.permute.xlu1 %446  }
  0xc5   :  { %540 = vst.msk [vmem:[#allocation0 + $0x442] ss:$8 sm:$0xf] %vm3_vm0, %v537_v57   ;;  %v438_v59 = vpop.permute.xlu0 %437  }
  0xc6   :  { %542 = vst.msk [vmem:[#allocation0 + $0x442] ss:$8 sm:$0xf0] %vm3_vm0, %v537_v57  }
  0xc7   :  { %450 = vst.msk [vmem:[#allocation0 + $0x1c2] ss:$8 sm:$0xf] %vm3_vm0, %v447_v58  }
  0xc8   :  { %452 = vst.msk [vmem:[#allocation0 + $0x1c2] ss:$8 sm:$0xf0] %vm3_vm0, %v447_v58  }
  0xc9   :  { %441 = vst.msk [vmem:[#allocation0 + $0x182] ss:$8 sm:$0xf] %vm3_vm0, %v438_v59  }
  0xca   :  { %443 = vst.msk [vmem:[#allocation0 + $0x182] ss:$8 sm:$0xf0] %vm3_vm0, %v438_v59  }
  0xcc   :  { %v564_v60 = vpop.permute.xlu2 %563   ;;  %v474_v61 = vpop.permute.xlu1 %473  }
  0xcd   :  { %567 = vst.msk [vmem:[#allocation0 + $0x502] ss:$8 sm:$0xf] %vm3_vm0, %v564_v60   ;;  %v465_v62 = vpop.permute.xlu0 %464  }
  0xce   :  { %569 = vst.msk [vmem:[#allocation0 + $0x502] ss:$8 sm:$0xf0] %vm3_vm0, %v564_v60  }
  0xcf   :  { %477 = vst.msk [vmem:[#allocation0 + $0x282] ss:$8 sm:$0xf] %vm3_vm0, %v474_v61  }
  0xd0   :  { %479 = vst.msk [vmem:[#allocation0 + $0x282] ss:$8 sm:$0xf0] %vm3_vm0, %v474_v61  }
  0xd1   :  { %468 = vst.msk [vmem:[#allocation0 + $0x242] ss:$8 sm:$0xf] %vm3_vm0, %v465_v62  }
  0xd2   :  { %470 = vst.msk [vmem:[#allocation0 + $0x242] ss:$8 sm:$0xf0] %vm3_vm0, %v465_v62  }
  0xd4   :  { %v591_v63 = vpop.permute.xlu2 %590   ;;  %v501_v0 = vpop.permute.xlu1 %500  }
  0xd5   :  { %594 = vst.msk [vmem:[#allocation0 + $0x5c2] ss:$8 sm:$0xf] %vm3_vm0, %v591_v63   ;;  %v492_v1 = vpop.permute.xlu0 %491  }
  0xd6   :  { %596 = vst.msk [vmem:[#allocation0 + $0x5c2] ss:$8 sm:$0xf0] %vm3_vm0, %v591_v63  }
  0xd7   :  { %504 = vst.msk [vmem:[#allocation0 + $0x342] ss:$8 sm:$0xf] %vm3_vm0, %v501_v0  }
  0xd8   :  { %506 = vst.msk [vmem:[#allocation0 + $0x342] ss:$8 sm:$0xf0] %vm3_vm0, %v501_v0  }
  0xd9   :  { %495 = vst.msk [vmem:[#allocation0 + $0x302] ss:$8 sm:$0xf] %vm3_vm0, %v492_v1  }
  0xda   :  { %497 = vst.msk [vmem:[#allocation0 + $0x302] ss:$8 sm:$0xf0] %vm3_vm0, %v492_v1  }
  0xdc   :  { %v617_v2 = vpop.permute.xlu2 %616   ;;  %v528_v3 = vpop.permute.xlu1 %527  }
  0xdd   :  { %620 = vst.msk [vmem:[#allocation0 + $0x83] ss:$8 sm:$0xf] %vm3_vm0, %v617_v2   ;;  %v519_v4 = vpop.permute.xlu0 %518  }
  0xde   :  { %622 = vst.msk [vmem:[#allocation0 + $0x83] ss:$8 sm:$0xf0] %vm3_vm0, %v617_v2  }
  0xdf   :  { %531 = vst.msk [vmem:[#allocation0 + $0x402] ss:$8 sm:$0xf] %vm3_vm0, %v528_v3  }
  0xe0   :  { %533 = vst.msk [vmem:[#allocation0 + $0x402] ss:$8 sm:$0xf0] %vm3_vm0, %v528_v3  }
  0xe1   :  { %522 = vst.msk [vmem:[#allocation0 + $0x3c2] ss:$8 sm:$0xf] %vm3_vm0, %v519_v4  }
  0xe2   :  { %524 = vst.msk [vmem:[#allocation0 + $0x3c2] ss:$8 sm:$0xf0] %vm3_vm0, %v519_v4  }
  0xe4   :  { %v909_v5 = vld [vmem:[#allocation0 + $0x80] sm:$0xf]  ;;  %v915_v6 = vld [vmem:[#allocation0 + $0x88] sm:$0xf]  ;;  %v644_v7 = vpop.permute.xlu2 %643   ;;  %v555_v8 = vpop.permute.xlu1 %554   ;;  %v921_v9 = vld [vmem:[#allocation0 + $0x90] sm:$0xf] }
  0xe5   :  { %v546_v10 = vpop.permute.xlu0 %545   ;;  %v927_v11 = vld [vmem:[#allocation0 + $0x98] sm:$0xf]  ;;  %2071 = vst [vmem:[%s3383_s1 + $0x40] sm:$0xf] %v909_v5  ;;  %v933_v12 = vld [vmem:[#allocation0 + $0xa0] sm:$0xf] }
  0xe6   :  { %2072 = vst [vmem:[%s3383_s1 + $0x44] sm:$0xf] %v915_v6  ;;  %v939_v13 = vld [vmem:[#allocation0 + $0xa8] sm:$0xf]  ;;  %v945_v14 = vld [vmem:[#allocation0 + $0xb0] sm:$0xf] }
  0xe7   :  { %2073 = vst [vmem:[%s3383_s1 + $0x48] sm:$0xf] %v921_v9  ;;  %v951_v15 = vld [vmem:[#allocation0 + $0xb8] sm:$0xf] }
  0xe8   :  { %2074 = vst [vmem:[%s3383_s1 + $0x4c] sm:$0xf] %v927_v11 }
  0xe9   :  { %2075 = vst [vmem:[%s3383_s1 + $0x50] sm:$0xf] %v933_v12 }
  0xea   :  { %2076 = vst [vmem:[%s3383_s1 + $0x54] sm:$0xf] %v939_v13 }
  0xeb   :  { %2077 = vst [vmem:[%s3383_s1 + $0x58] sm:$0xf] %v945_v14 }
  0xec   :  { %v671_v16 = vpop.permute.xlu2 %670   ;;  %v582_v17 = vpop.permute.xlu1 %581   ;;  %2078 = vst [vmem:[%s3383_s1 + $0x5c] sm:$0xf] %v951_v15 }
  0xed   :  { %v573_v18 = vpop.permute.xlu0 %572   ;;  %647 = vst.msk [vmem:[#allocation0 + $0x143] ss:$8 sm:$0xf] %vm3_vm0, %v644_v7  }
  0xee   :  { %649 = vst.msk [vmem:[#allocation0 + $0x143] ss:$8 sm:$0xf0] %vm3_vm0, %v644_v7  }
  0xef   :  { %558 = vst.msk [vmem:[#allocation0 + $0x4c2] ss:$8 sm:$0xf] %vm3_vm0, %v555_v8  }
  0xf0   :  { %560 = vst.msk [vmem:[#allocation0 + $0x4c2] ss:$8 sm:$0xf0] %vm3_vm0, %v555_v8  }
  0xf1   :  { %549 = vst.msk [vmem:[#allocation0 + $0x482] ss:$8 sm:$0xf] %vm3_vm0, %v546_v10  }
  0xf2   :  { %551 = vst.msk [vmem:[#allocation0 + $0x482] ss:$8 sm:$0xf0] %vm3_vm0, %v546_v10  }
  0xf3   :  { %674 = vst.msk [vmem:[#allocation0 + $0x203] ss:$8 sm:$0xf] %vm3_vm0, %v671_v16  }
  0xf4   :  { %v698_v19 = vpop.permute.xlu2 %697   ;;  %v608_v20 = vpop.permute.xlu1 %607   ;;  %v1053_v21 = vld [vmem:[#allocation0 + $0x140] sm:$0xf]  ;;  %v1059_v22 = vld [vmem:[#allocation0 + $0x148] sm:$0xf]  ;;  %v1065_v23 = vld [vmem:[#allocation0 + $0x150] sm:$0xf] }
  0xf5   :  { %v1071_v24 = vld [vmem:[#allocation0 + $0x158] sm:$0xf]  ;;  %2095 = vst [vmem:[%s3383_s1 + $0xa0] sm:$0xf] %v1053_v21  ;;  %v599_v25 = vpop.permute.xlu0 %598   ;;  %v1077_v26 = vld [vmem:[#allocation0 + $0x160] sm:$0xf] }
  0xf6   :  { %2096 = vst [vmem:[%s3383_s1 + $0xa4] sm:$0xf] %v1059_v22  ;;  %v1083_v27 = vld [vmem:[#allocation0 + $0x168] sm:$0xf]  ;;  %v1089_v28 = vld [vmem:[#allocation0 + $0x170] sm:$0xf] }
  0xf7   :  { %2097 = vst [vmem:[%s3383_s1 + $0xa8] sm:$0xf] %v1065_v23  ;;  %v1095_v29 = vld [vmem:[#allocation0 + $0x178] sm:$0xf] }
  0xf8   :  { %2098 = vst [vmem:[%s3383_s1 + $0xac] sm:$0xf] %v1071_v24 }
  0xf9   :  { %2099 = vst [vmem:[%s3383_s1 + $0xb0] sm:$0xf] %v1077_v26 }
  0xfa   :  { %2100 = vst [vmem:[%s3383_s1 + $0xb4] sm:$0xf] %v1083_v27  ;;  %v1197_v30 = vld [vmem:[#allocation0 + $0x200] sm:$0xf]  ;;  %v1203_v31 = vld [vmem:[#allocation0 + $0x208] sm:$0xf] }
  0xfb   :  { %2101 = vst [vmem:[%s3383_s1 + $0xb8] sm:$0xf] %v1089_v28  ;;  %v1209_v32 = vld [vmem:[#allocation0 + $0x210] sm:$0xf]  ;;  %v1215_v33 = vld [vmem:[#allocation0 + $0x218] sm:$0xf] }
  0xfc   :  { %2102 = vst [vmem:[%s3383_s1 + $0xbc] sm:$0xf] %v1095_v29  ;;  %v725_v38 = vpop.permute.xlu2 %724   ;;  %v2763_v43 = vpop.permute.xlu1 %634  }
  0xfd   :  { %676 = vst.msk [vmem:[#allocation0 + $0x203] ss:$8 sm:$0xf0] %vm3_vm0, %v671_v16   ;;  %v626_v52 = vpop.permute.xlu0 %625  }
  0xfe   :  { %585 = vst.msk [vmem:[#allocation0 + $0x582] ss:$8 sm:$0xf] %vm3_vm0, %v582_v17  }
  0xff   :  { %587 = vst.msk [vmem:[#allocation0 + $0x582] ss:$8 sm:$0xf0] %vm3_vm0, %v582_v17  }
 0x100   :  { %2119 = vst [vmem:[%s3383_s1 + $0x100] sm:$0xf] %v1197_v30 }
 0x101   :  { %2120 = vst [vmem:[%s3383_s1 + $0x104] sm:$0xf] %v1203_v31 }
 0x102   :  { %2121 = vst [vmem:[%s3383_s1 + $0x108] sm:$0xf] %v1209_v32 }
 0x103   :  { %2122 = vst [vmem:[%s3383_s1 + $0x10c] sm:$0xf] %v1215_v33 }
 0x104   :  { %v1221_v34 = vld [vmem:[#allocation0 + $0x220] sm:$0xf]  ;;  %v1227_v35 = vld [vmem:[#allocation0 + $0x228] sm:$0xf]  ;;  %v1233_v36 = vld [vmem:[#allocation0 + $0x230] sm:$0xf]  ;;  %v752_v3 = vpop.permute.xlu2 %751   ;;  %v2835_v4 = vpop.permute.xlu1 %661  }
 0x105   :  { %v1239_v37 = vld [vmem:[#allocation0 + $0x238] sm:$0xf]  ;;  %2123 = vst [vmem:[%s3383_s1 + $0x110] sm:$0xf] %v1221_v34  ;;  %v2866_v11 = vpop.permute.xlu0 %652  }
 0x106   :  { %2124 = vst [vmem:[%s3383_s1 + $0x114] sm:$0xf] %v1227_v35 }
 0x107   :  { %2125 = vst [vmem:[%s3383_s1 + $0x118] sm:$0xf] %v1233_v36 }
 0x108   :  { %2126 = vst [vmem:[%s3383_s1 + $0x11c] sm:$0xf] %v1239_v37 }
 0x109   :  { %576 = vst.msk [vmem:[#allocation0 + $0x542] ss:$8 sm:$0xf] %vm3_vm0, %v573_v18  }
 0x10a   :  { %578 = vst.msk [vmem:[#allocation0 + $0x542] ss:$8 sm:$0xf0] %vm3_vm0, %v573_v18  }
 0x10b   :  { %701 = vst.msk [vmem:[#allocation0 + $0x2c3] ss:$8 sm:$0xf] %vm3_vm0, %v698_v19  }
 0x10c   :  { %703 = vst.msk [vmem:[#allocation0 + $0x2c3] ss:$8 sm:$0xf0] %vm3_vm0, %v698_v19   ;;  %v779_v22 = vpop.permute.xlu2 %778  }
 0x10d   :  { %611 = vst.msk [vmem:[#allocation0 + $0x43] ss:$8 sm:$0xf] %vm3_vm0, %v608_v20  }
 0x10e   :  { %613 = vst.msk [vmem:[#allocation0 + $0x43] ss:$8 sm:$0xf0] %vm3_vm0, %v608_v20  }
 0x10f   :  { %602 = vst.msk [vmem:[#allocation0 + $0x3] ss:$8 sm:$0xf] %vm3_vm0, %v599_v25  }
 0x110   :  { %604 = vst.msk [vmem:[#allocation0 + $0x3] ss:$8 sm:$0xf0] %vm3_vm0, %v599_v25  }
 0x111   :  { %728 = vst.msk [vmem:[#allocation0 + $0x383] ss:$8 sm:$0xf] %vm3_vm0, %v725_v38  }
 0x112   :  { %v1341_v39 = vld [vmem:[#allocation0 + $0x2c0] sm:$0xf]  ;;  %v1347_v40 = vld [vmem:[#allocation0 + $0x2c8] sm:$0xf]  ;;  %v1353_v41 = vld [vmem:[#allocation0 + $0x2d0] sm:$0xf] }
 0x113   :  { %v1359_v42 = vld [vmem:[#allocation0 + $0x2d8] sm:$0xf]  ;;  %2143 = vst [vmem:[%s3383_s1 + $0x160] sm:$0xf] %v1341_v39  ;;  %v1365_v44 = vld [vmem:[#allocation0 + $0x2e0] sm:$0xf]  ;;  %v689_v39 = vpop.permute.xlu1 %688  }
 0x114   :  { %2144 = vst [vmem:[%s3383_s1 + $0x164] sm:$0xf] %v1347_v40  ;;  %v1371_v45 = vld [vmem:[#allocation0 + $0x2e8] sm:$0xf]  ;;  %v1377_v46 = vld [vmem:[#allocation0 + $0x2f0] sm:$0xf] }
 0x115   :  { %2145 = vst [vmem:[%s3383_s1 + $0x168] sm:$0xf] %v1353_v41  ;;  %v1383_v47 = vld [vmem:[#allocation0 + $0x2f8] sm:$0xf]  ;;  %v861_v53 = vld [vmem:[#allocation0 + $0x40] sm:$0xf] }
 0x116   :  { %2146 = vst [vmem:[%s3383_s1 + $0x16c] sm:$0xf] %v1359_v42  ;;  %v867_v54 = vld [vmem:[#allocation0 + $0x48] sm:$0xf]  ;;  %v873_v55 = vld [vmem:[#allocation0 + $0x50] sm:$0xf] }
 0x117   :  { %2147 = vst [vmem:[%s3383_s1 + $0x170] sm:$0xf] %v1365_v44  ;;  %v837_v48 = vld [vmem:[#allocation0 + $0x20] sm:$0xf]  ;;  %v843_v49 = vld [vmem:[#allocation0 + $0x28] sm:$0xf] }
 0x118   :  { %2148 = vst [vmem:[%s3383_s1 + $0x174] sm:$0xf] %v1371_v45  ;;  %v849_v50 = vld [vmem:[#allocation0 + $0x30] sm:$0xf]  ;;  %v855_v51 = vld [vmem:[#allocation0 + $0x38] sm:$0xf] }
 0x119   :  { %2149 = vst [vmem:[%s3383_s1 + $0x178] sm:$0xf] %v1377_v46  ;;  %v879_v56 = vld [vmem:[#allocation0 + $0x58] sm:$0xf]  ;;  %v885_v57 = vld [vmem:[#allocation0 + $0x60] sm:$0xf]  ;;  %v680_v46 = vpop.permute.xlu0 %679  }
 0x11a   :  { %2150 = vst [vmem:[%s3383_s1 + $0x17c] sm:$0xf] %v1383_v47  ;;  %v891_v58 = vld [vmem:[#allocation0 + $0x68] sm:$0xf]  ;;  %v897_v59 = vld [vmem:[#allocation0 + $0x70] sm:$0xf] }
 0x11b   :  { %2059 = vst [vmem:[%s3383_s1 + $0x10] sm:$0xf] %v837_v48  ;;  %v903_v60 = vld [vmem:[#allocation0 + $0x78] sm:$0xf]  ;;  %v1485_v61 = vld [vmem:[#allocation0 + $0x380] sm:$0xf] }
 0x11c   :  { %2060 = vst [vmem:[%s3383_s1 + $0x14] sm:$0xf] %v843_v49  ;;  %v1491_v62 = vld [vmem:[#allocation0 + $0x388] sm:$0xf]  ;;  %v1497_v63 = vld [vmem:[#allocation0 + $0x390] sm:$0xf] }
 0x11d   :  { %2061 = vst [vmem:[%s3383_s1 + $0x18] sm:$0xf] %v849_v50  ;;  %v1503_v0 = vld [vmem:[#allocation0 + $0x398] sm:$0xf]  ;;  %v814_v1 = vld [vmem:[#allocation0] sm:$0xf] }
 0x11e   :  { %2062 = vst [vmem:[%s3383_s1 + $0x1c] sm:$0xf] %v855_v51  ;;  %v819_v2 = vld [vmem:[#allocation0 + $0x8] sm:$0xf]  ;;  %v825_v9 = vld [vmem:[#allocation0 + $0x10] sm:$0xf] }
 0x11f   :  { %2063 = vst [vmem:[%s3383_s1 + $0x20] sm:$0xf] %v861_v53  ;;  %v831_v10 = vld [vmem:[#allocation0 + $0x18] sm:$0xf] }
 0x120   :  { %2064 = vst [vmem:[%s3383_s1 + $0x24] sm:$0xf] %v867_v54 }
 0x121   :  { %2065 = vst [vmem:[%s3383_s1 + $0x28] sm:$0xf] %v873_v55 }
 0x122   :  { %2066 = vst [vmem:[%s3383_s1 + $0x2c] sm:$0xf] %v879_v56 }
 0x123   :  { %2067 = vst [vmem:[%s3383_s1 + $0x30] sm:$0xf] %v885_v57 }
 0x124   :  { %2068 = vst [vmem:[%s3383_s1 + $0x34] sm:$0xf] %v891_v58 }
 0x125   :  { %2069 = vst [vmem:[%s3383_s1 + $0x38] sm:$0xf] %v897_v59  ;;  %v806_v59 = vpop.permute.xlu2 %805  }
 0x126   :  { %2070 = vst [vmem:[%s3383_s1 + $0x3c] sm:$0xf] %v903_v60 }
 0x127   :  { %730 = vst.msk [vmem:[#allocation0 + $0x383] ss:$8 sm:$0xf0] %vm3_vm0, %v725_v38  }
 0x128   :  { %2167 = vst [vmem:[%s3383_s1 + $0x1c0] sm:$0xf] %v1485_v61 }
 0x129   :  { %2168 = vst [vmem:[%s3383_s1 + $0x1c4] sm:$0xf] %v1491_v62 }
 0x12a   :  { %2169 = vst [vmem:[%s3383_s1 + $0x1c8] sm:$0xf] %v1497_v63 }
 0x12b   :  { %2170 = vst [vmem:[%s3383_s1 + $0x1cc] sm:$0xf] %v1503_v0  ;;  %v1973_v0 = vld [vmem:[%s3382_s0 + $0x50] sm:$0xff]  }
 0x12c   :  { %817 = vst [vmem:[%s3383_s1] sm:$0xf] %v814_v1  ;;  %v1972_v1 = vld [vmem:[%s3382_s0 + $0x48] sm:$0xff]  }
 0x12d   :  { %2056 = vst [vmem:[%s3383_s1 + $0x4] sm:$0xf] %v819_v2  ;;  %v716_v2 = vpop.permute.xlu1 %715  }
 0x12e   :  { %v1509_v5 = vld [vmem:[#allocation0 + $0x3a0] sm:$0xf]  ;;  %v1515_v6 = vld [vmem:[#allocation0 + $0x3a8] sm:$0xf]  ;;  %v1521_v7 = vld [vmem:[#allocation0 + $0x3b0] sm:$0xf] }
 0x12f   :  { %2171 = vst [vmem:[%s3383_s1 + $0x1d0] sm:$0xf] %v1509_v5  ;;  %v1527_v8 = vld [vmem:[#allocation0 + $0x3b8] sm:$0xf] }
 0x130   :  { %2172 = vst [vmem:[%s3383_s1 + $0x1d4] sm:$0xf] %v1515_v6 }
 0x131   :  { %2173 = vst [vmem:[%s3383_s1 + $0x1d8] sm:$0xf] %v1521_v7  ;;  %v3043_v7 = vpop.permute.xlu0 %706  }
 0x132   :  { %2174 = vst [vmem:[%s3383_s1 + $0x1dc] sm:$0xf] %v1527_v8 }
 0x133   :  { %2057 = vst [vmem:[%s3383_s1 + $0x8] sm:$0xf] %v825_v9 }
 0x134   :  { %2058 = vst [vmem:[%s3383_s1 + $0xc] sm:$0xf] %v831_v10 }
 0x135   :  { %638 = vst.msk [vmem:[#allocation0 + $0x103] ss:$8 sm:$0xf] %vm3_vm0, %v2763_v43  }
 0x136   :  { %640 = vst.msk [vmem:[#allocation0 + $0x103] ss:$8 sm:$0xf0] %vm3_vm0, %v2763_v43  }
 0x137   :  { %629 = vst.msk [vmem:[#allocation0 + $0xc3] ss:$8 sm:$0xf] %vm3_vm0, %v626_v52  }
 0x138   :  { %631 = vst.msk [vmem:[#allocation0 + $0xc3] ss:$8 sm:$0xf0] %vm3_vm0, %v626_v52  }
 0x139   :  { %755 = vst.msk [vmem:[#allocation0 + $0x443] ss:$8 sm:$0xf] %vm3_vm0, %v752_v3  }
 0x13a   :  { %757 = vst.msk [vmem:[#allocation0 + $0x443] ss:$8 sm:$0xf0] %vm3_vm0, %v752_v3   ;;  %v1986_v3 = vld [vmem:[%s3382_s0 + $0xb8] sm:$0xff]  }
 0x13b   :  { %665 = vst.msk [vmem:[#allocation0 + $0x1c3] ss:$8 sm:$0xf] %vm3_vm0, %v2835_v4  }
 0x13c   :  { %v1005_v12 = vld [vmem:[#allocation0 + $0x100] sm:$0xf]  ;;  %v1011_v13 = vld [vmem:[#allocation0 + $0x108] sm:$0xf]  ;;  %v1017_v14 = vld [vmem:[#allocation0 + $0x110] sm:$0xf] }
 0x13d   :  { %2087 = vst [vmem:[%s3383_s1 + $0x80] sm:$0xf] %v1005_v12  ;;  %v1023_v15 = vld [vmem:[#allocation0 + $0x118] sm:$0xf]  ;;  %v1029_v16 = vld [vmem:[#allocation0 + $0x120] sm:$0xf] }
 0x13e   :  { %2088 = vst [vmem:[%s3383_s1 + $0x84] sm:$0xf] %v1011_v13  ;;  %v1035_v17 = vld [vmem:[#allocation0 + $0x128] sm:$0xf]  ;;  %v1041_v18 = vld [vmem:[#allocation0 + $0x130] sm:$0xf] }
 0x13f   :  { %2089 = vst [vmem:[%s3383_s1 + $0x88] sm:$0xf] %v1017_v14  ;;  %v1047_v19 = vld [vmem:[#allocation0 + $0x138] sm:$0xf]  ;;  %v957_v20 = vld [vmem:[#allocation0 + $0xc0] sm:$0xf] }
 0x140   :  { %2090 = vst [vmem:[%s3383_s1 + $0x8c] sm:$0xf] %v1023_v15  ;;  %v963_v21 = vld [vmem:[#allocation0 + $0xc8] sm:$0xf]  ;;  %v969_v23 = vld [vmem:[#allocation0 + $0xd0] sm:$0xf] }
 0x141   :  { %2091 = vst [vmem:[%s3383_s1 + $0x90] sm:$0xf] %v1029_v16  ;;  %v975_v24 = vld [vmem:[#allocation0 + $0xd8] sm:$0xf]  ;;  %v981_v25 = vld [vmem:[#allocation0 + $0xe0] sm:$0xf] }
 0x142   :  { %2092 = vst [vmem:[%s3383_s1 + $0x94] sm:$0xf] %v1035_v17  ;;  %v987_v26 = vld [vmem:[#allocation0 + $0xe8] sm:$0xf]  ;;  %v993_v27 = vld [vmem:[#allocation0 + $0xf0] sm:$0xf] }
 0x143   :  { %2093 = vst [vmem:[%s3383_s1 + $0x98] sm:$0xf] %v1041_v18  ;;  %v999_v28 = vld [vmem:[#allocation0 + $0xf8] sm:$0xf]  ;;  %v1629_v29 = vld [vmem:[#allocation0 + $0x440] sm:$0xf] }
 0x144   :  { %2094 = vst [vmem:[%s3383_s1 + $0x9c] sm:$0xf] %v1047_v19  ;;  %v1635_v30 = vld [vmem:[#allocation0 + $0x448] sm:$0xf]  ;;  %v1641_v31 = vld [vmem:[#allocation0 + $0x450] sm:$0xf] }
 0x145   :  { %2079 = vst [vmem:[%s3383_s1 + $0x60] sm:$0xf] %v957_v20  ;;  %v1647_v32 = vld [vmem:[#allocation0 + $0x458] sm:$0xf]  ;;  %v1653_v33 = vld [vmem:[#allocation0 + $0x460] sm:$0xf] }
 0x146   :  { %2080 = vst [vmem:[%s3383_s1 + $0x64] sm:$0xf] %v963_v21  ;;  %v1659_v34 = vld [vmem:[#allocation0 + $0x468] sm:$0xf]  ;;  %v1665_v35 = vld [vmem:[#allocation0 + $0x470] sm:$0xf] }
 0x147   :  { %2081 = vst [vmem:[%s3383_s1 + $0x68] sm:$0xf] %v969_v23  ;;  %v1671_v36 = vld [vmem:[#allocation0 + $0x478] sm:$0xf]  ;;  %v1149_v37 = vld [vmem:[#allocation0 + $0x1c0] sm:$0xf] }
 0x148   :  { %2082 = vst [vmem:[%s3383_s1 + $0x6c] sm:$0xf] %v975_v24  ;;  %v1155_v38 = vld [vmem:[#allocation0 + $0x1c8] sm:$0xf]  ;;  %v1161_v40 = vld [vmem:[#allocation0 + $0x1d0] sm:$0xf] }
 0x149   :  { %2083 = vst [vmem:[%s3383_s1 + $0x70] sm:$0xf] %v981_v25  ;;  %v1167_v41 = vld [vmem:[#allocation0 + $0x1d8] sm:$0xf]  ;;  %v1976_v21 = vld [vmem:[%s3382_s0 + $0x68] sm:$0xff]  }
 0x14a   :  { %2084 = vst [vmem:[%s3383_s1 + $0x74] sm:$0xf] %v987_v26  ;;  %v743_v26 = vpop.permute.xlu1 %742  }
 0x14b   :  { %2085 = vst [vmem:[%s3383_s1 + $0x78] sm:$0xf] %v993_v27  ;;  %v3107_v27 = vpop.permute.xlu0 %733  }
 0x14c   :  { %2086 = vst [vmem:[%s3383_s1 + $0x7c] sm:$0xf] %v999_v28 }
 0x14d   :  { %2191 = vst [vmem:[%s3383_s1 + $0x220] sm:$0xf] %v1629_v29 }
 0x14e   :  { %2192 = vst [vmem:[%s3383_s1 + $0x224] sm:$0xf] %v1635_v30 }
 0x14f   :  { %2193 = vst [vmem:[%s3383_s1 + $0x228] sm:$0xf] %v1641_v31 }
 0x150   :  { %2194 = vst [vmem:[%s3383_s1 + $0x22c] sm:$0xf] %v1647_v32 }
 0x151   :  { %2195 = vst [vmem:[%s3383_s1 + $0x230] sm:$0xf] %v1653_v33 }
 0x152   :  { %2196 = vst [vmem:[%s3383_s1 + $0x234] sm:$0xf] %v1659_v34 }
 0x153   :  { %2197 = vst [vmem:[%s3383_s1 + $0x238] sm:$0xf] %v1665_v35 }
 0x154   :  { %2198 = vst [vmem:[%s3383_s1 + $0x23c] sm:$0xf] %v1671_v36 }
 0x155   :  { %667 = vst.msk [vmem:[#allocation0 + $0x1c3] ss:$8 sm:$0xf0] %vm3_vm0, %v2835_v4  }
 0x156   :  { %2111 = vst [vmem:[%s3383_s1 + $0xe0] sm:$0xf] %v1149_v37 }
 0x157   :  { %2112 = vst [vmem:[%s3383_s1 + $0xe4] sm:$0xf] %v1155_v38 }
 0x158   :  { %2113 = vst [vmem:[%s3383_s1 + $0xe8] sm:$0xf] %v1161_v40 }
 0x159   :  { %2114 = vst [vmem:[%s3383_s1 + $0xec] sm:$0xf] %v1167_v41  ;;  %v1979_v41 = vld [vmem:[%s3382_s0 + $0x80] sm:$0xff]  }
 0x15a   :  { %656 = vst.msk [vmem:[#allocation0 + $0x183] ss:$8 sm:$0xf] %vm3_vm0, %v2866_v11  }
 0x15b   :  { %658 = vst.msk [vmem:[#allocation0 + $0x183] ss:$8 sm:$0xf0] %vm3_vm0, %v2866_v11  }
 0x15c   :  { %v1173_v42 = vld [vmem:[#allocation0 + $0x1e0] sm:$0xf]  ;;  %v1179_v43 = vld [vmem:[#allocation0 + $0x1e8] sm:$0xf]  ;;  %v1185_v44 = vld [vmem:[#allocation0 + $0x1f0] sm:$0xf] }
 0x15d   :  { %2115 = vst [vmem:[%s3383_s1 + $0xf0] sm:$0xf] %v1173_v42  ;;  %v1191_v45 = vld [vmem:[#allocation0 + $0x1f8] sm:$0xf] }
 0x15e   :  { %2116 = vst [vmem:[%s3383_s1 + $0xf4] sm:$0xf] %v1179_v43  ;;  %v1978_v42 = vld [vmem:[%s3382_s0 + $0x78] sm:$0xff]  }
 0x15f   :  { %2117 = vst [vmem:[%s3383_s1 + $0xf8] sm:$0xf] %v1185_v44 }
 0x160   :  { %2118 = vst [vmem:[%s3383_s1 + $0xfc] sm:$0xf] %v1191_v45 }
 0x161   :  { %v1101_v47 = vld [vmem:[#allocation0 + $0x180] sm:$0xf]  ;;  %v1107_v48 = vld [vmem:[#allocation0 + $0x188] sm:$0xf]  ;;  %v1113_v49 = vld [vmem:[#allocation0 + $0x190] sm:$0xf] }
 0x162   :  { %2103 = vst [vmem:[%s3383_s1 + $0xc0] sm:$0xf] %v1101_v47  ;;  %v1119_v50 = vld [vmem:[#allocation0 + $0x198] sm:$0xf]  ;;  %v1125_v51 = vld [vmem:[#allocation0 + $0x1a0] sm:$0xf]  ;;  %v3173_v47 = vpop.permute.xlu0 %760  }
 0x163   :  { %782 = vst.msk [vmem:[#allocation0 + $0x503] ss:$8 sm:$0xf] %vm3_vm0, %v779_v22   ;;  %v1131_v52 = vld [vmem:[#allocation0 + $0x1a8] sm:$0xf] }
 0x164   :  { %784 = vst.msk [vmem:[#allocation0 + $0x503] ss:$8 sm:$0xf0] %vm3_vm0, %v779_v22   ;;  %v1137_v62 = vld [vmem:[#allocation0 + $0x1b0] sm:$0xf]  ;;  %v1975_v22 = vld [vmem:[%s3382_s0 + $0x60] sm:$0xff]  }
 0x165   :  { %2104 = vst [vmem:[%s3383_s1 + $0xc4] sm:$0xf] %v1107_v48  ;;  %v1143_v63 = vld [vmem:[#allocation0 + $0x1b8] sm:$0xf] }
 0x166   :  { %2105 = vst [vmem:[%s3383_s1 + $0xc8] sm:$0xf] %v1113_v49 }
 0x167   :  { %2106 = vst [vmem:[%s3383_s1 + $0xcc] sm:$0xf] %v1119_v50 }
 0x168   :  { %2107 = vst [vmem:[%s3383_s1 + $0xd0] sm:$0xf] %v1125_v51 }
 0x169   :  { %2108 = vst [vmem:[%s3383_s1 + $0xd4] sm:$0xf] %v1131_v52 }
 0x16a   :  { %v1773_v53 = vld [vmem:[#allocation0 + $0x500] sm:$0xf]  ;;  %v1779_v54 = vld [vmem:[#allocation0 + $0x508] sm:$0xf]  ;;  %v1785_v55 = vld [vmem:[#allocation0 + $0x510] sm:$0xf] }
 0x16b   :  { %2215 = vst [vmem:[%s3383_s1 + $0x280] sm:$0xf] %v1773_v53  ;;  %v1791_v56 = vld [vmem:[#allocation0 + $0x518] sm:$0xf]  ;;  %v1797_v57 = vld [vmem:[#allocation0 + $0x520] sm:$0xf] }
 0x16c   :  { %2216 = vst [vmem:[%s3383_s1 + $0x284] sm:$0xf] %v1779_v54  ;;  %v1803_v58 = vld [vmem:[#allocation0 + $0x528] sm:$0xf]  ;;  %v1809_v60 = vld [vmem:[#allocation0 + $0x530] sm:$0xf] }
 0x16d   :  { %2217 = vst [vmem:[%s3383_s1 + $0x288] sm:$0xf] %v1785_v55  ;;  %v1815_v61 = vld [vmem:[#allocation0 + $0x538] sm:$0xf] }
 0x16e   :  { %2218 = vst [vmem:[%s3383_s1 + $0x28c] sm:$0xf] %v1791_v56 }
 0x16f   :  { %2219 = vst [vmem:[%s3383_s1 + $0x290] sm:$0xf] %v1797_v57 }
 0x170   :  { %2220 = vst [vmem:[%s3383_s1 + $0x294] sm:$0xf] %v1803_v58 }
 0x171   :  { %2221 = vst [vmem:[%s3383_s1 + $0x298] sm:$0xf] %v1809_v60 }
 0x172   :  { %2222 = vst [vmem:[%s3383_s1 + $0x29c] sm:$0xf] %v1815_v61  ;;  %v1982_v61 = vld [vmem:[%s3382_s0 + $0x98] sm:$0xff]  }
 0x173   :  { %2109 = vst [vmem:[%s3383_s1 + $0xd8] sm:$0xf] %v1137_v62  ;;  %v1981_v62 = vld [vmem:[%s3382_s0 + $0x90] sm:$0xff]  }
 0x174   :  { %2110 = vst [vmem:[%s3383_s1 + $0xdc] sm:$0xf] %v1143_v63 }
 0x175   :  { %73 = vst.msk [vmem:[#allocation0 + $0x280] ss:$8 sm:$0xf] %vm3_vm0, %v1973_v0  }
 0x176   :  { %75 = vst.msk [vmem:[#allocation0 + $0x280] ss:$8 sm:$0xf0] %vm3_vm0, %v1973_v0  }
 0x177   :  { %692 = vst.msk [vmem:[#allocation0 + $0x283] ss:$8 sm:$0xf] %vm3_vm0, %v689_v39  }
 0x178   :  { %694 = vst.msk [vmem:[#allocation0 + $0x283] ss:$8 sm:$0xf0] %vm3_vm0, %v689_v39  }
 0x179   :  { %66 = vst.msk [vmem:[#allocation0 + $0x240] ss:$8 sm:$0xf] %vm3_vm0, %v1972_v1  }
 0x17a   :  { %68 = vst.msk [vmem:[#allocation0 + $0x240] ss:$8 sm:$0xf0] %vm3_vm0, %v1972_v1  }
 0x17b   :  { %683 = vst.msk [vmem:[#allocation0 + $0x243] ss:$8 sm:$0xf] %vm3_vm0, %v680_v46  }
 0x17c   :  { %685 = vst.msk [vmem:[#allocation0 + $0x243] ss:$8 sm:$0xf0] %vm3_vm0, %v680_v46   ;;  %v770_v46 = vpop.permute.xlu1 %769  }
 0x17d   :  { %164 = vst.msk [vmem:[#allocation0 + $0x5c0] ss:$8 sm:$0xf] %vm3_vm0, %v1986_v3  }
 0x17e   :  { %v1293_v4 = vld [vmem:[#allocation0 + $0x280] sm:$0xf]  ;;  %v1299_v5 = vld [vmem:[#allocation0 + $0x288] sm:$0xf]  ;;  %v1305_v6 = vld [vmem:[#allocation0 + $0x290] sm:$0xf] }
 0x17f   :  { %2135 = vst [vmem:[%s3383_s1 + $0x140] sm:$0xf] %v1293_v4  ;;  %v1311_v8 = vld [vmem:[#allocation0 + $0x298] sm:$0xf]  ;;  %v1317_v9 = vld [vmem:[#allocation0 + $0x2a0] sm:$0xf] }
 0x180   :  { %2136 = vst [vmem:[%s3383_s1 + $0x144] sm:$0xf] %v1299_v5  ;;  %v1323_v10 = vld [vmem:[#allocation0 + $0x2a8] sm:$0xf]  ;;  %v1329_v11 = vld [vmem:[#allocation0 + $0x2b0] sm:$0xf] }
 0x181   :  { %2137 = vst [vmem:[%s3383_s1 + $0x148] sm:$0xf] %v1305_v6  ;;  %v1335_v12 = vld [vmem:[#allocation0 + $0x2b8] sm:$0xf] }
 0x182   :  { %2138 = vst [vmem:[%s3383_s1 + $0x14c] sm:$0xf] %v1311_v8  ;;  %v1245_v13 = vld [vmem:[#allocation0 + $0x240] sm:$0xf]  ;;  %v1251_v14 = vld [vmem:[#allocation0 + $0x248] sm:$0xf] }
 0x183   :  { %2139 = vst [vmem:[%s3383_s1 + $0x150] sm:$0xf] %v1317_v9  ;;  %v1257_v15 = vld [vmem:[#allocation0 + $0x250] sm:$0xf]  ;;  %v1263_v16 = vld [vmem:[#allocation0 + $0x258] sm:$0xf] }
 0x184   :  { %2140 = vst [vmem:[%s3383_s1 + $0x154] sm:$0xf] %v1323_v10  ;;  %v1269_v17 = vld [vmem:[#allocation0 + $0x260] sm:$0xf]  ;;  %v1275_v18 = vld [vmem:[#allocation0 + $0x268] sm:$0xf] }
 0x185   :  { %2141 = vst [vmem:[%s3383_s1 + $0x158] sm:$0xf] %v1329_v11  ;;  %v1281_v19 = vld [vmem:[#allocation0 + $0x270] sm:$0xf]  ;;  %v1287_v20 = vld [vmem:[#allocation0 + $0x278] sm:$0xf] }
 0x186   :  { %2142 = vst [vmem:[%s3383_s1 + $0x15c] sm:$0xf] %v1335_v12 }
 0x187   :  { %2127 = vst [vmem:[%s3383_s1 + $0x120] sm:$0xf] %v1245_v13 }
 0x188   :  { %2128 = vst [vmem:[%s3383_s1 + $0x124] sm:$0xf] %v1251_v14 }
 0x189   :  { %2129 = vst [vmem:[%s3383_s1 + $0x128] sm:$0xf] %v1257_v15 }
 0x18a   :  { %2130 = vst [vmem:[%s3383_s1 + $0x12c] sm:$0xf] %v1263_v16 }
 0x18b   :  { %2131 = vst [vmem:[%s3383_s1 + $0x130] sm:$0xf] %v1269_v17  ;;  %v1985_v17 = vld [vmem:[%s3382_s0 + $0xb0] sm:$0xff]  }
 0x18c   :  { %2132 = vst [vmem:[%s3383_s1 + $0x134] sm:$0xf] %v1275_v18  ;;  %v1984_v18 = vld [vmem:[%s3382_s0 + $0xa8] sm:$0xff]  }
 0x18d   :  { %2133 = vst [vmem:[%s3383_s1 + $0x138] sm:$0xf] %v1281_v19 }
 0x18e   :  { %2134 = vst [vmem:[%s3383_s1 + $0x13c] sm:$0xf] %v1287_v20 }
 0x18f   :  { %166 = vst.msk [vmem:[#allocation0 + $0x5c0] ss:$8 sm:$0xf0] %vm3_vm0, %v1986_v3   ;;  %v3239_v3 = vpop.permute.xlu0 %787  }
 0x190   :  { %809 = vst.msk [vmem:[#allocation0 + $0x5c3] ss:$8 sm:$0xf] %vm3_vm0, %v806_v59  }
 0x191   :  { %811 = vst.msk [vmem:[#allocation0 + $0x5c3] ss:$8 sm:$0xf0] %vm3_vm0, %v806_v59  }
 0x192   :  { %94 = vst.msk [vmem:[#allocation0 + $0x340] ss:$8 sm:$0xf] %vm3_vm0, %v1976_v21  }
 0x193   :  { %96 = vst.msk [vmem:[#allocation0 + $0x340] ss:$8 sm:$0xf0] %vm3_vm0, %v1976_v21  }
 0x194   :  { %719 = vst.msk [vmem:[#allocation0 + $0x343] ss:$8 sm:$0xf] %vm3_vm0, %v716_v2  }
 0x195   :  { %721 = vst.msk [vmem:[#allocation0 + $0x343] ss:$8 sm:$0xf0] %vm3_vm0, %v716_v2   ;;  %v797_v2 = vpop.permute.xlu1 %796  }
 0x196   :  { %87 = vst.msk [vmem:[#allocation0 + $0x300] ss:$8 sm:$0xf] %vm3_vm0, %v1975_v22  }
 0x197   :  { %v1917_v23 = vld [vmem:[#allocation0 + $0x5c0] sm:$0xf]  ;;  %v1923_v24 = vld [vmem:[#allocation0 + $0x5c8] sm:$0xf]  ;;  %v1929_v25 = vld [vmem:[#allocation0 + $0x5d0] sm:$0xf] }
 0x198   :  { %2239 = vst [vmem:[%s3383_s1 + $0x2e0] sm:$0xf] %v1917_v23  ;;  %v1935_v28 = vld [vmem:[#allocation0 + $0x5d8] sm:$0xf]  ;;  %v1941_v29 = vld [vmem:[#allocation0 + $0x5e0] sm:$0xf] }
 0x199   :  { %2240 = vst [vmem:[%s3383_s1 + $0x2e4] sm:$0xf] %v1923_v24  ;;  %v1947_v30 = vld [vmem:[#allocation0 + $0x5e8] sm:$0xf]  ;;  %v1953_v31 = vld [vmem:[#allocation0 + $0x5f0] sm:$0xf] }
 0x19a   :  { %2241 = vst [vmem:[%s3383_s1 + $0x2e8] sm:$0xf] %v1929_v25  ;;  %v1959_v32 = vld [vmem:[#allocation0 + $0x5f8] sm:$0xf] }
 0x19b   :  { %2242 = vst [vmem:[%s3383_s1 + $0x2ec] sm:$0xf] %v1935_v28  ;;  %v1437_v33 = vld [vmem:[#allocation0 + $0x340] sm:$0xf]  ;;  %v1443_v34 = vld [vmem:[#allocation0 + $0x348] sm:$0xf] }
 0x19c   :  { %2243 = vst [vmem:[%s3383_s1 + $0x2f0] sm:$0xf] %v1941_v29  ;;  %v1449_v35 = vld [vmem:[#allocation0 + $0x350] sm:$0xf]  ;;  %v1455_v36 = vld [vmem:[#allocation0 + $0x358] sm:$0xf] }
 0x19d   :  { %2244 = vst [vmem:[%s3383_s1 + $0x2f4] sm:$0xf] %v1947_v30  ;;  %v1461_v37 = vld [vmem:[#allocation0 + $0x360] sm:$0xf]  ;;  %v1467_v38 = vld [vmem:[#allocation0 + $0x368] sm:$0xf] }
 0x19e   :  { %2245 = vst [vmem:[%s3383_s1 + $0x2f8] sm:$0xf] %v1953_v31  ;;  %v1473_v39 = vld [vmem:[#allocation0 + $0x370] sm:$0xf]  ;;  %v1479_v40 = vld [vmem:[#allocation0 + $0x378] sm:$0xf] }
 0x19f   :  { %2246 = vst [vmem:[%s3383_s1 + $0x2fc] sm:$0xf] %v1959_v32 }
 0x1a0   :  { %2159 = vst [vmem:[%s3383_s1 + $0x1a0] sm:$0xf] %v1437_v33 }
 0x1a1   :  { %2160 = vst [vmem:[%s3383_s1 + $0x1a4] sm:$0xf] %v1443_v34 }
 0x1a2   :  { %2161 = vst [vmem:[%s3383_s1 + $0x1a8] sm:$0xf] %v1449_v35 }
 0x1a3   :  { %2162 = vst [vmem:[%s3383_s1 + $0x1ac] sm:$0xf] %v1455_v36 }
 0x1a4   :  { %2163 = vst [vmem:[%s3383_s1 + $0x1b0] sm:$0xf] %v1461_v37 }
 0x1a5   :  { %2164 = vst [vmem:[%s3383_s1 + $0x1b4] sm:$0xf] %v1467_v38 }
 0x1a6   :  { %2165 = vst [vmem:[%s3383_s1 + $0x1b8] sm:$0xf] %v1473_v39 }
 0x1a7   :  { %2166 = vst [vmem:[%s3383_s1 + $0x1bc] sm:$0xf] %v1479_v40 }
 0x1a8   :  { %89 = vst.msk [vmem:[#allocation0 + $0x300] ss:$8 sm:$0xf0] %vm3_vm0, %v1975_v22  }
 0x1a9   :  { %710 = vst.msk [vmem:[#allocation0 + $0x303] ss:$8 sm:$0xf] %vm3_vm0, %v3043_v7  }
 0x1aa   :  { %712 = vst.msk [vmem:[#allocation0 + $0x303] ss:$8 sm:$0xf0] %vm3_vm0, %v3043_v7  }
 0x1ab   :  { %115 = vst.msk [vmem:[#allocation0 + $0x400] ss:$8 sm:$0xf] %vm3_vm0, %v1979_v41  }
 0x1ac   :  { %117 = vst.msk [vmem:[#allocation0 + $0x400] ss:$8 sm:$0xf0] %vm3_vm0, %v1979_v41  }
 0x1ad   :  { %746 = vst.msk [vmem:[#allocation0 + $0x403] ss:$8 sm:$0xf] %vm3_vm0, %v743_v26  }
 0x1ae   :  { %748 = vst.msk [vmem:[#allocation0 + $0x403] ss:$8 sm:$0xf0] %vm3_vm0, %v743_v26  }
 0x1af   :  { %108 = vst.msk [vmem:[#allocation0 + $0x3c0] ss:$8 sm:$0xf] %vm3_vm0, %v1978_v42  }
 0x1b0   :  { %v1389_v43 = vld [vmem:[#allocation0 + $0x300] sm:$0xf]  ;;  %v1395_v44 = vld [vmem:[#allocation0 + $0x308] sm:$0xf]  ;;  %v1401_v45 = vld [vmem:[#allocation0 + $0x310] sm:$0xf] }
 0x1b1   :  { %2151 = vst [vmem:[%s3383_s1 + $0x180] sm:$0xf] %v1389_v43  ;;  %v1407_v48 = vld [vmem:[#allocation0 + $0x318] sm:$0xf]  ;;  %v1413_v49 = vld [vmem:[#allocation0 + $0x320] sm:$0xf] }
 0x1b2   :  { %2152 = vst [vmem:[%s3383_s1 + $0x184] sm:$0xf] %v1395_v44  ;;  %v1419_v50 = vld [vmem:[#allocation0 + $0x328] sm:$0xf]  ;;  %v1425_v51 = vld [vmem:[#allocation0 + $0x330] sm:$0xf] }
 0x1b3   :  { %2153 = vst [vmem:[%s3383_s1 + $0x188] sm:$0xf] %v1401_v45  ;;  %v1431_v52 = vld [vmem:[#allocation0 + $0x338] sm:$0xf] }
 0x1b4   :  { %2154 = vst [vmem:[%s3383_s1 + $0x18c] sm:$0xf] %v1407_v48  ;;  %v1581_v53 = vld [vmem:[#allocation0 + $0x400] sm:$0xf]  ;;  %v1587_v54 = vld [vmem:[#allocation0 + $0x408] sm:$0xf] }
 0x1b5   :  { %2155 = vst [vmem:[%s3383_s1 + $0x190] sm:$0xf] %v1413_v49  ;;  %v1593_v55 = vld [vmem:[#allocation0 + $0x410] sm:$0xf]  ;;  %v1599_v56 = vld [vmem:[#allocation0 + $0x418] sm:$0xf] }
 0x1b6   :  { %2156 = vst [vmem:[%s3383_s1 + $0x194] sm:$0xf] %v1419_v50  ;;  %v1605_v57 = vld [vmem:[#allocation0 + $0x420] sm:$0xf]  ;;  %v1611_v58 = vld [vmem:[#allocation0 + $0x428] sm:$0xf] }
 0x1b7   :  { %2157 = vst [vmem:[%s3383_s1 + $0x198] sm:$0xf] %v1425_v51  ;;  %v1617_v59 = vld [vmem:[#allocation0 + $0x430] sm:$0xf]  ;;  %v1623_v60 = vld [vmem:[#allocation0 + $0x438] sm:$0xf] }
 0x1b8   :  { %2158 = vst [vmem:[%s3383_s1 + $0x19c] sm:$0xf] %v1431_v52 }
 0x1b9   :  { %2183 = vst [vmem:[%s3383_s1 + $0x200] sm:$0xf] %v1581_v53 }
 0x1ba   :  { %2184 = vst [vmem:[%s3383_s1 + $0x204] sm:$0xf] %v1587_v54 }
 0x1bb   :  { %2185 = vst [vmem:[%s3383_s1 + $0x208] sm:$0xf] %v1593_v55 }
 0x1bc   :  { %2186 = vst [vmem:[%s3383_s1 + $0x20c] sm:$0xf] %v1599_v56 }
 0x1bd   :  { %2187 = vst [vmem:[%s3383_s1 + $0x210] sm:$0xf] %v1605_v57 }
 0x1be   :  { %2188 = vst [vmem:[%s3383_s1 + $0x214] sm:$0xf] %v1611_v58 }
 0x1bf   :  { %2189 = vst [vmem:[%s3383_s1 + $0x218] sm:$0xf] %v1617_v59 }
 0x1c0   :  { %2190 = vst [vmem:[%s3383_s1 + $0x21c] sm:$0xf] %v1623_v60 }
 0x1c1   :  { %110 = vst.msk [vmem:[#allocation0 + $0x3c0] ss:$8 sm:$0xf0] %vm3_vm0, %v1978_v42  }
 0x1c2   :  { %737 = vst.msk [vmem:[#allocation0 + $0x3c3] ss:$8 sm:$0xf] %vm3_vm0, %v3107_v27  }
 0x1c3   :  { %739 = vst.msk [vmem:[#allocation0 + $0x3c3] ss:$8 sm:$0xf0] %vm3_vm0, %v3107_v27  }
 0x1c4   :  { %136 = vst.msk [vmem:[#allocation0 + $0x4c0] ss:$8 sm:$0xf] %vm3_vm0, %v1982_v61  }
 0x1c5   :  { %138 = vst.msk [vmem:[#allocation0 + $0x4c0] ss:$8 sm:$0xf0] %vm3_vm0, %v1982_v61  }
 0x1c6   :  { %773 = vst.msk [vmem:[#allocation0 + $0x4c3] ss:$8 sm:$0xf] %vm3_vm0, %v770_v46  }
 0x1c7   :  { %775 = vst.msk [vmem:[#allocation0 + $0x4c3] ss:$8 sm:$0xf0] %vm3_vm0, %v770_v46  }
 0x1c8   :  { %129 = vst.msk [vmem:[#allocation0 + $0x480] ss:$8 sm:$0xf] %vm3_vm0, %v1981_v62  }
 0x1c9   :  { %v1533_v63 = vld [vmem:[#allocation0 + $0x3c0] sm:$0xf]  ;;  %v1539_v0 = vld [vmem:[#allocation0 + $0x3c8] sm:$0xf]  ;;  %v1545_v1 = vld [vmem:[#allocation0 + $0x3d0] sm:$0xf] }
 0x1ca   :  { %2175 = vst [vmem:[%s3383_s1 + $0x1e0] sm:$0xf] %v1533_v63  ;;  %v1551_v4 = vld [vmem:[#allocation0 + $0x3d8] sm:$0xf]  ;;  %v1557_v5 = vld [vmem:[#allocation0 + $0x3e0] sm:$0xf] }
 0x1cb   :  { %2176 = vst [vmem:[%s3383_s1 + $0x1e4] sm:$0xf] %v1539_v0  ;;  %v1563_v6 = vld [vmem:[#allocation0 + $0x3e8] sm:$0xf]  ;;  %v1569_v7 = vld [vmem:[#allocation0 + $0x3f0] sm:$0xf] }
 0x1cc   :  { %2177 = vst [vmem:[%s3383_s1 + $0x1e8] sm:$0xf] %v1545_v1  ;;  %v1575_v8 = vld [vmem:[#allocation0 + $0x3f8] sm:$0xf] }
 0x1cd   :  { %2178 = vst [vmem:[%s3383_s1 + $0x1ec] sm:$0xf] %v1551_v4  ;;  %v1725_v9 = vld [vmem:[#allocation0 + $0x4c0] sm:$0xf]  ;;  %v1731_v10 = vld [vmem:[#allocation0 + $0x4c8] sm:$0xf] }
 0x1ce   :  { %2179 = vst [vmem:[%s3383_s1 + $0x1f0] sm:$0xf] %v1557_v5  ;;  %v1737_v11 = vld [vmem:[#allocation0 + $0x4d0] sm:$0xf]  ;;  %v1743_v12 = vld [vmem:[#allocation0 + $0x4d8] sm:$0xf] }
 0x1cf   :  { %2180 = vst [vmem:[%s3383_s1 + $0x1f4] sm:$0xf] %v1563_v6  ;;  %v1749_v13 = vld [vmem:[#allocation0 + $0x4e0] sm:$0xf]  ;;  %v1755_v14 = vld [vmem:[#allocation0 + $0x4e8] sm:$0xf] }
 0x1d0   :  { %2181 = vst [vmem:[%s3383_s1 + $0x1f8] sm:$0xf] %v1569_v7  ;;  %v1761_v15 = vld [vmem:[#allocation0 + $0x4f0] sm:$0xf]  ;;  %v1767_v16 = vld [vmem:[#allocation0 + $0x4f8] sm:$0xf] }
 0x1d1   :  { %2182 = vst [vmem:[%s3383_s1 + $0x1fc] sm:$0xf] %v1575_v8 }
 0x1d2   :  { %2207 = vst [vmem:[%s3383_s1 + $0x260] sm:$0xf] %v1725_v9 }
 0x1d3   :  { %2208 = vst [vmem:[%s3383_s1 + $0x264] sm:$0xf] %v1731_v10 }
 0x1d4   :  { %2209 = vst [vmem:[%s3383_s1 + $0x268] sm:$0xf] %v1737_v11 }
 0x1d5   :  { %2210 = vst [vmem:[%s3383_s1 + $0x26c] sm:$0xf] %v1743_v12 }
 0x1d6   :  { %2211 = vst [vmem:[%s3383_s1 + $0x270] sm:$0xf] %v1749_v13 }
 0x1d7   :  { %2212 = vst [vmem:[%s3383_s1 + $0x274] sm:$0xf] %v1755_v14 }
 0x1d8   :  { %2213 = vst [vmem:[%s3383_s1 + $0x278] sm:$0xf] %v1761_v15 }
 0x1d9   :  { %2214 = vst [vmem:[%s3383_s1 + $0x27c] sm:$0xf] %v1767_v16 }
 0x1da   :  { %131 = vst.msk [vmem:[#allocation0 + $0x480] ss:$8 sm:$0xf0] %vm3_vm0, %v1981_v62  }
 0x1db   :  { %764 = vst.msk [vmem:[#allocation0 + $0x483] ss:$8 sm:$0xf] %vm3_vm0, %v3173_v47  }
 0x1dc   :  { %766 = vst.msk [vmem:[#allocation0 + $0x483] ss:$8 sm:$0xf0] %vm3_vm0, %v3173_v47  }
 0x1dd   :  { %157 = vst.msk [vmem:[#allocation0 + $0x580] ss:$8 sm:$0xf] %vm3_vm0, %v1985_v17  }
 0x1de   :  { %159 = vst.msk [vmem:[#allocation0 + $0x580] ss:$8 sm:$0xf0] %vm3_vm0, %v1985_v17  }
 0x1df   :  { %800 = vst.msk [vmem:[#allocation0 + $0x583] ss:$8 sm:$0xf] %vm3_vm0, %v797_v2  }
 0x1e0   :  { %802 = vst.msk [vmem:[#allocation0 + $0x583] ss:$8 sm:$0xf0] %vm3_vm0, %v797_v2  }
 0x1e1   :  { %150 = vst.msk [vmem:[#allocation0 + $0x540] ss:$8 sm:$0xf] %vm3_vm0, %v1984_v18  }
 0x1e2   :  { %v1677_v19 = vld [vmem:[#allocation0 + $0x480] sm:$0xf]  ;;  %v1683_v20 = vld [vmem:[#allocation0 + $0x488] sm:$0xf]  ;;  %v1689_v21 = vld [vmem:[#allocation0 + $0x490] sm:$0xf] }
 0x1e3   :  { %2199 = vst [vmem:[%s3383_s1 + $0x240] sm:$0xf] %v1677_v19  ;;  %v1695_v22 = vld [vmem:[#allocation0 + $0x498] sm:$0xf]  ;;  %v1701_v23 = vld [vmem:[#allocation0 + $0x4a0] sm:$0xf] }
 0x1e4   :  { %2200 = vst [vmem:[%s3383_s1 + $0x244] sm:$0xf] %v1683_v20  ;;  %v1707_v24 = vld [vmem:[#allocation0 + $0x4a8] sm:$0xf]  ;;  %v1713_v25 = vld [vmem:[#allocation0 + $0x4b0] sm:$0xf] }
 0x1e5   :  { %2201 = vst [vmem:[%s3383_s1 + $0x248] sm:$0xf] %v1689_v21  ;;  %v1719_v26 = vld [vmem:[#allocation0 + $0x4b8] sm:$0xf] }
 0x1e6   :  { %2202 = vst [vmem:[%s3383_s1 + $0x24c] sm:$0xf] %v1695_v22  ;;  %v1869_v27 = vld [vmem:[#allocation0 + $0x580] sm:$0xf]  ;;  %v1875_v28 = vld [vmem:[#allocation0 + $0x588] sm:$0xf] }
 0x1e7   :  { %2203 = vst [vmem:[%s3383_s1 + $0x250] sm:$0xf] %v1701_v23  ;;  %v1881_v29 = vld [vmem:[#allocation0 + $0x590] sm:$0xf]  ;;  %v1887_v30 = vld [vmem:[#allocation0 + $0x598] sm:$0xf] }
 0x1e8   :  { %2204 = vst [vmem:[%s3383_s1 + $0x254] sm:$0xf] %v1707_v24  ;;  %v1893_v31 = vld [vmem:[#allocation0 + $0x5a0] sm:$0xf]  ;;  %v1899_v32 = vld [vmem:[#allocation0 + $0x5a8] sm:$0xf] }
 0x1e9   :  { %2205 = vst [vmem:[%s3383_s1 + $0x258] sm:$0xf] %v1713_v25  ;;  %v1905_v33 = vld [vmem:[#allocation0 + $0x5b0] sm:$0xf]  ;;  %v1911_v34 = vld [vmem:[#allocation0 + $0x5b8] sm:$0xf] }
 0x1ea   :  { %2206 = vst [vmem:[%s3383_s1 + $0x25c] sm:$0xf] %v1719_v26 }
 0x1eb   :  { %2231 = vst [vmem:[%s3383_s1 + $0x2c0] sm:$0xf] %v1869_v27 }
 0x1ec   :  { %2232 = vst [vmem:[%s3383_s1 + $0x2c4] sm:$0xf] %v1875_v28 }
 0x1ed   :  { %2233 = vst [vmem:[%s3383_s1 + $0x2c8] sm:$0xf] %v1881_v29 }
 0x1ee   :  { %2234 = vst [vmem:[%s3383_s1 + $0x2cc] sm:$0xf] %v1887_v30 }
 0x1ef   :  { %2235 = vst [vmem:[%s3383_s1 + $0x2d0] sm:$0xf] %v1893_v31 }
 0x1f0   :  { %2236 = vst [vmem:[%s3383_s1 + $0x2d4] sm:$0xf] %v1899_v32 }
 0x1f1   :  { %2237 = vst [vmem:[%s3383_s1 + $0x2d8] sm:$0xf] %v1905_v33 }
 0x1f2   :  { %2238 = vst [vmem:[%s3383_s1 + $0x2dc] sm:$0xf] %v1911_v34 }
 0x1f3   :  { %152 = vst.msk [vmem:[#allocation0 + $0x540] ss:$8 sm:$0xf0] %vm3_vm0, %v1984_v18  }
 0x1f4   :  { %791 = vst.msk [vmem:[#allocation0 + $0x543] ss:$8 sm:$0xf] %vm3_vm0, %v3239_v3  }
 0x1f5   :  { %793 = vst.msk [vmem:[#allocation0 + $0x543] ss:$8 sm:$0xf0] %vm3_vm0, %v3239_v3  }
 0x1fb   :  { %v1821_v35 = vld [vmem:[#allocation0 + $0x540] sm:$0xf]  ;;  %v1827_v36 = vld [vmem:[#allocation0 + $0x548] sm:$0xf]  ;;  %v1833_v37 = vld [vmem:[#allocation0 + $0x550] sm:$0xf] }
 0x1fc   :  { %2223 = vst [vmem:[%s3383_s1 + $0x2a0] sm:$0xf] %v1821_v35  ;;  %v1839_v38 = vld [vmem:[#allocation0 + $0x558] sm:$0xf]  ;;  %v1845_v39 = vld [vmem:[#allocation0 + $0x560] sm:$0xf] }
 0x1fd   :  { %2224 = vst [vmem:[%s3383_s1 + $0x2a4] sm:$0xf] %v1827_v36  ;;  %v1851_v40 = vld [vmem:[#allocation0 + $0x568] sm:$0xf]  ;;  %v1857_v41 = vld [vmem:[#allocation0 + $0x570] sm:$0xf] }
 0x1fe   :  { %2225 = vst [vmem:[%s3383_s1 + $0x2a8] sm:$0xf] %v1833_v37  ;;  %v1863_v42 = vld [vmem:[#allocation0 + $0x578] sm:$0xf] }
 0x1ff   :  { %2226 = vst [vmem:[%s3383_s1 + $0x2ac] sm:$0xf] %v1839_v38 }
 0x200   :  { %2227 = vst [vmem:[%s3383_s1 + $0x2b0] sm:$0xf] %v1845_v39 }
 0x201   :  { %2228 = vst [vmem:[%s3383_s1 + $0x2b4] sm:$0xf] %v1851_v40 }
 0x202   :  { %2229 = vst [vmem:[%s3383_s1 + $0x2b8] sm:$0xf] %v1857_v41 }
 0x203   :  { %2230 = vst [vmem:[%s3383_s1 + $0x2bc] sm:$0xf] %v1863_v42 }

// kernel: _lambda_.25
= control target key start
LH: loop header
LB: loop body
LE: loop exit
PB: predicated region body
PF: predicated region fallthrough
CT: control target
= control target key end

     0   :  { %v1165_v55 = vmov 0   ;;  %vm652_vm0 = vcmask 261120   ;;  %s1429_s1 = inlined_call_operand.vmem [shape: bf16[1184,128], index: 1, kind: input, shape index: {}]   ;;  %s1430_s0 = inlined_call_operand.vmem [shape: bf16[8,1184], index: 0, kind: input, shape index: {}]   ;;  %s1431_s2 = inlined_call_operand.vmem [shape: f32[8,1], index: 2, kind: input, shape index: {}]   ;;  %s1432_s3 = inlined_call_operand.vmem [shape: bf16[8,128], index: 3, kind: output, shape index: {}]  }
   0x1   :  { %v1096_v0 = vld [vmem:[%s1429_s1 + $0x38] sm:$0xff]  ;;  %v1095_v4 = vld [vmem:[%s1429_s1 + $0x30] sm:$0xff]  ;;  %v1094_v8 = vld [vmem:[%s1429_s1 + $0x28] sm:$0xff]  ;;  %1164 = vset.pattern.permute.xlu0 %v1165_v55 }
   0x2   :  { %v1112_v1 = vld [vmem:[%s1429_s1 + $0xb8] sm:$0xff]  ;;  %656 = vmatpush.bf16.msra.mxu0 %v1096_v0  ;;  %v1111_v5 = vld [vmem:[%s1429_s1 + $0xb0] sm:$0xff]  ;;  %v1110_v9 = vld [vmem:[%s1429_s1 + $0xa8] sm:$0xff] }
   0x3   :  { %v1120_v2 = vld [vmem:[%s1429_s1 + $0xf8] sm:$0xff]  ;;  %682 = vmatpush.bf16.msra.mxu2 %v1112_v1  ;;  %v1119_v6 = vld [vmem:[%s1429_s1 + $0xf0] sm:$0xff]  ;;  %v1118_v10 = vld [vmem:[%s1429_s1 + $0xe8] sm:$0xff] }
   0x4   :  { %v1104_v3 = vld [vmem:[%s1429_s1 + $0x78] sm:$0xff]  ;;  %695 = vmatpush.bf16.msra.mxu3 %v1120_v2  ;;  %v1103_v7 = vld [vmem:[%s1429_s1 + $0x70] sm:$0xff]  ;;  %v1102_v11 = vld [vmem:[%s1429_s1 + $0x68] sm:$0xff] }
   0x5   :  { %669 = vmatpush.bf16.msra.mxu1 %v1104_v3  ;;  %v1093_v12 = vld [vmem:[%s1429_s1 + $0x20] sm:$0xff]  ;;  %v1092_v16 = vld [vmem:[%s1429_s1 + $0x18] sm:$0xff]  ;;  %v1091_v20 = vld [vmem:[%s1429_s1 + $0x10] sm:$0xff] }
   0x6   :  { %657 = vmatpush.bf16.msra.mxu0 %v1095_v4  ;;  %v1109_v13 = vld [vmem:[%s1429_s1 + $0xa0] sm:$0xff]  ;;  %v1108_v17 = vld [vmem:[%s1429_s1 + $0x98] sm:$0xff]  ;;  %v1107_v21 = vld [vmem:[%s1429_s1 + $0x90] sm:$0xff] }
   0x7   :  { %683 = vmatpush.bf16.msra.mxu2 %v1111_v5  ;;  %v1117_v14 = vld [vmem:[%s1429_s1 + $0xe0] sm:$0xff]  ;;  %v1116_v18 = vld [vmem:[%s1429_s1 + $0xd8] sm:$0xff]  ;;  %v1115_v22 = vld [vmem:[%s1429_s1 + $0xd0] sm:$0xff] }
   0x8   :  { %696 = vmatpush.bf16.msra.mxu3 %v1119_v6  ;;  %v1101_v15 = vld [vmem:[%s1429_s1 + $0x60] sm:$0xff]  ;;  %v1100_v19 = vld [vmem:[%s1429_s1 + $0x58] sm:$0xff]  ;;  %v1099_v23 = vld [vmem:[%s1429_s1 + $0x50] sm:$0xff] }
   0x9   :  { %670 = vmatpush.bf16.msra.mxu1 %v1103_v7  ;;  %v1090_v24 = vld [vmem:[%s1429_s1 + $0x8] sm:$0xff]  ;;  %v15_v29 = vld [vmem:[%s1430_s0] sm:$0xff]  ;;  %v1128_v34 = vld [vmem:[%s1429_s1 + $0x138] sm:$0xff] }
   0xa   :  { %658 = vmatpush.bf16.msra.mxu0 %v1094_v8  ;;  %v1106_v25 = vld [vmem:[%s1429_s1 + $0x88] sm:$0xff]  ;;  %v1089_v30 = vld [vmem:[%s1429_s1] sm:$0xff]  ;;  %v179_v33 = vunpack.c.l.b16 %v15_v29  ;;  %v1144_v35 = vld [vmem:[%s1429_s1 + $0x1b8] sm:$0xff]  ;;  %v180_v39 = vunpack.c.h.b16 %v15_v29 }
   0xb   :  { %684 = vmatpush.bf16.msra.mxu2 %v1110_v9  ;;  %v1114_v26 = vld [vmem:[%s1429_s1 + $0xc8] sm:$0xff]  ;;  %v1105_v31 = vld [vmem:[%s1429_s1 + $0x80] sm:$0xff]  ;;  %v1152_v40 = vld [vmem:[%s1429_s1 + $0x1f8] sm:$0xff] }
   0xc   :  { %697 = vmatpush.bf16.msra.mxu3 %v1118_v10  ;;  %v1098_v27 = vld [vmem:[%s1429_s1 + $0x48] sm:$0xff]  ;;  %v1113_v36 = vld [vmem:[%s1429_s1 + $0xc0] sm:$0xff]  ;;  %v1136_v41 = vld [vmem:[%s1429_s1 + $0x178] sm:$0xff]  ;;  %v189_v43 = vpack.c.b16 %v179_v33, %v179_v33  ;;  %v190_v47 = vpack.c.b16 %v180_v39, %v180_v39 }
   0xd   :  { %671 = vmatpush.bf16.msra.mxu1 %v1102_v11  ;;  %v16_v28 = vld [vmem:[%s1430_s0 + $0x8] sm:$0xff]  ;;  %v1097_v37 = vld [vmem:[%s1429_s1 + $0x40] sm:$0xff]  ;;  %v1127_v44 = vld [vmem:[%s1429_s1 + $0x130] sm:$0xff] }
   0xe   :  { %659 = vmatpush.bf16.msra.mxu0 %v1093_v12  ;;  %v181_v32 = vunpack.c.l.b16 %v16_v28  ;;  %v182_v38 = vunpack.c.h.b16 %v16_v28  ;;  %v1143_v45 = vld [vmem:[%s1429_s1 + $0x1b0] sm:$0xff]  ;;  %v1126_v50 = vld [vmem:[%s1429_s1 + $0x128] sm:$0xff]  ;;  %v168_v54 = vld [vmem:[%s1431_s2] sm:$0xff] }
   0xf   :  { %685 = vmatpush.bf16.msra.mxu2 %v1109_v13  ;;  %v1151_v48 = vld [vmem:[%s1429_s1 + $0x1f0] sm:$0xff]  ;;  %v1142_v51 = vld [vmem:[%s1429_s1 + $0x1a8] sm:$0xff]  ;;  %v1125_v56 = vld [vmem:[%s1429_s1 + $0x120] sm:$0xff]  ;;  %171 = vperm.xlu0 %1164, %v168_v54  }
  0x10   :  { %698 = vmatpush.bf16.msra.mxu3 %v1117_v14  ;;  %v191_v42 = vpack.c.b16 %v181_v32, %v181_v32  ;;  %v192_v46 = vpack.c.b16 %v182_v38, %v182_v38  ;;  %v1135_v49 = vld [vmem:[%s1429_s1 + $0x170] sm:$0xff]  ;;  %v1150_v52 = vld [vmem:[%s1429_s1 + $0x1e8] sm:$0xff]  ;;  %v1141_v57 = vld [vmem:[%s1429_s1 + $0x1a0] sm:$0xff] }
  0x11   :  { %672 = vmatpush.bf16.msra.mxu1 %v1101_v15  ;;  %v1134_v53 = vld [vmem:[%s1429_s1 + $0x168] sm:$0xff]  ;;  %v1149_v58 = vld [vmem:[%s1429_s1 + $0x1e0] sm:$0xff]  ;;  %v1124_v60 = vld [vmem:[%s1429_s1 + $0x118] sm:$0xff] }
  0x12   :  { %660 = vmatpush.bf16.msra.mxu0 %v1092_v16  ;;  %v1133_v59 = vld [vmem:[%s1429_s1 + $0x160] sm:$0xff]  ;;  %v1140_v61 = vld [vmem:[%s1429_s1 + $0x198] sm:$0xff]  ;;  %v1123_v0 = vld [vmem:[%s1429_s1 + $0x110] sm:$0xff] }
  0x13   :  { %686 = vmatpush.bf16.msra.mxu2 %v1108_v17  ;;  %v1148_v62 = vld [vmem:[%s1429_s1 + $0x1d8] sm:$0xff]  ;;  %v1139_v1 = vld [vmem:[%s1429_s1 + $0x190] sm:$0xff]  ;;  %v1122_v4 = vld [vmem:[%s1429_s1 + $0x108] sm:$0xff] }
  0x14   :  { %699 = vmatpush.bf16.msra.mxu3 %v1116_v18  ;;  %v1132_v63 = vld [vmem:[%s1429_s1 + $0x158] sm:$0xff]  ;;  %v1147_v2 = vld [vmem:[%s1429_s1 + $0x1d0] sm:$0xff]  ;;  %v1138_v5 = vld [vmem:[%s1429_s1 + $0x188] sm:$0xff] }
  0x15   :  { %673 = vmatpush.bf16.msra.mxu1 %v1100_v19  ;;  %v1131_v3 = vld [vmem:[%s1429_s1 + $0x150] sm:$0xff]  ;;  %v18_v6 = vld [vmem:[%s1430_s0 + $0x18] sm:$0xff]  ;;  %v1146_v8 = vld [vmem:[%s1429_s1 + $0x1c8] sm:$0xff] }
  0x16   :  { %661 = vmatpush.bf16.msra.mxu0 %v1091_v20  ;;  %v17_v7 = vld [vmem:[%s1430_s0 + $0x10] sm:$0xff]  ;;  %v1130_v9 = vld [vmem:[%s1429_s1 + $0x148] sm:$0xff]  ;;  %v185_v10 = vunpack.c.l.b16 %v18_v6  ;;  %v1121_v12 = vld [vmem:[%s1429_s1 + $0x100] sm:$0xff]  ;;  %v186_v15 = vunpack.c.h.b16 %v18_v6 }
  0x17   :  { %687 = vmatpush.bf16.msra.mxu2 %v1107_v21  ;;  %v183_v11 = vunpack.c.l.b16 %v17_v7  ;;  %v1137_v13 = vld [vmem:[%s1429_s1 + $0x180] sm:$0xff]  ;;  %v1160_v14 = vld [vmem:[%s1429_s1 + $0x238] sm:$0xff]  ;;  %v184_v18 = vunpack.c.h.b16 %v17_v7  ;;  %v1162_v21 = vld [vmem:[%s1429_s1 + $0x248] sm:$0xff] }
  0x18   :  { %700 = vmatpush.bf16.msra.mxu3 %v1115_v22  ;;  %v1145_v16 = vld [vmem:[%s1429_s1 + $0x1c0] sm:$0xff]  ;;  %v195_v19 = vpack.c.b16 %v185_v10, %v185_v10  ;;  %v1159_v22 = vld [vmem:[%s1429_s1 + $0x230] sm:$0xff]  ;;  %v1156_v29 = vld [vmem:[%s1429_s1 + $0x218] sm:$0xff] }
  0x19   :  { %674 = vmatpush.bf16.msra.mxu1 %v1099_v23  ;;  %v1129_v17 = vld [vmem:[%s1429_s1 + $0x140] sm:$0xff]  ;;  %v193_v20 = vpack.c.b16 %v183_v11, %v183_v11  ;;  %v196_v23 = vpack.c.b16 %v186_v15, %v186_v15  ;;  %v1154_v33 = vld [vmem:[%s1429_s1 + $0x208] sm:$0xff] }
  0x1a   :  { %662 = vmatpush.bf16.msra.mxu0 %v1090_v24  ;;  %v194_v24 = vpack.c.b16 %v184_v18, %v184_v18  ;;  %v19_v28 = vld [vmem:[%s1430_s0 + $0x20] sm:$0xff] }
  0x1b   :  { %688 = vmatpush.bf16.msra.mxu2 %v1106_v25  ;;  %v1161_v25 = vld [vmem:[%s1429_s1 + $0x240] sm:$0xff] }
  0x1c   :  { %701 = vmatpush.bf16.msra.mxu3 %v1114_v26  ;;  %v1158_v26 = vld [vmem:[%s1429_s1 + $0x228] sm:$0xff] }
  0x1d   :  { %675 = vmatpush.bf16.msra.mxu1 %v1098_v27  ;;  %v1157_v27 = vld [vmem:[%s1429_s1 + $0x220] sm:$0xff] }
  0x1e   :  { %663 = vmatpush.bf16.msra.mxu0 %v1089_v30  ;;  %v188_v30 = vunpack.c.h.b16 %v19_v28 }
  0x1f   :  { %689 = vmatpush.bf16.msra.mxu2 %v1105_v31  ;;  %v1155_v31 = vld [vmem:[%s1429_s1 + $0x210] sm:$0xff] }
  0x20   :  { %702 = vmatpush.bf16.msra.mxu3 %v1113_v36  ;;  %v198_v32 = vpack.c.b16 %v188_v30, %v188_v30 }
  0x21   :  { %676 = vmatpush.bf16.msra.mxu1 %v1097_v37  ;;  %664 = vmatmul.bf16.vlgmr.msra.gmra.mxu0 %v189_v43 }
  0x22   :  { %708 = vmatpush.bf16.msrb.mxu0 %v1128_v34  ;;  %690 = vmatmul.bf16.vlgmr.msra.gmra.mxu2 %v191_v42  ;;  %v187_v34 = vunpack.c.l.b16 %v19_v28 }
  0x23   :  { %734 = vmatpush.bf16.msrb.mxu2 %v1144_v35  ;;  %703 = vmatmul.bf16.vlgmr.msra.gmra.mxu3 %v192_v46  ;;  %v1153_v35 = vld [vmem:[%s1429_s1 + $0x200] sm:$0xff] }
  0x24   :  { %747 = vmatpush.bf16.msrb.mxu3 %v1152_v40  ;;  %677 = vmatmul.bf16.vlgmr.msra.gmra.mxu1 %v190_v47  ;;  %v197_v36 = vpack.c.b16 %v187_v34, %v187_v34 }
  0x25   :  { %721 = vmatpush.bf16.msrb.mxu1 %v1136_v41 }
  0x26   :  { %709 = vmatpush.bf16.msrb.mxu0 %v1127_v44 }
  0x27   :  { %735 = vmatpush.bf16.msrb.mxu2 %v1143_v45 }
  0x28   :  { %748 = vmatpush.bf16.msrb.mxu3 %v1151_v48 }
  0x29   :  { %722 = vmatpush.bf16.msrb.mxu1 %v1135_v49 }
  0x2a   :  { %710 = vmatpush.bf16.msrb.mxu0 %v1126_v50 }
  0x2b   :  { %736 = vmatpush.bf16.msrb.mxu2 %v1142_v51 }
  0x2c   :  { %749 = vmatpush.bf16.msrb.mxu3 %v1150_v52 }
  0x2d   :  { %723 = vmatpush.bf16.msrb.mxu1 %v1134_v53 }
  0x2e   :  { %711 = vmatpush.bf16.msrb.mxu0 %v1125_v56 }
  0x2f   :  { %737 = vmatpush.bf16.msrb.mxu2 %v1141_v57 }
  0x30   :  { %750 = vmatpush.bf16.msrb.mxu3 %v1149_v58 }
  0x31   :  { %724 = vmatpush.bf16.msrb.mxu1 %v1133_v59 }
  0x32   :  { %712 = vmatpush.bf16.msrb.mxu0 %v1124_v60 }
  0x33   :  { %738 = vmatpush.bf16.msrb.mxu2 %v1140_v61 }
  0x34   :  { %751 = vmatpush.bf16.msrb.mxu3 %v1148_v62 }
  0x35   :  { %725 = vmatpush.bf16.msrb.mxu1 %v1132_v63 }
  0x36   :  { %713 = vmatpush.bf16.msrb.mxu0 %v1123_v0 }
  0x37   :  { %739 = vmatpush.bf16.msrb.mxu2 %v1139_v1 }
  0x38   :  { %752 = vmatpush.bf16.msrb.mxu3 %v1147_v2 }
  0x39   :  { %726 = vmatpush.bf16.msrb.mxu1 %v1131_v3 }
  0x3a   :  { %714 = vmatpush.bf16.msrb.mxu0 %v1122_v4 }
  0x3b   :  { %740 = vmatpush.bf16.msrb.mxu2 %v1138_v5 }
  0x3c   :  { %753 = vmatpush.bf16.msrb.mxu3 %v1146_v8 }
  0x3d   :  { %727 = vmatpush.bf16.msrb.mxu1 %v1130_v9 }
  0x3e   :  { %715 = vmatpush.bf16.msrb.mxu0 %v1121_v12 }
  0x3f   :  { %741 = vmatpush.bf16.msrb.mxu2 %v1137_v13 }
  0x40   :  { %754 = vmatpush.bf16.msrb.mxu3 %v1145_v16 }
  0x41   :  { %728 = vmatpush.bf16.msrb.mxu1 %v1129_v17  ;;  %716 = vmatmul.bf16.vlgmr.msrb.gmra.mxu0 %v193_v20 }
  0x42   :  { %760 = vmatpush.bf16.msra.mxu0 %v1160_v14  ;;  %742 = vmatmul.bf16.vlgmr.msrb.gmra.mxu2 %v195_v19 }
  0x43   :  { %755 = vmatmul.bf16.vlgmr.msrb.gmra.mxu3 %v196_v23 }
  0x44   :  { %729 = vmatmul.bf16.vlgmr.msrb.gmra.mxu1 %v194_v24 }
  0x45   :  { %779 = vmatpush.bf16.msra.mxu1 %v1162_v21 }
  0x46   :  { %761 = vmatpush.bf16.msra.mxu0 %v1159_v22 }
  0x49   :  { %780 = vmatpush.bf16.msra.mxu1 %v1161_v25 }
  0x4a   :  { %762 = vmatpush.bf16.msra.mxu0 %v1158_v26 }
  0x4e   :  { %763 = vmatpush.bf16.msra.mxu0 %v1157_v27 }
  0x52   :  { %764 = vmatpush.bf16.msra.mxu0 %v1156_v29 }
  0x54   :  { %1088 = vmatmul.msk.bf16.vlgmr.msra.gmra.mxu1 %vm652_vm0, %v198_v32 }
  0x56   :  { %765 = vmatpush.bf16.msra.mxu0 %v1155_v31 }
  0x5a   :  { %766 = vmatpush.bf16.msra.mxu0 %v1154_v33 }
  0x5e   :  { %767 = vmatpush.bf16.msra.mxu0 %v1153_v35 }
  0x61   :  { %768 = vmatmul.bf16.vlgmr.msra.gmra.mxu0 %v197_v36 }
  0x81   :  { %v172_v45 = vpop.permute.xlu0 %171 }
  0x9e   :  { %v665_v37 = vpop.f32.mrf.mxu0 }
  0x9f   :  { %v666_v46 = vadd.f32 %v665_v37, %v172_v45 }
  0xa1   :  { %v678_v38 = vpop.f32.mrf.mxu1 }
  0xa2   :  { %v679_v49 = vadd.f32 %v678_v38, %v666_v46 }
  0xa5   :  { %v691_v39 = vpop.f32.mrf.mxu2 }
  0xa6   :  { %v704_v40 = vpop.f32.mrf.mxu3  ;;  %v667_v41 = vpop.f32.mrf.mxu0  ;;  %v692_v51 = vadd.f32 %v691_v39, %v679_v49 }
  0xa8   :  { %v705_v55 = vadd.f32 %v704_v40, %v692_v51 }
  0xa9   :  { %v680_v42 = vpop.f32.mrf.mxu1 }
  0xad   :  { %v693_v43 = vpop.f32.mrf.mxu2 }
  0xae   :  { %v706_v44 = vpop.f32.mrf.mxu3 }
  0xbe   :  { %v717_v47 = vpop.f32.mrf.mxu0 }
  0xbf   :  { %v718_v57 = vadd.f32 %v717_v47, %v705_v55 }
  0xc1   :  { %v730_v48 = vpop.f32.mrf.mxu1 }
  0xc2   :  { %v731_v60 = vadd.f32 %v730_v48, %v718_v57 }
  0xc5   :  { %v743_v50 = vpop.f32.mrf.mxu2 }
  0xc6   :  { %v756_v52 = vpop.f32.mrf.mxu3  ;;  %v719_v53 = vpop.f32.mrf.mxu0  ;;  %v744_v61 = vadd.f32 %v743_v50, %v731_v60 }
  0xc8   :  { %v757_v63 = vadd.f32 %v756_v52, %v744_v61 }
  0xc9   :  { %v732_v54 = vpop.f32.mrf.mxu1 }
  0xcd   :  { %v745_v56 = vpop.f32.mrf.mxu2 }
  0xce   :  { %v758_v58 = vpop.f32.mrf.mxu3 }
  0xd1   :  { %v782_v59 = vpop.f32.mrf.mxu1 }
  0xd9   :  { %v784_v62 = vpop.f32.mrf.mxu1 }
  0xde   :  { %v769_v0 = vpop.f32.mrf.mxu0 }
  0xdf   :  { %v770_v1 = vadd.f32 %v769_v0, %v757_v63 }
  0xe1   :  { %v783_v2 = vadd.f32 %v782_v59, %v770_v1 }
  0xe3   :  { %v786_v3 = vpack.c.bf16 %v783_v2, %v783_v2 }
  0xe5   :  { %787 = vst [vmem:[%s1432_s3] sm:$0xf] %v786_v3 }
  0xe6   :  { %v771_v4 = vpop.f32.mrf.mxu0 }

// kernel: _lambda_.26
= control target key start
LH: loop header
LB: loop body
LE: loop exit
PB: predicated region body
PF: predicated region fallthrough
CT: control target
= control target key end

     0   :  { %v866_v20 = vmov 0   ;;  %vm462_vm0 = vcmask 130048   ;;  %s1085_s1 = inlined_call_operand.vmem [shape: bf16[784,128], index: 1, kind: input, shape index: {}]   ;;  %s1086_s2 = inlined_call_operand.vmem [shape: f32[16,1], index: 2, kind: input, shape index: {}]   ;;  %s1087_s0 = inlined_call_operand.vmem [shape: bf16[16,784], index: 0, kind: input, shape index: {}]   ;;  %s1088_s3 = inlined_call_operand.vmem [shape: bf16[16,128], index: 3, kind: output, shape index: {}]  }
   0x1   :  { %v817_v0 = vld [vmem:[%s1085_s1 + $0x38] sm:$0xff]  ;;  %v816_v4 = vld [vmem:[%s1085_s1 + $0x30] sm:$0xff]  ;;  %v815_v8 = vld [vmem:[%s1085_s1 + $0x28] sm:$0xff]  ;;  %865 = vset.pattern.permute.xlu0 %v866_v20 }
   0x2   :  { %v825_v1 = vld [vmem:[%s1085_s1 + $0x78] sm:$0xff]  ;;  %466 = vmatpush.bf16.msra.mxu0 %v817_v0  ;;  %v824_v5 = vld [vmem:[%s1085_s1 + $0x70] sm:$0xff]  ;;  %v823_v9 = vld [vmem:[%s1085_s1 + $0x68] sm:$0xff] }
   0x3   :  { %v833_v2 = vld [vmem:[%s1085_s1 + $0xb8] sm:$0xff]  ;;  %480 = vmatpush.bf16.msra.mxu1 %v825_v1  ;;  %v832_v6 = vld [vmem:[%s1085_s1 + $0xb0] sm:$0xff]  ;;  %v831_v10 = vld [vmem:[%s1085_s1 + $0xa8] sm:$0xff] }
   0x4   :  { %v841_v3 = vld [vmem:[%s1085_s1 + $0xf8] sm:$0xff]  ;;  %494 = vmatpush.bf16.msra.mxu2 %v833_v2  ;;  %v840_v7 = vld [vmem:[%s1085_s1 + $0xf0] sm:$0xff]  ;;  %v839_v11 = vld [vmem:[%s1085_s1 + $0xe8] sm:$0xff] }
   0x5   :  { %508 = vmatpush.bf16.msra.mxu3 %v841_v3  ;;  %v814_v12 = vld [vmem:[%s1085_s1 + $0x20] sm:$0xff]  ;;  %v813_v16 = vld [vmem:[%s1085_s1 + $0x18] sm:$0xff]  ;;  %v812_v22 = vld [vmem:[%s1085_s1 + $0x10] sm:$0xff] }
   0x6   :  { %467 = vmatpush.bf16.msra.mxu0 %v816_v4  ;;  %v822_v13 = vld [vmem:[%s1085_s1 + $0x60] sm:$0xff]  ;;  %v821_v17 = vld [vmem:[%s1085_s1 + $0x58] sm:$0xff]  ;;  %v820_v23 = vld [vmem:[%s1085_s1 + $0x50] sm:$0xff] }
   0x7   :  { %481 = vmatpush.bf16.msra.mxu1 %v824_v5  ;;  %v830_v14 = vld [vmem:[%s1085_s1 + $0xa0] sm:$0xff]  ;;  %v829_v18 = vld [vmem:[%s1085_s1 + $0x98] sm:$0xff]  ;;  %v828_v24 = vld [vmem:[%s1085_s1 + $0x90] sm:$0xff] }
   0x8   :  { %495 = vmatpush.bf16.msra.mxu2 %v832_v6  ;;  %v838_v15 = vld [vmem:[%s1085_s1 + $0xe0] sm:$0xff]  ;;  %v837_v19 = vld [vmem:[%s1085_s1 + $0xd8] sm:$0xff]  ;;  %v836_v25 = vld [vmem:[%s1085_s1 + $0xd0] sm:$0xff] }
   0x9   :  { %509 = vmatpush.bf16.msra.mxu3 %v840_v7  ;;  %v121_v21 = vld [vmem:[%s1086_s2] sm:$0xff]  ;;  %v811_v26 = vld [vmem:[%s1085_s1 + $0x8] sm:$0xff]  ;;  %v806_v34 = vld [vmem:[%s1087_s0 + $0x18] sm:$0xf0] }
   0xa   :  { %468 = vmatpush.bf16.msra.mxu0 %v815_v8  ;;  %125 = vperm.xlu0 %865, %v121_v21   ;;  %v819_v27 = vld [vmem:[%s1085_s1 + $0x48] sm:$0xff]  ;;  %v810_v30 = vld [vmem:[%s1085_s1] sm:$0xff]  ;;  %v849_v37 = vld [vmem:[%s1085_s1 + $0x138] sm:$0xff] }
   0xb   :  { %482 = vmatpush.bf16.msra.mxu1 %v823_v9  ;;  %v827_v28 = vld [vmem:[%s1085_s1 + $0x88] sm:$0xff]  ;;  %v818_v31 = vld [vmem:[%s1085_s1 + $0x40] sm:$0xff]  ;;  %v857_v38 = vld [vmem:[%s1085_s1 + $0x178] sm:$0xff] }
   0xc   :  { %496 = vmatpush.bf16.msra.mxu2 %v831_v10  ;;  %v835_v29 = vld [vmem:[%s1085_s1 + $0xc8] sm:$0xff]  ;;  %v580_v32 = vld [vmem:[%s1087_s0] sm:$0xf]  ;;  %v803_v35 = vld [vmem:[%s1087_s0 + $0x4] sm:$0xf] }
   0xd   :  { %510 = vmatpush.bf16.msra.mxu3 %v839_v11  ;;  %v122_v33 = vld [vmem:[%s1086_s2 + $0x8] sm:$0xff]  ;;  %v582_v36 = vld [vmem:[%s1087_s0 + $0x1c] sm:$0xf0]  ;;  %v807_v42 = vld [vmem:[%s1087_s0 + $0x20] sm:$0xf0]  ;;  %v581_v43 = vor.u32 %v806_v34, %v580_v32 }
   0xe   :  { %469 = vmatpush.bf16.msra.mxu0 %v814_v12  ;;  %v826_v39 = vld [vmem:[%s1085_s1 + $0x80] sm:$0xff]  ;;  %v588_v41 = vld [vmem:[%s1087_s0 + $0x8] sm:$0xf]  ;;  %v804_v44 = vld [vmem:[%s1087_s0 + $0xc] sm:$0xf]  ;;  %v585_v46 = vor.u32 %v803_v35, %v582_v36 }
   0xf   :  { %483 = vmatpush.bf16.msra.mxu1 %v822_v13  ;;  %v834_v40 = vld [vmem:[%s1085_s1 + $0xc0] sm:$0xff]  ;;  %v590_v45 = vld [vmem:[%s1087_s0 + $0x24] sm:$0xf0]  ;;  %v848_v48 = vld [vmem:[%s1085_s1 + $0x130] sm:$0xff]  ;;  %v589_v50 = vor.u32 %v807_v42, %v588_v41 }
  0x10   :  { %497 = vmatpush.bf16.msra.mxu2 %v830_v14  ;;  %v858_v47 = vld [vmem:[%s1085_s1 + $0x180] sm:$0xff]  ;;  %v856_v49 = vld [vmem:[%s1085_s1 + $0x170] sm:$0xff]  ;;  %v593_v51 = vor.u32 %v804_v44, %v590_v45  ;;  %v847_v52 = vld [vmem:[%s1085_s1 + $0x128] sm:$0xff] }
  0x11   :  { %511 = vmatpush.bf16.msra.mxu3 %v838_v15  ;;  %v855_v53 = vld [vmem:[%s1085_s1 + $0x168] sm:$0xff]  ;;  %v846_v54 = vld [vmem:[%s1085_s1 + $0x120] sm:$0xff]  ;;  %v845_v56 = vld [vmem:[%s1085_s1 + $0x118] sm:$0xff] }
  0x12   :  { %470 = vmatpush.bf16.msra.mxu0 %v813_v16  ;;  %130 = vperm.xlu0 %865, %v122_v33   ;;  %v854_v55 = vld [vmem:[%s1085_s1 + $0x160] sm:$0xff]  ;;  %v853_v57 = vld [vmem:[%s1085_s1 + $0x158] sm:$0xff]  ;;  %v809_v59 = vld [vmem:[%s1087_s0 + $0x30] sm:$0xf0] }
  0x13   :  { %484 = vmatpush.bf16.msra.mxu1 %v821_v17  ;;  %v604_v58 = vld [vmem:[%s1087_s0 + $0x18] sm:$0xf]  ;;  %v844_v60 = vld [vmem:[%s1085_s1 + $0x110] sm:$0xff]  ;;  %v843_v63 = vld [vmem:[%s1085_s1 + $0x108] sm:$0xff] }
  0x14   :  { %498 = vmatpush.bf16.msra.mxu2 %v829_v18  ;;  %v852_v61 = vld [vmem:[%s1085_s1 + $0x150] sm:$0xff]  ;;  %v605_v62 = vor.u32 %v809_v59, %v604_v58  ;;  %v851_v0 = vld [vmem:[%s1085_s1 + $0x148] sm:$0xff]  ;;  %v842_v1 = vld [vmem:[%s1085_s1 + $0x100] sm:$0xff] }
  0x15   :  { %512 = vmatpush.bf16.msra.mxu3 %v837_v19  ;;  %v850_v2 = vld [vmem:[%s1085_s1 + $0x140] sm:$0xff]  ;;  %v596_v3 = vld [vmem:[%s1087_s0 + $0x10] sm:$0xf]  ;;  %v808_v4 = vld [vmem:[%s1087_s0 + $0x28] sm:$0xf0] }
  0x16   :  { %471 = vmatpush.bf16.msra.mxu0 %v812_v22  ;;  %v805_v5 = vld [vmem:[%s1087_s0 + $0x14] sm:$0xf]  ;;  %v598_v6 = vld [vmem:[%s1087_s0 + $0x2c] sm:$0xf0]  ;;  %v597_v7 = vor.u32 %v808_v4, %v596_v3 }
  0x17   :  { %485 = vmatpush.bf16.msra.mxu1 %v820_v23  ;;  %v601_v8 = vor.u32 %v805_v5, %v598_v6 }
  0x18   :  { %499 = vmatpush.bf16.msra.mxu2 %v828_v24 }
  0x19   :  { %513 = vmatpush.bf16.msra.mxu3 %v836_v25 }
  0x1a   :  { %472 = vmatpush.bf16.msra.mxu0 %v811_v26 }
  0x1b   :  { %486 = vmatpush.bf16.msra.mxu1 %v819_v27 }
  0x1c   :  { %500 = vmatpush.bf16.msra.mxu2 %v827_v28 }
  0x1d   :  { %514 = vmatpush.bf16.msra.mxu3 %v835_v29 }
  0x1e   :  { %473 = vmatpush.bf16.msra.mxu0 %v810_v30 }
  0x1f   :  { %487 = vmatpush.bf16.msra.mxu1 %v818_v31 }
  0x20   :  { %501 = vmatpush.bf16.msra.mxu2 %v826_v39 }
  0x21   :  { %515 = vmatpush.bf16.msra.mxu3 %v834_v40  ;;  %474 = vmatmul.bf16.vlgmr.msra.gmra.mxu0 %v581_v43 }
  0x22   :  { %522 = vmatpush.bf16.msrb.mxu0 %v849_v37  ;;  %488 = vmatmul.bf16.vlgmr.msra.gmra.mxu1 %v585_v46 }
  0x23   :  { %536 = vmatpush.bf16.msrb.mxu1 %v857_v38  ;;  %502 = vmatmul.bf16.vlgmr.msra.gmra.mxu2 %v589_v50 }
  0x24   :  { %557 = vmatpush.bf16.msrb.mxu2 %v858_v47  ;;  %516 = vmatmul.bf16.vlgmr.msra.gmra.mxu3 %v593_v51 }
  0x26   :  { %523 = vmatpush.bf16.msrb.mxu0 %v848_v48 }
  0x27   :  { %537 = vmatpush.bf16.msrb.mxu1 %v856_v49 }
  0x2a   :  { %524 = vmatpush.bf16.msrb.mxu0 %v847_v52 }
  0x2b   :  { %538 = vmatpush.bf16.msrb.mxu1 %v855_v53 }
  0x2e   :  { %525 = vmatpush.bf16.msrb.mxu0 %v846_v54 }
  0x2f   :  { %539 = vmatpush.bf16.msrb.mxu1 %v854_v55 }
  0x32   :  { %526 = vmatpush.bf16.msrb.mxu0 %v845_v56 }
  0x33   :  { %540 = vmatpush.bf16.msrb.mxu1 %v853_v57  ;;  %802 = vmatmul.msk.bf16.vlgmr.msrb.gmra.mxu2 %vm462_vm0, %v605_v62 }
  0x36   :  { %527 = vmatpush.bf16.msrb.mxu0 %v844_v60 }
  0x37   :  { %541 = vmatpush.bf16.msrb.mxu1 %v852_v61 }
  0x3a   :  { %528 = vmatpush.bf16.msrb.mxu0 %v843_v63 }
  0x3b   :  { %542 = vmatpush.bf16.msrb.mxu1 %v851_v0 }
  0x3e   :  { %529 = vmatpush.bf16.msrb.mxu0 %v842_v1 }
  0x3f   :  { %543 = vmatpush.bf16.msrb.mxu1 %v850_v2 }
  0x41   :  { %530 = vmatmul.bf16.vlgmr.msrb.gmra.mxu0 %v597_v7 }
  0x42   :  { %544 = vmatmul.bf16.vlgmr.msrb.gmra.mxu1 %v601_v8 }
  0x7c   :  { %v126_v9 = vpop.permute.xlu0 %125 }
  0x84   :  { %v131_v15 = vpop.permute.xlu0 %130 }
  0x9e   :  { %v475_v10 = vpop.f32.mrf.mxu0 }
  0x9f   :  { %v489_v11 = vpop.f32.mrf.mxu1  ;;  %v476_v13 = vadd.f32 %v475_v10, %v126_v9 }
  0xa1   :  { %v490_v14 = vadd.f32 %v489_v11, %v476_v13 }
  0xa6   :  { %v503_v12 = vpop.f32.mrf.mxu2  ;;  %v477_v16 = vpop.f32.mrf.mxu0 }
  0xa7   :  { %v491_v17 = vpop.f32.mrf.mxu1  ;;  %v517_v19 = vpop.f32.mrf.mxu3  ;;  %v504_v20 = vadd.f32 %v503_v12, %v490_v14  ;;  %v478_v21 = vadd.f32 %v477_v16, %v131_v15 }
  0xa9   :  { %v518_v22 = vadd.f32 %v517_v19, %v504_v20  ;;  %v492_v23 = vadd.f32 %v491_v17, %v478_v21 }
  0xae   :  { %v505_v18 = vpop.f32.mrf.mxu2 }
  0xaf   :  { %v506_v28 = vadd.f32 %v505_v18, %v492_v23  ;;  %v519_v29 = vpop.f32.mrf.mxu3 }
  0xb1   :  { %v520_v31 = vadd.f32 %v519_v29, %v506_v28 }
  0xb6   :  { %v559_v27 = vpop.f32.mrf.mxu2 }
  0xbe   :  { %v531_v24 = vpop.f32.mrf.mxu0  ;;  %v561_v37 = vpop.f32.mrf.mxu2 }
  0xbf   :  { %v545_v25 = vpop.f32.mrf.mxu1  ;;  %v532_v26 = vadd.f32 %v531_v24, %v518_v22 }
  0xc1   :  { %v546_v30 = vadd.f32 %v545_v25, %v532_v26 }
  0xc3   :  { %v560_v33 = vadd.f32 %v559_v27, %v546_v30 }
  0xc5   :  { %v566_v38 = vmul.f32 0.3, %v560_v33  ;;  %vm564_vm1 = vcmp.gt.f32.partialorder %v560_v33, 0.0 }
  0xc6   :  { %v533_v32 = vpop.f32.mrf.mxu0 }
  0xc7   :  { %v534_v34 = vadd.f32 %v533_v32, %v520_v31  ;;  %v547_v35 = vpop.f32.mrf.mxu1  ;;  %v568_v41 = vsel %vm564_vm1, %v560_v33, %v566_v38 }
  0xc9   :  { %v548_v36 = vadd.f32 %v547_v35, %v534_v34 }
  0xcb   :  { %v562_v39 = vadd.f32 %v561_v37, %v548_v36 }
  0xcd   :  { %vm565_vm2 = vcmp.gt.f32.partialorder %v562_v39, 0.0  ;;  %v567_v40 = vmul.f32 0.3, %v562_v39 }
  0xcf   :  { %v569_v42 = vsel %vm565_vm2, %v562_v39, %v567_v40 }
  0xd0   :  { %v862_v43 = vpack.c.bf16 %v569_v42, %v568_v41 }
  0xd2   :  { %863 = vst [vmem:[%s1088_s3] sm:$0xff] %v862_v43  }

// kernel: _lambda_.27
= control target key start
LH: loop header
LB: loop body
LE: loop exit
PB: predicated region body
PF: predicated region fallthrough
CT: control target
= control target key end

     0   :  { %s2317_s21 = smov 0   ;;  %s2937_s0 = inlined_call_operand.vmem [shape: bf16[16,128], index: 0, kind: input, shape index: {}]   ;;  %s2938_s1 = inlined_call_operand.vmem [shape: bf16[6,9,16,16], index: 1, kind: input, shape index: {}]   ;;  %s2939_s2 = inlined_call_operand.vmem [shape: f32[6,16,1], index: 2, kind: input, shape index: {}]   ;;  %s2940_s3 = inlined_call_operand.vmem [shape: bf16[6,9,16,16], index: 3, kind: input, shape index: {}]   ;;  %s2941_s4 = inlined_call_operand.vmem [shape: f32[6,16,1], index: 4, kind: input, shape index: {}]   ;;  %s2942_s5 = inlined_call_operand.vmem [shape: bf16[9,128,128], index: 5, kind: input, shape index: {}]   ;;  %s2943_s6 = inlined_call_operand.vmem [shape: bf16[16,128], index: 6, kind: output, shape index: {}]  }
   0x1 LB: > { %s1737_s22 = sadd.s32 4294967295, %s2279_s21   ;;  %p1740_p0 = scmp.ge.s32.totalorder %s2279_s21, 1  ;;  %s2279_s21 = sphi %s2317_s21, %s16_s21  }
   0x2   : > { %p237_p1 = scmp.lt.s32.totalorder %s2279_s21, 7 }
   0x4   : > { %p238_p2 = pnand %p1740_p0, %p237_p1 }
   0x6   : > { %241 = sbr.rel (%p238_p2) target bundleno = 2035 (0x7f3), region = 44 }
   0xb   : > { %p277_p3 = scmp.lt.s32.totalorder %s1737_s22, 5  ;;  %p1747_p4 = scmp.ne.s32.totalorder %s1737_s22, 0 }
   0xd   : > { %s278_s23 = scalar_select %p277_p3, %s1737_s22, 5 }
   0xe   : > { %301 = sbr.rel (%p1747_p4) target bundleno = 24 (0x18), region = 48 }
   0xf   : > { %s2261_s24 = smul.u32 72, %s278_s23  ;;  %s2160_s25 = sshll.u32 %s278_s23, 4 }
  0x10   : > { %s2328_s28 = scalar_lea.vmem %s2939_s2, %s2160_s25  ;;  %s2333_s7 = scalar_lea.vmem %s2941_s4, %s2160_s25 }
  0x11   : > { %s2338_s10 = scalar_lea.vmem %s2938_s1, %s2261_s24  ;;  %s2343_s13 = scalar_lea.vmem %s2940_s3, %s2261_s24 }
  0x13   : > { %v2253_v0 = vld [vmem:[%s2937_s0] sm:$0xff]  }
  0x14   : > { %v2254_v1 = vunpack.c.l.bf16 %v2253_v0  ;;  %v2255_v2 = vunpack.c.h.bf16 %v2253_v0 }
  0x16   : > { %306 = vst [vmem:[#allocation2] sm:$0xff] %v2254_v1 }
  0x17   : > { %307 = vst [vmem:[#allocation2 + $0x8] sm:$0xff] %v2255_v2 }
  0x18 PF: > { %v2351_v3 = vld [vmem:[%s2942_s5 + $0x78] sm:$0xff]  ;;  %v2362_v5 = vld [vmem:[%s2942_s5 + $0x70] sm:$0xff]  ;;  %v2374_v7 = vld [vmem:[%s2942_s5 + $0x68] sm:$0xff]  ;;  %vm591_vm0 = vcmask 130048  }
  0x19   : > { %v2356_v4 = vld [vmem:[%s2942_s5 + $0x38] sm:$0xff]  ;;  %568 = vmatpush.bf16.msra.mxu1 %v2351_v3  ;;  %v2368_v6 = vld [vmem:[%s2942_s5 + $0x30] sm:$0xff]  ;;  %v2380_v8 = vld [vmem:[%s2942_s5 + $0x28] sm:$0xff] }
  0x1a   : > { %503 = vmatpush.bf16.msra.mxu0 %v2356_v4  ;;  %v2386_v9 = vld [vmem:[%s2942_s5 + $0x60] sm:$0xff]  ;;  %v2398_v11 = vld [vmem:[%s2942_s5 + $0x58] sm:$0xff]  ;;  %v2410_v13 = vld [vmem:[%s2942_s5 + $0x50] sm:$0xff] }
  0x1b   : > { %v2392_v10 = vld [vmem:[%s2942_s5 + $0x20] sm:$0xff]  ;;  %v2404_v12 = vld [vmem:[%s2942_s5 + $0x18] sm:$0xff]  ;;  %v2416_v14 = vld [vmem:[%s2942_s5 + $0x10] sm:$0xff] }
  0x1c   : > { %v2422_v15 = vld [vmem:[%s2942_s5 + $0x48] sm:$0xff]  ;;  %v2433_v17 = vld [vmem:[%s2942_s5 + $0x40] sm:$0xff]  ;;  %v2457_v25 = vld [vmem:[%s2942_s5 + $0xb8] sm:$0xff] }
  0x1d   : > { %569 = vmatpush.bf16.msra.mxu1 %v2362_v5  ;;  %v2428_v16 = vld [vmem:[%s2942_s5 + $0x8] sm:$0xff]  ;;  %v2437_v18 = vld [vmem:[#allocation2] sm:$0xff]  ;;  %v2465_v31 = vld [vmem:[%s2942_s5 + $0xb0] sm:$0xff] }
  0x1e   : > { %504 = vmatpush.bf16.msra.mxu0 %v2368_v6  ;;  %2957 = vst [vmem:[#allocation3_spill] sm:$0xff] %v2437_v18  ;;  %v2439_v19 = vld [vmem:[#allocation2 + $0x8] sm:$0xff]  ;;  %v2444_v20 = vld [vmem:[%s2942_s5] sm:$0xff]  ;;  %v2485_v34 = vld [vmem:[%s2942_s5 + $0x98] sm:$0xff] }
  0x1f   : > { %2958 = vst [vmem:[#allocation4_spill] sm:$0xff] %v2439_v19  ;;  %v2448_v21 = vpack.c.bf16 %v2439_v19, %v2437_v18  ;;  %v2235_v29 = vld [vmem:[%s2338_s10 + $0x8] sm:$0xff]  ;;  %v2234_v30 = vld [vmem:[%s2338_s10] sm:$0xff]  ;;  %v2491_v35 = vld [vmem:[%s2942_s5 + $0x90] sm:$0xff] }
  0x20   : > { %v2473_v32 = vld [vmem:[%s2942_s5 + $0xa8] sm:$0xff]  ;;  %v2479_v33 = vld [vmem:[%s2942_s5 + $0xa0] sm:$0xff]  ;;  %v2510_v38 = vld [vmem:[%s2942_s5 + $0x138] sm:$0xff] }
  0x21   : > { %570 = vmatpush.bf16.msra.mxu1 %v2374_v7  ;;  %v2497_v36 = vld [vmem:[%s2942_s5 + $0x88] sm:$0xff]  ;;  %v2503_v37 = vld [vmem:[%s2942_s5 + $0x80] sm:$0xff]  ;;  %v2518_v42 = vld [vmem:[%s2942_s5 + $0x130] sm:$0xff] }
  0x22   : > { %505 = vmatpush.bf16.msra.mxu0 %v2380_v8  ;;  %v2524_v43 = vld [vmem:[%s2942_s5 + $0x128] sm:$0xff]  ;;  %v2530_v44 = vld [vmem:[%s2942_s5 + $0x120] sm:$0xff]  ;;  %v2536_v45 = vld [vmem:[%s2942_s5 + $0x178] sm:$0xff] }
  0x23   : > { %v2542_v46 = vld [vmem:[%s2942_s5 + $0x118] sm:$0xff]  ;;  %v2548_v47 = vld [vmem:[%s2942_s5 + $0x170] sm:$0xff]  ;;  %v2560_v50 = vld [vmem:[%s2942_s5 + $0x168] sm:$0xff] }
  0x24   : > { %v2554_v49 = vld [vmem:[%s2942_s5 + $0x110] sm:$0xff]  ;;  %v2566_v51 = vld [vmem:[%s2942_s5 + $0x108] sm:$0xff]  ;;  %v2572_v52 = vld [vmem:[%s2942_s5 + $0x160] sm:$0xff] }
  0x25   : > { %571 = vmatpush.bf16.msra.mxu1 %v2386_v9  ;;  %v2578_v54 = vld [vmem:[%s2942_s5 + $0x100] sm:$0xff]  ;;  %v2584_v55 = vld [vmem:[%s2942_s5 + $0x158] sm:$0xff]  ;;  %v2591_v56 = vld [vmem:[%s2942_s5 + $0x150] sm:$0xff] }
  0x26   : > { %506 = vmatpush.bf16.msra.mxu0 %v2392_v10  ;;  %2959 = vst [vmem:[#allocation5_spill] sm:$0xff] %v2578_v54  ;;  %v2596_v58 = vld [vmem:[%s2942_s5 + $0xf8] sm:$0xff]  ;;  %v2236_v60 = vld [vmem:[%s2338_s10 + $0x10] sm:$0xff]  ;;  %v2603_v61 = vld [vmem:[%s2942_s5 + $0x148] sm:$0xff] }
  0x27   : > { %v2609_v62 = vld [vmem:[%s2942_s5 + $0xf0] sm:$0xff]  ;;  %v2615_v63 = vld [vmem:[%s2942_s5 + $0x140] sm:$0xff]  ;;  %v2622_v0 = vld [vmem:[%s2942_s5 + $0xe8] sm:$0xff] }
  0x28   : > { %v2630_v1 = vld [vmem:[%s2942_s5 + $0xe0] sm:$0xff]  ;;  %v2636_v2 = vld [vmem:[%s2942_s5 + $0xd8] sm:$0xff] }
  0x29   : > { %572 = vmatpush.bf16.msra.mxu1 %v2398_v11 }
  0x2a   : > { %507 = vmatpush.bf16.msra.mxu0 %v2404_v12 }
  0x2d   : > { %573 = vmatpush.bf16.msra.mxu1 %v2410_v13 }
  0x2e   : > { %508 = vmatpush.bf16.msra.mxu0 %v2416_v14 }
  0x31   : > { %574 = vmatpush.bf16.msra.mxu1 %v2422_v15 }
  0x32   : > { %509 = vmatpush.bf16.msra.mxu0 %v2428_v16 }
  0x35   : > { %575 = vmatpush.bf16.msra.mxu1 %v2433_v17 }
  0x36   : > { %510 = vmatpush.bf16.msra.mxu0 %v2444_v20 }
  0x38   : > { %576 = vmatmul.bf16.vlgmr.msra.gmra.mxu1 %v2448_v21 }
  0x39   : > { %511 = vmatmul.bf16.vlgmr.msra.gmra.mxu0 %v2448_v21  ;;  %859 = vmatpush.bf16.msrb.mxu1 %v2510_v38 }
  0x3a   : > { %949 = vmatpush.bf16.msrb.mxu0 %v2536_v45 }
  0x3d   : > { %860 = vmatpush.bf16.msrb.mxu1 %v2518_v42 }
  0x3e   : > { %950 = vmatpush.bf16.msrb.mxu0 %v2548_v47 }
  0x41   : > { %861 = vmatpush.bf16.msrb.mxu1 %v2524_v43 }
  0x42   : > { %951 = vmatpush.bf16.msrb.mxu0 %v2560_v50 }
  0x45   : > { %862 = vmatpush.bf16.msrb.mxu1 %v2530_v44 }
  0x46   : > { %952 = vmatpush.bf16.msrb.mxu0 %v2572_v52 }
  0x49   : > { %863 = vmatpush.bf16.msrb.mxu1 %v2542_v46 }
  0x4a   : > { %953 = vmatpush.bf16.msrb.mxu0 %v2584_v55 }
  0x4d   : > { %864 = vmatpush.bf16.msrb.mxu1 %v2554_v49 }
  0x4e   : > { %954 = vmatpush.bf16.msrb.mxu0 %v2591_v56 }
  0x51   : > { %865 = vmatpush.bf16.msrb.mxu1 %v2566_v51 }
  0x52   : > { %955 = vmatpush.bf16.msrb.mxu0 %v2603_v61 }
  0x55   : > { %866 = vmatpush.bf16.msrb.mxu1 %v2578_v54  ;;  %v2668_v54 = vld [vmem:[%s2942_s5 + $0x1f8] sm:$0xff] }
  0x56   : > { %956 = vmatpush.bf16.msrb.mxu0 %v2615_v63 }
  0x58   : > { %867 = vmatmul.bf16.vlgmr.msrb.gmra.mxu1 %v2448_v21 }
  0x59   : > { %957 = vmatmul.bf16.vlgmr.msrb.gmra.mxu0 %v2448_v21 }
  0xb5   : > { %v577_v22 = vpop.f32.mrf.mxu1 }
  0xb6   : > { %v512_v23 = vpop.f32.mrf.mxu0 }
  0xbd   : > { %v579_v24 = vpop.f32.mrf.mxu1 }
  0xbe   : > { %v514_v26 = vpop.f32.mrf.mxu0  ;;  %v582_v27 = vpack.c.bf16 %v579_v24, %v577_v22  ;;  %v2642_v22 = vld [vmem:[%s2942_s5 + $0xd0] sm:$0xff]  ;;  %v2654_v24 = vld [vmem:[%s2942_s5 + $0xc0] sm:$0xff] }
  0xbf   : > { %v517_v28 = vpack.c.bf16 %v514_v26, %v512_v23  ;;  %v2648_v23 = vld [vmem:[%s2942_s5 + $0xc8] sm:$0xff] }
  0xc0   : > { %602 = vmatpush.bf16.msra.mxu2 %v582_v27 }
  0xc1   : > { %624 = vmatpush.bf16.msra.mxu3 %v517_v28 }
  0xc3   : > { %1818 = vmatmul.msk.bf16.vlgmr.msra.gmra.mxu2 %vm591_vm0, %v2235_v29 }
  0xc4   : > { %679 = vmatpush.bf16.msrb.mxu2 %v2457_v25  ;;  %1823 = vmatmul.msk.bf16.vlgmr.msra.gmra.mxu3 %vm591_vm0, %v2234_v30  ;;  %v2238_v30 = vld [vmem:[%s2338_s10 + $0x20] sm:$0xff] }
  0xc8   : > { %680 = vmatpush.bf16.msrb.mxu2 %v2465_v31 }
  0xcc   : > { %681 = vmatpush.bf16.msrb.mxu2 %v2473_v32 }
  0xd0   : > { %682 = vmatpush.bf16.msrb.mxu2 %v2479_v33 }
  0xd4   : > { %683 = vmatpush.bf16.msrb.mxu2 %v2485_v34 }
  0xd5   : > { %v868_v26 = vpop.f32.mrf.mxu1 }
  0xd8   : > { %684 = vmatpush.bf16.msrb.mxu2 %v2491_v35 }
  0xdc   : > { %685 = vmatpush.bf16.msrb.mxu2 %v2497_v36 }
  0xdd   : > { %v870_v28 = vpop.f32.mrf.mxu1 }
  0xde   : > { %v873_v29 = vpack.c.bf16 %v870_v28, %v868_v26  ;;  %v2239_v26 = vld [vmem:[%s2338_s10 + $0x28] sm:$0xff] }
  0xe0   : > { %686 = vmatpush.bf16.msrb.mxu2 %v2503_v37 }
  0xe3   : > { %687 = vmatmul.bf16.vlgmr.msrb.gmra.mxu2 %v2448_v21 }
  0xe4   : > { %892 = vmatpush.bf16.msra.mxu2 %v873_v29  ;;  %v2700_v29 = vld [vmem:[%s2942_s5 + $0x1d0] sm:$0xff] }
  0xf3   : > { %1940 = vmatmul.msk.bf16.vlgmr.msra.gmra.mxu2 %vm591_vm0, %v2238_v30  ;;  %v2706_v30 = vld [vmem:[%s2942_s5 + $0x1c8] sm:$0xff] }
  0xf4   : > { %2960 = vst [vmem:[#allocation6_spill] sm:$0xff] %v2706_v30 }
 0x146   : > { %v604_v39 = vpop.f32.mrf.mxu2 }
 0x147   : > { %v626_v40 = vpop.f32.mrf.mxu3 }
 0x148   : > { %v2513_v41 = vadd.f32 %v626_v40, %v604_v39  ;;  %v958_v39 = vpop.f32.mrf.mxu0 }
 0x14e   : > { %v606_v48 = vpop.f32.mrf.mxu2 }
 0x14f   : > { %v628_v27 = vpop.f32.mrf.mxu3 }
 0x166   : > { %v688_v53 = vpop.f32.mrf.mxu2 }
 0x16e   : > { %v690_v57 = vpop.f32.mrf.mxu2 }
 0x16f   : > { %v693_v59 = vpack.c.bf16 %v690_v57, %v688_v53  ;;  %v629_v57 = vadd.f32 %v628_v27, %v606_v48  ;;  %v2682_v48 = vld [vmem:[%s2942_s5 + $0x1e8] sm:$0xff]  ;;  %v2694_v27 = vld [vmem:[%s2942_s5 + $0x1d8] sm:$0xff] }
 0x171   : > { %712 = vmatpush.bf16.msrb.mxu3 %v693_v59  ;;  %v960_v59 = vpop.f32.mrf.mxu0 }
 0x172   : > { %v963_v19 = vpack.c.bf16 %v960_v59, %v958_v39 }
 0x174   : > { %1862 = vmatmul.msk.bf16.vlgmr.msrb.gmra.mxu3 %vm591_vm0, %v2236_v60  ;;  %982 = vmatpush.bf16.msrb.mxu2 %v963_v19  ;;  %v2688_v19 = vld [vmem:[%s2942_s5 + $0x1e0] sm:$0xff] }
 0x175   : > { %769 = vmatpush.bf16.msra.mxu3 %v2596_v58 }
 0x177   : > { %1979 = vmatmul.msk.bf16.vlgmr.msrb.gmra.mxu2 %vm591_vm0, %v2239_v26  ;;  %v2725_v26 = vld [vmem:[%s2942_s5 + $0x1b0] sm:$0xff] }
 0x178   : > { %1129 = vmatpush.bf16.msra.mxu2 %v2668_v54  ;;  %2963 = vst [vmem:[#allocation9_spill] sm:$0xff] %v2725_v26 }
 0x179   : > { %770 = vmatpush.bf16.msra.mxu3 %v2609_v62 }
 0x17d   : > { %771 = vmatpush.bf16.msra.mxu3 %v2622_v0 }
 0x181   : > { %772 = vmatpush.bf16.msra.mxu3 %v2630_v1 }
 0x185   : > { %773 = vmatpush.bf16.msra.mxu3 %v2636_v2 }
 0x189   : > { %774 = vmatpush.bf16.msra.mxu3 %v2642_v22 }
 0x18d   : > { %775 = vmatpush.bf16.msra.mxu3 %v2648_v23 }
 0x191   : > { %776 = vmatpush.bf16.msra.mxu3 %v2654_v24 }
 0x194   : > { %777 = vmatmul.bf16.vlgmr.msra.gmra.mxu3 %v2448_v21 }
 0x1f7   : > { %v714_v40 = vpop.f32.mrf.mxu3 }
 0x1f8   : > { %v2661_v53 = vadd.f32 %v714_v40, %v2513_v41  ;;  %v2675_v41 = vld [vmem:[%s2942_s5 + $0x1f0] sm:$0xff]  ;;  %v2712_v40 = vld [vmem:[%s2942_s5 + $0x1b8] sm:$0xff] }
 0x1f9   : > { %1130 = vmatpush.bf16.msra.mxu2 %v2675_v41  ;;  %2961 = vst [vmem:[#allocation7_spill] sm:$0xff] %v2712_v40 }
 0x1fd   : > { %1131 = vmatpush.bf16.msra.mxu2 %v2682_v48 }
 0x1ff   : > { %v716_v60 = vpop.f32.mrf.mxu3 }
 0x200   : > { %v2663_v18 = vadd.f32 %v716_v60, %v629_v57  ;;  %v2717_v57 = vld [vmem:[%s2942_s5 + $0x1c0] sm:$0xff]  ;;  %v2237_v60 = vld [vmem:[%s2338_s10 + $0x18] sm:$0xff] }
 0x201   : > { %1132 = vmatpush.bf16.msra.mxu2 %v2688_v19  ;;  %2962 = vst [vmem:[#allocation8_spill] sm:$0xff] %v2717_v57 }
 0x205   : > { %1133 = vmatpush.bf16.msra.mxu2 %v2694_v27 }
 0x209   : > { %1134 = vmatpush.bf16.msra.mxu2 %v2700_v29 }
 0x20d   : > { %1135 = vmatpush.bf16.msra.mxu2 %v2706_v30 }
 0x211   : > { %1136 = vmatpush.bf16.msra.mxu2 %v2717_v57 }
 0x214   : > { %1137 = vmatmul.bf16.vlgmr.msra.gmra.mxu2 %v2448_v21 }
 0x215   : > { %1295 = vmatpush.bf16.msrb.mxu2 %v2351_v3  ;;  %v2748_v3 = vld [vmem:[%s2942_s5 + $0x198] sm:$0xff] }
 0x216   : > { %2966 = vst [vmem:[#allocation12_spill] sm:$0xff] %v2748_v3 }
 0x217   : > { %v778_v28 = vpop.f32.mrf.mxu3 }
 0x219   : > { %1296 = vmatpush.bf16.msrb.mxu2 %v2362_v5  ;;  %v2755_v5 = vld [vmem:[%s2942_s5 + $0x190] sm:$0xff] }
 0x21a   : > { %2967 = vst [vmem:[#allocation13_spill] sm:$0xff] %v2755_v5 }
 0x21d   : > { %1297 = vmatpush.bf16.msrb.mxu2 %v2374_v7  ;;  %v2762_v7 = vld [vmem:[%s2942_s5 + $0x188] sm:$0xff] }
 0x21e   : > { %2968 = vst [vmem:[#allocation14_spill] sm:$0xff] %v2762_v7 }
 0x21f   : > { %v780_v39 = vpop.f32.mrf.mxu3 }
 0x220   : > { %v783_v59 = vpack.c.bf16 %v780_v39, %v778_v28  ;;  %v2734_v28 = vld [vmem:[%s2942_s5 + $0x1a8] sm:$0xff]  ;;  %v2741_v39 = vld [vmem:[%s2942_s5 + $0x1a0] sm:$0xff] }
 0x221   : > { %2964 = vst [vmem:[#allocation10_spill] sm:$0xff] %v2734_v28  ;;  %1298 = vmatpush.bf16.msrb.mxu2 %v2386_v9  ;;  %v2769_v9 = vld [vmem:[%s2942_s5 + $0x180] sm:$0xff] }
 0x222   : > { %802 = vmatpush.bf16.msrb.mxu3 %v783_v59  ;;  %2965 = vst [vmem:[#allocation11_spill] sm:$0xff] %v2741_v39 }
 0x223   : > { %2969 = vst [vmem:[#allocation15_spill] sm:$0xff] %v2769_v9 }
 0x225   : > { %1901 = vmatmul.msk.bf16.vlgmr.msrb.gmra.mxu3 %vm591_vm0, %v2237_v60  ;;  %1299 = vmatpush.bf16.msrb.mxu2 %v2398_v11  ;;  %v894_v11 = vpop.f32.mrf.mxu2 }
 0x226   : > { %1039 = vmatpush.bf16.msra.mxu3 %v2712_v40 }
 0x229   : > { %1300 = vmatpush.bf16.msrb.mxu2 %v2410_v13 }
 0x22a   : > { %1040 = vmatpush.bf16.msra.mxu3 %v2725_v26 }
 0x22d   : > { %1301 = vmatpush.bf16.msrb.mxu2 %v2422_v15  ;;  %v896_v59 = vpop.f32.mrf.mxu2 }
 0x22e   : > { %1041 = vmatpush.bf16.msra.mxu3 %v2734_v28 }
 0x231   : > { %1302 = vmatpush.bf16.msrb.mxu2 %v2433_v17  ;;  %v2241_v17 = vld [vmem:[%s2338_s10 + $0x38] sm:$0xff] }
 0x232   : > { %1042 = vmatpush.bf16.msra.mxu3 %v2741_v39 }
 0x235   : > { %v984_v60 = vpop.f32.mrf.mxu2 }
 0x236   : > { %1043 = vmatpush.bf16.msra.mxu3 %v2748_v3 }
 0x23a   : > { %1044 = vmatpush.bf16.msra.mxu3 %v2755_v5 }
 0x23d   : > { %v986_v13 = vpop.f32.mrf.mxu2 }
 0x23e   : > { %1045 = vmatpush.bf16.msra.mxu3 %v2762_v7 }
 0x242   : > { %1046 = vmatpush.bf16.msra.mxu3 %v2769_v9 }
 0x245   : > { %1047 = vmatmul.bf16.vlgmr.msra.gmra.mxu3 %v2448_v21 }
 0x297   : > { %v1138_v7 = vpop.f32.mrf.mxu2 }
 0x29f   : > { %v1140_v40 = vpop.f32.mrf.mxu2 }
 0x2a0   : > { %v1143_v9 = vpack.c.bf16 %v1140_v40, %v1138_v7  ;;  %v1261_v7 = vld [vmem:[%s2328_s28] sm:$0xff] }
 0x2a2   : > { %1162 = vmatpush.bf16.msra.mxu0 %v1143_v9  ;;  %v2281_v9 = vmov 0  }
 0x2a3   : > { %2271 = vset.pattern.permute.xlu0 %v2281_v9  ;;  %2272 = vset.pattern.permute.xlu1 %v2281_v9 }
 0x2a4   : > { %1265 = vperm.xlu0 %2271, %v1261_v7  }
 0x2a5   : > { %2057 = vmatmul.msk.bf16.vlgmr.msra.gmra.mxu0 %vm591_vm0, %v2241_v17 }
 0x2a6   : > { %1278 = vmatpush.bf16.msrb.mxu0 %v2356_v4  ;;  %v2789_v4 = vld [vmem:[%s2942_s5 + $0x238] sm:$0xff] }
 0x2a8   : > { %v804_v5 = vpop.f32.mrf.mxu3 }
 0x2a9   : > { %v809_v3 = vadd.f32 %v804_v5, %v2661_v53 }
 0x2aa   : > { %1279 = vmatpush.bf16.msrb.mxu0 %v2368_v6  ;;  %v2797_v6 = vld [vmem:[%s2942_s5 + $0x230] sm:$0xff] }
 0x2ab   : > { %v899_v39 = vadd.f32 %v894_v11, %v809_v3  ;;  %v1262_v11 = vld [vmem:[%s2328_s28 + $0x8] sm:$0xff] }
 0x2ac   : > { %1270 = vperm.xlu0 %2271, %v1262_v11  }
 0x2ad   : > { %v989_v28 = vadd.f32 %v984_v60, %v899_v39 }
 0x2ae   : > { %1280 = vmatpush.bf16.msrb.mxu0 %v2380_v8  ;;  %v2804_v8 = vld [vmem:[%s2942_s5 + $0x228] sm:$0xff] }
 0x2b0   : > { %v806_v26 = vpop.f32.mrf.mxu3 }
 0x2b1   : > { %v810_v15 = vadd.f32 %v806_v26, %v2663_v18 }
 0x2b2   : > { %1281 = vmatpush.bf16.msrb.mxu0 %v2392_v10  ;;  %v2810_v10 = vld [vmem:[%s2942_s5 + $0x220] sm:$0xff] }
 0x2b3   : > { %v900_v57 = vadd.f32 %v896_v59, %v810_v15  ;;  %v2242_v15 = vld [vmem:[%s2338_s10 + $0x40] sm:$0xff] }
 0x2b5   : > { %v990_v30 = vadd.f32 %v986_v13, %v900_v57  ;;  %v2240_v57 = vld [vmem:[%s2338_s10 + $0x30] sm:$0xff] }
 0x2b6   : > { %1282 = vmatpush.bf16.msrb.mxu0 %v2404_v12  ;;  %v2816_v12 = vld [vmem:[%s2942_s5 + $0x218] sm:$0xff] }
 0x2ba   : > { %1283 = vmatpush.bf16.msrb.mxu0 %v2416_v14  ;;  %v2822_v14 = vld [vmem:[%s2942_s5 + $0x210] sm:$0xff] }
 0x2be   : > { %1284 = vmatpush.bf16.msrb.mxu0 %v2428_v16  ;;  %v2828_v16 = vld [vmem:[%s2942_s5 + $0x208] sm:$0xff] }
 0x2c2   : > { %1285 = vmatpush.bf16.msrb.mxu0 %v2444_v20  ;;  %v2834_v20 = vld [vmem:[%s2942_s5 + $0x200] sm:$0xff] }
 0x2c8   : > { %v1048_v53 = vpop.f32.mrf.mxu3 }
 0x2d0   : > { %v1050_v18 = vpop.f32.mrf.mxu3 }
 0x2d1   : > { %v1053_v40 = vpack.c.bf16 %v1050_v18, %v1048_v53 }
 0x2d3   : > { %1072 = vmatpush.bf16.msra.mxu1 %v1053_v40 }
 0x2d6   : > { %2018 = vmatmul.msk.bf16.vlgmr.msra.gmra.mxu1 %vm591_vm0, %v2240_v57 }
 0x2d7   : > { %1219 = vmatpush.bf16.msrb.mxu1 %v2789_v4 }
 0x2db   : > { %1220 = vmatpush.bf16.msrb.mxu1 %v2797_v6 }
 0x2df   : > { %1221 = vmatpush.bf16.msrb.mxu1 %v2804_v8 }
 0x2e3   : > { %1222 = vmatpush.bf16.msrb.mxu1 %v2810_v10 }
 0x2e7   : > { %1223 = vmatpush.bf16.msrb.mxu1 %v2816_v12 }
 0x2eb   : > { %1224 = vmatpush.bf16.msrb.mxu1 %v2822_v14 }
 0x2ef   : > { %1225 = vmatpush.bf16.msrb.mxu1 %v2828_v16 }
 0x2f3   : > { %1226 = vmatpush.bf16.msrb.mxu1 %v2834_v20 }
 0x2f6   : > { %1227 = vmatmul.bf16.vlgmr.msrb.gmra.mxu1 %v2448_v21 }
 0x316   : > { %v1266_v21 = vpop.permute.xlu0 %1265 }
 0x31e   : > { %v1271_v7 = vpop.permute.xlu0 %1270 }
 0x322   : > { %v1164_v17 = vpop.f32.mrf.mxu0 }
 0x32a   : > { %v1166_v18 = vpop.f32.mrf.mxu0 }
 0x353   : > { %v1074_v26 = vpop.f32.mrf.mxu1 }
 0x354   : > { %v1079_v39 = vadd.f32 %v1074_v26, %v989_v28 }
 0x356   : > { %v1169_v28 = vadd.f32 %v1164_v17, %v1079_v39 }
 0x35b   : > { %v1076_v3 = vpop.f32.mrf.mxu1 }
 0x35c   : > { %v1080_v5 = vadd.f32 %v1076_v3, %v990_v30 }
 0x35e   : > { %v1170_v40 = vadd.f32 %v1166_v18, %v1080_v5  ;;  %v2977_v18 = vld [vmem:[#allocation12_spill] sm:$0xff] }
 0x373   : > { %v1228_v59 = vpop.f32.mrf.mxu1 }
 0x37b   : > { %v1230_v60 = vpop.f32.mrf.mxu1 }
 0x37c   : > { %v1233_v13 = vpack.c.bf16 %v1230_v60, %v1228_v59 }
 0x37e   : > { %1252 = vmatpush.bf16.msrb.mxu3 %v1233_v13 }
 0x381   : > { %2096 = vmatmul.msk.bf16.vlgmr.msrb.gmra.mxu3 %vm591_vm0, %v2242_v15 }
 0x404   : > { %v1254_v53 = vpop.f32.mrf.mxu3 }
 0x405   : > { %v1259_v30 = vadd.f32 %v1254_v53, %v1169_v28  ;;  %v2243_v53 = vld [vmem:[%s2343_s13] sm:$0xff]  ;;  %v2244_v28 = vld [vmem:[%s2343_s13 + $0x8] sm:$0xff] }
 0x407   : > { %v1273_v26 = vadd.f32 %v1266_v21, %v1259_v30 }
 0x409   : > { %v1275_v11 = vmax.f32 %v1273_v26, 0.0 }
 0x40c   : > { %v1256_v57 = vpop.f32.mrf.mxu3 }
 0x40d   : > { %v1260_v3 = vadd.f32 %v1256_v57, %v1170_v40  ;;  %v2978_v40 = vld [vmem:[#allocation13_spill] sm:$0xff]  ;;  %v2979_v57 = vld [vmem:[#allocation14_spill] sm:$0xff] }
 0x40f   : > { %v1274_v9 = vadd.f32 %v1271_v7, %v1260_v3  ;;  %v2980_v7 = vld [vmem:[#allocation15_spill] sm:$0xff] }
 0x411   : > { %v1276_v59 = vmax.f32 %v1274_v9, 0.0 }
 0x413   : > { %v2842_v60 = vpack.c.bf16 %v1276_v59, %v1275_v11 }
 0x415   : > { %1286 = vmatmul.bf16.vlgmr.msrb.gmra.mxu0 %v2842_v60  ;;  %1303 = vmatmul.bf16.vlgmr.msrb.gmra.mxu2 %v2842_v60 }
 0x492   : > { %v1287_v13 = vpop.f32.mrf.mxu0 }
 0x498   : > { %v1304_v39 = vpop.f32.mrf.mxu2 }
 0x49a   : > { %v1289_v15 = vpop.f32.mrf.mxu0 }
 0x49b   : > { %v1292_v17 = vpack.c.bf16 %v1289_v15, %v1287_v13  ;;  %v2250_v13 = vld [vmem:[%s2343_s13 + $0x38] sm:$0xff] }
 0x49d   : > { %1350 = vmatpush.bf16.msra.mxu1 %v1292_v17 }
 0x4a0   : > { %v1306_v5 = vpop.f32.mrf.mxu2  ;;  %2108 = vmatmul.msk.bf16.vlgmr.msra.gmra.mxu1 %vm591_vm0, %v2243_v53 }
 0x4a1   : > { %1399 = vmatpush.bf16.msrb.mxu1 %v2596_v58  ;;  %v1309_v21 = vpack.c.bf16 %v1306_v5, %v1304_v39 }
 0x4a3   : > { %1328 = vmatpush.bf16.msra.mxu3 %v1309_v21 }
 0x4a5   : > { %1400 = vmatpush.bf16.msrb.mxu1 %v2609_v62 }
 0x4a6   : > { %2103 = vmatmul.msk.bf16.vlgmr.msra.gmra.mxu3 %vm591_vm0, %v2244_v28  ;;  %v2249_v28 = vld [vmem:[%s2343_s13 + $0x30] sm:$0xff] }
 0x4a7   : > { %1357 = vmatpush.bf16.msrb.mxu3 %v2457_v25 }
 0x4a9   : > { %1401 = vmatpush.bf16.msrb.mxu1 %v2622_v0  ;;  %v2970_v0 = vld [vmem:[#allocation5_spill] sm:$0xff] }
 0x4ab   : > { %1358 = vmatpush.bf16.msrb.mxu3 %v2465_v31 }
 0x4ad   : > { %1402 = vmatpush.bf16.msrb.mxu1 %v2630_v1 }
 0x4af   : > { %1359 = vmatpush.bf16.msrb.mxu3 %v2473_v32 }
 0x4b1   : > { %1403 = vmatpush.bf16.msrb.mxu1 %v2636_v2 }
 0x4b3   : > { %1360 = vmatpush.bf16.msrb.mxu3 %v2479_v33 }
 0x4b5   : > { %1404 = vmatpush.bf16.msrb.mxu1 %v2642_v22 }
 0x4b7   : > { %1361 = vmatpush.bf16.msrb.mxu3 %v2485_v34 }
 0x4b9   : > { %1405 = vmatpush.bf16.msrb.mxu1 %v2648_v23 }
 0x4bb   : > { %1362 = vmatpush.bf16.msrb.mxu3 %v2491_v35 }
 0x4bd   : > { %1406 = vmatpush.bf16.msrb.mxu1 %v2654_v24  ;;  %v2247_v24 = vld [vmem:[%s2343_s13 + $0x20] sm:$0xff] }
 0x4bf   : > { %1363 = vmatpush.bf16.msrb.mxu3 %v2497_v36 }
 0x4c0   : > { %1407 = vmatmul.bf16.vlgmr.msrb.gmra.mxu1 %v2842_v60 }
 0x4c3   : > { %1364 = vmatpush.bf16.msrb.mxu3 %v2503_v37 }
 0x4c6   : > { %1365 = vmatmul.bf16.vlgmr.msrb.gmra.mxu3 %v2842_v60 }
 0x4c7   : > { %1483 = vmatpush.bf16.msra.mxu3 %v2536_v45 }
 0x4cb   : > { %1484 = vmatpush.bf16.msra.mxu3 %v2548_v47  ;;  %v2246_v47 = vld [vmem:[%s2343_s13 + $0x18] sm:$0xff] }
 0x4cf   : > { %1485 = vmatpush.bf16.msra.mxu3 %v2560_v50 }
 0x4d3   : > { %1486 = vmatpush.bf16.msra.mxu3 %v2572_v52 }
 0x4d7   : > { %1487 = vmatpush.bf16.msra.mxu3 %v2584_v55 }
 0x4db   : > { %1488 = vmatpush.bf16.msra.mxu3 %v2591_v56  ;;  %v2245_v56 = vld [vmem:[%s2343_s13 + $0x10] sm:$0xff] }
 0x4df   : > { %1489 = vmatpush.bf16.msra.mxu3 %v2603_v61 }
 0x4e3   : > { %1490 = vmatpush.bf16.msra.mxu3 %v2615_v63  ;;  %v2248_v63 = vld [vmem:[%s2343_s13 + $0x28] sm:$0xff] }
 0x4e6   : > { %1491 = vmatmul.bf16.vlgmr.msra.gmra.mxu3 %v2842_v60 }
 0x51d   : > { %v1352_v25 = vpop.f32.mrf.mxu1 }
 0x525   : > { %v1354_v33 = vpop.f32.mrf.mxu1 }
 0x529   : > { %v1330_v31 = vpop.f32.mrf.mxu3 }
 0x52a   : > { %v1353_v32 = vadd.f32 %v1352_v25, %v1330_v31 }
 0x531   : > { %v1332_v34 = vpop.f32.mrf.mxu3 }
 0x532   : > { %v1355_v35 = vadd.f32 %v1354_v33, %v1332_v34 }
 0x53d   : > { %v1408_v36 = vpop.f32.mrf.mxu1 }
 0x545   : > { %v1410_v37 = vpop.f32.mrf.mxu1 }
 0x546   : > { %v1413_v45 = vpack.c.bf16 %v1410_v37, %v1408_v36 }
 0x548   : > { %1432 = vmatpush.bf16.msra.mxu2 %v1413_v45 }
 0x549   : > { %v1366_v50 = vpop.f32.mrf.mxu3 }
 0x54b   : > { %2122 = vmatmul.msk.bf16.vlgmr.msra.gmra.mxu2 %vm591_vm0, %v2246_v47 }
 0x551   : > { %v1368_v52 = vpop.f32.mrf.mxu3 }
 0x552   : > { %v1371_v55 = vpack.c.bf16 %v1368_v52, %v1366_v50  ;;  %v2981_v50 = vld [vmem:[#allocation3_spill] sm:$0xff] }
 0x554   : > { %1390 = vmatpush.bf16.msra.mxu0 %v1371_v55 }
 0x557   : > { %2115 = vmatmul.msk.bf16.vlgmr.msra.gmra.mxu0 %vm591_vm0, %v2245_v56 }
 0x558   : > { %1441 = vmatpush.bf16.msrb.mxu0 %v2510_v38  ;;  %v2971_v38 = vld [vmem:[#allocation6_spill] sm:$0xff] }
 0x55c   : > { %1442 = vmatpush.bf16.msrb.mxu0 %v2518_v42  ;;  %v2972_v42 = vld [vmem:[#allocation8_spill] sm:$0xff] }
 0x560   : > { %1443 = vmatpush.bf16.msrb.mxu0 %v2524_v43 }
 0x564   : > { %1444 = vmatpush.bf16.msrb.mxu0 %v2530_v44 }
 0x568   : > { %1445 = vmatpush.bf16.msrb.mxu0 %v2542_v46 }
 0x569   : > { %v1492_v58 = vpop.f32.mrf.mxu3 }
 0x56c   : > { %1446 = vmatpush.bf16.msrb.mxu0 %v2554_v49 }
 0x570   : > { %1447 = vmatpush.bf16.msrb.mxu0 %v2566_v51 }
 0x571   : > { %v1494_v61 = vpop.f32.mrf.mxu3 }
 0x572   : > { %v1497_v62 = vpack.c.bf16 %v1494_v61, %v1492_v58 }
 0x574   : > { %1448 = vmatpush.bf16.msrb.mxu0 %v2970_v0  ;;  %1516 = vmatpush.bf16.msra.mxu1 %v1497_v62 }
 0x577   : > { %1449 = vmatmul.bf16.vlgmr.msrb.gmra.mxu0 %v2842_v60  ;;  %2136 = vmatmul.msk.bf16.vlgmr.msra.gmra.mxu1 %vm591_vm0, %v2248_v63  ;;  %v2982_v63 = vld [vmem:[#allocation4_spill] sm:$0xff] }
 0x578   : > { %1567 = vmatpush.bf16.msrb.mxu1 %v2668_v54 }
 0x57c   : > { %1568 = vmatpush.bf16.msrb.mxu1 %v2675_v41  ;;  %v2973_v41 = vld [vmem:[#allocation7_spill] sm:$0xff] }
 0x580   : > { %1569 = vmatpush.bf16.msrb.mxu1 %v2682_v48  ;;  %v2974_v48 = vld [vmem:[#allocation9_spill] sm:$0xff] }
 0x584   : > { %1570 = vmatpush.bf16.msrb.mxu1 %v2688_v19 }
 0x588   : > { %1571 = vmatpush.bf16.msrb.mxu1 %v2694_v27  ;;  %v2975_v27 = vld [vmem:[#allocation10_spill] sm:$0xff] }
 0x58c   : > { %1572 = vmatpush.bf16.msrb.mxu1 %v2700_v29  ;;  %v2976_v29 = vld [vmem:[#allocation11_spill] sm:$0xff] }
 0x590   : > { %1573 = vmatpush.bf16.msrb.mxu1 %v2971_v38 }
 0x594   : > { %1574 = vmatpush.bf16.msrb.mxu1 %v2972_v42 }
 0x597   : > { %1575 = vmatmul.bf16.vlgmr.msrb.gmra.mxu1 %v2842_v60 }
 0x5ce   : > { %v1434_v44 = vpop.f32.mrf.mxu2 }
 0x5d4   : > { %v1392_v43 = vpop.f32.mrf.mxu0 }
 0x5d5   : > { %v1397_v46 = vadd.f32 %v1392_v43, %v1353_v32 }
 0x5d6   : > { %v1436_v9 = vpop.f32.mrf.mxu2 }
 0x5d7   : > { %v1439_v49 = vadd.f32 %v1434_v44, %v1397_v46 }
 0x5dc   : > { %v1394_v51 = vpop.f32.mrf.mxu0 }
 0x5dd   : > { %v1398_v54 = vadd.f32 %v1394_v51, %v1355_v35  ;;  %v2251_v35 = vld [vmem:[%s2343_s13 + $0x40] sm:$0xff] }
 0x5df   : > { %v1440_v39 = vadd.f32 %v1436_v9, %v1398_v54 }
 0x5f4   : > { %v1450_v1 = vpop.f32.mrf.mxu0  ;;  %v1518_v23 = vpop.f32.mrf.mxu1 }
 0x5fc   : > { %v1452_v2 = vpop.f32.mrf.mxu0  ;;  %v1520_v19 = vpop.f32.mrf.mxu1 }
 0x5fd   : > { %v1455_v22 = vpack.c.bf16 %v1452_v2, %v1450_v1 }
 0x5ff   : > { %1474 = vmatpush.bf16.msrb.mxu2 %v1455_v22 }
 0x602   : > { %2129 = vmatmul.msk.bf16.vlgmr.msrb.gmra.mxu2 %vm591_vm0, %v2247_v24 }
 0x603   : > { %1525 = vmatpush.bf16.msra.mxu2 %v2973_v41 }
 0x607   : > { %1526 = vmatpush.bf16.msra.mxu2 %v2974_v48 }
 0x60b   : > { %1527 = vmatpush.bf16.msra.mxu2 %v2975_v27 }
 0x60f   : > { %1528 = vmatpush.bf16.msra.mxu2 %v2976_v29 }
 0x613   : > { %1529 = vmatpush.bf16.msra.mxu2 %v2977_v18 }
 0x614   : > { %v1576_v30 = vpop.f32.mrf.mxu1 }
 0x617   : > { %1530 = vmatpush.bf16.msra.mxu2 %v2978_v40 }
 0x61b   : > { %1531 = vmatpush.bf16.msra.mxu2 %v2979_v57 }
 0x61c   : > { %v1578_v26 = vpop.f32.mrf.mxu1 }
 0x61d   : > { %v1581_v3 = vpack.c.bf16 %v1578_v26, %v1576_v30 }
 0x61f   : > { %1532 = vmatpush.bf16.msra.mxu2 %v2980_v7  ;;  %1600 = vmatpush.bf16.msrb.mxu3 %v1581_v3 }
 0x622   : > { %1533 = vmatmul.bf16.vlgmr.msra.gmra.mxu2 %v2842_v60  ;;  %2150 = vmatmul.msk.bf16.vlgmr.msrb.gmra.mxu3 %vm591_vm0, %v2250_v13 }
 0x685   : > { %v1476_v11 = vpop.f32.mrf.mxu2 }
 0x686   : > { %v1481_v59 = vadd.f32 %v1476_v11, %v1439_v49 }
 0x68d   : > { %v1478_v15 = vpop.f32.mrf.mxu2 }
 0x68e   : > { %v1482_v17 = vadd.f32 %v1478_v15, %v1440_v39 }
 0x6a5   : > { %v1534_v53 = vpop.f32.mrf.mxu2 }
 0x6ad   : > { %v1536_v5 = vpop.f32.mrf.mxu2 }
 0x6ae   : > { %v1539_v21 = vpack.c.bf16 %v1536_v5, %v1534_v53 }
 0x6b0   : > { %1558 = vmatpush.bf16.msra.mxu0 %v1539_v21 }
 0x6b3   : > { %2143 = vmatmul.msk.bf16.vlgmr.msra.gmra.mxu0 %vm591_vm0, %v2249_v28 }
 0x6b4   : > { %1609 = vmatpush.bf16.msrb.mxu0 %v2789_v4  ;;  %v1523_v4 = vadd.f32 %v1518_v23, %v1481_v59 }
 0x6b8   : > { %1610 = vmatpush.bf16.msrb.mxu0 %v2797_v6  ;;  %v1524_v6 = vadd.f32 %v1520_v19, %v1482_v17 }
 0x6bc   : > { %1611 = vmatpush.bf16.msrb.mxu0 %v2804_v8  ;;  %v1651_v8 = vld [vmem:[%s2333_s7] sm:$0xff] }
 0x6bd   : > { %1655 = vperm.xlu1 %2272, %v1651_v8  }
 0x6c0   : > { %1612 = vmatpush.bf16.msrb.mxu0 %v2810_v10  ;;  %v1652_v10 = vld [vmem:[%s2333_s7 + $0x8] sm:$0xff] }
 0x6c4   : > { %1613 = vmatpush.bf16.msrb.mxu0 %v2816_v12 }
 0x6c5   : > { %1660 = vperm.xlu1 %2272, %v1652_v10  }
 0x6c8   : > { %1614 = vmatpush.bf16.msrb.mxu0 %v2822_v14 }
 0x6cc   : > { %1615 = vmatpush.bf16.msrb.mxu0 %v2828_v16  ;;  %v1602_v16 = vpop.f32.mrf.mxu3 }
 0x6d0   : > { %1616 = vmatpush.bf16.msrb.mxu0 %v2834_v20 }
 0x6d3   : > { %1617 = vmatmul.bf16.vlgmr.msrb.gmra.mxu0 %v2842_v60 }
 0x6d4   : > { %v1604_v47 = vpop.f32.mrf.mxu3 }
 0x72f   : > { %v1656_v36 = vpop.permute.xlu1 %1655 }
 0x730   : > { %v1560_v25 = vpop.f32.mrf.mxu0 }
 0x731   : > { %v1565_v31 = vadd.f32 %v1560_v25, %v1523_v4 }
 0x733   : > { %v1607_v20 = vadd.f32 %v1602_v16, %v1565_v31 }
 0x737   : > { %v1661_v61 = vpop.permute.xlu1 %1660 }
 0x738   : > { %v1562_v32 = vpop.f32.mrf.mxu0 }
 0x739   : > { %v1566_v33 = vadd.f32 %v1562_v32, %v1524_v6 }
 0x73b   : > { %v1608_v55 = vadd.f32 %v1604_v47, %v1566_v33 }
 0x750   : > { %v1618_v12 = vpop.f32.mrf.mxu0 }
 0x758   : > { %v1620_v34 = vpop.f32.mrf.mxu0 }
 0x759   : > { %v1623_v14 = vpack.c.bf16 %v1620_v34, %v1618_v12 }
 0x75b   : > { %1642 = vmatpush.bf16.msrb.mxu2 %v1623_v14 }
 0x75e   : > { %2157 = vmatmul.msk.bf16.vlgmr.msrb.gmra.mxu2 %vm591_vm0, %v2251_v35 }
 0x7e1   : > { %v1644_v60 = vpop.f32.mrf.mxu2 }
 0x7e2   : > { %v1649_v37 = vadd.f32 %v1644_v60, %v1607_v20 }
 0x7e4   : > { %v1663_v45 = vadd.f32 %v1656_v36, %v1649_v37 }
 0x7e6   : > { %v1665_v52 = vadd.f32 %v1663_v45, %v2981_v50 }
 0x7e8   : > { %1667 = vst [vmem:[#allocation2] sm:$0xff] %v1665_v52 }
 0x7e9   : > { %v1646_v56 = vpop.f32.mrf.mxu2 }
 0x7ea   : > { %v1650_v58 = vadd.f32 %v1646_v56, %v1608_v55 }
 0x7ec   : > { %v1664_v62 = vadd.f32 %v1661_v61, %v1650_v58 }
 0x7ee   : > { %v1666_v0 = vadd.f32 %v1664_v62, %v2982_v63 }
 0x7f0   : > { %1668 = vst [vmem:[#allocation2 + $0x8] sm:$0xff] %v1666_v0  ;;  %v2259_v38 = vpack.c.bf16 %v1666_v0, %v1665_v52 }
 0x7f2   : > { %2260 = vst [vmem:[%s2943_s6] sm:$0xff] %v2259_v38  }
 0x7f3 PF: > { %s16_s21 = sadd.s32 1, %s2279_s21  }
 0x7f4   : > { %p13_p5 = scmp.ge.s32.totalorder %s16_s21, 8  }
 0x7f6   :  { %15 = sbr.rel (!%p13_p5) target bundleno = 1 (0x1), region = 99 }

// kernel: _lambda_.28
= control target key start
LH: loop header
LB: loop body
LE: loop exit
PB: predicated region body
PF: predicated region fallthrough
CT: control target
= control target key end

     0   :  { %v1140_v9 = vmov 0   ;;  %vm575_vm0 = vcmask 130048   ;;  %s1508_s1 = inlined_call_operand.vmem [shape: bf16[784,128], index: 1, kind: input, shape index: {}]   ;;  %s1509_s2 = inlined_call_operand.vmem [shape: f32[48,1], index: 2, kind: input, shape index: {}]   ;;  %s1510_s0 = inlined_call_operand.vmem [shape: bf16[48,784], index: 0, kind: input, shape index: {}]   ;;  %s1511_s3 = inlined_call_operand.vmem [shape: f32[48,128], index: 3, kind: input, shape index: {}]   ;;  %s1512_s4 = inlined_call_operand.vmem [shape: f32[48,128], index: 4, kind: output, shape index: {}]  }
   0x1   :  { %v1086_v0 = vld [vmem:[%s1508_s1 + $0x38] sm:$0xff]  ;;  %v1085_v3 = vld [vmem:[%s1508_s1 + $0x30] sm:$0xff]  ;;  %v1084_v6 = vld [vmem:[%s1508_s1 + $0x28] sm:$0xff]  ;;  %1137 = vset.pattern.permute.xlu0 %v1140_v9  ;;  %1138 = vset.pattern.permute.xlu1 %v1140_v9 }
   0x2   :  { %v1094_v1 = vld [vmem:[%s1508_s1 + $0x78] sm:$0xff]  ;;  %585 = vmatpush.bf16.msra.mxu0 %v1086_v0  ;;  %1128 = vmatpush.bf16.msra.mxu3 %v1086_v0  ;;  %v1093_v4 = vld [vmem:[%s1508_s1 + $0x70] sm:$0xff]  ;;  %v1092_v7 = vld [vmem:[%s1508_s1 + $0x68] sm:$0xff] }
   0x3   :  { %v1102_v2 = vld [vmem:[%s1508_s1 + $0xb8] sm:$0xff]  ;;  %609 = vmatpush.bf16.msra.mxu1 %v1094_v1  ;;  %v1101_v5 = vld [vmem:[%s1508_s1 + $0xb0] sm:$0xff]  ;;  %v1100_v8 = vld [vmem:[%s1508_s1 + $0xa8] sm:$0xff]  ;;  %1139 = vset.pattern.permute.xlu2 %v1140_v9 }
   0x4   :  { %633 = vmatpush.bf16.msra.mxu2 %v1102_v2  ;;  %v1083_v10 = vld [vmem:[%s1508_s1 + $0x20] sm:$0xff]  ;;  %v1082_v14 = vld [vmem:[%s1508_s1 + $0x18] sm:$0xff]  ;;  %v1081_v17 = vld [vmem:[%s1508_s1 + $0x10] sm:$0xff] }
   0x5   :  { %v1091_v11 = vld [vmem:[%s1508_s1 + $0x60] sm:$0xff]  ;;  %v1090_v15 = vld [vmem:[%s1508_s1 + $0x58] sm:$0xff]  ;;  %v1089_v18 = vld [vmem:[%s1508_s1 + $0x50] sm:$0xff] }
   0x6   :  { %586 = vmatpush.bf16.msra.mxu0 %v1085_v3  ;;  %1129 = vmatpush.bf16.msra.mxu3 %v1085_v3  ;;  %v1099_v12 = vld [vmem:[%s1508_s1 + $0xa0] sm:$0xff]  ;;  %v1098_v16 = vld [vmem:[%s1508_s1 + $0x98] sm:$0xff]  ;;  %v1097_v19 = vld [vmem:[%s1508_s1 + $0x90] sm:$0xff] }
   0x7   :  { %610 = vmatpush.bf16.msra.mxu1 %v1093_v4  ;;  %v140_v13 = vld [vmem:[%s1509_s2] sm:$0xff]  ;;  %v141_v20 = vld [vmem:[%s1509_s2 + $0x8] sm:$0xff]  ;;  %v1110_v28 = vld [vmem:[%s1508_s1 + $0xf8] sm:$0xff] }
   0x8   :  { %634 = vmatpush.bf16.msra.mxu2 %v1101_v5  ;;  %148 = vperm.xlu0 %1137, %v140_v13   ;;  %v1080_v21 = vld [vmem:[%s1508_s1 + $0x8] sm:$0xff]  ;;  %v1079_v24 = vld [vmem:[%s1508_s1] sm:$0xff]  ;;  %v1061_v29 = vld [vmem:[%s1510_s0 + $0x18] sm:$0xf0] }
   0x9   :  { %v1088_v22 = vld [vmem:[%s1508_s1 + $0x48] sm:$0xff]  ;;  %v1087_v25 = vld [vmem:[%s1508_s1 + $0x40] sm:$0xff]  ;;  %v833_v35 = vld [vmem:[%s1510_s0 + $0x70] sm:$0xf] }
   0xa   :  { %587 = vmatpush.bf16.msra.mxu0 %v1084_v6  ;;  %1130 = vmatpush.bf16.msra.mxu3 %v1084_v6  ;;  %v1096_v23 = vld [vmem:[%s1508_s1 + $0x88] sm:$0xff]  ;;  %v1095_v26 = vld [vmem:[%s1508_s1 + $0x80] sm:$0xff]  ;;  %v142_v37 = vld [vmem:[%s1509_s2 + $0x10] sm:$0xff] }
   0xb   :  { %611 = vmatpush.bf16.msra.mxu1 %v1092_v7  ;;  %v777_v27 = vld [vmem:[%s1510_s0] sm:$0xf]  ;;  %v1058_v30 = vld [vmem:[%s1510_s0 + $0x4] sm:$0xf]  ;;  %v785_v32 = vld [vmem:[%s1510_s0 + $0x8] sm:$0xf]  ;;  %158 = vperm.xlu1 %1138, %v142_v37  }
   0xc   :  { %635 = vmatpush.bf16.msra.mxu2 %v1100_v8  ;;  %v779_v31 = vld [vmem:[%s1510_s0 + $0x1c] sm:$0xf0]  ;;  %v1062_v33 = vld [vmem:[%s1510_s0 + $0x20] sm:$0xf0]  ;;  %v1075_v36 = vld [vmem:[%s1510_s0 + $0x88] sm:$0xf0]  ;;  %v778_v38 = vor.u32 %v1061_v29, %v777_v27 }
   0xd   :  { %v1127_v34 = vld [vmem:[%s1508_s1 + $0x180] sm:$0xff]  ;;  %v1126_v39 = vld [vmem:[%s1508_s1 + $0x178] sm:$0xff]  ;;  %v782_v40 = vor.u32 %v1058_v30, %v779_v31  ;;  %v786_v41 = vor.u32 %v1062_v33, %v785_v32  ;;  %v834_v43 = vor.u32 %v1075_v36, %v833_v35  ;;  %v1109_v44 = vld [vmem:[%s1508_s1 + $0xf0] sm:$0xff] }
   0xe   :  { %588 = vmatpush.bf16.msra.mxu0 %v1083_v10  ;;  %1131 = vmatpush.bf16.msra.mxu3 %v1083_v10  ;;  %v1118_v42 = vld [vmem:[%s1508_s1 + $0x138] sm:$0xff]  ;;  %v1125_v45 = vld [vmem:[%s1508_s1 + $0x170] sm:$0xff]  ;;  %v1108_v48 = vld [vmem:[%s1508_s1 + $0xe8] sm:$0xff] }
   0xf   :  { %612 = vmatpush.bf16.msra.mxu1 %v1091_v11  ;;  %v143_v46 = vld [vmem:[%s1509_s2 + $0x18] sm:$0xff]  ;;  %v1117_v47 = vld [vmem:[%s1508_s1 + $0x130] sm:$0xff]  ;;  %v1124_v49 = vld [vmem:[%s1508_s1 + $0x168] sm:$0xff] }
  0x10   :  { %636 = vmatpush.bf16.msra.mxu2 %v1099_v12  ;;  %153 = vperm.xlu0 %1137, %v141_v20   ;;  %v1116_v50 = vld [vmem:[%s1508_s1 + $0x128] sm:$0xff]  ;;  %v1107_v51 = vld [vmem:[%s1508_s1 + $0xe0] sm:$0xff]  ;;  %v805_v52 = vld [vmem:[%s1510_s0 + $0x38] sm:$0xf] }
  0x11   :  { %v1123_v53 = vld [vmem:[%s1508_s1 + $0x160] sm:$0xff]  ;;  %v1068_v54 = vld [vmem:[%s1510_s0 + $0x50] sm:$0xf0]  ;;  %v1065_v55 = vld [vmem:[%s1510_s0 + $0x3c] sm:$0xf] }
  0x12   :  { %589 = vmatpush.bf16.msra.mxu0 %v1082_v14  ;;  %1132 = vmatpush.bf16.msra.mxu3 %v1082_v14  ;;  %v807_v56 = vld [vmem:[%s1510_s0 + $0x54] sm:$0xf0]  ;;  %v813_v57 = vld [vmem:[%s1510_s0 + $0x40] sm:$0xf]  ;;  %v1069_v58 = vld [vmem:[%s1510_s0 + $0x58] sm:$0xf0]  ;;  %v806_v61 = vor.u32 %v1068_v54, %v805_v52 }
  0x13   :  { %613 = vmatpush.bf16.msra.mxu1 %v1090_v15  ;;  %163 = vperm.xlu1 %1138, %v143_v46   ;;  %v1115_v59 = vld [vmem:[%s1508_s1 + $0x120] sm:$0xff]  ;;  %v1106_v60 = vld [vmem:[%s1508_s1 + $0xd8] sm:$0xff]  ;;  %v810_v63 = vor.u32 %v1065_v55, %v807_v56  ;;  %v814_v0 = vor.u32 %v1069_v58, %v813_v57  ;;  %v1105_v2 = vld [vmem:[%s1508_s1 + $0xd0] sm:$0xff] }
  0x14   :  { %637 = vmatpush.bf16.msra.mxu2 %v1098_v16  ;;  %v1122_v62 = vld [vmem:[%s1508_s1 + $0x158] sm:$0xff]  ;;  %v1121_v3 = vld [vmem:[%s1508_s1 + $0x150] sm:$0xff]  ;;  %v144_v5 = vld [vmem:[%s1509_s2 + $0x20] sm:$0xff] }
  0x15   :  { %v1114_v1 = vld [vmem:[%s1508_s1 + $0x118] sm:$0xff]  ;;  %v1113_v4 = vld [vmem:[%s1508_s1 + $0x110] sm:$0xff]  ;;  %v1104_v6 = vld [vmem:[%s1508_s1 + $0xc8] sm:$0xff]  ;;  %168 = vperm.xlu2 %1139, %v144_v5  }
  0x16   :  { %590 = vmatpush.bf16.msra.mxu0 %v1081_v17  ;;  %1133 = vmatpush.bf16.msra.mxu3 %v1081_v17  ;;  %v1120_v7 = vld [vmem:[%s1508_s1 + $0x148] sm:$0xff]  ;;  %v1103_v9 = vld [vmem:[%s1508_s1 + $0xc0] sm:$0xff]  ;;  %v1072_v13 = vld [vmem:[%s1510_s0 + $0x74] sm:$0xf] }
  0x17   :  { %614 = vmatpush.bf16.msra.mxu1 %v1089_v18  ;;  %v1112_v8 = vld [vmem:[%s1508_s1 + $0x108] sm:$0xff]  ;;  %v1119_v12 = vld [vmem:[%s1508_s1 + $0x140] sm:$0xff]  ;;  %v835_v14 = vld [vmem:[%s1510_s0 + $0x8c] sm:$0xf0] }
  0x18   :  { %638 = vmatpush.bf16.msra.mxu2 %v1097_v19  ;;  %v1059_v10 = vld [vmem:[%s1510_s0 + $0xc] sm:$0xf]  ;;  %v787_v11 = vld [vmem:[%s1510_s0 + $0x24] sm:$0xf0]  ;;  %v841_v16 = vld [vmem:[%s1510_s0 + $0x78] sm:$0xf] }
  0x19   :  { %v790_v15 = vor.u32 %v1059_v10, %v787_v11  ;;  %v1076_v17 = vld [vmem:[%s1510_s0 + $0x90] sm:$0xf0]  ;;  %v1111_v18 = vld [vmem:[%s1508_s1 + $0x100] sm:$0xff]  ;;  %v793_v19 = vld [vmem:[%s1510_s0 + $0x10] sm:$0xf] }
  0x1a   :  { %591 = vmatpush.bf16.msra.mxu0 %v1080_v21  ;;  %1134 = vmatpush.bf16.msra.mxu3 %v1080_v21  ;;  %v1063_v20 = vld [vmem:[%s1510_s0 + $0x28] sm:$0xf0]  ;;  %v838_v21 = vor.u32 %v1072_v13, %v835_v14  ;;  %v1060_v27 = vld [vmem:[%s1510_s0 + $0x14] sm:$0xf]  ;;  %v795_v29 = vld [vmem:[%s1510_s0 + $0x2c] sm:$0xf0] }
  0x1b   :  { %615 = vmatpush.bf16.msra.mxu1 %v1088_v22  ;;  %v842_v22 = vor.u32 %v1076_v17, %v841_v16  ;;  %v801_v30 = vld [vmem:[%s1510_s0 + $0x18] sm:$0xf]  ;;  %v1064_v31 = vld [vmem:[%s1510_s0 + $0x30] sm:$0xf0]  ;;  %v821_v32 = vld [vmem:[%s1510_s0 + $0x48] sm:$0xf] }
  0x1c   :  { %639 = vmatpush.bf16.msra.mxu2 %v1096_v23  ;;  %v794_v23 = vor.u32 %v1063_v20, %v793_v19  ;;  %v1070_v33 = vld [vmem:[%s1510_s0 + $0x60] sm:$0xf0]  ;;  %v802_v35 = vor.u32 %v1064_v31, %v801_v30  ;;  %v1073_v37 = vld [vmem:[%s1510_s0 + $0x7c] sm:$0xf] }
  0x1d   :  { %v822_v36 = vor.u32 %v1070_v33, %v821_v32  ;;  %v1078_v52 = vld [vmem:[%s1510_s0 + $0xa0] sm:$0xf0] }
  0x1e   :  { %592 = vmatpush.bf16.msra.mxu0 %v1079_v24  ;;  %1135 = vmatpush.bf16.msra.mxu3 %v1079_v24  ;;  %v145_v24 = vld [vmem:[%s1509_s2 + $0x28] sm:$0xff] }
  0x1f   :  { %616 = vmatpush.bf16.msra.mxu1 %v1087_v25  ;;  %173 = vperm.xlu2 %1139, %v145_v24   ;;  %v1066_v25 = vld [vmem:[%s1510_s0 + $0x44] sm:$0xf] }
  0x20   :  { %640 = vmatpush.bf16.msra.mxu2 %v1095_v26  ;;  %v815_v26 = vld [vmem:[%s1510_s0 + $0x5c] sm:$0xf0] }
  0x21   :  { %593 = vmatmul.bf16.vlgmr.msra.gmra.mxu0 %v778_v38  ;;  %603 = vmatmul.bf16.vlgmr.msra.gmra.mxu3 %v834_v43  ;;  %v843_v38 = vld [vmem:[%s1510_s0 + $0x94] sm:$0xf0]  ;;  %v1071_v43 = vld [vmem:[%s1510_s0 + $0x68] sm:$0xf0] }
  0x22   :  { %657 = vmatpush.bf16.msrb.mxu3 %v1110_v28  ;;  %617 = vmatmul.bf16.vlgmr.msra.gmra.mxu1 %v782_v40  ;;  %v818_v28 = vor.u32 %v1066_v25, %v815_v26  ;;  %v846_v40 = vor.u32 %v1073_v37, %v843_v38 }
  0x23   :  { %705 = vmatpush.bf16.msrb.mxu1 %v1126_v39  ;;  %641 = vmatmul.bf16.vlgmr.msra.gmra.mxu2 %v786_v41  ;;  %v1067_v39 = vld [vmem:[%s1510_s0 + $0x4c] sm:$0xf]  ;;  %v823_v41 = vld [vmem:[%s1510_s0 + $0x64] sm:$0xf0] }
  0x24   :  { %736 = vmatpush.bf16.msrb.mxu2 %v1127_v34  ;;  %681 = vmatpush.bf16.msrb.mxu0 %v1118_v42  ;;  %v798_v34 = vor.u32 %v1060_v27, %v795_v29  ;;  %v829_v42 = vld [vmem:[%s1510_s0 + $0x50] sm:$0xf]  ;;  %v826_v46 = vor.u32 %v1067_v39, %v823_v41  ;;  %v753_v29 = vld [vmem:[%s1511_s3] sm:$0xff]  ;;  %v754_v41 = vld [vmem:[%s1511_s3 + $0x8] sm:$0xff] }
  0x26   :  { %658 = vmatpush.bf16.msrb.mxu3 %v1109_v44  ;;  %v849_v44 = vld [vmem:[%s1510_s0 + $0x80] sm:$0xf] }
  0x27   :  { %706 = vmatpush.bf16.msrb.mxu1 %v1125_v45  ;;  %v1077_v45 = vld [vmem:[%s1510_s0 + $0x98] sm:$0xf0] }
  0x28   :  { %682 = vmatpush.bf16.msrb.mxu0 %v1117_v47  ;;  %v830_v47 = vor.u32 %v1071_v43, %v829_v42 }
  0x2a   :  { %659 = vmatpush.bf16.msrb.mxu3 %v1108_v48  ;;  %v850_v48 = vor.u32 %v1077_v45, %v849_v44 }
  0x2b   :  { %707 = vmatpush.bf16.msrb.mxu1 %v1124_v49  ;;  %v1074_v49 = vld [vmem:[%s1510_s0 + $0x84] sm:$0xf] }
  0x2c   :  { %683 = vmatpush.bf16.msrb.mxu0 %v1116_v50  ;;  %v851_v50 = vld [vmem:[%s1510_s0 + $0x9c] sm:$0xf0] }
  0x2e   :  { %660 = vmatpush.bf16.msrb.mxu3 %v1107_v51  ;;  %v857_v51 = vld [vmem:[%s1510_s0 + $0x88] sm:$0xf] }
  0x2f   :  { %708 = vmatpush.bf16.msrb.mxu1 %v1123_v53  ;;  %v854_v53 = vor.u32 %v1074_v49, %v851_v50  ;;  %v858_v54 = vor.u32 %v1078_v52, %v857_v51 }
  0x30   :  { %684 = vmatpush.bf16.msrb.mxu0 %v1115_v59 }
  0x31   :  { %598 = vmatmul.bf16.gmra.mxu0 %v806_v61 }
  0x32   :  { %661 = vmatpush.bf16.msrb.mxu3 %v1106_v60  ;;  %622 = vmatmul.bf16.gmra.mxu1 %v810_v63 }
  0x33   :  { %709 = vmatpush.bf16.msrb.mxu1 %v1122_v62  ;;  %646 = vmatmul.bf16.gmra.mxu2 %v814_v0 }
  0x34   :  { %685 = vmatpush.bf16.msrb.mxu0 %v1114_v1 }
  0x36   :  { %662 = vmatpush.bf16.msrb.mxu3 %v1105_v2 }
  0x37   :  { %710 = vmatpush.bf16.msrb.mxu1 %v1121_v3 }
  0x38   :  { %686 = vmatpush.bf16.msrb.mxu0 %v1113_v4 }
  0x3a   :  { %663 = vmatpush.bf16.msrb.mxu3 %v1104_v6 }
  0x3b   :  { %711 = vmatpush.bf16.msrb.mxu1 %v1120_v7 }
  0x3c   :  { %687 = vmatpush.bf16.msrb.mxu0 %v1112_v8 }
  0x3e   :  { %664 = vmatpush.bf16.msrb.mxu3 %v1103_v9 }
  0x3f   :  { %712 = vmatpush.bf16.msrb.mxu1 %v1119_v12 }
  0x40   :  { %688 = vmatpush.bf16.msrb.mxu0 %v1111_v18 }
  0x41   :  { %665 = vmatmul.bf16.vlgmr.msrb.gmra.mxu3 %v790_v15 }
  0x42   :  { %627 = vmatmul.bf16.gmra.mxu1 %v838_v21 }
  0x43   :  { %651 = vmatmul.bf16.gmra.mxu2 %v842_v22  ;;  %689 = vmatmul.bf16.vlgmr.msrb.gmra.mxu0 %v794_v23 }
  0x51   :  { %670 = vmatmul.bf16.gmra.mxu3 %v818_v28 }
  0x52   :  { %713 = vmatmul.bf16.vlgmr.msrb.gmra.mxu1 %v798_v34 }
  0x53   :  { %1055 = vmatmul.msk.bf16.vlgmr.msrb.gmra.mxu2 %vm575_vm0, %v802_v35  ;;  %694 = vmatmul.bf16.gmra.mxu0 %v822_v36 }
  0x61   :  { %675 = vmatmul.bf16.gmra.mxu3 %v846_v40 }
  0x62   :  { %718 = vmatmul.bf16.gmra.mxu1 %v826_v46 }
  0x63   :  { %1056 = vmatmul.msk.bf16.gmra.mxu2 %vm575_vm0, %v830_v47  ;;  %699 = vmatmul.bf16.gmra.mxu0 %v850_v48 }
  0x6f   :  { %v169_v48 = vpop.permute.xlu2 %168 }
  0x72   :  { %723 = vmatmul.bf16.gmra.mxu1 %v854_v53 }
  0x73   :  { %1057 = vmatmul.msk.bf16.gmra.mxu2 %vm575_vm0, %v858_v54 }
  0x7a   :  { %v149_v6 = vpop.permute.xlu0 %148 }
  0x7d   :  { %v159_v21 = vpop.permute.xlu1 %158 }
  0x82   :  { %v154_v13 = vpop.permute.xlu0 %153 }
  0x85   :  { %v164_v37 = vpop.permute.xlu1 %163 }
  0x9e   :  { %v594_v55 = vpop.f32.mrf.mxu0 }
  0x9f   :  { %v618_v56 = vpop.f32.mrf.mxu1  ;;  %v595_v8 = vadd.f32 %v594_v55, %v149_v6  ;;  %v755_v55 = vld [vmem:[%s1511_s3 + $0x10] sm:$0xff] }
  0xa1   :  { %v619_v12 = vadd.f32 %v618_v56, %v595_v8 }
  0xa4   :  { %v1460_v61 = vpop.f32.mrf.mxu3 }
  0xa5   :  { %v605_v56 = vadd.f32 %v1460_v61, %v169_v48  ;;  %v756_v61 = vld [vmem:[%s1511_s3 + $0x18] sm:$0xff] }
  0xa6   :  { %v642_v57 = vpop.f32.mrf.mxu2  ;;  %v596_v59 = vpop.f32.mrf.mxu0 }
  0xa7   :  { %v620_v58 = vpop.f32.mrf.mxu1  ;;  %v643_v15 = vadd.f32 %v642_v57, %v619_v12  ;;  %v597_v17 = vadd.f32 %v596_v59, %v154_v13 }
  0xa9   :  { %v621_v22 = vadd.f32 %v620_v58, %v597_v17 }
  0xac   :  { %v1462_v2 = vpop.f32.mrf.mxu3 }
  0xae   :  { %v644_v60 = vpop.f32.mrf.mxu2  ;;  %v599_v63 = vpop.f32.mrf.mxu0 }
  0xaf   :  { %v623_v62 = vpop.f32.mrf.mxu1  ;;  %v645_v24 = vadd.f32 %v644_v60, %v621_v22  ;;  %v600_v25 = vadd.f32 %v599_v63, %v159_v21 }
  0xb1   :  { %v624_v33 = vadd.f32 %v623_v62, %v600_v25 }
  0xb6   :  { %v647_v0 = vpop.f32.mrf.mxu2  ;;  %v601_v3 = vpop.f32.mrf.mxu0 }
  0xb7   :  { %v625_v1 = vpop.f32.mrf.mxu1  ;;  %v648_v38 = vadd.f32 %v647_v0, %v624_v33  ;;  %v602_v42 = vadd.f32 %v601_v3, %v164_v37 }
  0xb9   :  { %v626_v49 = vadd.f32 %v625_v1, %v602_v42  ;;  %v174_v1 = vpop.permute.xlu2 %173 }
  0xba   :  { %v607_v13 = vadd.f32 %v1462_v2, %v174_v1 }
  0xbe   :  { %v649_v4 = vpop.f32.mrf.mxu2 }
  0xbf   :  { %v628_v5 = vpop.f32.mrf.mxu1  ;;  %v650_v52 = vadd.f32 %v649_v4, %v626_v49 }
  0xc0   :  { %v690_v9 = vpop.f32.mrf.mxu0  ;;  %v629_v63 = vadd.f32 %v628_v5, %v605_v56 }
  0xc4   :  { %v666_v7 = vpop.f32.mrf.mxu3 }
  0xc5   :  { %v667_v18 = vadd.f32 %v666_v7, %v643_v15 }
  0xc6   :  { %v652_v10 = vpop.f32.mrf.mxu2 }
  0xc7   :  { %v1464_v11 = vpop.f32.mrf.mxu1  ;;  %v691_v23 = vadd.f32 %v690_v9, %v667_v18  ;;  %v653_v3 = vadd.f32 %v652_v10, %v629_v63 }
  0xc8   :  { %v692_v19 = vpop.f32.mrf.mxu0 }
  0xcc   :  { %v668_v14 = vpop.f32.mrf.mxu3 }
  0xcd   :  { %v669_v30 = vadd.f32 %v668_v14, %v645_v24  ;;  %v631_v14 = vadd.f32 %v1464_v11, %v607_v13 }
  0xce   :  { %v1466_v16 = vpop.f32.mrf.mxu2 }
  0xcf   :  { %v714_v20 = vpop.f32.mrf.mxu1  ;;  %v693_v36 = vadd.f32 %v692_v19, %v669_v30  ;;  %v655_v17 = vadd.f32 %v1466_v16, %v631_v14  ;;  %v758_v16 = vld [vmem:[%s1511_s3 + $0x28] sm:$0xff] }
  0xd0   :  { %v715_v26 = vadd.f32 %v714_v20, %v691_v23  ;;  %v695_v35 = vpop.f32.mrf.mxu0  ;;  %v757_v20 = vld [vmem:[%s1511_s3 + $0x20] sm:$0xff] }
  0xd4   :  { %v671_v27 = vpop.f32.mrf.mxu3 }
  0xd5   :  { %v672_v43 = vadd.f32 %v671_v27, %v648_v38 }
  0xd6   :  { %v738_v28 = vpop.f32.mrf.mxu2 }
  0xd7   :  { %v739_v31 = vadd.f32 %v738_v28, %v715_v26  ;;  %v716_v32 = vpop.f32.mrf.mxu1  ;;  %v696_v50 = vadd.f32 %v695_v35, %v672_v43 }
  0xd8   :  { %v717_v39 = vadd.f32 %v716_v32, %v693_v36  ;;  %v697_v51 = vpop.f32.mrf.mxu0 }
  0xd9   :  { %v759_v34 = vadd.f32 %v753_v29, %v739_v31 }
  0xdb   :  { %765 = vst [vmem:[%s1512_s4] sm:$0xff] %v759_v34 }
  0xdc   :  { %v673_v45 = vpop.f32.mrf.mxu3 }
  0xdd   :  { %v674_v57 = vadd.f32 %v673_v45, %v650_v52 }
  0xde   :  { %v740_v40 = vpop.f32.mrf.mxu2 }
  0xdf   :  { %v741_v44 = vadd.f32 %v740_v40, %v717_v39  ;;  %v719_v46 = vpop.f32.mrf.mxu1  ;;  %v698_v0 = vadd.f32 %v697_v51, %v674_v57 }
  0xe0   :  { %v720_v53 = vadd.f32 %v719_v46, %v696_v50  ;;  %v700_v6 = vpop.f32.mrf.mxu0 }
  0xe1   :  { %v760_v47 = vadd.f32 %v754_v41, %v741_v44 }
  0xe3   :  { %766 = vst [vmem:[%s1512_s4 + $0x8] sm:$0xff] %v760_v47 }
  0xe4   :  { %v676_v62 = vpop.f32.mrf.mxu3 }
  0xe5   :  { %v677_v8 = vadd.f32 %v676_v62, %v653_v3 }
  0xe6   :  { %v743_v54 = vpop.f32.mrf.mxu2 }
  0xe7   :  { %v744_v58 = vadd.f32 %v743_v54, %v720_v53  ;;  %v721_v59 = vpop.f32.mrf.mxu1  ;;  %v701_v15 = vadd.f32 %v700_v6, %v677_v8 }
  0xe8   :  { %v722_v4 = vadd.f32 %v721_v59, %v698_v0  ;;  %v702_v2 = vpop.f32.mrf.mxu0 }
  0xe9   :  { %v761_v60 = vadd.f32 %v755_v55, %v744_v58 }
  0xeb   :  { %767 = vst [vmem:[%s1512_s4 + $0x10] sm:$0xff] %v761_v60 }
  0xec   :  { %v678_v10 = vpop.f32.mrf.mxu3 }
  0xed   :  { %v679_v21 = vadd.f32 %v678_v10, %v655_v17 }
  0xee   :  { %v745_v7 = vpop.f32.mrf.mxu2 }
  0xef   :  { %v746_v9 = vadd.f32 %v745_v7, %v722_v4  ;;  %v724_v12 = vpop.f32.mrf.mxu1  ;;  %v703_v11 = vadd.f32 %v702_v2, %v679_v21 }
  0xf0   :  { %v725_v18 = vadd.f32 %v724_v12, %v701_v15 }
  0xf1   :  { %v762_v5 = vadd.f32 %v756_v61, %v746_v9 }
  0xf3   :  { %768 = vst [vmem:[%s1512_s4 + $0x18] sm:$0xff] %v762_v5 }
  0xf6   :  { %v748_v19 = vpop.f32.mrf.mxu2 }
  0xf7   :  { %v749_v22 = vadd.f32 %v748_v19, %v725_v18  ;;  %v726_v24 = vpop.f32.mrf.mxu1 }
  0xf8   :  { %v727_v25 = vadd.f32 %v726_v24, %v703_v11 }
  0xf9   :  { %v763_v23 = vadd.f32 %v757_v20, %v749_v22 }
  0xfb   :  { %769 = vst [vmem:[%s1512_s4 + $0x20] sm:$0xff] %v763_v23 }
  0xfe   :  { %v750_v26 = vpop.f32.mrf.mxu2 }
  0xff   :  { %v751_v27 = vadd.f32 %v750_v26, %v727_v25 }
 0x101   :  { %v764_v28 = vadd.f32 %v758_v16, %v751_v27 }
 0x103   :  { %770 = vst [vmem:[%s1512_s4 + $0x28] sm:$0xff] %v764_v28 }

</bundles_post_ra>
